<compile_context>
chip_gen: v7x
topology: tpu7x:2x2x1
jax: 0.10.0
libtpu: 0.0.40
codegen_flags: <defaults>
</compile_context>

<pallas_src>
import functools

import jax
import jax.numpy as jnp
import numpy as np
from jax.experimental import pallas as pl
from jax.experimental.pallas import tpu as pltpu

BN_EPS = 1e-5
NEG_BIG = -1e9                      # bias for padded (fake) classes
COMPUTE_DTYPE = jnp.bfloat16        # MXU operand dtype (f32 accumulate).
                                    # Use jnp.float32 for exact-f32 semantics / v5e.
VMEM_LIMIT = 48 * 1024 * 1024       # leave headroom vs v7x's 64 MiB physical VMEM


# ----------------------------------------------------------------------------
# Glue: deterministic pooling / bilinear-interpolation matrices (pure numpy).
# ----------------------------------------------------------------------------
def _adaptive_pool_matrix(in_size, out_size):
    """(out_size, in_size) matrix implementing torch AdaptiveAvgPool1d bins."""
    m = np.zeros((out_size, in_size), dtype=np.float32)
    for i in range(out_size):
        start = (i * in_size) // out_size
        end = -(-((i + 1) * in_size) // out_size)  # ceil
        m[i, start:end] = 1.0 / (end - start)
    return m


def _bilinear_matrix(out_size, in_size):
    """(out_size, in_size) bilinear interp matrix, align_corners=False."""
    m = np.zeros((out_size, in_size), dtype=np.float32)
    scale = in_size / out_size
    for o in range(out_size):
        src = max((o + 0.5) * scale - 0.5, 0.0)
        i0 = min(int(np.floor(src)), in_size - 1)
        i1 = min(i0 + 1, in_size - 1)
        lam = src - i0
        m[o, i0] += 1.0 - lam
        m[o, i1] += lam
    return m


def _largest_row_tile(total, cap=128):
    """Largest multiple-of-8 divisor of `total` that is <= cap (else total)."""
    for t in range(min(cap, total), 7, -1):
        if total % t == 0 and t % 8 == 0:
            return t
    return total


# ----------------------------------------------------------------------------
# Pallas kernels
# ----------------------------------------------------------------------------
def ppm_pool_conv_kernel(xf_ref, mpool_ref, w_ref, pc_ref, *, ss_list):
    """Per image: adaptive avg-pool for all scales (one matmul) + 1x1 convs.

    xf_ref:    (1, HW, Cin)        input features (compute dtype)
    mpool_ref: (SS_tot, HW)        stacked adaptive-pool matrices
    w_ref:     (L, Cin, Ch)        per-scale 1x1 conv weights (no bias)
    pc_ref:    (1, SS_tot, Ch)     stacked pre-BN conv outputs (f32)
    """
    xf = xf_ref[0]                                                  # (HW, Cin)
    pooled = jnp.dot(mpool_ref[...], xf,
                     preferred_element_type=jnp.float32)            # (SS_tot, Cin)
    pooled = pooled.astype(xf.dtype)
    convs = []
    off = 0
    for s_idx, ss in enumerate(ss_list):
        convs.append(jnp.dot(pooled[off:off + ss, :], w_ref[s_idx],
                             preferred_element_type=jnp.float32))   # (ss, Ch)
        off += ss
    pc_ref[0] = jnp.concatenate(convs, axis=0)                      # (SS_tot, Ch)


def ppm_bn_upsample_kernel(pc_all_ref, pc_n_ref, gamma_ref, beta_ref, *rest,
                           ss_list, compute_dtype):
    """Per image: BN (batch stats over all images) + ReLU + bilinear upsample.

    pc_all_ref: (N, SS_tot, Ch)    all images' conv outputs (for BN stats)
    pc_n_ref:   (1, SS_tot, Ch)    this image's conv outputs
    gamma/beta: (L, 1, Ch)         per-scale BN affine params
    rest:       L upsample matrices (HW, SS_s)  +  out_ref (1, HW, L*Ch)
    """
    num_scales = len(ss_list)
    mup_refs = rest[:num_scales]
    out_ref = rest[num_scales]
    hw = out_ref.shape[1]
    pc_all = pc_all_ref[...]                                        # (N, SS_tot, Ch)
    pc_n = pc_n_ref[0]                                              # (SS_tot, Ch)

    ups = []
    off = 0
    for s_idx, ss in enumerate(ss_list):
        blk = pc_all[:, off:off + ss, :]                            # (N, ss, Ch)
        mu = jnp.mean(blk, axis=(0, 1), keepdims=True)              # (1, 1, Ch)
        var = jnp.mean((blk - mu) ** 2, axis=(0, 1), keepdims=True)
        y = (pc_n[off:off + ss, :] - mu[0]) * jax.lax.rsqrt(var[0] + BN_EPS)
        y = y * gamma_ref[s_idx] + beta_ref[s_idx]
        y = jnp.maximum(y, 0.0)                                     # (ss, Ch)
        if ss == 1:
            # bilinear upsample of a 1x1 map == broadcast; no matmul needed
            up = jnp.broadcast_to(y, (hw, y.shape[-1]))
        else:
            up = jnp.dot(mup_refs[s_idx][...], y.astype(compute_dtype),
                         preferred_element_type=jnp.float32)        # (HW, Ch)
        ups.append(up)
        off += ss
    out_ref[0] = jnp.concatenate(ups, axis=-1)                      # (HW, L*Ch)


def head_conv3_stats_kernel(xpf_ref, w3_ref, conv_ref, stats_ref, *, h, w):
    """Per image: 3x3 conv (pad=1) as 9 shifted matmuls on the row-flattened,
    spatially padded feature map, plus masked per-image BN partial sums.

    xpf_ref:   (1, (H+2)*(W+2)+8, Ctot)  padded + flattened features
    w3_ref:    (9, Ctot, Ch)             3x3 weights, tap t = dy*3+dx
    conv_ref:  (1, H*(W+2), Ch)          conv output (2 wrap columns per row
                                         are garbage and sliced off later)
    stats_ref: (1, 2, Ch)                [sum, sum of squares] over valid pixels
    """
    wp = w + 2
    hpw = h * wp
    ch = conv_ref.shape[-1]
    acc = jnp.zeros((hpw, ch), jnp.float32)
    for t in range(9):
        dy, dx = t // 3, t % 3
        off = dy * wp + dx
        xt = xpf_ref[0, pl.ds(off, hpw), :]                         # (HPW, Ctot)
        acc = acc + jnp.dot(xt, w3_ref[t], preferred_element_type=jnp.float32)
    conv_ref[0] = acc

    # BN partial sums over valid pixels only (exclude the 2 wrap columns / row)
    col = jax.lax.broadcasted_iota(jnp.int32, (hpw, 1), 0) % wp
    mask = (col < w).astype(jnp.float32)
    s1 = jnp.sum(acc * mask, axis=0, keepdims=True)                 # (1, Ch)
    s2 = jnp.sum(acc * acc * mask, axis=0, keepdims=True)           # (1, Ch)
    stats_ref[0] = jnp.concatenate([s1, s2], axis=0)                # (2, Ch)


def head_bn_logits_kernel(conv_ref, stats_ref, gamma_ref, beta_ref, w1_ref,
                          b1_ref, out_ref, *, count, compute_dtype,
                          apply_log_softmax):
    """Row tile: BN (from per-image sums) + ReLU + 1x1 conv (+bias) + log_softmax.

    conv_ref:  (1, RT, Ch)        tile of 3x3-conv output
    stats_ref: (N, 2, Ch)         per-image [sum, sumsq]
    gamma/beta:(1, Ch)            BN affine params
    w1_ref:    (Ch, NCpad)        final 1x1 conv weight, class dim padded to 128
    b1_ref:    (1, NCpad)         final bias (padded classes get a huge negative)
    out_ref:   (1, RT, NCpad)     lane-dense per-pixel class log-probabilities
    """
    s = jnp.sum(stats_ref[...], axis=0)                             # (2, Ch)
    mean = s[0:1, :] / count
    var = jnp.maximum(s[1:2, :] / count - mean * mean, 0.0)
    y = (conv_ref[0] - mean) * jax.lax.rsqrt(var + BN_EPS)
    y = y * gamma_ref[...] + beta_ref[...]
    y = jnp.maximum(y, 0.0)                                         # (RT, Ch)
    logits = jnp.dot(y.astype(compute_dtype), w1_ref[...],
                     preferred_element_type=jnp.float32) + b1_ref[...]
    if apply_log_softmax:  # task_type == 'C'
        m = jnp.max(logits, axis=-1, keepdims=True)
        lse = m + jnp.log(jnp.sum(jnp.exp(logits - m), axis=-1, keepdims=True))
        out_ref[0] = logits - lse
    else:
        out_ref[0] = logits


# ----------------------------------------------------------------------------
# Parameters + forward wrapper
# ----------------------------------------------------------------------------
def init_params(key, fc_dim, hidden, num_class, pool_scales):
    keys = iter(jax.random.split(key, 3 * len(pool_scales) + 5))
    ppm = []
    for _ in pool_scales:
        ppm.append({
            "w": 0.05 * jax.random.normal(next(keys), (fc_dim, hidden), jnp.float32),
            "gamma": 1.0 + 0.1 * jax.random.normal(next(keys), (1, hidden), jnp.float32),
            "beta": 0.05 * jax.random.normal(next(keys), (1, hidden), jnp.float32),
        })
    ctot = fc_dim + len(pool_scales) * hidden
    return {
        "ppm": ppm,
        "w3": 0.02 * jax.random.normal(next(keys), (3, 3, ctot, hidden), jnp.float32),
        "gamma3": 1.0 + 0.1 * jax.random.normal(next(keys), (1, hidden), jnp.float32),
        "beta3": 0.05 * jax.random.normal(next(keys), (1, hidden), jnp.float32),
        "w1": 0.05 * jax.random.normal(next(keys), (hidden, num_class), jnp.float32),
        "b1": 0.05 * jax.random.normal(next(keys), (1, num_class), jnp.float32),
    }


def segmentation_decoder_forward(params, x_nchw, pool_scales, hidden, num_class,
                                 task_type="C", compute_dtype=COMPUTE_DTYPE):
    n, c, h, w = x_nchw.shape
    hw = h * w
    num_scales = len(pool_scales)
    ss_list = tuple(s * s for s in pool_scales)
    ss_tot = sum(ss_list)

    x = jnp.transpose(x_nchw, (0, 2, 3, 1)).astype(jnp.float32)     # NHWC
    xf = x.reshape(n, hw, c)

    cp1 = pltpu.CompilerParams(dimension_semantics=("parallel",),
                               vmem_limit_bytes=VMEM_LIMIT)

    # ---- PPM stage 1: adaptive pool (all scales at once) + 1x1 convs -------
    mpool_all = np.concatenate(
        [np.kron(_adaptive_pool_matrix(h, s), _adaptive_pool_matrix(w, s))
         for s in pool_scales], axis=0)                             # (SS_tot, HW)
    w_stack = jnp.stack([p["w"] for p in params["ppm"]], axis=0)    # (L, C, Ch)
    gam = jnp.stack([p["gamma"] for p in params["ppm"]], axis=0)    # (L, 1, Ch)
    bet = jnp.stack([p["beta"] for p in params["ppm"]], axis=0)

    pc = pl.pallas_call(
        functools.partial(ppm_pool_conv_kernel, ss_list=ss_list),
        out_shape=jax.ShapeDtypeStruct((n, ss_tot, hidden), jnp.float32),
        grid=(n,),
        in_specs=[
            pl.BlockSpec((1, hw, c), lambda i: (i, 0, 0)),
            pl.BlockSpec((ss_tot, hw), lambda i: (0, 0)),
            pl.BlockSpec((num_scales, c, hidden), lambda i: (0, 0, 0)),
        ],
        out_specs=pl.BlockSpec((1, ss_tot, hidden), lambda i: (i, 0, 0)),
        compiler_params=cp1,
    )(xf.astype(compute_dtype), jnp.asarray(mpool_all, compute_dtype),
      w_stack.astype(compute_dtype))

    # ---- PPM stage 2: BN + ReLU + bilinear upsample (fused, concatenated) --
    mups = [jnp.asarray(np.kron(_bilinear_matrix(h, s), _bilinear_matrix(w, s)),
                        compute_dtype) for s in pool_scales]        # (HW, SS_s)
    branches = pl.pallas_call(
        functools.partial(ppm_bn_upsample_kernel, ss_list=ss_list,
                          compute_dtype=compute_dtype),
        out_shape=jax.ShapeDtypeStruct((n, hw, num_scales * hidden), jnp.float32),
        grid=(n,),
        in_specs=[
            pl.BlockSpec((n, ss_tot, hidden), lambda i: (0, 0, 0)),
            pl.BlockSpec((1, ss_tot, hidden), lambda i: (i, 0, 0)),
            pl.BlockSpec((num_scales, 1, hidden), lambda i: (0, 0, 0)),
            pl.BlockSpec((num_scales, 1, hidden), lambda i: (0, 0, 0)),
        ] + [pl.BlockSpec((hw, ss), lambda i: (0, 0)) for ss in ss_list],
        out_specs=pl.BlockSpec((1, hw, num_scales * hidden), lambda i: (i, 0, 0)),
        compiler_params=cp1,
    )(pc, pc, gam, bet, *mups)

    # ---- concat + spatial pad + row-flatten (no im2col) --------------------
    ctot = c + num_scales * hidden
    cat = jnp.concatenate([x, branches.reshape(n, h, w, num_scales * hidden)],
                          axis=-1)                                  # (N, H, W, Ctot)
    xp = jnp.pad(cat, ((0, 0), (1, 1), (1, 1), (0, 0))).astype(compute_dtype)
    wp = w + 2
    hpw = h * wp                                                    # conv rows (+2 wrap cols/row)
    xpf = xp.reshape(n, (h + 2) * wp, ctot)
    xpf = jnp.pad(xpf, ((0, 0), (0, 8), (0, 0)))                    # tap-offset slack
    hpwp = (h + 2) * wp + 8

    w3 = params["w3"].reshape(9, ctot, hidden).astype(compute_dtype)

    conv, stats = pl.pallas_call(
        functools.partial(head_conv3_stats_kernel, h=h, w=w),
        out_shape=(jax.ShapeDtypeStruct((n, hpw, hidden), jnp.float32),
                   jax.ShapeDtypeStruct((n, 2, hidden), jnp.float32)),
        grid=(n,),
        in_specs=[
            pl.BlockSpec((1, hpwp, ctot), lambda i: (i, 0, 0)),
            pl.BlockSpec((9, ctot, hidden), lambda i: (0, 0, 0)),
        ],
        out_specs=(pl.BlockSpec((1, hpw, hidden), lambda i: (i, 0, 0)),
                   pl.BlockSpec((1, 2, hidden), lambda i: (i, 0, 0))),
        compiler_params=cp1,
    )(xpf, w3)

    # ---- BN + ReLU + 1x1 conv + log_softmax (lane-dense 128 classes) -------
    nc_pad = ((num_class + 127) // 128) * 128
    w1p = jnp.zeros((hidden, nc_pad), jnp.float32).at[:, :num_class].set(
        params["w1"]).astype(compute_dtype)
    b1p = jnp.full((1, nc_pad), NEG_BIG, jnp.float32).at[:, :num_class].set(
        params["b1"])

    rt = _largest_row_tile(hpw, cap=128)
    cp2 = pltpu.CompilerParams(dimension_semantics=("parallel", "parallel"),
                               vmem_limit_bytes=VMEM_LIMIT)
    out_pad = pl.pallas_call(
        functools.partial(head_bn_logits_kernel, count=float(n * h * w),
                          compute_dtype=compute_dtype,
                          apply_log_softmax=(task_type == "C")),
        out_shape=jax.ShapeDtypeStruct((n, hpw, nc_pad), jnp.float32),
        grid=(n, hpw // rt),
        in_specs=[
            pl.BlockSpec((1, rt, hidden), lambda i, r: (i, r, 0)),
            pl.BlockSpec((n, 2, hidden), lambda i, r: (0, 0, 0)),
            pl.BlockSpec((1, hidden), lambda i, r: (0, 0)),
            pl.BlockSpec((1, hidden), lambda i, r: (0, 0)),
            pl.BlockSpec((hidden, nc_pad), lambda i, r: (0, 0)),
            pl.BlockSpec((1, nc_pad), lambda i, r: (0, 0)),
        ],
        out_specs=pl.BlockSpec((1, rt, nc_pad), lambda i, r: (i, r, 0)),
        compiler_params=cp2,
    )(conv, stats, params["gamma3"], params["beta3"], w1p, b1p)

    # drop wrap columns + padded classes, return NCHW like PyTorch
    out = out_pad.reshape(n, h, wp, nc_pad)[:, :, :w, :num_class]
    return jnp.transpose(out, (0, 3, 1, 2))                         # (N, NC, H, W)


# ----------------------------------------------------------------------------
if __name__ == "__main__":
    N, FC_DIM, H, W = 2, 128, 12, 12          # H, W divisible by all pool scales
    HIDDEN, NUM_CLASS = 128, 8                # original: fc_dim=2048, hidden=512, nc=21
    POOL_SCALES = (1, 2, 3, 6)

    key = jax.random.PRNGKey(0)
    pkey, xkey = jax.random.split(key)
    params = init_params(pkey, FC_DIM, HIDDEN, NUM_CLASS, POOL_SCALES)
    x = jax.random.normal(xkey, (N, FC_DIM, H, W), jnp.float32)     # NCHW like PyTorch

    fwd = jax.jit(lambda p, xx: segmentation_decoder_forward(
        p, xx, POOL_SCALES, HIDDEN, NUM_CLASS, task_type="C"))
    out = jax.block_until_ready(fwd(params, x))

    assert out.shape == (N, NUM_CLASS, H, W), out.shape
    # log_softmax sanity: exp(log-probs) sums to 1 over the class dim
    probs_sum = jnp.sum(jnp.exp(out), axis=1)
    assert bool(jnp.all(jnp.abs(probs_sum - 1.0) < 1e-3)), float(
        jnp.max(jnp.abs(probs_sum - 1.0)))
    print("KERNEL_OK")
</pallas_src>

<mosaic_0001>
module attributes {stable_mosaic.version = 11 : i64} {
  func.func @ppm_bn_upsample_kernel(%arg0: i32, %arg1: memref<2x50x128xf32, #tpu.memory_space<vmem>>, %arg2: memref<1x50x128xf32, #tpu.memory_space<vmem>>, %arg3: memref<4x1x128xf32, #tpu.memory_space<vmem>>, %arg4: memref<4x1x128xf32, #tpu.memory_space<vmem>>, %arg5: memref<144x1xbf16, #tpu.memory_space<vmem>>, %arg6: memref<144x4xbf16, #tpu.memory_space<vmem>>, %arg7: memref<144x9xbf16, #tpu.memory_space<vmem>>, %arg8: memref<144x36xbf16, #tpu.memory_space<vmem>>, %arg9: memref<1x144x512xf32, #tpu.memory_space<vmem>>) attributes {dimension_semantics = [#tpu.dimension_semantics<parallel>], iteration_bounds = array<i64: 2>, scalar_prefetch = 0 : i64, scratch_operands = 0 : i64, tpu.core_type = #tpu.core_type<tc>, window_params = [{pipeline_mode = #tpu.pipeline_mode<synchronous>, transform_indices = @transform_0, window_bounds = array<i64: 2, 50, 128>}, {transform_indices = @transform_1, window_bounds = array<i64: 1, 50, 128>}, {pipeline_mode = #tpu.pipeline_mode<synchronous>, transform_indices = @transform_2, window_bounds = array<i64: 4, 1, 128>}, {pipeline_mode = #tpu.pipeline_mode<synchronous>, transform_indices = @transform_3, window_bounds = array<i64: 4, 1, 128>}, {pipeline_mode = #tpu.pipeline_mode<synchronous>, transform_indices = @transform_4, window_bounds = array<i64: 144, 1>}, {pipeline_mode = #tpu.pipeline_mode<synchronous>, transform_indices = @transform_5, window_bounds = array<i64: 144, 4>}, {pipeline_mode = #tpu.pipeline_mode<synchronous>, transform_indices = @transform_6, window_bounds = array<i64: 144, 9>}, {pipeline_mode = #tpu.pipeline_mode<synchronous>, transform_indices = @transform_7, window_bounds = array<i64: 144, 36>}, {transform_indices = @transform_8, window_bounds = array<i64: 1, 144, 512>}]} {
    %c0 = arith.constant 0 : index
    %c0_0 = arith.constant 0 : index
    %c0_1 = arith.constant 0 : index
    %0 = vector.load %arg1[%c0, %c0_0, %c0_1] : memref<2x50x128xf32, #tpu.memory_space<vmem>>, vector<2x50x128xf32>
    %c0_2 = arith.constant 0 : index
    %c0_3 = arith.constant 0 : index
    %c0_4 = arith.constant 0 : index
    %1 = vector.load %arg2[%c0_2, %c0_3, %c0_4] : memref<1x50x128xf32, #tpu.memory_space<vmem>>, vector<1x50x128xf32>
    %2 = vector.shape_cast %1 : vector<1x50x128xf32> to vector<50x128xf32>
    %3 = vector.extract_strided_slice %0 {offsets = [0, 0, 0], sizes = [2, 1, 128], strides = [1, 1, 1]} : vector<2x50x128xf32> to vector<2x1x128xf32>
    %cst = arith.constant dense<0.000000e+00> : vector<128xf32>
    %4 = vector.multi_reduction <add>, %3, %cst [0, 1] : vector<2x1x128xf32> to vector<128xf32>
    %5 = vector.shape_cast %4 : vector<128xf32> to vector<1x1x128xf32>
    %cst_5 = arith.constant 2.000000e+00 : f32
    %6 = vector.broadcast %cst_5 : f32 to vector<1x1x128xf32>
    %7 = arith.divf %5, %6 : vector<1x1x128xf32>
    %8 = vector.broadcast %7 : vector<1x1x128xf32> to vector<2x1x128xf32>
    %9 = arith.subf %3, %8 : vector<2x1x128xf32>
    %10 = arith.mulf %9, %9 : vector<2x1x128xf32>
    %cst_6 = arith.constant dense<0.000000e+00> : vector<128xf32>
    %11 = vector.multi_reduction <add>, %10, %cst_6 [0, 1] : vector<2x1x128xf32> to vector<128xf32>
    %12 = vector.shape_cast %11 : vector<128xf32> to vector<1x1x128xf32>
    %cst_7 = arith.constant 2.000000e+00 : f32
    %13 = vector.broadcast %cst_7 : f32 to vector<1x1x128xf32>
    %14 = arith.divf %12, %13 : vector<1x1x128xf32>
    %15 = vector.extract_strided_slice %2 {offsets = [0, 0], sizes = [1, 128], strides = [1, 1]} : vector<50x128xf32> to vector<1x128xf32>
    %16 = vector.shape_cast %7 : vector<1x1x128xf32> to vector<1x128xf32>
    %17 = arith.subf %15, %16 : vector<1x128xf32>
    %18 = vector.shape_cast %14 : vector<1x1x128xf32> to vector<1x128xf32>
    %cst_8 = arith.constant 9.99999974E-6 : f32
    %19 = vector.broadcast %cst_8 : f32 to vector<1x128xf32>
    %20 = arith.addf %18, %19 : vector<1x128xf32>
    %21 = math.rsqrt %20 : vector<1x128xf32>
    %22 = arith.mulf %17, %21 : vector<1x128xf32>
    %c0_9 = arith.constant 0 : index
    %c0_10 = arith.constant 0 : index
    %c0_11 = arith.constant 0 : index
    %23 = vector.load %arg3[%c0_9, %c0_10, %c0_11] : memref<4x1x128xf32, #tpu.memory_space<vmem>>, vector<1x1x128xf32>
    %24 = vector.shape_cast %23 : vector<1x1x128xf32> to vector<1x128xf32>
    %25 = arith.mulf %22, %24 : vector<1x128xf32>
    %c0_12 = arith.constant 0 : index
    %c0_13 = arith.constant 0 : index
    %c0_14 = arith.constant 0 : index
    %26 = vector.load %arg4[%c0_12, %c0_13, %c0_14] : memref<4x1x128xf32, #tpu.memory_space<vmem>>, vector<1x1x128xf32>
    %27 = vector.shape_cast %26 : vector<1x1x128xf32> to vector<1x128xf32>
    %28 = arith.addf %25, %27 : vector<1x128xf32>
    %cst_15 = arith.constant 0.000000e+00 : f32
    %29 = vector.broadcast %cst_15 : f32 to vector<1x128xf32>
    %30 = arith.maximumf %28, %29 : vector<1x128xf32>
    %31 = vector.shape_cast %30 : vector<1x128xf32> to vector<1x128xf32>
    %32 = vector.broadcast %31 : vector<1x128xf32> to vector<144x128xf32>
    %33 = vector.extract_strided_slice %0 {offsets = [0, 1, 0], sizes = [2, 4, 128], strides = [1, 1, 1]} : vector<2x50x128xf32> to vector<2x4x128xf32>
    %cst_16 = arith.constant dense<0.000000e+00> : vector<128xf32>
    %34 = vector.multi_reduction <add>, %33, %cst_16 [0, 1] : vector<2x4x128xf32> to vector<128xf32>
    %35 = vector.shape_cast %34 : vector<128xf32> to vector<1x1x128xf32>
    %cst_17 = arith.constant 8.000000e+00 : f32
    %36 = vector.broadcast %cst_17 : f32 to vector<1x1x128xf32>
    %37 = arith.divf %35, %36 : vector<1x1x128xf32>
    %38 = vector.broadcast %37 : vector<1x1x128xf32> to vector<2x4x128xf32>
    %39 = arith.subf %33, %38 : vector<2x4x128xf32>
    %40 = arith.mulf %39, %39 : vector<2x4x128xf32>
    %cst_18 = arith.constant dense<0.000000e+00> : vector<128xf32>
    %41 = vector.multi_reduction <add>, %40, %cst_18 [0, 1] : vector<2x4x128xf32> to vector<128xf32>
    %42 = vector.shape_cast %41 : vector<128xf32> to vector<1x1x128xf32>
    %cst_19 = arith.constant 8.000000e+00 : f32
    %43 = vector.broadcast %cst_19 : f32 to vector<1x1x128xf32>
    %44 = arith.divf %42, %43 : vector<1x1x128xf32>
    %45 = vector.extract_strided_slice %2 {offsets = [1, 0], sizes = [4, 128], strides = [1, 1]} : vector<50x128xf32> to vector<4x128xf32>
    %46 = vector.shape_cast %37 : vector<1x1x128xf32> to vector<1x128xf32>
    %47 = vector.broadcast %46 : vector<1x128xf32> to vector<4x128xf32>
    %48 = arith.subf %45, %47 : vector<4x128xf32>
    %49 = vector.shape_cast %44 : vector<1x1x128xf32> to vector<1x128xf32>
    %cst_20 = arith.constant 9.99999974E-6 : f32
    %50 = vector.broadcast %cst_20 : f32 to vector<1x128xf32>
    %51 = arith.addf %49, %50 : vector<1x128xf32>
    %52 = math.rsqrt %51 : vector<1x128xf32>
    %53 = vector.broadcast %52 : vector<1x128xf32> to vector<4x128xf32>
    %54 = arith.mulf %48, %53 : vector<4x128xf32>
    %c1 = arith.constant 1 : index
    %c0_21 = arith.constant 0 : index
    %c0_22 = arith.constant 0 : index
    %55 = vector.load %arg3[%c1, %c0_21, %c0_22] : memref<4x1x128xf32, #tpu.memory_space<vmem>>, vector<1x1x128xf32>
    %56 = vector.shape_cast %55 : vector<1x1x128xf32> to vector<1x128xf32>
    %57 = vector.broadcast %56 : vector<1x128xf32> to vector<4x128xf32>
    %58 = arith.mulf %54, %57 : vector<4x128xf32>
    %c1_23 = arith.constant 1 : index
    %c0_24 = arith.constant 0 : index
    %c0_25 = arith.constant 0 : index
    %59 = vector.load %arg4[%c1_23, %c0_24, %c0_25] : memref<4x1x128xf32, #tpu.memory_space<vmem>>, vector<1x1x128xf32>
    %60 = vector.shape_cast %59 : vector<1x1x128xf32> to vector<1x128xf32>
    %61 = vector.broadcast %60 : vector<1x128xf32> to vector<4x128xf32>
    %62 = arith.addf %58, %61 : vector<4x128xf32>
    %cst_26 = arith.constant 0.000000e+00 : f32
    %63 = vector.broadcast %cst_26 : f32 to vector<4x128xf32>
    %64 = arith.maximumf %62, %63 : vector<4x128xf32>
    %c0_27 = arith.constant 0 : index
    %c0_28 = arith.constant 0 : index
    %65 = vector.load %arg6[%c0_27, %c0_28] : memref<144x4xbf16, #tpu.memory_space<vmem>>, vector<144x4xbf16>
    %66 = arith.truncf %64 : vector<4x128xf32> to vector<4x128xbf16>
    %cst_29 = arith.constant dense<0.000000e+00> : vector<144x128xf32>
    %67 = tpu.matmul %65, %66, %cst_29 {dimension_numbers = #tpu.dot_dimension_numbers<[1], [0], [0], [1], [0, 0, 1, 1], [], []>} : vector<144x4xbf16>, vector<4x128xbf16>, vector<144x128xf32> -> vector<144x128xf32>
    %68 = vector.extract_strided_slice %0 {offsets = [0, 5, 0], sizes = [2, 9, 128], strides = [1, 1, 1]} : vector<2x50x128xf32> to vector<2x9x128xf32>
    %cst_30 = arith.constant dense<0.000000e+00> : vector<128xf32>
    %69 = vector.multi_reduction <add>, %68, %cst_30 [0, 1] : vector<2x9x128xf32> to vector<128xf32>
    %70 = vector.shape_cast %69 : vector<128xf32> to vector<1x1x128xf32>
    %cst_31 = arith.constant 1.800000e+01 : f32
    %71 = vector.broadcast %cst_31 : f32 to vector<1x1x128xf32>
    %72 = arith.divf %70, %71 : vector<1x1x128xf32>
    %73 = vector.broadcast %72 : vector<1x1x128xf32> to vector<2x9x128xf32>
    %74 = arith.subf %68, %73 : vector<2x9x128xf32>
    %75 = arith.mulf %74, %74 : vector<2x9x128xf32>
    %cst_32 = arith.constant dense<0.000000e+00> : vector<128xf32>
    %76 = vector.multi_reduction <add>, %75, %cst_32 [0, 1] : vector<2x9x128xf32> to vector<128xf32>
    %77 = vector.shape_cast %76 : vector<128xf32> to vector<1x1x128xf32>
    %cst_33 = arith.constant 1.800000e+01 : f32
    %78 = vector.broadcast %cst_33 : f32 to vector<1x1x128xf32>
    %79 = arith.divf %77, %78 : vector<1x1x128xf32>
    %80 = vector.extract_strided_slice %2 {offsets = [5, 0], sizes = [9, 128], strides = [1, 1]} : vector<50x128xf32> to vector<9x128xf32>
    %81 = vector.shape_cast %72 : vector<1x1x128xf32> to vector<1x128xf32>
    %82 = vector.broadcast %81 : vector<1x128xf32> to vector<9x128xf32>
    %83 = arith.subf %80, %82 : vector<9x128xf32>
    %84 = vector.shape_cast %79 : vector<1x1x128xf32> to vector<1x128xf32>
    %cst_34 = arith.constant 9.99999974E-6 : f32
    %85 = vector.broadcast %cst_34 : f32 to vector<1x128xf32>
    %86 = arith.addf %84, %85 : vector<1x128xf32>
    %87 = math.rsqrt %86 : vector<1x128xf32>
    %88 = vector.broadcast %87 : vector<1x128xf32> to vector<9x128xf32>
    %89 = arith.mulf %83, %88 : vector<9x128xf32>
    %c2 = arith.constant 2 : index
    %c0_35 = arith.constant 0 : index
    %c0_36 = arith.constant 0 : index
    %90 = vector.load %arg3[%c2, %c0_35, %c0_36] : memref<4x1x128xf32, #tpu.memory_space<vmem>>, vector<1x1x128xf32>
    %91 = vector.shape_cast %90 : vector<1x1x128xf32> to vector<1x128xf32>
    %92 = vector.broadcast %91 : vector<1x128xf32> to vector<9x128xf32>
    %93 = arith.mulf %89, %92 : vector<9x128xf32>
    %c2_37 = arith.constant 2 : index
    %c0_38 = arith.constant 0 : index
    %c0_39 = arith.constant 0 : index
    %94 = vector.load %arg4[%c2_37, %c0_38, %c0_39] : memref<4x1x128xf32, #tpu.memory_space<vmem>>, vector<1x1x128xf32>
    %95 = vector.shape_cast %94 : vector<1x1x128xf32> to vector<1x128xf32>
    %96 = vector.broadcast %95 : vector<1x128xf32> to vector<9x128xf32>
    %97 = arith.addf %93, %96 : vector<9x128xf32>
    %cst_40 = arith.constant 0.000000e+00 : f32
    %98 = vector.broadcast %cst_40 : f32 to vector<9x128xf32>
    %99 = arith.maximumf %97, %98 : vector<9x128xf32>
    %c0_41 = arith.constant 0 : index
    %c0_42 = arith.constant 0 : index
    %100 = vector.load %arg7[%c0_41, %c0_42] : memref<144x9xbf16, #tpu.memory_space<vmem>>, vector<144x9xbf16>
    %101 = arith.truncf %99 : vector<9x128xf32> to vector<9x128xbf16>
    %cst_43 = arith.constant dense<0.000000e+00> : vector<144x128xf32>
    %102 = tpu.matmul %100, %101, %cst_43 {dimension_numbers = #tpu.dot_dimension_numbers<[1], [0], [0], [1], [0, 0, 1, 1], [], []>} : vector<144x9xbf16>, vector<9x128xbf16>, vector<144x128xf32> -> vector<144x128xf32>
    %103 = vector.extract_strided_slice %0 {offsets = [0, 14, 0], sizes = [2, 36, 128], strides = [1, 1, 1]} : vector<2x50x128xf32> to vector<2x36x128xf32>
    %cst_44 = arith.constant dense<0.000000e+00> : vector<128xf32>
    %104 = vector.multi_reduction <add>, %103, %cst_44 [0, 1] : vector<2x36x128xf32> to vector<128xf32>
    %105 = vector.shape_cast %104 : vector<128xf32> to vector<1x1x128xf32>
    %cst_45 = arith.constant 7.200000e+01 : f32
    %106 = vector.broadcast %cst_45 : f32 to vector<1x1x128xf32>
    %107 = arith.divf %105, %106 : vector<1x1x128xf32>
    %108 = vector.broadcast %107 : vector<1x1x128xf32> to vector<2x36x128xf32>
    %109 = arith.subf %103, %108 : vector<2x36x128xf32>
    %110 = arith.mulf %109, %109 : vector<2x36x128xf32>
    %cst_46 = arith.constant dense<0.000000e+00> : vector<128xf32>
    %111 = vector.multi_reduction <add>, %110, %cst_46 [0, 1] : vector<2x36x128xf32> to vector<128xf32>
    %112 = vector.shape_cast %111 : vector<128xf32> to vector<1x1x128xf32>
    %cst_47 = arith.constant 7.200000e+01 : f32
    %113 = vector.broadcast %cst_47 : f32 to vector<1x1x128xf32>
    %114 = arith.divf %112, %113 : vector<1x1x128xf32>
    %115 = vector.extract_strided_slice %2 {offsets = [14, 0], sizes = [36, 128], strides = [1, 1]} : vector<50x128xf32> to vector<36x128xf32>
    %116 = vector.shape_cast %107 : vector<1x1x128xf32> to vector<1x128xf32>
    %117 = vector.broadcast %116 : vector<1x128xf32> to vector<36x128xf32>
    %118 = arith.subf %115, %117 : vector<36x128xf32>
    %119 = vector.shape_cast %114 : vector<1x1x128xf32> to vector<1x128xf32>
    %cst_48 = arith.constant 9.99999974E-6 : f32
    %120 = vector.broadcast %cst_48 : f32 to vector<1x128xf32>
    %121 = arith.addf %119, %120 : vector<1x128xf32>
    %122 = math.rsqrt %121 : vector<1x128xf32>
    %123 = vector.broadcast %122 : vector<1x128xf32> to vector<36x128xf32>
    %124 = arith.mulf %118, %123 : vector<36x128xf32>
    %c3 = arith.constant 3 : index
    %c0_49 = arith.constant 0 : index
    %c0_50 = arith.constant 0 : index
    %125 = vector.load %arg3[%c3, %c0_49, %c0_50] : memref<4x1x128xf32, #tpu.memory_space<vmem>>, vector<1x1x128xf32>
    %126 = vector.shape_cast %125 : vector<1x1x128xf32> to vector<1x128xf32>
    %127 = vector.broadcast %126 : vector<1x128xf32> to vector<36x128xf32>
    %128 = arith.mulf %124, %127 : vector<36x128xf32>
    %c3_51 = arith.constant 3 : index
    %c0_52 = arith.constant 0 : index
    %c0_53 = arith.constant 0 : index
    %129 = vector.load %arg4[%c3_51, %c0_52, %c0_53] : memref<4x1x128xf32, #tpu.memory_space<vmem>>, vector<1x1x128xf32>
    %130 = vector.shape_cast %129 : vector<1x1x128xf32> to vector<1x128xf32>
    %131 = vector.broadcast %130 : vector<1x128xf32> to vector<36x128xf32>
    %132 = arith.addf %128, %131 : vector<36x128xf32>
    %cst_54 = arith.constant 0.000000e+00 : f32
    %133 = vector.broadcast %cst_54 : f32 to vector<36x128xf32>
    %134 = arith.maximumf %132, %133 : vector<36x128xf32>
    %c0_55 = arith.constant 0 : index
    %c0_56 = arith.constant 0 : index
    %135 = vector.load %arg8[%c0_55, %c0_56] : memref<144x36xbf16, #tpu.memory_space<vmem>>, vector<144x36xbf16>
    %136 = arith.truncf %134 : vector<36x128xf32> to vector<36x128xbf16>
    %cst_57 = arith.constant dense<0.000000e+00> : vector<144x128xf32>
    %137 = tpu.matmul %135, %136, %cst_57 {dimension_numbers = #tpu.dot_dimension_numbers<[1], [0], [0], [1], [0, 0, 1, 1], [], []>} : vector<144x36xbf16>, vector<36x128xbf16>, vector<144x128xf32> -> vector<144x128xf32>
    %138 = tpu.concatenate %32, %67, %102, %137 in 1 : vector<144x128xf32>, vector<144x128xf32>, vector<144x128xf32>, vector<144x128xf32> -> vector<144x512xf32>
    %c0_58 = arith.constant 0 : index
    %c0_59 = arith.constant 0 : index
    %c0_60 = arith.constant 0 : index
    %139 = vector.load %arg9[%c0_58, %c0_59, %c0_60] : memref<1x144x512xf32, #tpu.memory_space<vmem>>, vector<1x144x512xf32>
    %140 = vector.shape_cast %139 : vector<1x144x512xf32> to vector<144x512xf32>
    %141 = vector.shape_cast %138 : vector<144x512xf32> to vector<1x144x512xf32>
    tpu.vector_store %arg9[%c0_58, %c0_59, %c0_60], %141 {strides = array<i32>} : memref<1x144x512xf32, #tpu.memory_space<vmem>>, vector<1x144x512xf32>,
    return
  }
  func.func @transform_0(%arg0: i32) -> (i32, i32, i32) {
    %c0_i32 = arith.constant 0 : i32
    %c0_i32_0 = arith.constant 0 : i32
    %c0_i32_1 = arith.constant 0 : i32
    %c0_i32_2 = arith.constant 0 : i32
    return %c0_i32, %c0_i32_0, %c0_i32_1 : i32, i32, i32
  }
  func.func @transform_1(%arg0: i32) -> (i32, i32, i32) {
    %c0_i32 = arith.constant 0 : i32
    %c0_i32_0 = arith.constant 0 : i32
    %c0_i32_1 = arith.constant 0 : i32
    return %arg0, %c0_i32, %c0_i32_0 : i32, i32, i32
  }
  func.func @transform_2(%arg0: i32) -> (i32, i32, i32) {
    %c0_i32 = arith.constant 0 : i32
    %c0_i32_0 = arith.constant 0 : i32
    %c0_i32_1 = arith.constant 0 : i32
    %c0_i32_2 = arith.constant 0 : i32
    return %c0_i32, %c0_i32_0, %c0_i32_1 : i32, i32, i32
  }
  func.func @transform_3(%arg0: i32) -> (i32, i32, i32) {
    %c0_i32 = arith.constant 0 : i32
    %c0_i32_0 = arith.constant 0 : i32
    %c0_i32_1 = arith.constant 0 : i32
    %c0_i32_2 = arith.constant 0 : i32
    return %c0_i32, %c0_i32_0, %c0_i32_1 : i32, i32, i32
  }
  func.func @transform_4(%arg0: i32) -> (i32, i32) {
    %c0_i32 = arith.constant 0 : i32
    %c0_i32_0 = arith.constant 0 : i32
    %c0_i32_1 = arith.constant 0 : i32
    return %c0_i32, %c0_i32_0 : i32, i32
  }
  func.func @transform_5(%arg0: i32) -> (i32, i32) {
    %c0_i32 = arith.constant 0 : i32
    %c0_i32_0 = arith.constant 0 : i32
    %c0_i32_1 = arith.constant 0 : i32
    return %c0_i32, %c0_i32_0 : i32, i32
  }
  func.func @transform_6(%arg0: i32) -> (i32, i32) {
    %c0_i32 = arith.constant 0 : i32
    %c0_i32_0 = arith.constant 0 : i32
    %c0_i32_1 = arith.constant 0 : i32
    return %c0_i32, %c0_i32_0 : i32, i32
  }
  func.func @transform_7(%arg0: i32) -> (i32, i32) {
    %c0_i32 = arith.constant 0 : i32
    %c0_i32_0 = arith.constant 0 : i32
    %c0_i32_1 = arith.constant 0 : i32
    return %c0_i32, %c0_i32_0 : i32, i32
  }
  func.func @transform_8(%arg0: i32) -> (i32, i32, i32) {
    %c0_i32 = arith.constant 0 : i32
    %c0_i32_0 = arith.constant 0 : i32
    %c0_i32_1 = arith.constant 0 : i32
    return %arg0, %c0_i32, %c0_i32_0 : i32, i32, i32
  }
}

module attributes {stable_mosaic.version = 11 : i64} {
  func.func @ppm_pool_conv_kernel(%arg0: i32, %arg1: memref<1x144x128xbf16, #tpu.memory_space<vmem>>, %arg2: memref<50x144xbf16, #tpu.memory_space<vmem>>, %arg3: memref<4x128x128xbf16, #tpu.memory_space<vmem>>, %arg4: memref<1x50x128xf32, #tpu.memory_space<vmem>>) attributes {dimension_semantics = [#tpu.dimension_semantics<parallel>], iteration_bounds = array<i64: 2>, scalar_prefetch = 0 : i64, scratch_operands = 0 : i64, tpu.core_type = #tpu.core_type<tc>, window_params = [{transform_indices = @transform_0, window_bounds = array<i64: 1, 144, 128>}, {pipeline_mode = #tpu.pipeline_mode<synchronous>, transform_indices = @transform_1, window_bounds = array<i64: 50, 144>}, {pipeline_mode = #tpu.pipeline_mode<synchronous>, transform_indices = @transform_2, window_bounds = array<i64: 4, 128, 128>}, {transform_indices = @transform_3, window_bounds = array<i64: 1, 50, 128>}]} {
    %c0 = arith.constant 0 : index
    %c0_0 = arith.constant 0 : index
    %c0_1 = arith.constant 0 : index
    %0 = vector.load %arg1[%c0, %c0_0, %c0_1] : memref<1x144x128xbf16, #tpu.memory_space<vmem>>, vector<1x144x128xbf16>
    %1 = vector.shape_cast %0 : vector<1x144x128xbf16> to vector<144x128xbf16>
    %c0_2 = arith.constant 0 : index
    %c0_3 = arith.constant 0 : index
    %2 = vector.load %arg2[%c0_2, %c0_3] : memref<50x144xbf16, #tpu.memory_space<vmem>>, vector<50x144xbf16>
    %cst = arith.constant dense<0.000000e+00> : vector<50x128xf32>
    %3 = tpu.matmul %2, %1, %cst {dimension_numbers = #tpu.dot_dimension_numbers<[1], [0], [0], [1], [0, 0, 1, 1], [], []>} : vector<50x144xbf16>, vector<144x128xbf16>, vector<50x128xf32> -> vector<50x128xf32>
    %4 = arith.truncf %3 : vector<50x128xf32> to vector<50x128xbf16>
    %5 = vector.extract_strided_slice %4 {offsets = [0, 0], sizes = [1, 128], strides = [1, 1]} : vector<50x128xbf16> to vector<1x128xbf16>
    %c0_4 = arith.constant 0 : index
    %c0_5 = arith.constant 0 : index
    %c0_6 = arith.constant 0 : index
    %6 = vector.load %arg3[%c0_4, %c0_5, %c0_6] : memref<4x128x128xbf16, #tpu.memory_space<vmem>>, vector<1x128x128xbf16>
    %7 = vector.shape_cast %6 : vector<1x128x128xbf16> to vector<128x128xbf16>
    %cst_7 = arith.constant dense<0.000000e+00> : vector<1x128xf32>
    %8 = tpu.matmul %5, %7, %cst_7 {dimension_numbers = #tpu.dot_dimension_numbers<[1], [0], [0], [1], [0, 0, 1, 1], [], []>} : vector<1x128xbf16>, vector<128x128xbf16>, vector<1x128xf32> -> vector<1x128xf32>
    %9 = vector.extract_strided_slice %4 {offsets = [1, 0], sizes = [4, 128], strides = [1, 1]} : vector<50x128xbf16> to vector<4x128xbf16>
    %c1 = arith.constant 1 : index
    %c0_8 = arith.constant 0 : index
    %c0_9 = arith.constant 0 : index
    %10 = vector.load %arg3[%c1, %c0_8, %c0_9] : memref<4x128x128xbf16, #tpu.memory_space<vmem>>, vector<1x128x128xbf16>
    %11 = vector.shape_cast %10 : vector<1x128x128xbf16> to vector<128x128xbf16>
    %cst_10 = arith.constant dense<0.000000e+00> : vector<4x128xf32>
    %12 = tpu.matmul %9, %11, %cst_10 {dimension_numbers = #tpu.dot_dimension_numbers<[1], [0], [0], [1], [0, 0, 1, 1], [], []>} : vector<4x128xbf16>, vector<128x128xbf16>, vector<4x128xf32> -> vector<4x128xf32>
    %13 = vector.extract_strided_slice %4 {offsets = [5, 0], sizes = [9, 128], strides = [1, 1]} : vector<50x128xbf16> to vector<9x128xbf16>
    %c2 = arith.constant 2 : index
    %c0_11 = arith.constant 0 : index
    %c0_12 = arith.constant 0 : index
    %14 = vector.load %arg3[%c2, %c0_11, %c0_12] : memref<4x128x128xbf16, #tpu.memory_space<vmem>>, vector<1x128x128xbf16>
    %15 = vector.shape_cast %14 : vector<1x128x128xbf16> to vector<128x128xbf16>
    %cst_13 = arith.constant dense<0.000000e+00> : vector<9x128xf32>
    %16 = tpu.matmul %13, %15, %cst_13 {dimension_numbers = #tpu.dot_dimension_numbers<[1], [0], [0], [1], [0, 0, 1, 1], [], []>} : vector<9x128xbf16>, vector<128x128xbf16>, vector<9x128xf32> -> vector<9x128xf32>
    %17 = vector.extract_strided_slice %4 {offsets = [14, 0], sizes = [36, 128], strides = [1, 1]} : vector<50x128xbf16> to vector<36x128xbf16>
    %c3 = arith.constant 3 : index
    %c0_14 = arith.constant 0 : index
    %c0_15 = arith.constant 0 : index
    %18 = vector.load %arg3[%c3, %c0_14, %c0_15] : memref<4x128x128xbf16, #tpu.memory_space<vmem>>, vector<1x128x128xbf16>
    %19 = vector.shape_cast %18 : vector<1x128x128xbf16> to vector<128x128xbf16>
    %cst_16 = arith.constant dense<0.000000e+00> : vector<36x128xf32>
    %20 = tpu.matmul %17, %19, %cst_16 {dimension_numbers = #tpu.dot_dimension_numbers<[1], [0], [0], [1], [0, 0, 1, 1], [], []>} : vector<36x128xbf16>, vector<128x128xbf16>, vector<36x128xf32> -> vector<36x128xf32>
    %21 = tpu.concatenate %8, %12, %16, %20 in 0 : vector<1x128xf32>, vector<4x128xf32>, vector<9x128xf32>, vector<36x128xf32> -> vector<50x128xf32>
    %c0_17 = arith.constant 0 : index
    %c0_18 = arith.constant 0 : index
    %c0_19 = arith.constant 0 : index
    %22 = vector.load %arg4[%c0_17, %c0_18, %c0_19] : memref<1x50x128xf32, #tpu.memory_space<vmem>>, vector<1x50x128xf32>
    %23 = vector.shape_cast %22 : vector<1x50x128xf32> to vector<50x128xf32>
    %24 = vector.shape_cast %21 : vector<50x128xf32> to vector<1x50x128xf32>
    tpu.vector_store %arg4[%c0_17, %c0_18, %c0_19], %24 {strides = array<i32>} : memref<1x50x128xf32, #tpu.memory_space<vmem>>, vector<1x50x128xf32>,
    return
  }
  func.func @transform_0(%arg0: i32) -> (i32, i32, i32) {
    %c0_i32 = arith.constant 0 : i32
    %c0_i32_0 = arith.constant 0 : i32
    %c0_i32_1 = arith.constant 0 : i32
    return %arg0, %c0_i32, %c0_i32_0 : i32, i32, i32
  }
  func.func @transform_1(%arg0: i32) -> (i32, i32) {
    %c0_i32 = arith.constant 0 : i32
    %c0_i32_0 = arith.constant 0 : i32
    %c0_i32_1 = arith.constant 0 : i32
    return %c0_i32, %c0_i32_0 : i32, i32
  }
  func.func @transform_2(%arg0: i32) -> (i32, i32, i32) {
    %c0_i32 = arith.constant 0 : i32
    %c0_i32_0 = arith.constant 0 : i32
    %c0_i32_1 = arith.constant 0 : i32
    %c0_i32_2 = arith.constant 0 : i32
    return %c0_i32, %c0_i32_0, %c0_i32_1 : i32, i32, i32
  }
  func.func @transform_3(%arg0: i32) -> (i32, i32, i32) {
    %c0_i32 = arith.constant 0 : i32
    %c0_i32_0 = arith.constant 0 : i32
    %c0_i32_1 = arith.constant 0 : i32
    return %arg0, %c0_i32, %c0_i32_0 : i32, i32, i32
  }
}

module attributes {stable_mosaic.version = 11 : i64} {
  func.func @head_conv3_stats_kernel(%arg0: i32, %arg1: memref<1x204x640xbf16, #tpu.memory_space<vmem>>, %arg2: memref<9x640x128xbf16, #tpu.memory_space<vmem>>, %arg3: memref<1x168x128xf32, #tpu.memory_space<vmem>>, %arg4: memref<1x2x128xf32, #tpu.memory_space<vmem>>) attributes {dimension_semantics = [#tpu.dimension_semantics<parallel>], iteration_bounds = array<i64: 2>, scalar_prefetch = 0 : i64, scratch_operands = 0 : i64, tpu.core_type = #tpu.core_type<tc>, window_params = [{transform_indices = @transform_0, window_bounds = array<i64: 1, 204, 640>}, {pipeline_mode = #tpu.pipeline_mode<synchronous>, transform_indices = @transform_1, window_bounds = array<i64: 9, 640, 128>}, {transform_indices = @transform_2, window_bounds = array<i64: 1, 168, 128>}, {transform_indices = @transform_3, window_bounds = array<i64: 1, 2, 128>}]} {
    %cst = arith.constant 0.000000e+00 : f32
    %0 = vector.broadcast %cst : f32 to vector<168x128xf32>
    %c0 = arith.constant 0 : index
    %c0_0 = arith.constant 0 : index
    %c0_1 = arith.constant 0 : index
    %1 = vector.load %arg1[%c0, %c0_0, %c0_1] : memref<1x204x640xbf16, #tpu.memory_space<vmem>>, vector<1x168x640xbf16>
    %2 = vector.shape_cast %1 : vector<1x168x640xbf16> to vector<168x640xbf16>
    %c0_2 = arith.constant 0 : index
    %c0_3 = arith.constant 0 : index
    %c0_4 = arith.constant 0 : index
    %3 = vector.load %arg2[%c0_2, %c0_3, %c0_4] : memref<9x640x128xbf16, #tpu.memory_space<vmem>>, vector<1x640x128xbf16>
    %4 = vector.shape_cast %3 : vector<1x640x128xbf16> to vector<640x128xbf16>
    %cst_5 = arith.constant dense<0.000000e+00> : vector<168x128xf32>
    %5 = tpu.matmul %2, %4, %cst_5 {dimension_numbers = #tpu.dot_dimension_numbers<[1], [0], [0], [1], [0, 0, 1, 1], [], []>} : vector<168x640xbf16>, vector<640x128xbf16>, vector<168x128xf32> -> vector<168x128xf32>
    %6 = arith.addf %0, %5 : vector<168x128xf32>
    %c0_6 = arith.constant 0 : index
    %c1 = arith.constant 1 : index
    %c0_7 = arith.constant 0 : index
    %7 = vector.load %arg1[%c0_6, %c1, %c0_7] : memref<1x204x640xbf16, #tpu.memory_space<vmem>>, vector<1x168x640xbf16>
    %8 = vector.shape_cast %7 : vector<1x168x640xbf16> to vector<168x640xbf16>
    %c1_8 = arith.constant 1 : index
    %c0_9 = arith.constant 0 : index
    %c0_10 = arith.constant 0 : index
    %9 = vector.load %arg2[%c1_8, %c0_9, %c0_10] : memref<9x640x128xbf16, #tpu.memory_space<vmem>>, vector<1x640x128xbf16>
    %10 = vector.shape_cast %9 : vector<1x640x128xbf16> to vector<640x128xbf16>
    %cst_11 = arith.constant dense<0.000000e+00> : vector<168x128xf32>
    %11 = tpu.matmul %8, %10, %cst_11 {dimension_numbers = #tpu.dot_dimension_numbers<[1], [0], [0], [1], [0, 0, 1, 1], [], []>} : vector<168x640xbf16>, vector<640x128xbf16>, vector<168x128xf32> -> vector<168x128xf32>
    %12 = arith.addf %6, %11 : vector<168x128xf32>
    %c0_12 = arith.constant 0 : index
    %c2 = arith.constant 2 : index
    %c0_13 = arith.constant 0 : index
    %13 = vector.load %arg1[%c0_12, %c2, %c0_13] : memref<1x204x640xbf16, #tpu.memory_space<vmem>>, vector<1x168x640xbf16>
    %14 = vector.shape_cast %13 : vector<1x168x640xbf16> to vector<168x640xbf16>
    %c2_14 = arith.constant 2 : index
    %c0_15 = arith.constant 0 : index
    %c0_16 = arith.constant 0 : index
    %15 = vector.load %arg2[%c2_14, %c0_15, %c0_16] : memref<9x640x128xbf16, #tpu.memory_space<vmem>>, vector<1x640x128xbf16>
    %16 = vector.shape_cast %15 : vector<1x640x128xbf16> to vector<640x128xbf16>
    %cst_17 = arith.constant dense<0.000000e+00> : vector<168x128xf32>
    %17 = tpu.matmul %14, %16, %cst_17 {dimension_numbers = #tpu.dot_dimension_numbers<[1], [0], [0], [1], [0, 0, 1, 1], [], []>} : vector<168x640xbf16>, vector<640x128xbf16>, vector<168x128xf32> -> vector<168x128xf32>
    %18 = arith.addf %12, %17 : vector<168x128xf32>
    %c0_18 = arith.constant 0 : index
    %c14 = arith.constant 14 : index
    %c0_19 = arith.constant 0 : index
    %19 = vector.load %arg1[%c0_18, %c14, %c0_19] : memref<1x204x640xbf16, #tpu.memory_space<vmem>>, vector<1x168x640xbf16>
    %20 = vector.shape_cast %19 : vector<1x168x640xbf16> to vector<168x640xbf16>
    %c3 = arith.constant 3 : index
    %c0_20 = arith.constant 0 : index
    %c0_21 = arith.constant 0 : index
    %21 = vector.load %arg2[%c3, %c0_20, %c0_21] : memref<9x640x128xbf16, #tpu.memory_space<vmem>>, vector<1x640x128xbf16>
    %22 = vector.shape_cast %21 : vector<1x640x128xbf16> to vector<640x128xbf16>
    %cst_22 = arith.constant dense<0.000000e+00> : vector<168x128xf32>
    %23 = tpu.matmul %20, %22, %cst_22 {dimension_numbers = #tpu.dot_dimension_numbers<[1], [0], [0], [1], [0, 0, 1, 1], [], []>} : vector<168x640xbf16>, vector<640x128xbf16>, vector<168x128xf32> -> vector<168x128xf32>
    %24 = arith.addf %18, %23 : vector<168x128xf32>
    %c0_23 = arith.constant 0 : index
    %c15 = arith.constant 15 : index
    %c0_24 = arith.constant 0 : index
    %25 = vector.load %arg1[%c0_23, %c15, %c0_24] : memref<1x204x640xbf16, #tpu.memory_space<vmem>>, vector<1x168x640xbf16>
    %26 = vector.shape_cast %25 : vector<1x168x640xbf16> to vector<168x640xbf16>
    %c4 = arith.constant 4 : index
    %c0_25 = arith.constant 0 : index
    %c0_26 = arith.constant 0 : index
    %27 = vector.load %arg2[%c4, %c0_25, %c0_26] : memref<9x640x128xbf16, #tpu.memory_space<vmem>>, vector<1x640x128xbf16>
    %28 = vector.shape_cast %27 : vector<1x640x128xbf16> to vector<640x128xbf16>
    %cst_27 = arith.constant dense<0.000000e+00> : vector<168x128xf32>
    %29 = tpu.matmul %26, %28, %cst_27 {dimension_numbers = #tpu.dot_dimension_numbers<[1], [0], [0], [1], [0, 0, 1, 1], [], []>} : vector<168x640xbf16>, vector<640x128xbf16>, vector<168x128xf32> -> vector<168x128xf32>
    %30 = arith.addf %24, %29 : vector<168x128xf32>
    %c0_28 = arith.constant 0 : index
    %c16 = arith.constant 16 : index
    %c0_29 = arith.constant 0 : index
    %31 = vector.load %arg1[%c0_28, %c16, %c0_29] : memref<1x204x640xbf16, #tpu.memory_space<vmem>>, vector<1x168x640xbf16>
    %32 = vector.shape_cast %31 : vector<1x168x640xbf16> to vector<168x640xbf16>
    %c5 = arith.constant 5 : index
    %c0_30 = arith.constant 0 : index
    %c0_31 = arith.constant 0 : index
    %33 = vector.load %arg2[%c5, %c0_30, %c0_31] : memref<9x640x128xbf16, #tpu.memory_space<vmem>>, vector<1x640x128xbf16>
    %34 = vector.shape_cast %33 : vector<1x640x128xbf16> to vector<640x128xbf16>
    %cst_32 = arith.constant dense<0.000000e+00> : vector<168x128xf32>
    %35 = tpu.matmul %32, %34, %cst_32 {dimension_numbers = #tpu.dot_dimension_numbers<[1], [0], [0], [1], [0, 0, 1, 1], [], []>} : vector<168x640xbf16>, vector<640x128xbf16>, vector<168x128xf32> -> vector<168x128xf32>
    %36 = arith.addf %30, %35 : vector<168x128xf32>
    %c0_33 = arith.constant 0 : index
    %c28 = arith.constant 28 : index
    %c0_34 = arith.constant 0 : index
    %37 = vector.load %arg1[%c0_33, %c28, %c0_34] : memref<1x204x640xbf16, #tpu.memory_space<vmem>>, vector<1x168x640xbf16>
    %38 = vector.shape_cast %37 : vector<1x168x640xbf16> to vector<168x640xbf16>
    %c6 = arith.constant 6 : index
    %c0_35 = arith.constant 0 : index
    %c0_36 = arith.constant 0 : index
    %39 = vector.load %arg2[%c6, %c0_35, %c0_36] : memref<9x640x128xbf16, #tpu.memory_space<vmem>>, vector<1x640x128xbf16>
    %40 = vector.shape_cast %39 : vector<1x640x128xbf16> to vector<640x128xbf16>
    %cst_37 = arith.constant dense<0.000000e+00> : vector<168x128xf32>
    %41 = tpu.matmul %38, %40, %cst_37 {dimension_numbers = #tpu.dot_dimension_numbers<[1], [0], [0], [1], [0, 0, 1, 1], [], []>} : vector<168x640xbf16>, vector<640x128xbf16>, vector<168x128xf32> -> vector<168x128xf32>
    %42 = arith.addf %36, %41 : vector<168x128xf32>
    %c0_38 = arith.constant 0 : index
    %c29 = arith.constant 29 : index
    %c0_39 = arith.constant 0 : index
    %43 = vector.load %arg1[%c0_38, %c29, %c0_39] : memref<1x204x640xbf16, #tpu.memory_space<vmem>>, vector<1x168x640xbf16>
    %44 = vector.shape_cast %43 : vector<1x168x640xbf16> to vector<168x640xbf16>
    %c7 = arith.constant 7 : index
    %c0_40 = arith.constant 0 : index
    %c0_41 = arith.constant 0 : index
    %45 = vector.load %arg2[%c7, %c0_40, %c0_41] : memref<9x640x128xbf16, #tpu.memory_space<vmem>>, vector<1x640x128xbf16>
    %46 = vector.shape_cast %45 : vector<1x640x128xbf16> to vector<640x128xbf16>
    %cst_42 = arith.constant dense<0.000000e+00> : vector<168x128xf32>
    %47 = tpu.matmul %44, %46, %cst_42 {dimension_numbers = #tpu.dot_dimension_numbers<[1], [0], [0], [1], [0, 0, 1, 1], [], []>} : vector<168x640xbf16>, vector<640x128xbf16>, vector<168x128xf32> -> vector<168x128xf32>
    %48 = arith.addf %42, %47 : vector<168x128xf32>
    %c0_43 = arith.constant 0 : index
    %c30 = arith.constant 30 : index
    %c0_44 = arith.constant 0 : index
    %49 = vector.load %arg1[%c0_43, %c30, %c0_44] : memref<1x204x640xbf16, #tpu.memory_space<vmem>>, vector<1x168x640xbf16>
    %50 = vector.shape_cast %49 : vector<1x168x640xbf16> to vector<168x640xbf16>
    %c8 = arith.constant 8 : index
    %c0_45 = arith.constant 0 : index
    %c0_46 = arith.constant 0 : index
    %51 = vector.load %arg2[%c8, %c0_45, %c0_46] : memref<9x640x128xbf16, #tpu.memory_space<vmem>>, vector<1x640x128xbf16>
    %52 = vector.shape_cast %51 : vector<1x640x128xbf16> to vector<640x128xbf16>
    %cst_47 = arith.constant dense<0.000000e+00> : vector<168x128xf32>
    %53 = tpu.matmul %50, %52, %cst_47 {dimension_numbers = #tpu.dot_dimension_numbers<[1], [0], [0], [1], [0, 0, 1, 1], [], []>} : vector<168x640xbf16>, vector<640x128xbf16>, vector<168x128xf32> -> vector<168x128xf32>
    %54 = arith.addf %48, %53 : vector<168x128xf32>
    %c0_48 = arith.constant 0 : index
    %c0_49 = arith.constant 0 : index
    %c0_50 = arith.constant 0 : index
    %55 = vector.load %arg3[%c0_48, %c0_49, %c0_50] : memref<1x168x128xf32, #tpu.memory_space<vmem>>, vector<1x168x128xf32>
    %56 = vector.shape_cast %55 : vector<1x168x128xf32> to vector<168x128xf32>
    %57 = vector.shape_cast %54 : vector<168x128xf32> to vector<1x168x128xf32>
    tpu.vector_store %arg3[%c0_48, %c0_49, %c0_50], %57 {strides = array<i32>} : memref<1x168x128xf32, #tpu.memory_space<vmem>>, vector<1x168x128xf32>,
    %58 = tpu.iota {dimensions = array<i32: 0>} : vector<168x1xi32>
    %c14_i32 = arith.constant 14 : i32
    %c0_i32 = arith.constant 0 : i32
    %59 = arith.cmpi eq, %c14_i32, %c0_i32 : i32
    %c1_i32 = arith.constant 1 : i32
    %60 = arith.select %59, %c1_i32, %c14_i32 : i32
    %61 = vector.broadcast %60 : i32 to vector<168x1xi32>
    %62 = arith.remsi %58, %61 : vector<168x1xi32>
    %c0_i32_51 = arith.constant 0 : i32
    %63 = vector.broadcast %c0_i32_51 : i32 to vector<168x1xi32>
    %64 = arith.cmpi ne, %62, %63 : vector<168x1xi32>
    %c0_i32_52 = arith.constant 0 : i32
    %65 = vector.broadcast %c0_i32_52 : i32 to vector<168x1xi32>
    %66 = arith.cmpi slt, %62, %65 : vector<168x1xi32>
    %c0_i32_53 = arith.constant 0 : i32
    %67 = arith.cmpi slt, %60, %c0_i32_53 : i32
    %68 = vector.broadcast %67 : i1 to vector<168x1xi1>
    %69 = vector.broadcast %68 : vector<168x1xi1> to vector<168x1xi1>
    %70 = arith.xori %66, %69 : vector<168x1xi1>
    %71 = arith.andi %70, %64 : vector<168x1xi1>
    %72 = vector.broadcast %60 : i32 to vector<168x1xi32>
    %73 = arith.addi %62, %72 : vector<168x1xi32>
    %74 = arith.select %71, %73, %62 : vector<168x1xi1>, vector<168x1xi32>
    %c12_i32 = arith.constant 12 : i32
    %75 = vector.broadcast %c12_i32 : i32 to vector<168x1xi32>
    %76 = arith.cmpi slt, %74, %75 : vector<168x1xi32>
    %77 = arith.extui %76 : vector<168x1xi1> to vector<168x1xi32>
    %78 = arith.sitofp %77 : vector<168x1xi32> to vector<168x1xf32>
    %79 = vector.broadcast %78 : vector<168x1xf32> to vector<168x128xf32>
    %80 = arith.mulf %54, %79 : vector<168x128xf32>
    %cst_54 = arith.constant dense<0.000000e+00> : vector<128xf32>
    %81 = vector.multi_reduction <add>, %80, %cst_54 [0] : vector<168x128xf32> to vector<128xf32>
    %82 = vector.shape_cast %81 : vector<128xf32> to vector<1x128xf32>
    %83 = arith.mulf %54, %54 : vector<168x128xf32>
    %84 = vector.broadcast %78 : vector<168x1xf32> to vector<168x128xf32>
    %85 = arith.mulf %83, %84 : vector<168x128xf32>
    %cst_55 = arith.constant dense<0.000000e+00> : vector<128xf32>
    %86 = vector.multi_reduction <add>, %85, %cst_55 [0] : vector<168x128xf32> to vector<128xf32>
    %87 = vector.shape_cast %86 : vector<128xf32> to vector<1x128xf32>
    %88 = tpu.concatenate %82, %87 in 0 : vector<1x128xf32>, vector<1x128xf32> -> vector<2x128xf32>
    %c0_56 = arith.constant 0 : index
    %c0_57 = arith.constant 0 : index
    %c0_58 = arith.constant 0 : index
    %89 = vector.load %arg4[%c0_56, %c0_57, %c0_58] : memref<1x2x128xf32, #tpu.memory_space<vmem>>, vector<1x2x128xf32>
    %90 = vector.shape_cast %89 : vector<1x2x128xf32> to vector<2x128xf32>
    %91 = vector.shape_cast %88 : vector<2x128xf32> to vector<1x2x128xf32>
    tpu.vector_store %arg4[%c0_56, %c0_57, %c0_58], %91 {strides = array<i32>} : memref<1x2x128xf32, #tpu.memory_space<vmem>>, vector<1x2x128xf32>,
    return
  }
  func.func @transform_0(%arg0: i32) -> (i32, i32, i32) {
    %c0_i32 = arith.constant 0 : i32
    %c0_i32_0 = arith.constant 0 : i32
    %c0_i32_1 = arith.constant 0 : i32
    return %arg0, %c0_i32, %c0_i32_0 : i32, i32, i32
  }
  func.func @transform_1(%arg0: i32) -> (i32, i32, i32) {
    %c0_i32 = arith.constant 0 : i32
    %c0_i32_0 = arith.constant 0 : i32
    %c0_i32_1 = arith.constant 0 : i32
    %c0_i32_2 = arith.constant 0 : i32
    return %c0_i32, %c0_i32_0, %c0_i32_1 : i32, i32, i32
  }
  func.func @transform_2(%arg0: i32) -> (i32, i32, i32) {
    %c0_i32 = arith.constant 0 : i32
    %c0_i32_0 = arith.constant 0 : i32
    %c0_i32_1 = arith.constant 0 : i32
    return %arg0, %c0_i32, %c0_i32_0 : i32, i32, i32
  }
  func.func @transform_3(%arg0: i32) -> (i32, i32, i32) {
    %c0_i32 = arith.constant 0 : i32
    %c0_i32_0 = arith.constant 0 : i32
    %c0_i32_1 = arith.constant 0 : i32
    return %arg0, %c0_i32, %c0_i32_0 : i32, i32, i32
  }
}

module attributes {stable_mosaic.version = 11 : i64} {
  func.func @head_bn_logits_kernel(%arg0: i32, %arg1: i32, %arg2: memref<1x56x128xf32, #tpu.memory_space<vmem>>, %arg3: memref<2x2x128xf32, #tpu.memory_space<vmem>>, %arg4: memref<1x128xf32, #tpu.memory_space<vmem>>, %arg5: memref<1x128xf32, #tpu.memory_space<vmem>>, %arg6: memref<128x128xbf16, #tpu.memory_space<vmem>>, %arg7: memref<1x128xf32, #tpu.memory_space<vmem>>, %arg8: memref<1x56x128xf32, #tpu.memory_space<vmem>>) attributes {dimension_semantics = [#tpu.dimension_semantics<parallel>, #tpu.dimension_semantics<parallel>], iteration_bounds = array<i64: 2, 3>, scalar_prefetch = 0 : i64, scratch_operands = 0 : i64, tpu.core_type = #tpu.core_type<tc>, window_params = [{transform_indices = @transform_0, window_bounds = array<i64: 1, 56, 128>}, {pipeline_mode = #tpu.pipeline_mode<synchronous>, transform_indices = @transform_1, window_bounds = array<i64: 2, 2, 128>}, {pipeline_mode = #tpu.pipeline_mode<synchronous>, transform_indices = @transform_2, window_bounds = array<i64: 1, 128>}, {pipeline_mode = #tpu.pipeline_mode<synchronous>, transform_indices = @transform_3, window_bounds = array<i64: 1, 128>}, {pipeline_mode = #tpu.pipeline_mode<synchronous>, transform_indices = @transform_4, window_bounds = array<i64: 128, 128>}, {pipeline_mode = #tpu.pipeline_mode<synchronous>, transform_indices = @transform_5, window_bounds = array<i64: 1, 128>}, {transform_indices = @transform_6, window_bounds = array<i64: 1, 56, 128>}]} {
    %c0 = arith.constant 0 : index
    %c0_0 = arith.constant 0 : index
    %c0_1 = arith.constant 0 : index
    %0 = vector.load %arg3[%c0, %c0_0, %c0_1] : memref<2x2x128xf32, #tpu.memory_space<vmem>>, vector<2x2x128xf32>
    %cst = arith.constant dense<0.000000e+00> : vector<2x128xf32>
    %1 = vector.multi_reduction <add>, %0, %cst [0] : vector<2x2x128xf32> to vector<2x128xf32>
    %2 = vector.extract_strided_slice %1 {offsets = [0, 0], sizes = [1, 128], strides = [1, 1]} : vector<2x128xf32> to vector<1x128xf32>
    %cst_2 = arith.constant 2.880000e+02 : f32
    %3 = vector.broadcast %cst_2 : f32 to vector<1x128xf32>
    %4 = arith.divf %2, %3 : vector<1x128xf32>
    %5 = vector.extract_strided_slice %1 {offsets = [1, 0], sizes = [1, 128], strides = [1, 1]} : vector<2x128xf32> to vector<1x128xf32>
    %cst_3 = arith.constant 2.880000e+02 : f32
    %6 = vector.broadcast %cst_3 : f32 to vector<1x128xf32>
    %7 = arith.divf %5, %6 : vector<1x128xf32>
    %8 = arith.mulf %4, %4 : vector<1x128xf32>
    %9 = arith.subf %7, %8 : vector<1x128xf32>
    %cst_4 = arith.constant 0.000000e+00 : f32
    %10 = vector.broadcast %cst_4 : f32 to vector<1x128xf32>
    %11 = arith.maximumf %9, %10 : vector<1x128xf32>
    %c0_5 = arith.constant 0 : index
    %c0_6 = arith.constant 0 : index
    %c0_7 = arith.constant 0 : index
    %12 = vector.load %arg2[%c0_5, %c0_6, %c0_7] : memref<1x56x128xf32, #tpu.memory_space<vmem>>, vector<1x56x128xf32>
    %13 = vector.shape_cast %12 : vector<1x56x128xf32> to vector<56x128xf32>
    %14 = vector.broadcast %4 : vector<1x128xf32> to vector<56x128xf32>
    %15 = arith.subf %13, %14 : vector<56x128xf32>
    %cst_8 = arith.constant 9.99999974E-6 : f32
    %16 = vector.broadcast %cst_8 : f32 to vector<1x128xf32>
    %17 = arith.addf %11, %16 : vector<1x128xf32>
    %18 = math.rsqrt %17 : vector<1x128xf32>
    %19 = vector.broadcast %18 : vector<1x128xf32> to vector<56x128xf32>
    %20 = arith.mulf %15, %19 : vector<56x128xf32>
    %c0_9 = arith.constant 0 : index
    %c0_10 = arith.constant 0 : index
    %21 = vector.load %arg4[%c0_9, %c0_10] : memref<1x128xf32, #tpu.memory_space<vmem>>, vector<1x128xf32>
    %22 = vector.broadcast %21 : vector<1x128xf32> to vector<56x128xf32>
    %23 = arith.mulf %20, %22 : vector<56x128xf32>
    %c0_11 = arith.constant 0 : index
    %c0_12 = arith.constant 0 : index
    %24 = vector.load %arg5[%c0_11, %c0_12] : memref<1x128xf32, #tpu.memory_space<vmem>>, vector<1x128xf32>
    %25 = vector.broadcast %24 : vector<1x128xf32> to vector<56x128xf32>
    %26 = arith.addf %23, %25 : vector<56x128xf32>
    %cst_13 = arith.constant 0.000000e+00 : f32
    %27 = vector.broadcast %cst_13 : f32 to vector<56x128xf32>
    %28 = arith.maximumf %26, %27 : vector<56x128xf32>
    %29 = arith.truncf %28 : vector<56x128xf32> to vector<56x128xbf16>
    %c0_14 = arith.constant 0 : index
    %c0_15 = arith.constant 0 : index
    %30 = vector.load %arg6[%c0_14, %c0_15] : memref<128x128xbf16, #tpu.memory_space<vmem>>, vector<128x128xbf16>
    %cst_16 = arith.constant dense<0.000000e+00> : vector<56x128xf32>
    %31 = tpu.matmul %29, %30, %cst_16 {dimension_numbers = #tpu.dot_dimension_numbers<[1], [0], [0], [1], [0, 0, 1, 1], [], []>} : vector<56x128xbf16>, vector<128x128xbf16>, vector<56x128xf32> -> vector<56x128xf32>
    %c0_17 = arith.constant 0 : index
    %c0_18 = arith.constant 0 : index
    %32 = vector.load %arg7[%c0_17, %c0_18] : memref<1x128xf32, #tpu.memory_space<vmem>>, vector<1x128xf32>
    %33 = vector.broadcast %32 : vector<1x128xf32> to vector<56x128xf32>
    %34 = arith.addf %31, %33 : vector<56x128xf32>
    %cst_19 = arith.constant dense<0xFF800000> : vector<56xf32>
    %35 = vector.multi_reduction <maximumf>, %34, %cst_19 [1] : vector<56x128xf32> to vector<56xf32>
    %36 = vector.shape_cast %35 : vector<56xf32> to vector<56x1xf32>
    %37 = vector.broadcast %36 : vector<56x1xf32> to vector<56x128xf32>
    %38 = arith.subf %34, %37 : vector<56x128xf32>
    %39 = math.exp %38 : vector<56x128xf32>
    %cst_20 = arith.constant dense<0.000000e+00> : vector<56xf32>
    %40 = vector.multi_reduction <add>, %39, %cst_20 [1] : vector<56x128xf32> to vector<56xf32>
    %41 = vector.shape_cast %40 : vector<56xf32> to vector<56x1xf32>
    %42 = math.log %41 : vector<56x1xf32>
    %43 = arith.addf %36, %42 : vector<56x1xf32>
    %44 = vector.broadcast %43 : vector<56x1xf32> to vector<56x128xf32>
    %45 = arith.subf %34, %44 : vector<56x128xf32>
    %c0_21 = arith.constant 0 : index
    %c0_22 = arith.constant 0 : index
    %c0_23 = arith.constant 0 : index
    %46 = vector.load %arg8[%c0_21, %c0_22, %c0_23] : memref<1x56x128xf32, #tpu.memory_space<vmem>>, vector<1x56x128xf32>
    %47 = vector.shape_cast %46 : vector<1x56x128xf32> to vector<56x128xf32>
    %48 = vector.shape_cast %45 : vector<56x128xf32> to vector<1x56x128xf32>
    tpu.vector_store %arg8[%c0_21, %c0_22, %c0_23], %48 {strides = array<i32>} : memref<1x56x128xf32, #tpu.memory_space<vmem>>, vector<1x56x128xf32>,
    return
  }
  func.func @transform_0(%arg0: i32, %arg1: i32) -> (i32, i32, i32) {
    %c0_i32 = arith.constant 0 : i32
    %c0_i32_0 = arith.constant 0 : i32
    return %arg0, %arg1, %c0_i32 : i32, i32, i32
  }
  func.func @transform_1(%arg0: i32, %arg1: i32) -> (i32, i32, i32) {
    %c0_i32 = arith.constant 0 : i32
    %c0_i32_0 = arith.constant 0 : i32
    %c0_i32_1 = arith.constant 0 : i32
    %c0_i32_2 = arith.constant 0 : i32
    return %c0_i32, %c0_i32_0, %c0_i32_1 : i32, i32, i32
  }
  func.func @transform_2(%arg0: i32, %arg1: i32) -> (i32, i32) {
    %c0_i32 = arith.constant 0 : i32
    %c0_i32_0 = arith.constant 0 : i32
    %c0_i32_1 = arith.constant 0 : i32
    return %c0_i32, %c0_i32_0 : i32, i32
  }
  func.func @transform_3(%arg0: i32, %arg1: i32) -> (i32, i32) {
    %c0_i32 = arith.constant 0 : i32
    %c0_i32_0 = arith.constant 0 : i32
    %c0_i32_1 = arith.constant 0 : i32
    return %c0_i32, %c0_i32_0 : i32, i32
  }
  func.func @transform_4(%arg0: i32, %arg1: i32) -> (i32, i32) {
    %c0_i32 = arith.constant 0 : i32
    %c0_i32_0 = arith.constant 0 : i32
    %c0_i32_1 = arith.constant 0 : i32
    return %c0_i32, %c0_i32_0 : i32, i32
  }
  func.func @transform_5(%arg0: i32, %arg1: i32) -> (i32, i32) {
    %c0_i32 = arith.constant 0 : i32
    %c0_i32_0 = arith.constant 0 : i32
    %c0_i32_1 = arith.constant 0 : i32
    return %c0_i32, %c0_i32_0 : i32, i32
  }
  func.func @transform_6(%arg0: i32, %arg1: i32) -> (i32, i32, i32) {
    %c0_i32 = arith.constant 0 : i32
    %c0_i32_0 = arith.constant 0 : i32
    return %arg0, %arg1, %c0_i32 : i32, i32, i32
  }
}

</mosaic_0001>

<bundles_post_ra>
// kernel: _lambda_.4
= control target key start
LH: loop header
LB: loop body
LE: loop exit
PB: predicated region body
PF: predicated region fallthrough
CT: control target
= control target key end

     0   :  { %8 = vsyncpa [#allocation3], 0  ;;  %s1335_s12 = smov 0   ;;  %s1578_s0 = inlined_call_operand.vmem [shape: bf16[2,144,128], index: 0, kind: input, shape index: {}]   ;;  %s1579_s1 = inlined_call_operand.hbm [shape: bf16[50,144], index: 1, kind: input, shape index: {}]   ;;  %s1580_s2 = inlined_call_operand.vmem [shape: bf16[4,128,128], index: 2, kind: input, shape index: {}]   ;;  %s1581_s3 = inlined_call_operand.vmem [shape: f32[2,50,128], index: 3, kind: output, shape index: {}]  }
   0x1 LB: > { %s1341_s13 = sadd.s32 4294967295, %s1307_s12   ;;  %p955_p0 = scmp.ge.s32.totalorder %s1307_s12, 1  ;;  %s1307_s12 = sphi %s1335_s12, %s14_s12  }
   0x2   : > { %p113_p1 = scmp.lt.s32.totalorder %s1307_s12, 3  ;;  %s1309_s14 = smov [#allocation2]  }
   0x3   : > { %s125_s15 = sshll.u32 %s1309_s14, 4  ;;  %p1582_p3 = scmp.eq.s32.totalorder %s1341_s13, 0  ;;  %s126_s15 = int_to_ptr.vmem [resolvable:$true] %s125_s15 }
   0x4   : > { %p1345_p2 = pnand %p955_p0, %p113_p1  ;;  %s1269_s20 = scalar_lea.hbm %s1579_s1, 896 }
   0x5   : > { %p1270_p6 = scmp.ne.s32.totalorder %s1579_s1, %s1269_s20  ;;  %p1276_p10 = scmp.lt.u32.totalorder %s1269_s20, %s1579_s1 }
   0x6   : > { %s1584_s16 = scalar_select %p1345_p2, 1, 0 }
   0x7   : > { %p1197_p4 = pneg %p1345_p2 }
   0x9   : > { %p1354_p5 = pnand %p1582_p3, %p1197_p4 }
   0xb   : > { %p1271_p7 = pneg %p1354_p5 }
   0xd   : > { %p1272_p8 = pnand %p1271_p7, %p1270_p6 }
   0xf   : > { %p1273_p9 = pneg %p1272_p8 }
  0x11   : > { %p1278_p11 = pnand %p1276_p10, %p1273_p9 }
  0x13   : > { %1281 = shalt.err (!%p1278_p11)
}
  0x14   : > { %s1282_s25 = scalar_lea.vmem %s126_s15, 896  ;;  %p1290_p1 = scmp.lt.s32.totalorder %s126_s15, %s126_s15 }
  0x15   : > { %p1283_p12 = scmp.ne.s32.totalorder %s126_s15, %s1282_s25  ;;  %p1291_p4 = scmp.lt.s32.totalorder %s1282_s25, %s1282_s25 }
  0x17   : > { %p1285_p13 = pnand %p1283_p12, %p1271_p7  ;;  %p1292_p3 = por %p1291_p4, %p1290_p1 }
  0x19   : > { %p1286_p0 = pneg %p1285_p13 }
  0x1b   : > { %p1293_p2 = pnand %p1292_p3, %p1286_p0 }
  0x1d   : > { %1296 = shalt.err (!%p1293_p2)
}
  0x1e   : > { %s1310_s26 = smov 128   ;;  %s1311_s27 = smov 8  }
  0x1f   : > { %1200 = dma.hbm_to_vmem [thread:$0]  (!%p1354_p5), %s1579_s1, 896, %s126_s15, [#allocation3], %s1310_s26, %s1310_s26, %s1311_s27  }
  0x20   : > { %p1586_p6 = scmp.ne.s32.totalorder %s1584_s16, 0 }
  0x21   : > { %p1587_p8 = scmp.eq.s32.totalorder (!%p1586_p6), %s1341_s13, 0 }
  0x22   : > { %152 = sbr.rel (%p1586_p6) target bundleno = 570 (0x23a), region = 32 }
  0x29   : > { %1302 = dma.done.wait (%p1587_p8), [#allocation3], 896   ;;  %p1588_p7 = pmov %p1587_p8 }
  0x2a   : > { %p176_p2 = scmp.lt.s32.totalorder %s1341_s13, 1  ;;  %v1312_v0 = vmov 0   ;;  %v1313_v1 = vmov 0.0   ;;  %vm299_vm0 = vcmask 130048   ;;  %v1228_v6 = vld [vmem:[#allocation2 + $0x4] ss:$8 sps:$4 sm:$0xff]  }
  0x2b   : > { %1304 = vsyncadd (%p1588_p7), [#allocation3], 4294966400  ;;  %312 = vmatprep.subr.bf16.mxu0 %v1312_v0  ;;  %1123 = vmatprep.subr.bf16.mxu1 %v1313_v1  ;;  %v1239_v8 = vld [vmem:[%s1580_s2 + $0x40] sm:$0xff]   ;;  %v1241_v10 = vld [vmem:[%s1580_s2 + $0x48] sm:$0xff]   ;;  %vm1314_vm1 = vmmov 0   ;;  %vm728_vm2 = vcmask 1040384  }
  0x2c   : > { %s1590_s13 = smov (!%p176_p2, %s1341_s13), 1  ;;  %979 = vmatprep.mubr.msk.bf16.mxu0 %vm299_vm0, %v1228_v6  ;;  %1124 = vmatpush3.bf16.msra.mxu1 %v1239_v8  ;;  %v1243_v12 = vld [vmem:[%s1580_s2 + $0x50] sm:$0xff]   ;;  %v1245_v14 = vld [vmem:[%s1580_s2 + $0x58] sm:$0xff]   ;;  %v1247_v16 = vld [vmem:[%s1580_s2 + $0x60] sm:$0xff]   ;;  %vm848_vm3 = vcmask 1044480   ;;  %vm859_vm4 = vcmask 1045504  }
  0x2d   : > { %s1191_s30 = smul.u32 72, %s1590_s13  ;;  %1125 = vmatprep.subr.bf16.mxu1 %v1313_v1  ;;  %v1226_v17 = vld [vmem:[#allocation2] ss:$8 sps:$4 sm:$0xff]   ;;  %v1229_v18 = vld [vmem:[#allocation2 + $0x14] ss:$8 sps:$4 sm:$0xff]   ;;  %1139 = vmatprep.mubr.msk.bf16.mxu1 %vm1314_vm1, %v1313_v1 }
  0x2e   : > { %v1237_v19 = vld [vmem:[%s1580_s2] sm:$0xff]   ;;  %v1249_v20 = vld [vmem:[%s1580_s2 + $0x68] sm:$0xff]   ;;  %v1231_v22 = vld [vmem:[#allocation2 + $0x10] ss:$8 sps:$4 sm:$0xff]   ;;  %s1192_s23 = smul.u32 56, %s1590_s13 }
  0x2f   : > { %s1389_s6 = scalar_lea.vmem %s1578_s0, %s1191_s30  ;;  %v1238_v21 = vld [vmem:[%s1580_s2 + $0x8] sm:$0xff]   ;;  %v1240_v24 = vld [vmem:[%s1580_s2 + $0x10] sm:$0xff]   ;;  %v1242_v25 = vld [vmem:[%s1580_s2 + $0x18] sm:$0xff]  }
  0x30   : > { %v1217_v2 = vld [vmem:[%s1389_s6] sm:$0xff]   ;;  %v1218_v3 = vld [vmem:[%s1389_s6 + $0x8] sm:$0xff]   ;;  %v1219_v4 = vld [vmem:[%s1389_s6 + $0x10] sm:$0xff]   ;;  %1126 = vmatpush3.bf16.msra.mxu1 %v1241_v10  ;;  %s1561_s26 = scalar_lea.vmem %s1581_s3, %s1192_s23 }
  0x31   : > { %313 = vmatpush1.bf16.msra.mxu0 %v1217_v2  ;;  %v1220_v5 = vld [vmem:[%s1389_s6 + $0x18] sm:$0xff]   ;;  %v1221_v7 = vld [vmem:[%s1389_s6 + $0x20] sm:$0xff]   ;;  %v1222_v9 = vld [vmem:[%s1389_s6 + $0x28] sm:$0xff]   ;;  %1127 = vmatprep.subr.bf16.mxu1 %v1313_v1 }
  0x32   : > { %314 = vmatprep.subr.bf16.mxu0 %v1312_v0  ;;  %v1223_v11 = vld [vmem:[%s1389_s6 + $0x30] sm:$0xff]   ;;  %v1224_v13 = vld [vmem:[%s1389_s6 + $0x38] sm:$0xff]   ;;  %v1225_v15 = vld [vmem:[%s1389_s6 + $0x40] sm:$0xff]  }
  0x33   : > { %v1232_v23 = vld [vmem:[#allocation2 + $0x24] ss:$8 sps:$4 sm:$0xff]   ;;  %v211_v26 = vld [vmem:[#allocation2 + $0x30] sm:$0x11]  ;;  %v1234_v27 = vld [vmem:[#allocation2 + $0x20] ss:$8 sps:$4 sm:$0xff]  }
  0x34   : > { %1128 = vmatpush3.bf16.msra.mxu1 %v1243_v12  ;;  %v969_v28 = vcombine.high %v211_v26, %v211_v26  ;;  %v1244_v29 = vld [vmem:[%s1580_s2 + $0x20] sm:$0xff]   ;;  %v1246_v30 = vld [vmem:[%s1580_s2 + $0x28] sm:$0xff]   ;;  %v968_v31 = vcombine.low %v211_v26, %v211_v26  ;;  %v1248_v32 = vld [vmem:[%s1580_s2 + $0x30] sm:$0xff]  }
  0x35   : > { %315 = vmatpush1.bf16.msra.mxu0 %v1218_v3  ;;  %1129 = vmatprep.subr.bf16.mxu1 %v1313_v1  ;;  %v1250_v33 = vld [vmem:[%s1580_s2 + $0x38] sm:$0xff]   ;;  %v1251_v34 = vld [vmem:[%s1580_s2 + $0x70] sm:$0xff]   ;;  %v1252_v39 = vld [vmem:[%s1580_s2 + $0x80] sm:$0xff]  }
  0x36   : > { %316 = vmatprep.subr.bf16.mxu0 %v1312_v0  ;;  %v1253_v35 = vld [vmem:[%s1580_s2 + $0x78] sm:$0xff]   ;;  %v1254_v43 = vld [vmem:[%s1580_s2 + $0x88] sm:$0xff]   ;;  %v1255_v47 = vld [vmem:[%s1580_s2 + $0xc0] sm:$0xff]  }
  0x37   : > { %v1256_v51 = vld [vmem:[%s1580_s2 + $0x90] sm:$0xff]   ;;  %v1257_v54 = vld [vmem:[%s1580_s2 + $0xc8] sm:$0xff]   ;;  %v1258_v57 = vld [vmem:[%s1580_s2 + $0x98] sm:$0xff]  }
  0x38   : > { %1130 = vmatpush3.bf16.msra.mxu1 %v1245_v14  ;;  %v1259_v59 = vld [vmem:[%s1580_s2 + $0xd0] sm:$0xff]   ;;  %v1260_v62 = vld [vmem:[%s1580_s2 + $0xa0] sm:$0xff]   ;;  %v1261_v3 = vld [vmem:[%s1580_s2 + $0xd8] sm:$0xff]  }
  0x39   : > { %317 = vmatpush1.bf16.msra.mxu0 %v1219_v4  ;;  %1131 = vmatprep.subr.bf16.mxu1 %v1313_v1 }
  0x3a   : > { %318 = vmatprep.subr.bf16.mxu0 %v1312_v0 }
  0x3c   : > { %1132 = vmatpush3.bf16.msra.mxu1 %v1247_v16 }
  0x3d   : > { %319 = vmatpush1.bf16.msra.mxu0 %v1220_v5  ;;  %1133 = vmatprep.subr.bf16.mxu1 %v1313_v1  ;;  %v1262_v5 = vld [vmem:[%s1580_s2 + $0xa8] sm:$0xff]  }
  0x3e   : > { %320 = vmatprep.subr.bf16.mxu0 %v1312_v0 }
  0x40   : > { %1134 = vmatpush3.bf16.msra.mxu1 %v1249_v20  ;;  %v1267_v20 = vld [vmem:[%s1580_s2 + $0xf0] sm:$0xff]  }
  0x41   : > { %321 = vmatpush1.bf16.msra.mxu0 %v1221_v7  ;;  %1135 = vmatprep.subr.bf16.mxu1 %v1313_v1  ;;  %v1263_v7 = vld [vmem:[%s1580_s2 + $0xe0] sm:$0xff]  }
  0x42   : > { %322 = vmatprep.subr.bf16.mxu0 %v1312_v0 }
  0x44   : > { %1136 = vmatpush3.bf16.msra.mxu1 %v1251_v34 }
  0x45   : > { %323 = vmatpush1.bf16.msra.mxu0 %v1222_v9  ;;  %1137 = vmatprep.subr.bf16.mxu1 %v1313_v1 }
  0x46   : > { %324 = vmatprep.subr.bf16.mxu0 %v1312_v0 }
  0x48   : > { %1138 = vmatpush3.bf16.msra.mxu1 %v1253_v35 }
  0x49   : > { %325 = vmatpush1.bf16.msra.mxu0 %v1223_v11  ;;  %1163 = vmatprep.subr.bf16.mxu1 %v1313_v1  ;;  %v1264_v11 = vld [vmem:[%s1580_s2 + $0xb0] sm:$0xff]  }
  0x4a   : > { %326 = vmatprep.subr.bf16.mxu0 %v1312_v0 }
  0x4d   : > { %327 = vmatpush1.bf16.msra.mxu0 %v1224_v13 }
  0x4e   : > { %328 = vmatprep.subr.bf16.mxu0 %v1312_v0 }
  0x51   : > { %329 = vmatpush1.bf16.msra.mxu0 %v1225_v15  ;;  %v1265_v15 = vld [vmem:[%s1580_s2 + $0xe8] sm:$0xff]  }
  0x52   : > { %1103 = vmatprep.subr.bf16.mxu0 %v1313_v1 }
  0x54   : > { %345 = vmatmul.mubr.bf16.vlgmr.msra.gmra.mrb[0].mxu0 %v1226_v17  ;;  %v1266_v17 = vld [vmem:[%s1580_s2 + $0xb8] sm:$0xff]  }
  0x55   : > { %980 = vmatprep.mubr.msk.bf16.mxu0 %vm299_vm0, %v1229_v18  ;;  %1104 = vmatpush3.bf16.msra.mxu0 %v1237_v19 }
  0x56   : > { %1105 = vmatprep.subr.bf16.mxu0 %v1313_v1 }
  0x59   : > { %1106 = vmatpush3.bf16.msra.mxu0 %v1238_v21 }
  0x5a   : > { %1107 = vmatprep.subr.bf16.mxu0 %v1313_v1 }
  0x5c   : > { %353 = vmatmul.mubr.bf16.gmra.mrb[4].mxu0 %v1231_v22  ;;  %v1268_v22 = vld [vmem:[%s1580_s2 + $0xf8] sm:$0xff]  }
  0x5d   : > { %981 = vmatprep.mubr.msk.bf16.mxu0 %vm299_vm0, %v1232_v23  ;;  %1108 = vmatpush3.bf16.msra.mxu0 %v1240_v24 }
  0x5e   : > { %1109 = vmatprep.subr.bf16.mxu0 %v1313_v1 }
  0x61   : > { %1110 = vmatpush3.bf16.msra.mxu0 %v1242_v25 }
  0x62   : > { %1111 = vmatprep.subr.bf16.mxu0 %v1313_v1 }
  0x64   : > { %361 = vmatmul.mubr.bf16.gmra.mrb[8].mxu0 %v1234_v27 }
  0x65   : > { %982 = vmatprep.mubr.msk.bf16.mxu0 %vm299_vm0, %v969_v28  ;;  %1112 = vmatpush3.bf16.msra.mxu0 %v1244_v29 }
  0x66   : > { %1113 = vmatprep.subr.bf16.mxu0 %v1313_v1 }
  0x69   : > { %1114 = vmatpush3.bf16.msra.mxu0 %v1246_v30 }
  0x6a   : > { %1115 = vmatprep.subr.bf16.mxu0 %v1313_v1 }
  0x6c   : > { %369 = vmatmul.mubr.bf16.gmra.mrb[12].mxu0 %v968_v31 }
  0x6d   : > { %1116 = vmatpush3.bf16.msra.mxu0 %v1248_v32  ;;  %1119 = vmatprep.mubr.msk.bf16.mxu0 %vm1314_vm1, %v1313_v1 }
  0x6e   : > { %1117 = vmatprep.subr.bf16.mxu0 %v1313_v1 }
  0x71   : > { %1118 = vmatpush3.bf16.msra.mxu0 %v1250_v33 }
  0x72   : > { %1143 = vmatprep.subr.bf16.mxu0 %v1313_v1 }
 0x127   : > { %v346_v36 = vpop.f32.mrb[0].mxu0 }
 0x128   : > { %v348_v37 = vpop.f32.mrb[1].mxu0 }
 0x129   : > { %v349_v38 = vpop.f32.mrb[2].mxu0 }
 0x12a   : > { %v1476_v40 = vpack.c.bf16 %v349_v38, %v346_v36  ;;  %v351_v41 = vpop.f32.mrb[3].mxu0 }
 0x12c   : > { %1120 = vmatmul.mubr.bf16.vlgmr.msra.gmra.mrb[16].mxu0 %v1476_v40  ;;  %v504_v42 = vshll.u32 %v1476_v40, 16  ;;  %v502_v44 = vshrl.u32 %v1476_v40, 16  ;;  %v729_v56 = vrot.slane %v1476_v40, 7 }
 0x12d   : > { %1144 = vmatpush3.bf16.msra.mxu0 %v1252_v39  ;;  %1159 = vmatprep.mubr.msk.bf16.mxu0 %vm1314_vm1, %v1313_v1 }
 0x12e   : > { %1145 = vmatprep.subr.bf16.mxu0 %v1313_v1  ;;  %v506_v45 = vrot.slane %v504_v42, 1  ;;  %v614_v18 = vrot.slane %v502_v44, 2  ;;  %v615_v19 = vrot.slane %v504_v42, 3 }
 0x12f   : > { %v354_v46 = vpop.f32.mrb[4].mxu0 }
 0x130   : > { %v356_v48 = vpop.f32.mrb[5].mxu0  ;;  %v507_v49 = vor.u32 %v506_v45, %v502_v44  ;;  %v616_v21 = vor.u32 %v615_v19, %v614_v18 }
 0x131   : > { %1146 = vmatpush3.bf16.msra.mxu0 %v1254_v43  ;;  %v357_v50 = vpop.f32.mrb[6].mxu0 }
 0x132   : > { %v377_v52 = vpack.c.bf16 %v357_v50, %v354_v46  ;;  %1140 = vmatmul.mubr.bf16.vlgmr.msra.gmra.mrb[0].mxu1 %v507_v49  ;;  %1147 = vmatprep.subr.bf16.mxu0 %v1313_v1  ;;  %v359_v53 = vpop.f32.mrb[7].mxu0 }
 0x133   : > { %1164 = vmatpush3.bf16.msra.mxu1 %v1255_v47  ;;  %1179 = vmatprep.mubr.msk.bf16.mxu1 %vm1314_vm1, %v1313_v1 }
 0x134   : > { %v730_v55 = vrot.slane %v377_v52, 7  ;;  %1165 = vmatprep.subr.bf16.mxu1 %v1313_v1 }
 0x135   : > { %1148 = vmatpush3.bf16.msra.mxu0 %v1256_v51 }
 0x136   : > { %1149 = vmatprep.subr.bf16.mxu0 %v1313_v1  ;;  %v731_v58 = vsel %vm728_vm2, %v729_v56, %v730_v55 }
 0x137   : > { %1166 = vmatpush3.bf16.msra.mxu1 %v1257_v54  ;;  %v362_v60 = vpop.f32.mrb[8].mxu0 }
 0x138   : > { %1167 = vmatprep.subr.bf16.mxu1 %v1313_v1  ;;  %v364_v61 = vpop.f32.mrb[9].mxu0 }
 0x139   : > { %1150 = vmatpush3.bf16.msra.mxu0 %v1258_v57  ;;  %v365_v63 = vpop.f32.mrb[10].mxu0 }
 0x13a   : > { %1151 = vmatprep.subr.bf16.mxu0 %v1313_v1  ;;  %v378_v0 = vpack.c.bf16 %v365_v63, %v362_v60  ;;  %v367_v2 = vpop.f32.mrb[11].mxu0 }
 0x13b   : > { %1168 = vmatpush3.bf16.msra.mxu1 %v1259_v59 }
 0x13c   : > { %1169 = vmatprep.subr.bf16.mxu1 %v1313_v1  ;;  %v732_v4 = vrot.slane %v378_v0, 7 }
 0x13d   : > { %1152 = vmatpush3.bf16.msra.mxu0 %v1260_v62 }
 0x13e   : > { %1153 = vmatprep.subr.bf16.mxu0 %v1313_v1  ;;  %v733_v6 = vsel %vm728_vm2, %v730_v55, %v732_v4 }
 0x13f   : > { %1170 = vmatpush3.bf16.msra.mxu1 %v1261_v3  ;;  %v370_v8 = vpop.f32.mrb[12].mxu0 }
 0x140   : > { %1171 = vmatprep.subr.bf16.mxu1 %v1313_v1  ;;  %v379_v9 = vpack.c.bf16 %v370_v8, %v370_v8  ;;  %v372_v10 = vpop.f32.mrb[13].mxu0 }
 0x141   : > { %1154 = vmatpush3.bf16.msra.mxu0 %v1262_v5  ;;  %v373_v12 = vpop.f32.mrb[14].mxu0 }
 0x142   : > { %1155 = vmatprep.subr.bf16.mxu0 %v1313_v1  ;;  %v734_v13 = vrot.slane %v379_v9, 7  ;;  %v374_v14 = vpop.f32.mrb[15].mxu0 }
 0x143   : > { %1172 = vmatpush3.bf16.msra.mxu1 %v1263_v7 }
 0x144   : > { %1173 = vmatprep.subr.bf16.mxu1 %v1313_v1  ;;  %v735_v16 = vsel %vm728_vm2, %v732_v4, %v734_v13 }
 0x145   : > { %1156 = vmatpush3.bf16.msra.mxu0 %v1264_v11 }
 0x146   : > { %1157 = vmatprep.subr.bf16.mxu0 %v1313_v1 }
 0x147   : > { %1174 = vmatpush3.bf16.msra.mxu1 %v1265_v15 }
 0x148   : > { %1175 = vmatprep.subr.bf16.mxu1 %v1313_v1 }
 0x149   : > { %1158 = vmatpush3.bf16.msra.mxu0 %v1266_v17 }
 0x14b   : > { %1176 = vmatpush3.bf16.msra.mxu1 %v1267_v20 }
 0x14c   : > { %1160 = vmatmul.mubr.bf16.vlgmr.msra.gmra.mrb[20].mxu0 %v616_v21  ;;  %1177 = vmatprep.subr.bf16.mxu1 %v1313_v1 }
 0x14f   : > { %1178 = vmatpush3.bf16.msra.mxu1 %v1268_v22 }
 0x152   : > { %1180 = vmatmul.mubr.bf16.vlgmr.msra.gmra.mrb[4].mxu1 %v731_v58 }
 0x153   : > { %1183 = vmatprep.mubr.msk.bf16.mxu1 %vm1314_vm1, %v1313_v1 }
 0x15a   : > { %1184 = vmatmul.mubr.bf16.gmra.mrb[8].mxu1 %v733_v6 }
 0x15b   : > { %1187 = vmatprep.mubr.msk.bf16.mxu1 %vm1314_vm1, %v1313_v1 }
 0x162   : > { %1188 = vmatmul.mubr.bf16.gmra.mrb[12].mxu1 %v735_v16 }
 0x1ff   : > { %v478_v23 = vpop.f32.mrb[16].mxu0 }
 0x200   : > { %v1121_v24 = vpop.f32.mrb[17].mxu0 }
 0x201   : > { %v481_v25 = vpop.f32.mrb[18].mxu0 }
 0x202   : > { %v1122_v26 = vpop.f32.mrb[19].mxu0 }
 0x205   : > { %v591_v27 = vpop.f32.mrb[0].mxu1 }
 0x206   : > { %v844_v28 = vrot.slane %v591_v27, 7  ;;  %v1141_v29 = vpop.f32.mrb[1].mxu1 }
 0x207   : > { %v594_v30 = vpop.f32.mrb[2].mxu1 }
 0x208   : > { %v876_v31 = vsel %vm728_vm2, %v478_v23, %v844_v28  ;;  %v1142_v32 = vpop.f32.mrb[3].mxu1 }
 0x21f   : > { %v700_v33 = vpop.f32.mrb[20].mxu0 }
 0x220   : > { %v849_v1 = vrot.slane %v700_v33, 3  ;;  %v1161_v34 = vpop.f32.mrb[21].mxu0 }
 0x221   : > { %v703_v35 = vpop.f32.mrb[22].mxu0 }
 0x222   : > { %v877_v36 = vsel %vm848_vm3, %v876_v31, %v849_v1  ;;  %v850_v37 = vrot.slane %v703_v35, 3  ;;  %v1162_v38 = vpop.f32.mrb[23].mxu0 }
 0x223   : > { %879 = vst [vmem:[%s1561_s26] sm:$0xff] %v877_v36 }
 0x224   : > { %v851_v39 = vsel %vm848_vm3, %v849_v1, %v850_v37 }
 0x225   : > { %v821_v40 = vpop.f32.mrb[4].mxu1 }
 0x226   : > { %v860_v41 = vrot.slane %v821_v40, 2  ;;  %v1181_v42 = vpop.f32.mrb[5].mxu1 }
 0x227   : > { %v824_v43 = vpop.f32.mrb[6].mxu1 }
 0x228   : > { %v878_v44 = vsel %vm859_vm4, %v851_v39, %v860_v41  ;;  %v861_v45 = vrot.slane %v824_v43, 2  ;;  %v1182_v46 = vpop.f32.mrb[7].mxu1 }
 0x229   : > { %880 = vst [vmem:[%s1561_s26 + $0x8] sm:$0xff] %v878_v44 }
 0x22a   : > { %v862_v47 = vsel %vm859_vm4, %v860_v41, %v861_v45 }
 0x22b   : > { %881 = vst [vmem:[%s1561_s26 + $0x10] sm:$0xff] %v862_v47 }
 0x22d   : > { %v829_v48 = vpop.f32.mrb[8].mxu1 }
 0x22e   : > { %v863_v49 = vrot.slane %v829_v48, 2  ;;  %v1185_v50 = vpop.f32.mrb[9].mxu1 }
 0x22f   : > { %v832_v51 = vpop.f32.mrb[10].mxu1 }
 0x230   : > { %v864_v52 = vsel %vm859_vm4, %v861_v45, %v863_v49  ;;  %v865_v53 = vrot.slane %v832_v51, 2  ;;  %v1186_v54 = vpop.f32.mrb[11].mxu1 }
 0x231   : > { %882 = vst [vmem:[%s1561_s26 + $0x18] sm:$0xff] %v864_v52 }
 0x232   : > { %v866_v55 = vsel %vm859_vm4, %v863_v49, %v865_v53 }
 0x233   : > { %883 = vst [vmem:[%s1561_s26 + $0x20] sm:$0xff] %v866_v55 }
 0x235   : > { %v837_v56 = vpop.f32.mrb[12].mxu1 }
 0x236   : > { %v867_v57 = vrot.slane %v837_v56, 2  ;;  %v1189_v58 = vpop.f32.mrb[13].mxu1 }
 0x237   : > { %v840_v59 = vpop.f32.mrb[14].mxu1 }
 0x238   : > { %v868_v60 = vsel %vm859_vm4, %v865_v53, %v867_v57  ;;  %885 = vst [vmem:[%s1561_s26 + $0x30] sm:$0x3] %v867_v57  ;;  %v1190_v61 = vpop.f32.mrb[15].mxu1 }
 0x239   : > { %884 = vst [vmem:[%s1561_s26 + $0x28] sm:$0xff] %v868_v60 }
 0x23a PF: > { %s14_s12 = sadd.s32 1, %s1307_s12  }
 0x23b   : > { %p11_p3 = scmp.ge.s32.totalorder %s14_s12, 4  }
 0x23d   :  { %13 = sbr.rel (!%p11_p3) target bundleno = 1 (0x1), region = 70 }
 0x244   :  { %907 = vsyncpa [#allocation3], 1 }
 0x245   :  { %909 = vsyncpa [#allocation3 + $0x1], 1 }

// kernel: _lambda_.5
= control target key start
LH: loop header
LB: loop body
LE: loop exit
PB: predicated region body
PF: predicated region fallthrough
CT: control target
= control target key end

     0   :  { %13 = vsyncpa [#allocation3], 0  ;;  %s2543_s0 = inlined_call_operand.vmem [shape: f32[2,50,128], index: 0, kind: input, shape index: {}, may-alias: {0,1}]   ;;  %s2544_s1 = inlined_call_operand.vmem [shape: f32[2,50,128], index: 1, kind: input, shape index: {}, may-alias: {0,1}]   ;;  %s2545_s2 = inlined_call_operand.vmem [shape: f32[4,1,128], index: 2, kind: input, shape index: {}]   ;;  %s2546_s3 = inlined_call_operand.vmem [shape: f32[4,1,128], index: 3, kind: input, shape index: {}]   ;;  %s2547_s4 = inlined_call_operand.vmem [shape: bf16[144,1], index: 4, kind: input, shape index: {}]   ;;  %s2548_s5 = inlined_call_operand.hbm [shape: bf16[144,4], index: 5, kind: input, shape index: {}]   ;;  %s2549_s6 = inlined_call_operand.hbm [shape: bf16[144,9], index: 6, kind: input, shape index: {}]   ;;  %s2550_s7 = inlined_call_operand.hbm [shape: bf16[144,36], index: 7, kind: input, shape index: {}]   ;;  %s2551_s8 = inlined_call_operand.vmem [shape: f32[2,144,512], index: 8, kind: output, shape index: {}]  }
   0x1   :  { %14 = vsyncpa [#allocation5], 0  ;;  %s2012_s27 = smov 0  }
   0x2 LB: > { %s2018_s4 = sadd.s32 4294967295, %s1957_s27   ;;  %p1547_p0 = scmp.ge.s32.totalorder %s1957_s27, 1  ;;  %s1957_s27 = sphi %s2012_s27, %s20_s27  }
   0x3   : > { %p224_p1 = scmp.lt.s32.totalorder %s1957_s27, 3  ;;  %p2552_p2 = scmp.eq.s32.totalorder %s2018_s4, 0 }
   0x4   : > { %s1959_s29 = smov [#allocation4]   ;;  %s1960_s9 = smov [#allocation2]  }
   0x5   : > { %p2023_p3 = pnand %p1547_p0, %p224_p1  ;;  %s261_s30 = sshll.u32 %s1959_s29, 4  ;;  %s262_s30 = int_to_ptr.vmem [resolvable:$true] %s261_s30 }
   0x6   : > { %s248_s10 = sshll.u32 %s1960_s9, 4  ;;  %s1961_s12 = smov [#allocation6]   ;;  %s2035_s10 = int_to_ptr.vmem [resolvable:$true] %s248_s10 }
   0x7   : > { %s2554_s28 = scalar_select %p2023_p3, 1, 0 }
   0x8   : > { %p1792_p4 = pneg %p2023_p3  ;;  %s274_s13 = sshll.u32 %s1961_s12, 4  ;;  %s2037_s13 = int_to_ptr.vmem [resolvable:$true] %s274_s13 }
   0x9   : > { %s1859_s16 = scalar_lea.hbm %s2549_s6, 1152 }
   0xa   : > { %p2031_p5 = pnand %p2552_p2, %p1792_p4  ;;  %p1860_p6 = scmp.ne.s32.totalorder %s2549_s6, %s1859_s16 }
   0xb   : > { %p1866_p10 = scmp.lt.u32.totalorder %s1859_s16, %s2549_s6 }
   0xc   : > { %p2047_p7 = pneg %p2031_p5 }
   0xe   : > { %p1862_p8 = pnand %p2047_p7, %p1860_p6 }
  0x10   : > { %p1863_p9 = pneg %p1862_p8 }
  0x12   : > { %p1868_p11 = pnand %p1866_p10, %p1863_p9 }
  0x14   : > { %1871 = shalt.err (!%p1868_p11)
}
  0x15   : > { %s1872_s22 = scalar_lea.vmem %s262_s30, 1152  ;;  %p1880_p1 = scmp.lt.s32.totalorder %s262_s30, %s262_s30 }
  0x16   : > { %p1873_p12 = scmp.ne.s32.totalorder %s262_s30, %s1872_s22  ;;  %p1881_p4 = scmp.lt.s32.totalorder %s1872_s22, %s1872_s22 }
  0x18   : > { %p1875_p13 = pnand %p1873_p12, %p2047_p7  ;;  %p1882_p2 = por %p1881_p4, %p1880_p1 }
  0x1a   : > { %p1876_p0 = pneg %p1875_p13 }
  0x1c   : > { %p1883_p3 = pnand %p1882_p2, %p1876_p0 }
  0x1e   : > { %1886 = shalt.err (!%p1883_p3)
}
  0x1f   : > { %s1962_s23 = smov 64   ;;  %s1963_s24 = smov 4  }
  0x20   : > { %1798 = dma.hbm_to_vmem [thread:$0]  (!%p2031_p5), %s2549_s6, 1152, %s262_s30, [#allocation5], %s1962_s23, %s1962_s23, %s1963_s24  }
  0x21   : > { %s1887_s12 = scalar_lea.hbm %s2548_s5, 1152 }
  0x22   : > { %p1888_p2 = scmp.ne.s32.totalorder %s2548_s5, %s1887_s12  ;;  %p1894_p8 = scmp.lt.u32.totalorder %s1887_s12, %s2548_s5 }
  0x24   : > { %p1890_p3 = pnand %p1888_p2, %p2047_p7 }
  0x26   : > { %p1891_p6 = pneg %p1890_p3 }
  0x28   : > { %p1896_p9 = pnand %p1894_p8, %p1891_p6 }
  0x2a   : > { %1899 = shalt.err (!%p1896_p9)
}
  0x2b   : > { %s1900_s30 = scalar_lea.vmem %s2035_s10, 1152  ;;  %p1908_p13 = scmp.lt.s32.totalorder %s2035_s10, %s2035_s10 }
  0x2c   : > { %p1901_p10 = scmp.ne.s32.totalorder %s2035_s10, %s1900_s30  ;;  %p1909_p0 = scmp.lt.s32.totalorder %s1900_s30, %s1900_s30 }
  0x2e   : > { %p1903_p11 = pnand %p1901_p10, %p2047_p7  ;;  %p1910_p1 = por %p1909_p0, %p1908_p13 }
  0x30   : > { %p1904_p12 = pneg %p1903_p11 }
  0x32   : > { %p1911_p4 = pnand %p1910_p1, %p1904_p12 }
  0x34   : > { %1914 = shalt.err (!%p1911_p4)
}
  0x35   : > { %1795 = dma.hbm_to_vmem [thread:$0]  (!%p2031_p5), %s2548_s5, 1152, %s2035_s10, [#allocation3], %s1962_s23, %s1962_s23, %s1963_s24  }
  0x36   : > { %s1915_s25 = scalar_lea.hbm %s2550_s7, 1152 }
  0x37   : > { %p1916_p2 = scmp.ne.s32.totalorder %s2550_s7, %s1915_s25  ;;  %p1922_p8 = scmp.lt.u32.totalorder %s1915_s25, %s2550_s7 }
  0x39   : > { %p1918_p3 = pnand %p1916_p2, %p2047_p7 }
  0x3b   : > { %p1919_p6 = pneg %p1918_p3 }
  0x3d   : > { %p1924_p9 = pnand %p1922_p8, %p1919_p6 }
  0x3f   : > { %1927 = shalt.err (!%p1924_p9)
}
  0x40   : > { %s1928_s10 = scalar_lea.vmem %s2037_s13, 1152  ;;  %p1936_p13 = scmp.lt.s32.totalorder %s2037_s13, %s2037_s13 }
  0x41   : > { %p1929_p10 = scmp.ne.s32.totalorder %s2037_s13, %s1928_s10  ;;  %p1937_p0 = scmp.lt.s32.totalorder %s1928_s10, %s1928_s10 }
  0x43   : > { %p1931_p11 = pnand %p1929_p10, %p2047_p7  ;;  %p1938_p1 = por %p1937_p0, %p1936_p13 }
  0x45   : > { %p1932_p12 = pneg %p1931_p11 }
  0x47   : > { %p1939_p4 = pnand %p1938_p1, %p1932_p12 }
  0x49   : > { %1942 = shalt.err (!%p1939_p4)
}
  0x4a   : > { %1801 = dma.hbm_to_vmem [thread:$0]  (!%p2031_p5), %s2550_s7, 1152, %s2037_s13, [#allocation5], %s1962_s23, %s1962_s23, %s1963_s24  }
  0x4b   : > { %p2557_p2 = scmp.ne.s32.totalorder %s2554_s28, 0 }
  0x4c   : > { %p2558_p7 = scmp.eq.s32.totalorder (!%p2557_p2), %s2018_s4, 0 }
  0x4d   : > { %298 = sbr.rel (%p2557_p2) target bundleno = 492 (0x1ec), region = 52 }
  0x54   : > { %1948 = dma.done.wait (%p2558_p7), [#allocation3], 1152   ;;  %p2559_p3 = pmov %p2558_p7 }
  0x56   : > { %1950 = vsyncadd (%p2559_p3), [#allocation3], 4294966144  ;;  %p2560_p6 = pmov %p2559_p3 }
  0x57   : > { %p2561_p8 = pmov %p2559_p3 }
  0x58   : > { %1952 = dma.done.wait (%p2560_p6), [#allocation5], 2304  }
  0x59   : > { %1954 = vsyncadd (%p2561_p8), [#allocation5], 4294964992  ;;  %v1964_v0 = vmov 0.0   ;;  %vm1965_vm0 = vmmov 0   ;;  %v2137_v1 = vld [vmem:[%s2543_s0] sm:$0xff]  ;;  %vm372_vm1 = vcmask 1040384  }
  0x5a   : > { %1658 = vmatprep.subr.bf16.mxu0 %v1964_v0  ;;  %1776 = vmatprep.subr.bf16.mxu1 %v1964_v0  ;;  %vm417_vm2 = vcmask 1043456   ;;  %v2142_v2 = vld [vmem:[%s2543_s0 + $0x8] sm:$0xff]  ;;  %v373_v3 = vsel %vm372_vm1, %v2137_v1, 0.0  ;;  %v413_v4 = vrot.slane %v2137_v1, 1  ;;  %vm682_vm3 = vcmask 1042432   ;;  %v2151_v6 = vld [vmem:[%s2543_s0 + $0x38] sm:$0xff] }
  0x5b   : > { %1660 = vmatprep.mubr.msk.bf16.mxu0 %vm1965_vm0, %v1964_v0  ;;  %1680 = vmatprep.mubr.msk.bf16.mxu1 %vm1965_vm0, %v1964_v0  ;;  %v683_v5 = vrot.slane %v2137_v1, 5  ;;  %v684_v7 = vrot.slane %v2142_v2, 5  ;;  %v2157_v8 = vld [vmem:[%s2543_s0 + $0x40] sm:$0xff]  ;;  %v374_v9 = vsel %vm372_vm1, %v2151_v6, 0.0  ;;  %v414_v10 = vrot.slane %v2151_v6, 1  ;;  %v2166_v12 = vld [vmem:[%s2543_s0 + $0x10] sm:$0xff] }
  0x5c   : > { %v418_v11 = vsel %vm417_vm2, %v413_v4, 0.0  ;;  %v375_v13 = vadd.f32 %v374_v9, %v373_v3  ;;  %v686_v15 = vrot.slane %v2151_v6, 5  ;;  %v687_v16 = vrot.slane %v2157_v8, 5  ;;  %v2174_v17 = vld [vmem:[%s2543_s0 + $0x18] sm:$0xff]  ;;  %v2181_v20 = vld [vmem:[%s2543_s0 + $0x20] sm:$0xff]  ;;  %v2187_v25 = vld [vmem:[%s2543_s0 + $0x28] sm:$0xff] }
  0x5d   : > { %v685_v14 = vsel %vm682_vm3, %v683_v5, %v684_v7  ;;  %v419_v18 = vsel %vm417_vm2, %v414_v10, 0.0  ;;  %vm571_vm4 = vcmask 1041408   ;;  %v693_v19 = vsel %vm372_vm1, %v684_v7, 0.0  ;;  %v2195_v29 = vld [vmem:[%s2543_s0 + $0x30] sm:$0x3]  ;;  %v2205_v41 = vld [vmem:[%s2543_s0 + $0x48] sm:$0xff] }
  0x5e   : > { %v376_v21 = vrot.slane %v375_v13, 4  ;;  %v420_v22 = vadd.f32 %v419_v18, %v418_v11  ;;  %v688_v23 = vsel %vm682_vm3, %v686_v15, %v687_v16  ;;  %v694_v24 = vadd.f32 %v693_v19, %v685_v14  ;;  %v2211_v46 = vld [vmem:[%s2543_s0 + $0x50] sm:$0xff]  ;;  %v2220_v55 = vld [vmem:[%s2543_s0 + $0x58] sm:$0xff]  ;;  %v2225_v56 = vld [vmem:[%s2543_s0 + $0x60] sm:$0xff]  ;;  %p340_p5 = scmp.lt.s32.totalorder %s2018_s4, 1 }
  0x5f   : > { %v696_v26 = vsel %vm372_vm1, %v687_v16, 0.0  ;;  %v989_v27 = vrot.slane %v2142_v2, 6  ;;  %v990_v28 = vrot.slane %v2166_v12, 6  ;;  %v992_v33 = vrot.slane %v2174_v17, 6  ;;  %v2231_v61 = vld [vmem:[%s2543_s0 + $0x68] sm:$0x3] }
  0x60   : > { %v377_v30 = vadd.f32 %v376_v21, %v375_v13  ;;  %v421_v31 = vrot.slane %v420_v22, 4  ;;  %v695_v32 = vadd.f32 %v694_v24, %v688_v23  ;;  %v994_v37 = vrot.slane %v2181_v20, 6  ;;  %s2563_s4 = smov (!%p340_p5, %s2018_s4), 1 }
  0x61   : > { %v991_v38 = vsel %vm571_vm4, %v989_v27, %v990_v28  ;;  %v996_v39 = vrot.slane %v2187_v25, 6  ;;  %v998_v40 = vrot.slane %v2195_v29, 6  ;;  %v993_v45 = vsel %vm571_vm4, %v990_v28, %v992_v33  ;;  %s1778_s17 = smul.u32 56, %s2563_s4 }
  0x62   : > { %v378_v34 = vrot.slane %v377_v30, 2  ;;  %v422_v35 = vadd.f32 %v421_v31, %v420_v22  ;;  %v697_v36 = vadd.f32 %v696_v26, %v695_v32  ;;  %v995_v50 = vsel %vm571_vm4, %v992_v33, %v994_v37  ;;  %s1779_s12 = smul.u32 576, %s2563_s4 }
  0x63   : > { %v999_v51 = vsel %vm571_vm4, %v996_v39, %v998_v40  ;;  %v1000_v52 = vrot.slane %v2157_v8, 6  ;;  %v1001_v53 = vrot.slane %v2205_v41, 6  ;;  %v1021_v54 = vadd.f32 %v993_v45, %v991_v38  ;;  %s2282_s20 = scalar_lea.vmem %s2544_s1, %s1778_s17 }
  0x64   : > { %v379_v42 = vadd.f32 %v378_v34, %v377_v30  ;;  %v423_v43 = vrot.slane %v422_v35, 2  ;;  %v698_v44 = vrot.slane %v697_v36, 4  ;;  %v997_v60 = vsel %vm571_vm4, %v994_v37, %v996_v39  ;;  %s2345_s28 = scalar_lea.vmem %s2551_s8, %s1779_s12 }
  0x65   : > { %v1022_v62 = vadd.f32 %v1021_v54, %v995_v50  ;;  %v1024_v5 = vsel %vm417_vm2, %v999_v51, 0.0  ;;  %v1002_v7 = vsel %vm571_vm4, %v1000_v52, %v1001_v53  ;;  %v1003_v9 = vrot.slane %v2211_v46, 6 }
  0x66   : > { %v380_v47 = vrot.slane %v379_v42, 1  ;;  %v424_v48 = vadd.f32 %v423_v43, %v422_v35  ;;  %v699_v49 = vadd.f32 %v698_v44, %v697_v36  ;;  %v1005_v10 = vrot.slane %v2220_v55, 6 }
  0x67   : > { %v1023_v11 = vadd.f32 %v1022_v62, %v997_v60  ;;  %v1007_v16 = vrot.slane %v2225_v56, 6  ;;  %v1009_v19 = vrot.slane %v2231_v61, 6  ;;  %v1004_v28 = vsel %vm571_vm4, %v1001_v53, %v1003_v9 }
  0x68   : > { %v381_v57 = vadd.f32 %v380_v47, %v379_v42  ;;  %v425_v58 = vrot.slane %v424_v48, 1  ;;  %v700_v59 = vrot.slane %v699_v49, 2  ;;  %v1006_v37 = vsel %vm571_vm4, %v1003_v9, %v1005_v10 }
  0x69   : > { %v1025_v21 = vadd.f32 %v1024_v5, %v1023_v11  ;;  %v1010_v40 = vsel %vm571_vm4, %v1007_v16, %v1009_v19  ;;  %v1008_v51 = vsel %vm571_vm4, %v1005_v10, %v1007_v16  ;;  %vm543_vm5 = vcmask 31744  }
  0x6a   : > { %v2233_v63 = vmul.f32 0.5, %v381_v57  ;;  %v426_v3 = vadd.f32 %v425_v58, %v424_v48  ;;  %v701_v4 = vadd.f32 %v700_v59, %v699_v49  ;;  %v1030_v60 = vsel %vm417_vm2, %v1010_v40, 0.0 }
  0x6b   : > { %v1026_v30 = vadd.f32 %v1025_v21, %v1002_v7  ;;  %vm868_vm6 = vcmask 1044480   ;;  %vm840_vm7 = vcmask 72704   ;;  %vm1251_vm8 = vcmask 293888  }
  0x6c   : > { %v384_v13 = vsub.f32 %v2137_v1, %v2233_v63  ;;  %v385_v14 = vsub.f32 %v2151_v6, %v2233_v63  ;;  %v2243_v15 = vmul.f32 0.125, %v426_v3  ;;  %v702_v18 = vrot.slane %v701_v4, 1 }
  0x6d   : > { %v1027_v42 = vadd.f32 %v1026_v30, %v1004_v28 }
  0x6e   : > { %v386_v22 = vmul.f32 %v384_v13, %v384_v13  ;;  %v387_v23 = vmul.f32 %v385_v14, %v385_v14  ;;  %v429_v24 = vsub.f32 %v2137_v1, %v2243_v15  ;;  %v430_v26 = vsub.f32 %v2151_v6, %v2243_v15 }
  0x6f   : > { %v703_v27 = vadd.f32 %v702_v18, %v701_v4  ;;  %v1028_v59 = vadd.f32 %v1027_v42, %v1006_v37 }
  0x70   : > { %v388_v31 = vsel %vm372_vm1, %v386_v22, 0.0  ;;  %v389_v32 = vsel %vm372_vm1, %v387_v23, 0.0  ;;  %v431_v33 = vmul.f32 %v429_v24, %v429_v24  ;;  %v432_v34 = vmul.f32 %v430_v26, %v430_v26 }
  0x71   : > { %v390_v35 = vadd.f32 %v389_v32, %v388_v31  ;;  %v2254_v36 = vmul.f32 0.055555556, %v703_v27  ;;  %v1029_v9 = vadd.f32 %v1028_v59, %v1008_v51 }
  0x72   : > { %v435_v38 = vrot.slane %v431_v33, 1  ;;  %v436_v39 = vrot.slane %v432_v34, 1 }
  0x73   : > { %v391_v43 = vrot.slane %v390_v35, 4  ;;  %v706_v44 = vsub.f32 %v2137_v1, %v2254_v36  ;;  %v707_v45 = vsub.f32 %v2142_v2, %v2254_v36  ;;  %v708_v47 = vsub.f32 %v2151_v6, %v2254_v36 }
  0x74   : > { %v439_v48 = vsel %vm417_vm2, %v435_v38, 0.0  ;;  %v440_v49 = vsel %vm417_vm2, %v436_v39, 0.0  ;;  %v709_v50 = vsub.f32 %v2157_v8, %v2254_v36  ;;  %v1031_v21 = vadd.f32 %v1030_v60, %v1029_v9 }
  0x75   : > { %v392_v52 = vadd.f32 %v391_v43, %v390_v35  ;;  %v441_v53 = vadd.f32 %v440_v49, %v439_v48  ;;  %v710_v54 = vmul.f32 %v706_v44, %v706_v44  ;;  %v711_v1 = vmul.f32 %v707_v45, %v707_v45  ;;  %v2285_v49 = vld [vmem:[%s2282_s20] sm:$0xff] }
  0x76   : > { %v712_v57 = vmul.f32 %v708_v47, %v708_v47  ;;  %v713_v58 = vmul.f32 %v709_v50, %v709_v50  ;;  %v1032_v26 = vrot.slane %v1031_v21, 4  ;;  %v407_v50 = vlaneseq }
  0x77   : > { %v393_v6 = vrot.slane %v392_v52, 2  ;;  %v442_v62 = vrot.slane %v441_v53, 4  ;;  %v718_v3 = vrot.slane %v710_v54, 5  ;;  %v719_v4 = vrot.slane %v711_v1, 5 }
  0x78   : > { %v721_v5 = vrot.slane %v712_v57, 5  ;;  %v722_v7 = vrot.slane %v713_v58, 5  ;;  %v1033_v31 = vadd.f32 %v1032_v26, %v1031_v21 }
  0x79   : > { %v394_v10 = vadd.f32 %v393_v6, %v392_v52  ;;  %v443_v11 = vadd.f32 %v442_v62, %v441_v53  ;;  %v720_v13 = vsel %vm682_vm3, %v718_v3, %v719_v4  ;;  %v728_v14 = vsel %vm372_vm1, %v719_v4, 0.0 }
  0x7a   : > { %v723_v16 = vsel %vm682_vm3, %v721_v5, %v722_v7  ;;  %v729_v18 = vadd.f32 %v728_v14, %v720_v13  ;;  %v731_v19 = vsel %vm372_vm1, %v722_v7, 0.0  ;;  %v1034_v35 = vrot.slane %v1033_v31, 2 }
  0x7b   : > { %v395_v22 = vrot.slane %v394_v10, 1  ;;  %v444_v23 = vrot.slane %v443_v11, 2  ;;  %v398_v53 = vsub.f32 %v2285_v49, %v2233_v63  ;;  %v408_v63 = vshrl.u32 %v407_v50, 7 }
  0x7c   : > { %v730_v24 = vadd.f32 %v729_v18, %v723_v16  ;;  %v1035_v40 = vadd.f32 %v1034_v35, %v1033_v31 }
  0x7d   : > { %v396_v27 = vadd.f32 %v395_v22, %v394_v10  ;;  %v445_v28 = vadd.f32 %v444_v23, %v443_v11  ;;  %v409_v14 = vsub.s32 0, %v408_v63 }
  0x7e   : > { %v732_v30 = vadd.f32 %v731_v19, %v730_v24  ;;  %v1036_v44 = vrot.slane %v1035_v40, 1  ;;  %v1559_v19 = vld [vmem:[%s2545_s2 + $0x1] ss:$0 sm:$0xff] }
  0x7f   : > { %v397_v32 = vmul.f32 0.5, %v396_v27  ;;  %v446_v33 = vrot.slane %v445_v28, 1 }
  0x80   : > { %v733_v34 = vrot.slane %v732_v30, 4  ;;  %v1037_v48 = vadd.f32 %v1036_v44, %v1035_v40 }
  0x81   : > { %v399_v37 = vadd.f32 1e-05, %v397_v32  ;;  %v447_v38 = vadd.f32 %v446_v33, %v445_v28  ;;  %v2325_v28 = vld [vmem:[%s2282_s20 + $0x8] sm:$0xff] }
  0x82   : > { %v734_v39 = vadd.f32 %v733_v34, %v732_v30  ;;  %v2287_v52 = vmul.f32 0.013888889, %v1037_v48 }
  0x83   : > { %1851 = vrsqrt.f32 %v399_v37  ;;  %v448_v42 = vmul.f32 0.125, %v447_v38  ;;  %v740_v37 = vsub.f32 %v2285_v49, %v2254_v36 }
  0x84   : > { %v735_v43 = vrot.slane %v734_v39, 2  ;;  %v1040_v1 = vsub.f32 %v2142_v2, %v2287_v52  ;;  %v1041_v57 = vsub.f32 %v2166_v12, %v2287_v52  ;;  %v1042_v58 = vsub.f32 %v2174_v17, %v2287_v52  ;;  %v402_v2 = vld [vmem:[%s2545_s2] sm:$0x1] }
  0x85   : > { %v450_v45 = vadd.f32 1e-05, %v448_v42  ;;  %v1043_v59 = vsub.f32 %v2181_v20, %v2287_v52  ;;  %v1044_v60 = vsub.f32 %v2187_v25, %v2287_v52  ;;  %v1045_v6 = vsub.f32 %v2195_v29, %v2287_v52  ;;  %v404_v25 = vld [vmem:[%s2546_s3] sm:$0x1] }
  0x86   : > { %v736_v47 = vadd.f32 %v735_v43, %v734_v39  ;;  %v449_v12 = vsub.f32 %v2285_v49, %v2243_v15  ;;  %v1052_v17 = vmul.f32 %v1040_v1, %v1040_v1  ;;  %v1053_v4 = vmul.f32 %v1041_v57, %v1041_v57 }
  0x87   : > { %1853 = vrsqrt.f32 %v450_v45  ;;  %v1054_v7 = vmul.f32 %v1042_v58, %v1042_v58  ;;  %v1055_v9 = vmul.f32 %v1043_v59, %v1043_v59  ;;  %v1046_v29 = vsub.f32 %v2157_v8, %v2287_v52 }
  0x88   : > { %v737_v51 = vrot.slane %v736_v47, 1  ;;  %v1047_v10 = vsub.f32 %v2205_v41, %v2287_v52  ;;  %v1056_v11 = vmul.f32 %v1044_v60, %v1044_v60  ;;  %v1057_v13 = vmul.f32 %v1045_v6, %v1045_v6  ;;  %v1581_v60 = vld [vmem:[%s2545_s2 + $0x2] ss:$0 sm:$0xff] }
  0x89   : > { %v1048_v16 = vsub.f32 %v2211_v46, %v2287_v52  ;;  %v1049_v8 = vsub.f32 %v2220_v55, %v2287_v52  ;;  %v1050_v41 = vsub.f32 %v2225_v56, %v2287_v52  ;;  %v1076_v21 = vrot.slane %v1052_v17, 6  ;;  %v1561_v46 = vld [vmem:[%s2546_s3 + $0x1] ss:$0 sm:$0xff] }
  0x8a   : > { %v738_v54 = vadd.f32 %v737_v51, %v736_v47  ;;  %v1077_v22 = vrot.slane %v1053_v4, 6  ;;  %v1079_v26 = vrot.slane %v1054_v7, 6  ;;  %v1081_v27 = vrot.slane %v1055_v9, 6 }
  0x8b   : > { %v1058_v30 = vmul.f32 %v1046_v29, %v1046_v29  ;;  %v2331_v31 = vmul.f32 %v1047_v10, %v1047_v10  ;;  %v1083_v55 = vrot.slane %v1056_v11, 6  ;;  %v1085_v32 = vrot.slane %v1057_v13, 6 }
  0x8c   : > { %v739_v62 = vmul.f32 0.055555556, %v738_v54  ;;  %v1078_v34 = vsel %vm571_vm4, %v1076_v21, %v1077_v22  ;;  %v1080_v35 = vsel %vm571_vm4, %v1077_v22, %v1079_v26  ;;  %v1051_v38 = vsub.f32 %v2231_v61, %v2287_v52 }
  0x8d   : > { %v1852_v3 = vpop.eup %1851  ;;  %v741_v39 = vsub.f32 %v2325_v28, %v2254_v36  ;;  %v1060_v43 = vmul.f32 %v1048_v16, %v1048_v16  ;;  %v1082_v44 = vsel %vm571_vm4, %v1079_v26, %v1081_v27  ;;  %v1061_v61 = vmul.f32 %v1049_v8, %v1049_v8 }
  0x8e   : > { %v401_v5 = vmul.f32 %v1852_v3, %v398_v53  ;;  %v742_v20 = vadd.f32 1e-05, %v739_v62  ;;  %v1062_v36 = vmul.f32 %v1050_v41, %v1050_v41  ;;  %v1086_v45 = vsel %vm571_vm4, %v1083_v55, %v1085_v32 }
  0x8f   : > { %v1108_v47 = vadd.f32 %v1080_v35, %v1078_v34  ;;  %v1084_v49 = vsel %vm571_vm4, %v1081_v27, %v1083_v55  ;;  %v1087_v50 = vrot.slane %v1058_v30, 6  ;;  %v1088_v51 = vrot.slane %v2331_v31, 6 }
  0x90   : > { %v403_v15 = vmul.f32 %v402_v2, %v401_v5  ;;  %1855 = vrsqrt.f32 %v742_v20  ;;  %v1063_v53 = vmul.f32 %v1051_v38, %v1051_v38  ;;  %v1090_v58 = vrot.slane %v1060_v43, 6  ;;  %v1583_v5 = vld [vmem:[%s2546_s3 + $0x2] ss:$0 sm:$0xff] }
  0x91   : > { %v1854_v18 = vpop.eup %1853  ;;  %v1109_v54 = vadd.f32 %v1108_v47, %v1082_v44  ;;  %v1111_v59 = vsel %vm417_vm2, %v1086_v45, 0.0  ;;  %v1092_v63 = vrot.slane %v1061_v61, 6  ;;  %v1089_v17 = vsel %vm571_vm4, %v1087_v50, %v1088_v51  ;;  %v1827_v47 = vld [vmem:[#allocation2 + $0x10] sm:$0xff]  }
  0x92   : > { %v405_v23 = vadd.f32 %v404_v25, %v403_v15  ;;  %v452_v24 = vmul.f32 %v1854_v18, %v449_v12  ;;  %v1094_v4 = vrot.slane %v1062_v36, 6  ;;  %v1096_v20 = vrot.slane %v1063_v53, 6  ;;  %v1829_v53 = vld [vmem:[#allocation2 + $0x18] sm:$0xff]  }
  0x93   : > { %v1110_v62 = vadd.f32 %v1109_v54, %v1084_v49  ;;  %v1091_v10 = vsel %vm571_vm4, %v1088_v51, %v1090_v58  ;;  %v1093_v16 = vsel %vm571_vm4, %v1090_v58, %v1092_v63  ;;  %v1966_v31 = vmov 65535   ;;  %v1832_v54 = vld [vmem:[#allocation2 + $0x40] sm:$0xff]  }
  0x94   : > { %v406_v33 = vmax.f32 %v405_v23, 0.0  ;;  %v461_v56 = vmul.f32 %v1559_v19, %v452_v24  ;;  %v1097_v18 = vsel %vm571_vm4, %v1094_v4, %v1096_v20  ;;  %v1095_v22 = vsel %vm571_vm4, %v1092_v63, %v1094_v4  ;;  %v1824_v23 = vld [vmem:[#allocation2] sm:$0xff]   ;;  %v1826_v24 = vld [vmem:[#allocation2 + $0x28] sm:$0xff]  }
  0x95   : > { %v1112_v7 = vadd.f32 %v1111_v59, %v1110_v62  ;;  %v869_v55 = vsel %vm417_vm2, 4294967295, %v1966_v31  ;;  %v369_v58 = vld [vmem:[%s2282_s20 + $0x20] sm:$0xff]  ;;  %v370_v59 = vld [vmem:[%s2282_s20 + $0x28] sm:$0xff] }
  0x96   : > { %v410_v40 = vrot.slane %v406_v33, %v409_v14  ;;  %v470_v42 = vadd.f32 %v1561_v46, %v461_v56  ;;  %v1117_v46 = vsel %vm417_vm2, %v1097_v18, 0.0  ;;  %v1833_v20 = vld [vmem:[#allocation4] sm:$0xff]  }
  0x97   : > { %v1113_v11 = vadd.f32 %v1112_v7, %v1089_v17  ;;  %v1831_v17 = vld [vmem:[#allocation2 + $0x20] sm:$0xff]  }
  0x98   : > { %v471_v48 = vmax.f32 %v470_v42, 0.0  ;;  %1387 = vst [vmem:[%s2345_s28] sm:$0xff] %v410_v40  ;;  %1391 = vst [vmem:[%s2345_s28 + $0x20] sm:$0xff] %v410_v40  ;;  %v1828_v42 = vld [vmem:[#allocation2 + $0x30] sm:$0xff]  }
  0x99   : > { %1395 = vst [vmem:[%s2345_s28 + $0x40] sm:$0xff] %v410_v40  ;;  %1399 = vst [vmem:[%s2345_s28 + $0x60] sm:$0xff] %v410_v40  ;;  %v1114_v19 = vadd.f32 %v1113_v11, %v1091_v10 }
  0x9a   : > { %1403 = vst [vmem:[%s2345_s28 + $0x80] sm:$0xff] %v410_v40  ;;  %1407 = vst [vmem:[%s2345_s28 + $0xa0] sm:$0xff] %v410_v40  ;;  %v1856_v1 = vpop.eup %1855  ;;  %v490_v57 = vpack.c.bf16 %v471_v48, %v471_v48  ;;  %v1830_v48 = vld [vmem:[#allocation2 + $0x38] sm:$0xff]  }
  0x9b   : > { %1411 = vst [vmem:[%s2345_s28 + $0xc0] sm:$0xff] %v410_v40  ;;  %1415 = vst [vmem:[%s2345_s28 + $0xe0] sm:$0xff] %v410_v40  ;;  %v744_v6 = vmul.f32 %v1856_v1, %v740_v37  ;;  %v745_v3 = vmul.f32 %v1856_v1, %v741_v39  ;;  %v1115_v26 = vadd.f32 %v1114_v19, %v1093_v16  ;;  %v870_v37 = vsel %vm868_vm6, %v869_v55, 0  ;;  %v367_v1 = vld [vmem:[%s2282_s20 + $0x10] sm:$0xff] }
  0x9c   : > { %1419 = vst [vmem:[%s2345_s28 + $0x100] sm:$0xff] %v410_v40  ;;  %1423 = vst [vmem:[%s2345_s28 + $0x120] sm:$0xff] %v410_v40  ;;  %v537_v2 = vshrl.u32 %v490_v57, 16  ;;  %v539_v12 = vshll.u32 %v490_v57, 16  ;;  %v368_v57 = vld [vmem:[%s2282_s20 + $0x18] sm:$0xff]  ;;  %v1127_v63 = vsub.f32 %v367_v1, %v2287_v52  ;;  %v1835_v55 = vld [vmem:[#allocation4 + $0x8] sm:$0xff]  }
  0x9d   : > { %1427 = vst [vmem:[%s2345_s28 + $0x140] sm:$0xff] %v410_v40  ;;  %1431 = vst [vmem:[%s2345_s28 + $0x160] sm:$0xff] %v410_v40  ;;  %v754_v9 = vmul.f32 %v1581_v60, %v744_v6  ;;  %v755_v25 = vmul.f32 %v1581_v60, %v745_v3  ;;  %v1116_v30 = vadd.f32 %v1115_v26, %v1095_v22  ;;  %v371_v60 = vld [vmem:[%s2282_s20 + $0x30] sm:$0x3]  ;;  %v1846_v1 = vld [vmem:[#allocation6 + $0x30] sm:$0xff]  }
  0x9e   : > { %1435 = vst [vmem:[%s2345_s28 + $0x180] sm:$0xff] %v410_v40  ;;  %1439 = vst [vmem:[%s2345_s28 + $0x1a0] sm:$0xff] %v410_v40  ;;  %v541_v29 = vrot.slane %v539_v12, 1  ;;  %v1126_v6 = vsub.f32 %v2325_v28, %v2287_v52  ;;  %v1128_v62 = vsub.f32 %v368_v57, %v2287_v52  ;;  %v1129_v3 = vsub.f32 %v369_v58, %v2287_v52  ;;  %v1848_v57 = vld [vmem:[#allocation6 + $0x38] sm:$0xff]   ;;  %v1850_v58 = vld [vmem:[#allocation6 + $0x40] sm:$0xff]  }
  0x9f   : > { %1443 = vst [vmem:[%s2345_s28 + $0x1c0] sm:$0xff] %v410_v40  ;;  %1447 = vst [vmem:[%s2345_s28 + $0x1e0] sm:$0xff] %v410_v40  ;;  %v764_v13 = vadd.f32 %v1583_v5, %v754_v9  ;;  %v765_v15 = vadd.f32 %v1583_v5, %v755_v25  ;;  %v1118_v56 = vadd.f32 %v1117_v46, %v1116_v30  ;;  %v1603_v5 = vld [vmem:[%s2545_s2 + $0x3] ss:$0 sm:$0xff] }
  0xa0   : > { %1451 = vst [vmem:[%s2345_s28 + $0x200] sm:$0xff] %v410_v40  ;;  %1455 = vst [vmem:[%s2345_s28 + $0x220] sm:$0xff] %v410_v40  ;;  %v542_v14 = vor.u32 %v541_v29, %v537_v2  ;;  %v1825_v40 = vld [vmem:[#allocation2 + $0x8] sm:$0xff]   ;;  %v1130_v2 = vsub.f32 %v370_v59, %v2287_v52  ;;  %v1131_v12 = vsub.f32 %v371_v60, %v2287_v52  ;;  %v1605_v29 = vld [vmem:[%s2546_s3 + $0x3] ss:$0 sm:$0xff] }
  0xa1   : > { %v766_v8 = vmax.f32 %v764_v13, 0.0  ;;  %v767_v41 = vmax.f32 %v765_v15, 0.0  ;;  %v1119_v38 = vrot.slane %v1118_v56, 4 }
  0xa2   : > { %v573_v21 = vsel %vm571_vm4, %v542_v14, 0 }
  0xa3   : > { %1659 = vmatpush3.bf16.msra.mxu0 %v573_v21  ;;  %1777 = vmatpush3.bf16.msra.mxu1 %v573_v21  ;;  %v786_v27 = vpack.c.bf16 %v767_v41, %v766_v8  ;;  %v1120_v43 = vadd.f32 %v1119_v38, %v1118_v56 }
  0xa4   : > { %1734 = vmatprep.subr.bf16.mxu0 %v1964_v0  ;;  %1696 = vmatprep.subr.bf16.mxu1 %v1964_v0 }
  0xa5   : > { %v833_v32 = vshrl.u32 %v786_v27, 16  ;;  %v836_v33 = vshll.u32 %v786_v27, 16  ;;  %v1121_v61 = vrot.slane %v1120_v43, 2 }
  0xa6   : > { %1661 = vmatmul.mubr.msk.bf16.vlgmr.msra.gmra.mrb[0].mxu0 %vm543_vm5, %v1824_v23  ;;  %1681 = vmatmul.mubr.msk.bf16.vlgmr.msra.gmra.mrb[0].mxu1 %vm543_vm5, %v1826_v24 }
  0xa7   : > { %1664 = vmatprep.mubr.msk.bf16.mxu0 %vm1965_vm0, %v1964_v0  ;;  %v835_v34 = vrot.slane %v833_v32, 2  ;;  %v838_v35 = vrot.slane %v836_v33, 3  ;;  %1684 = vmatprep.mubr.msk.bf16.mxu1 %vm1965_vm0, %v1964_v0  ;;  %v1122_v36 = vadd.f32 %v1121_v61, %v1120_v43  ;;  %v1834_v43 = vld [vmem:[#allocation6] sm:$0xff]   ;;  %v1836_v61 = vld [vmem:[#allocation6 + $0x8] sm:$0xff]  }
  0xa9   : > { %v839_v39 = vor.u32 %v838_v35, %v835_v34  ;;  %v1123_v45 = vrot.slane %v1122_v36, 1 }
  0xab   : > { %v872_v44 = vand.u32 %v870_v37, %v839_v39  ;;  %v1124_v49 = vadd.f32 %v1123_v45, %v1122_v36  ;;  %v1841_v36 = vld [vmem:[#allocation4 + $0x20] sm:$0xff]   ;;  %v1838_v45 = vld [vmem:[#allocation6 + $0x10] sm:$0xff]  }
  0xad   : > { %1697 = vmatpush3.bf16.msra.mxu1 %v872_v44  ;;  %v1125_v50 = vmul.f32 0.013888889, %v1124_v49  ;;  %v1839_v44 = vld [vmem:[#allocation4 + $0x18] sm:$0xff]   ;;  %v1845_v49 = vld [vmem:[#allocation4 + $0x30] sm:$0xff]  }
  0xae   : > { %1665 = vmatmul.mubr.msk.bf16.gmra.mrb[4].mxu0 %vm543_vm5, %v1825_v40  ;;  %1685 = vmatmul.mubr.msk.bf16.gmra.mrb[4].mxu1 %vm543_vm5, %v1828_v42  ;;  %v1837_v40 = vld [vmem:[#allocation4 + $0x10] sm:$0xff]  }
  0xaf   : > { %1668 = vmatprep.mubr.msk.bf16.mxu0 %vm1965_vm0, %v1964_v0  ;;  %1688 = vmatprep.mubr.msk.bf16.mxu1 %vm1965_vm0, %v1964_v0  ;;  %v1132_v51 = vadd.f32 1e-05, %v1125_v50  ;;  %v1842_v50 = vld [vmem:[#allocation6 + $0x20] sm:$0xff]  }
  0xb1   : > { %1857 = vrsqrt.f32 %v1132_v51  ;;  %v1847_v51 = vld [vmem:[#allocation4 + $0x38] sm:$0xff]  }
  0xb6   : > { %1669 = vmatmul.mubr.msk.bf16.gmra.mrb[8].mxu0 %vm543_vm5, %v1827_v47  ;;  %1689 = vmatmul.mubr.msk.bf16.gmra.mrb[8].mxu1 %vm543_vm5, %v1830_v48  ;;  %v1843_v47 = vld [vmem:[#allocation4 + $0x28] sm:$0xff]   ;;  %v1840_v48 = vld [vmem:[#allocation6 + $0x18] sm:$0xff]  }
  0xb7   : > { %1672 = vmatprep.mubr.msk.bf16.mxu0 %vm1965_vm0, %v1964_v0  ;;  %1692 = vmatprep.mubr.msk.bf16.mxu1 %vm1965_vm0, %v1964_v0 }
  0xbb   : > { %v1858_v4 = vpop.eup %1857 }
  0xbc   : > { %v1134_v7 = vmul.f32 %v1858_v4, %v1126_v6  ;;  %v1135_v28 = vmul.f32 %v1858_v4, %v1127_v63  ;;  %v1136_v9 = vmul.f32 %v1858_v4, %v1128_v62  ;;  %v1137_v25 = vmul.f32 %v1858_v4, %v1129_v3 }
  0xbd   : > { %v1138_v10 = vmul.f32 %v1858_v4, %v1130_v2  ;;  %v1139_v11 = vmul.f32 %v1858_v4, %v1131_v12 }
  0xbe   : > { %1673 = vmatmul.mubr.msk.bf16.gmra.mrb[12].mxu0 %vm543_vm5, %v1829_v53  ;;  %1693 = vmatmul.mubr.msk.bf16.gmra.mrb[12].mxu1 %vm543_vm5, %v1832_v54  ;;  %v1148_v13 = vmul.f32 %v1603_v5, %v1134_v7  ;;  %v1149_v52 = vmul.f32 %v1603_v5, %v1135_v28  ;;  %v1150_v15 = vmul.f32 %v1603_v5, %v1136_v9  ;;  %v1844_v53 = vld [vmem:[#allocation6 + $0x28] sm:$0xff]   ;;  %v1849_v54 = vld [vmem:[#allocation4 + $0x40] sm:$0xff]  }
  0xbf   : > { %1676 = vmatprep.mubr.msk.bf16.mxu0 %vm1965_vm0, %v1964_v0  ;;  %1698 = vmatprep.mubr.msk.bf16.mxu1 %vm1965_vm0, %v1964_v0  ;;  %v1151_v14 = vmul.f32 %v1603_v5, %v1137_v25  ;;  %v1152_v16 = vmul.f32 %v1603_v5, %v1138_v10  ;;  %v1153_v18 = vmul.f32 %v1603_v5, %v1139_v11 }
  0xc0   : > { %v1162_v19 = vadd.f32 %v1605_v29, %v1148_v13  ;;  %v1163_v8 = vadd.f32 %v1605_v29, %v1149_v52  ;;  %v1164_v41 = vadd.f32 %v1605_v29, %v1150_v15 }
  0xc1   : > { %v1165_v21 = vadd.f32 %v1605_v29, %v1151_v14  ;;  %v1166_v22 = vadd.f32 %v1605_v29, %v1152_v16  ;;  %v1167_v23 = vadd.f32 %v1605_v29, %v1153_v18 }
  0xc2   : > { %v1168_v24 = vmax.f32 %v1162_v19, 0.0  ;;  %v1169_v26 = vmax.f32 %v1163_v8, 0.0  ;;  %v1170_v27 = vmax.f32 %v1164_v41, 0.0 }
  0xc3   : > { %v1171_v46 = vmax.f32 %v1165_v21, 0.0  ;;  %v1172_v30 = vmax.f32 %v1166_v22, 0.0  ;;  %v1173_v31 = vmax.f32 %v1167_v23, 0.0 }
  0xc4   : > { %v1192_v32 = vpack.c.bf16 %v1169_v26, %v1168_v24 }
  0xc5   : > { %v1193_v33 = vpack.c.bf16 %v1171_v46, %v1170_v27  ;;  %v1194_v56 = vpack.c.bf16 %v1173_v31, %v1172_v30 }
  0xc6   : > { %1677 = vmatmul.mubr.msk.bf16.gmra.mrb[16].mxu0 %vm543_vm5, %v1831_v17  ;;  %1699 = vmatmul.mubr.msk.bf16.vlgmr.msra.gmra.mrb[16].mxu1 %vm840_vm7, %v1833_v20  ;;  %v1244_v34 = vrot.slane %v1192_v32, 3 }
  0xc7   : > { %1740 = vmatprep.mubr.msk.bf16.mxu0 %vm1965_vm0, %v1964_v0  ;;  %1702 = vmatprep.mubr.msk.bf16.mxu1 %vm1965_vm0, %v1964_v0  ;;  %v1245_v35 = vrot.slane %v1193_v33, 3  ;;  %v1247_v37 = vrot.slane %v1194_v56, 3 }
  0xc9   : > { %v1246_v38 = vsel %vm868_vm6, %v1244_v34, %v1245_v35  ;;  %v1248_v39 = vsel %vm868_vm6, %v1245_v35, %v1247_v37  ;;  %v1280_v42 = vsel %vm571_vm4, %v1247_v37, 0 }
  0xca   : > { %1735 = vmatpush3.bf16.msra.mxu0 %v1246_v38 }
  0xcb   : > { %1736 = vmatprep.subr.bf16.mxu0 %v1964_v0 }
  0xce   : > { %1703 = vmatmul.mubr.msk.bf16.gmra.mrb[20].mxu1 %vm840_vm7, %v1835_v55  ;;  %1737 = vmatpush3.bf16.msra.mxu0 %v1248_v39 }
  0xcf   : > { %1706 = vmatprep.mubr.msk.bf16.mxu1 %vm1965_vm0, %v1964_v0  ;;  %1738 = vmatprep.subr.bf16.mxu0 %v1964_v0 }
  0xd2   : > { %1739 = vmatpush3.bf16.msra.mxu0 %v1280_v42 }
  0xd5   : > { %1741 = vmatmul.mubr.msk.bf16.vlgmr.msra.gmra.mrb[20].mxu0 %vm1251_vm8, %v1834_v43 }
  0xd6   : > { %1707 = vmatmul.mubr.msk.bf16.gmra.mrb[24].mxu1 %vm840_vm7, %v1837_v40  ;;  %1744 = vmatprep.mubr.msk.bf16.mxu0 %vm1965_vm0, %v1964_v0 }
  0xd7   : > { %1710 = vmatprep.mubr.msk.bf16.mxu1 %vm1965_vm0, %v1964_v0 }
  0xdd   : > { %1745 = vmatmul.mubr.msk.bf16.gmra.mrb[24].mxu0 %vm1251_vm8, %v1836_v61 }
  0xde   : > { %1711 = vmatmul.mubr.msk.bf16.gmra.mrb[28].mxu1 %vm840_vm7, %v1839_v44  ;;  %1748 = vmatprep.mubr.msk.bf16.mxu0 %vm1965_vm0, %v1964_v0 }
  0xdf   : > { %1714 = vmatprep.mubr.msk.bf16.mxu1 %vm1965_vm0, %v1964_v0 }
  0xe5   : > { %1749 = vmatmul.mubr.msk.bf16.gmra.mrb[28].mxu0 %vm1251_vm8, %v1838_v45 }
  0xe6   : > { %1715 = vmatmul.mubr.msk.bf16.gmra.mrb[32].mxu1 %vm840_vm7, %v1841_v36  ;;  %1752 = vmatprep.mubr.msk.bf16.mxu0 %vm1965_vm0, %v1964_v0 }
  0xe7   : > { %1718 = vmatprep.mubr.msk.bf16.mxu1 %vm1965_vm0, %v1964_v0 }
  0xed   : > { %1753 = vmatmul.mubr.msk.bf16.gmra.mrb[32].mxu0 %vm1251_vm8, %v1840_v48 }
  0xee   : > { %1719 = vmatmul.mubr.msk.bf16.gmra.mrb[36].mxu1 %vm840_vm7, %v1843_v47  ;;  %1756 = vmatprep.mubr.msk.bf16.mxu0 %vm1965_vm0, %v1964_v0 }
  0xef   : > { %1722 = vmatprep.mubr.msk.bf16.mxu1 %vm1965_vm0, %v1964_v0 }
  0xf5   : > { %1757 = vmatmul.mubr.msk.bf16.gmra.mrb[36].mxu0 %vm1251_vm8, %v1842_v50 }
  0xf6   : > { %1723 = vmatmul.mubr.msk.bf16.gmra.mrb[40].mxu1 %vm840_vm7, %v1845_v49  ;;  %1760 = vmatprep.mubr.msk.bf16.mxu0 %vm1965_vm0, %v1964_v0 }
  0xf7   : > { %1726 = vmatprep.mubr.msk.bf16.mxu1 %vm1965_vm0, %v1964_v0 }
  0xfd   : > { %1761 = vmatmul.mubr.msk.bf16.gmra.mrb[40].mxu0 %vm1251_vm8, %v1844_v53 }
  0xfe   : > { %1727 = vmatmul.mubr.msk.bf16.gmra.mrb[44].mxu1 %vm840_vm7, %v1847_v51  ;;  %1764 = vmatprep.mubr.msk.bf16.mxu0 %vm1965_vm0, %v1964_v0 }
  0xff   : > { %1730 = vmatprep.mubr.msk.bf16.mxu1 %vm1965_vm0, %v1964_v0 }
 0x105   : > { %1765 = vmatmul.mubr.msk.bf16.gmra.mrb[44].mxu0 %vm1251_vm8, %v1846_v1 }
 0x106   : > { %1731 = vmatmul.mubr.msk.bf16.gmra.mrb[48].mxu1 %vm840_vm7, %v1849_v54  ;;  %1768 = vmatprep.mubr.msk.bf16.mxu0 %vm1965_vm0, %v1964_v0 }
 0x10d   : > { %1769 = vmatmul.mubr.msk.bf16.gmra.mrb[48].mxu0 %vm1251_vm8, %v1848_v57 }
 0x10e   : > { %1772 = vmatprep.mubr.msk.bf16.mxu0 %vm1965_vm0, %v1964_v0 }
 0x115   : > { %1773 = vmatmul.mubr.msk.bf16.gmra.mrb[52].mxu0 %vm1251_vm8, %v1850_v58 }
 0x179   : > { %v609_v59 = vpop.f32.mrb[0].mxu0  ;;  %v649_v60 = vpop.f32.mrb[0].mxu1 }
 0x17a   : > { %1388 = vst [vmem:[%s2345_s28 + $0x8] sm:$0xff] %v609_v59  ;;  %v1662_v6 = vpop.f32.mrb[1].mxu0  ;;  %1428 = vst [vmem:[%s2345_s28 + $0x148] sm:$0xff] %v649_v60  ;;  %v1682_v63 = vpop.f32.mrb[1].mxu1 }
 0x17b   : > { %v612_v62 = vpop.f32.mrb[2].mxu0  ;;  %v652_v3 = vpop.f32.mrb[2].mxu1 }
 0x17c   : > { %1392 = vst [vmem:[%s2345_s28 + $0x28] sm:$0xff] %v612_v62  ;;  %v1663_v2 = vpop.f32.mrb[3].mxu0  ;;  %1432 = vst [vmem:[%s2345_s28 + $0x168] sm:$0xff] %v652_v3  ;;  %v1683_v0 = vpop.f32.mrb[3].mxu1 }
 0x181   : > { %v617_v12 = vpop.f32.mrb[4].mxu0  ;;  %v657_v17 = vpop.f32.mrb[4].mxu1 }
 0x182   : > { %1396 = vst [vmem:[%s2345_s28 + $0x48] sm:$0xff] %v617_v12  ;;  %v1666_v4 = vpop.f32.mrb[5].mxu0  ;;  %1436 = vst [vmem:[%s2345_s28 + $0x188] sm:$0xff] %v657_v17  ;;  %v1686_v5 = vpop.f32.mrb[5].mxu1 }
 0x183   : > { %v620_v20 = vpop.f32.mrb[6].mxu0  ;;  %v660_v7 = vpop.f32.mrb[6].mxu1 }
 0x184   : > { %1400 = vst [vmem:[%s2345_s28 + $0x68] sm:$0xff] %v620_v20  ;;  %v1667_v28 = vpop.f32.mrb[7].mxu0  ;;  %1440 = vst [vmem:[%s2345_s28 + $0x1a8] sm:$0xff] %v660_v7  ;;  %v1687_v9 = vpop.f32.mrb[7].mxu1 }
 0x189   : > { %v625_v25 = vpop.f32.mrb[8].mxu0  ;;  %v665_v29 = vpop.f32.mrb[8].mxu1 }
 0x18a   : > { %1404 = vst [vmem:[%s2345_s28 + $0x88] sm:$0xff] %v625_v25  ;;  %v1670_v10 = vpop.f32.mrb[9].mxu0  ;;  %1444 = vst [vmem:[%s2345_s28 + $0x1c8] sm:$0xff] %v665_v29  ;;  %v1690_v11 = vpop.f32.mrb[9].mxu1 }
 0x18b   : > { %v628_v13 = vpop.f32.mrb[10].mxu0  ;;  %v668_v52 = vpop.f32.mrb[10].mxu1 }
 0x18c   : > { %1408 = vst [vmem:[%s2345_s28 + $0xa8] sm:$0xff] %v628_v13  ;;  %v1671_v15 = vpop.f32.mrb[11].mxu0  ;;  %1448 = vst [vmem:[%s2345_s28 + $0x1e8] sm:$0xff] %v668_v52  ;;  %v1691_v14 = vpop.f32.mrb[11].mxu1 }
 0x191   : > { %v633_v16 = vpop.f32.mrb[12].mxu0  ;;  %v673_v18 = vpop.f32.mrb[12].mxu1 }
 0x192   : > { %1412 = vst [vmem:[%s2345_s28 + $0xc8] sm:$0xff] %v633_v16  ;;  %v1674_v19 = vpop.f32.mrb[13].mxu0  ;;  %1452 = vst [vmem:[%s2345_s28 + $0x208] sm:$0xff] %v673_v18  ;;  %v1694_v8 = vpop.f32.mrb[13].mxu1 }
 0x193   : > { %v636_v41 = vpop.f32.mrb[14].mxu0  ;;  %v676_v21 = vpop.f32.mrb[14].mxu1 }
 0x194   : > { %1416 = vst [vmem:[%s2345_s28 + $0xe8] sm:$0xff] %v636_v41  ;;  %v1675_v22 = vpop.f32.mrb[15].mxu0  ;;  %1456 = vst [vmem:[%s2345_s28 + $0x228] sm:$0xff] %v676_v21  ;;  %v1695_v23 = vpop.f32.mrb[15].mxu1 }
 0x199   : > { %v641_v24 = vpop.f32.mrb[16].mxu0  ;;  %v908_v27 = vpop.f32.mrb[16].mxu1 }
 0x19a   : > { %1420 = vst [vmem:[%s2345_s28 + $0x108] sm:$0xff] %v641_v24  ;;  %v1678_v26 = vpop.f32.mrb[17].mxu0  ;;  %1389 = vst [vmem:[%s2345_s28 + $0x10] sm:$0xff] %v908_v27  ;;  %v1700_v30 = vpop.f32.mrb[17].mxu1 }
 0x19b   : > { %v644_v46 = vpop.f32.mrb[18].mxu0  ;;  %v911_v55 = vpop.f32.mrb[18].mxu1 }
 0x19c   : > { %1424 = vst [vmem:[%s2345_s28 + $0x128] sm:$0xff] %v644_v46  ;;  %v1679_v31 = vpop.f32.mrb[19].mxu0  ;;  %1393 = vst [vmem:[%s2345_s28 + $0x30] sm:$0xff] %v911_v55  ;;  %v1701_v32 = vpop.f32.mrb[19].mxu1 }
 0x1a1   : > { %v916_v33 = vpop.f32.mrb[20].mxu1 }
 0x1a2   : > { %1397 = vst [vmem:[%s2345_s28 + $0x50] sm:$0xff] %v916_v33  ;;  %v1704_v56 = vpop.f32.mrb[21].mxu1 }
 0x1a3   : > { %v919_v34 = vpop.f32.mrb[22].mxu1 }
 0x1a4   : > { %1401 = vst [vmem:[%s2345_s28 + $0x70] sm:$0xff] %v919_v34  ;;  %v1705_v35 = vpop.f32.mrb[23].mxu1 }
 0x1a8   : > { %v1316_v42 = vpop.f32.mrb[20].mxu0 }
 0x1a9   : > { %v924_v37 = vpop.f32.mrb[24].mxu1  ;;  %1390 = vst [vmem:[%s2345_s28 + $0x18] sm:$0xff] %v1316_v42  ;;  %v1742_v43 = vpop.f32.mrb[21].mxu0 }
 0x1aa   : > { %1405 = vst [vmem:[%s2345_s28 + $0x90] sm:$0xff] %v924_v37  ;;  %v1708_v38 = vpop.f32.mrb[25].mxu1  ;;  %v1319_v44 = vpop.f32.mrb[22].mxu0 }
 0x1ab   : > { %v927_v39 = vpop.f32.mrb[26].mxu1  ;;  %1394 = vst [vmem:[%s2345_s28 + $0x38] sm:$0xff] %v1319_v44  ;;  %v1743_v61 = vpop.f32.mrb[23].mxu0 }
 0x1ac   : > { %1409 = vst [vmem:[%s2345_s28 + $0xb0] sm:$0xff] %v927_v39  ;;  %v1709_v40 = vpop.f32.mrb[27].mxu1 }
 0x1b0   : > { %v1324_v49 = vpop.f32.mrb[24].mxu0 }
 0x1b1   : > { %v932_v36 = vpop.f32.mrb[28].mxu1  ;;  %1398 = vst [vmem:[%s2345_s28 + $0x58] sm:$0xff] %v1324_v49  ;;  %v1746_v50 = vpop.f32.mrb[25].mxu0 }
 0x1b2   : > { %1413 = vst [vmem:[%s2345_s28 + $0xd0] sm:$0xff] %v932_v36  ;;  %v1712_v45 = vpop.f32.mrb[29].mxu1  ;;  %v1327_v51 = vpop.f32.mrb[26].mxu0 }
 0x1b3   : > { %v935_v47 = vpop.f32.mrb[30].mxu1  ;;  %1402 = vst [vmem:[%s2345_s28 + $0x78] sm:$0xff] %v1327_v51  ;;  %v1747_v53 = vpop.f32.mrb[27].mxu0 }
 0x1b4   : > { %1417 = vst [vmem:[%s2345_s28 + $0xf0] sm:$0xff] %v935_v47  ;;  %v1713_v48 = vpop.f32.mrb[31].mxu1 }
 0x1b8   : > { %v1332_v59 = vpop.f32.mrb[28].mxu0 }
 0x1b9   : > { %v940_v54 = vpop.f32.mrb[32].mxu1  ;;  %1406 = vst [vmem:[%s2345_s28 + $0x98] sm:$0xff] %v1332_v59  ;;  %v1750_v60 = vpop.f32.mrb[29].mxu0 }
 0x1ba   : > { %1421 = vst [vmem:[%s2345_s28 + $0x110] sm:$0xff] %v940_v54  ;;  %v1716_v1 = vpop.f32.mrb[33].mxu1  ;;  %v1335_v6 = vpop.f32.mrb[30].mxu0 }
 0x1bb   : > { %v943_v57 = vpop.f32.mrb[34].mxu1  ;;  %1410 = vst [vmem:[%s2345_s28 + $0xb8] sm:$0xff] %v1335_v6  ;;  %v1751_v63 = vpop.f32.mrb[31].mxu0 }
 0x1bc   : > { %1425 = vst [vmem:[%s2345_s28 + $0x130] sm:$0xff] %v943_v57  ;;  %v1717_v58 = vpop.f32.mrb[35].mxu1 }
 0x1c0   : > { %v1340_v12 = vpop.f32.mrb[32].mxu0 }
 0x1c1   : > { %v948_v62 = vpop.f32.mrb[36].mxu1  ;;  %1414 = vst [vmem:[%s2345_s28 + $0xd8] sm:$0xff] %v1340_v12  ;;  %v1754_v17 = vpop.f32.mrb[33].mxu0 }
 0x1c2   : > { %1429 = vst [vmem:[%s2345_s28 + $0x150] sm:$0xff] %v948_v62  ;;  %v1720_v3 = vpop.f32.mrb[37].mxu1  ;;  %v1343_v4 = vpop.f32.mrb[34].mxu0 }
 0x1c3   : > { %v951_v2 = vpop.f32.mrb[38].mxu1  ;;  %1418 = vst [vmem:[%s2345_s28 + $0xf8] sm:$0xff] %v1343_v4  ;;  %v1755_v5 = vpop.f32.mrb[35].mxu0 }
 0x1c4   : > { %1433 = vst [vmem:[%s2345_s28 + $0x170] sm:$0xff] %v951_v2  ;;  %v1721_v0 = vpop.f32.mrb[39].mxu1 }
 0x1c8   : > { %v1348_v25 = vpop.f32.mrb[36].mxu0 }
 0x1c9   : > { %v956_v20 = vpop.f32.mrb[40].mxu1  ;;  %1422 = vst [vmem:[%s2345_s28 + $0x118] sm:$0xff] %v1348_v25  ;;  %v1758_v29 = vpop.f32.mrb[37].mxu0 }
 0x1ca   : > { %1437 = vst [vmem:[%s2345_s28 + $0x190] sm:$0xff] %v956_v20  ;;  %v1724_v7 = vpop.f32.mrb[41].mxu1  ;;  %v1351_v10 = vpop.f32.mrb[38].mxu0 }
 0x1cb   : > { %v959_v28 = vpop.f32.mrb[42].mxu1  ;;  %1426 = vst [vmem:[%s2345_s28 + $0x138] sm:$0xff] %v1351_v10  ;;  %v1759_v11 = vpop.f32.mrb[39].mxu0 }
 0x1cc   : > { %1441 = vst [vmem:[%s2345_s28 + $0x1b0] sm:$0xff] %v959_v28  ;;  %v1725_v9 = vpop.f32.mrb[43].mxu1 }
 0x1d0   : > { %v1356_v16 = vpop.f32.mrb[40].mxu0 }
 0x1d1   : > { %v964_v13 = vpop.f32.mrb[44].mxu1  ;;  %1430 = vst [vmem:[%s2345_s28 + $0x158] sm:$0xff] %v1356_v16  ;;  %v1762_v18 = vpop.f32.mrb[41].mxu0 }
 0x1d2   : > { %1445 = vst [vmem:[%s2345_s28 + $0x1d0] sm:$0xff] %v964_v13  ;;  %v1728_v52 = vpop.f32.mrb[45].mxu1  ;;  %v1359_v19 = vpop.f32.mrb[42].mxu0 }
 0x1d3   : > { %v967_v15 = vpop.f32.mrb[46].mxu1  ;;  %1434 = vst [vmem:[%s2345_s28 + $0x178] sm:$0xff] %v1359_v19  ;;  %v1763_v8 = vpop.f32.mrb[43].mxu0 }
 0x1d4   : > { %1449 = vst [vmem:[%s2345_s28 + $0x1f0] sm:$0xff] %v967_v15  ;;  %v1729_v14 = vpop.f32.mrb[47].mxu1 }
 0x1d8   : > { %v1364_v24 = vpop.f32.mrb[44].mxu0 }
 0x1d9   : > { %v972_v41 = vpop.f32.mrb[48].mxu1  ;;  %1438 = vst [vmem:[%s2345_s28 + $0x198] sm:$0xff] %v1364_v24  ;;  %v1766_v26 = vpop.f32.mrb[45].mxu0 }
 0x1da   : > { %1453 = vst [vmem:[%s2345_s28 + $0x210] sm:$0xff] %v972_v41  ;;  %v1732_v21 = vpop.f32.mrb[49].mxu1  ;;  %v1367_v27 = vpop.f32.mrb[46].mxu0 }
 0x1db   : > { %v975_v22 = vpop.f32.mrb[50].mxu1  ;;  %1442 = vst [vmem:[%s2345_s28 + $0x1b8] sm:$0xff] %v1367_v27  ;;  %v1767_v46 = vpop.f32.mrb[47].mxu0 }
 0x1dc   : > { %1457 = vst [vmem:[%s2345_s28 + $0x230] sm:$0xff] %v975_v22  ;;  %v1733_v23 = vpop.f32.mrb[51].mxu1 }
 0x1e0   : > { %v1372_v30 = vpop.f32.mrb[48].mxu0 }
 0x1e1   : > { %1446 = vst [vmem:[%s2345_s28 + $0x1d8] sm:$0xff] %v1372_v30  ;;  %v1770_v31 = vpop.f32.mrb[49].mxu0 }
 0x1e2   : > { %v1375_v55 = vpop.f32.mrb[50].mxu0 }
 0x1e3   : > { %1450 = vst [vmem:[%s2345_s28 + $0x1f8] sm:$0xff] %v1375_v55  ;;  %v1771_v32 = vpop.f32.mrb[51].mxu0 }
 0x1e8   : > { %v1380_v33 = vpop.f32.mrb[52].mxu0 }
 0x1e9   : > { %1454 = vst [vmem:[%s2345_s28 + $0x218] sm:$0xff] %v1380_v33  ;;  %v1774_v56 = vpop.f32.mrb[53].mxu0 }
 0x1ea   : > { %v1383_v34 = vpop.f32.mrb[54].mxu0 }
 0x1eb   : > { %1458 = vst [vmem:[%s2345_s28 + $0x238] sm:$0xff] %v1383_v34  ;;  %v1775_v35 = vpop.f32.mrb[55].mxu0 }
 0x1ec PF: > { %s20_s27 = sadd.s32 1, %s1957_s27  }
 0x1ed   : > { %p17_p9 = scmp.ge.s32.totalorder %s20_s27, 4  }
 0x1ef   :  { %19 = sbr.rel (!%p17_p9) target bundleno = 2 (0x2), region = 101 }
 0x1f6   :  { %1480 = vsyncpa [#allocation3], 1 }
 0x1f7   :  { %1482 = vsyncpa [#allocation3 + $0x1], 1 }
 0x1f8   :  { %1483 = vsyncpa [#allocation5], 1 }

// kernel: _lambda_.7
= control target key start
LH: loop header
LB: loop body
LE: loop exit
PB: predicated region body
PF: predicated region fallthrough
CT: control target
= control target key end

     0   :  { %s911_s21 = smov 0   ;;  %s913_s22 = smov 0   ;;  %s1075_s0 = inlined_call_operand.vmem [shape: f32[2,168,128], index: 0, kind: input, shape index: {}]   ;;  %s1076_s1 = inlined_call_operand.vmem [shape: f32[2,2,128], index: 1, kind: input, shape index: {}]   ;;  %s1077_s2 = inlined_call_operand.vmem [shape: f32[1,128], index: 2, kind: input, shape index: {}]   ;;  %s1078_s3 = inlined_call_operand.vmem [shape: f32[1,128], index: 3, kind: input, shape index: {}]   ;;  %s1079_s4 = inlined_call_operand.vmem [shape: bf16[128,128], index: 4, kind: input, shape index: {}]   ;;  %s1080_s5 = inlined_call_operand.vmem [shape: f32[1,128], index: 5, kind: input, shape index: {}]   ;;  %s1081_s6 = inlined_call_operand.vmem [shape: f32[2,168,128], index: 6, kind: output, shape index: {}]  }
   0x1   :  { %s915_s23 = smov 0   ;;  %s917_s24 = smov 0  }
   0x2   :  { %s919_s25 = smov 0  }
   0x3 LB: > { %s25_s26 = sadd.s32 1, %s866_s23  ;;  %s28_s27 = sadd.s32 1, %s870_s24  ;;  %s874_s25 = sphi %s919_s25, %s16_s25   ;;  %s870_s24 = sphi %s917_s24, %s1085_s24   ;;  %s866_s23 = sphi %s915_s23, %s1084_s23   ;;  %s862_s22 = sphi %s913_s22, %s1083_s22   ;;  %s858_s21 = sphi %s911_s21, %s1082_s21  }
   0x4   : > { %p26_p0 = scmp.ge.s32.totalorder %s25_s26, 3  ;;  %p689_p1 = scmp.ge.s32.totalorder %s874_s25, 1 }
   0x5   : > { %p233_p2 = scmp.lt.s32.totalorder %s874_s25, 7 }
   0x6   : > { %s1087_s26 = smov (%p26_p0, %s25_s26), 0  ;;  %s1089_s27 = smov (!%p26_p0, %s28_s27), %s870_s24 }
   0x7   : > { %p234_p3 = pnand %p689_p1, %p233_p2  ;;  %p30_p4 = scmp.ge.s32.totalorder %s1089_s27, 2 }
   0x8   : > { %v798_v0 = vld [vmem:[%s1079_s4] sm:$0xff] (!%p234_p3)   ;;  %v799_v1 = vld [vmem:[%s1079_s4 + $0x8] sm:$0xff] (!%p234_p3)   ;;  %v800_v2 = vld [vmem:[%s1079_s4 + $0x10] sm:$0xff] (!%p234_p3)   ;;  %vm294_vm0 = vcmask (!%p234_p3), 1041408   ;;  %s271_s10 = smul.u32 (!%p234_p3), 7, %s858_s21  ;;  %p272_p5 = scmp.lt.s32.totalorder (!%p234_p3), %s862_s22, 1  ;;  %v313_v14 = vlaneseq (!%p234_p3) }
   0x9   : > { %s1091_s27 = smov (%p30_p4, %s1089_s27), 0  ;;  %237 = sbr.rel (%p234_p3) target bundleno = 595 (0x253), region = 44 }
   0xa   : > { %717 = vmatprep.subr.bf16.mxu0 (!%p234_p3), %v798_v0  ;;  %741 = vmatprep.subr.bf16.mxu1 (!%p234_p3), %v798_v0  ;;  %v801_v3 = vld [vmem:[%s1079_s4 + $0x18] sm:$0xff] (!%p234_p3)   ;;  %v292_v4 = vld [vmem:[%s1076_s1] sm:$0x3] (!%p234_p3)  ;;  %v293_v5 = vld [vmem:[%s1076_s1 + $0x2] sm:$0x3] (!%p234_p3)  ;;  %p274_p6 = scmp.lt.s32.totalorder (!%p234_p3), %s271_s10, 20 }
   0xb   : > { %718 = vmatpush3.bf16.msra.mxu0 (!%p234_p3), %v798_v0  ;;  %749 = vmatpush3.bf16.msra.mxu1 (!%p234_p3), %v798_v0  ;;  %v295_v6 = vsel (!%p234_p3), %vm294_vm0, %v292_v4, 0.0  ;;  %v296_v7 = vsel (!%p234_p3), %vm294_vm0, %v293_v5, 0.0  ;;  %v802_v9 = vld [vmem:[%s1079_s4 + $0x20] sm:$0xff] (!%p234_p3)   ;;  %v803_v12 = vld [vmem:[%s1079_s4 + $0x28] sm:$0xff] (!%p234_p3)   ;;  %v804_v16 = vld [vmem:[%s1079_s4 + $0x30] sm:$0xff] (!%p234_p3)   ;;  %v314_v18 = vshrl.u32 (!%p234_p3), %v313_v14, 7 }
   0xc   : > { %719 = vmatprep.subr.bf16.mxu0 (!%p234_p3), %v799_v1  ;;  %742 = vmatprep.subr.bf16.mxu1 (!%p234_p3), %v799_v1  ;;  %v297_v8 = vadd.f32 (!%p234_p3), %v296_v7, %v295_v6  ;;  %v805_v20 = vld [vmem:[%s1079_s4 + $0x38] sm:$0xff] (!%p234_p3)   ;;  %v692_v40 = vld [vmem:[%s1077_s2] ss:$0 sm:$0xff] (!%p234_p3) }
   0xd   : > { %v315_v21 = vsub.s32 (!%p234_p3), 0, %v314_v18  ;;  %v328_v27 = vsub.s32 (!%p234_p3), 1, %v314_v18  ;;  %v693_v45 = vld [vmem:[%s1078_s3] ss:$0 sm:$0xff] (!%p234_p3) }
   0xe   : > { %v299_v10 = vmul.f32 (!%p234_p3), 0.0034722222, %v297_v8 }
   0xf   : > { %720 = vmatpush3.bf16.msra.mxu0 (!%p234_p3), %v799_v1  ;;  %750 = vmatpush3.bf16.msra.mxu1 (!%p234_p3), %v799_v1 }
  0x10   : > { %721 = vmatprep.subr.bf16.mxu0 %v800_v2  ;;  %743 = vmatprep.subr.bf16.mxu1 %v800_v2  ;;  %s1093_s22 = smov (!%p272_p5, %s862_s22), 1  ;;  %v300_v11 = vmul.f32 %v299_v10, %v299_v10  ;;  %s1095_s10 = smov (!%p274_p6, %s271_s10), 20  ;;  %v316_v23 = vrot.slane %v299_v10, %v315_v21 }
  0x11   : > { %s757_s21 = smul.u32 21, %s1093_s22 }
  0x12   : > { %v302_v13 = vrot.slane %v300_v11, 7 }
  0x13   : > { %722 = vmatpush3.bf16.msra.mxu0 %v800_v2  ;;  %751 = vmatpush3.bf16.msra.mxu1 %v800_v2  ;;  %s975_s30 = sadd.s32 %s757_s21, %s1095_s10 }
  0x14   : > { %723 = vmatprep.subr.bf16.mxu0 %v801_v3  ;;  %744 = vmatprep.subr.bf16.mxu1 %v801_v3  ;;  %v304_v15 = vsub.f32 %v299_v10, %v302_v13  ;;  %s690_s22 = sshll.u32 %s975_s30, 3  ;;  %v694_v10 = vld [vmem:[%s1080_s5] ss:$0 sm:$0xff] }
  0x15   : > { %s279_s11 = scalar_lea.vmem %s1075_s0, %s690_s22  ;;  %s1040_s20 = scalar_lea.vmem %s1081_s6, %s690_s22 }
  0x16   : > { %v305_v17 = vmax.f32 %v304_v15, 0.0  ;;  %v306_v22 = vld [vmem:[%s279_s11] sm:$0xff]  ;;  %v307_v24 = vld [vmem:[%s279_s11 + $0x8] sm:$0xff]  ;;  %v308_v25 = vld [vmem:[%s279_s11 + $0x10] sm:$0xff] }
  0x17   : > { %724 = vmatpush3.bf16.msra.mxu0 %v801_v3  ;;  %752 = vmatpush3.bf16.msra.mxu1 %v801_v3  ;;  %v309_v26 = vld [vmem:[%s279_s11 + $0x18] sm:$0xff]  ;;  %v310_v28 = vld [vmem:[%s279_s11 + $0x20] sm:$0xff]  ;;  %v311_v29 = vld [vmem:[%s279_s11 + $0x28] sm:$0xff]  ;;  %v317_v31 = vsub.f32 %v306_v22, %v316_v23  ;;  %v318_v32 = vsub.f32 %v307_v24, %v316_v23  ;;  %v319_v33 = vsub.f32 %v308_v25, %v316_v23 }
  0x18   : > { %725 = vmatprep.subr.bf16.mxu0 %v802_v9  ;;  %745 = vmatprep.subr.bf16.mxu1 %v802_v9  ;;  %v324_v19 = vadd.f32 1e-05, %v305_v17  ;;  %v312_v30 = vld [vmem:[%s279_s11 + $0x30] sm:$0xff]  ;;  %v320_v34 = vsub.f32 %v309_v26, %v316_v23  ;;  %v321_v36 = vsub.f32 %v310_v28, %v316_v23  ;;  %v322_v37 = vsub.f32 %v311_v29, %v316_v23 }
  0x19   : > { %v323_v38 = vsub.f32 %v312_v30, %v316_v23 }
  0x1a   : > { %806 = vrsqrt.f32 %v324_v19 }
  0x1b   : > { %726 = vmatpush3.bf16.msra.mxu0 %v802_v9  ;;  %753 = vmatpush3.bf16.msra.mxu1 %v802_v9 }
  0x1c   : > { %727 = vmatprep.subr.bf16.mxu0 %v803_v12  ;;  %746 = vmatprep.subr.bf16.mxu1 %v803_v12 }
  0x1f   : > { %728 = vmatpush3.bf16.msra.mxu0 %v803_v12  ;;  %754 = vmatpush3.bf16.msra.mxu1 %v803_v12 }
  0x20   : > { %729 = vmatprep.subr.bf16.mxu0 %v804_v16  ;;  %747 = vmatprep.subr.bf16.mxu1 %v804_v16 }
  0x23   : > { %730 = vmatpush3.bf16.msra.mxu0 %v804_v16  ;;  %755 = vmatpush3.bf16.msra.mxu1 %v804_v16 }
  0x24   : > { %731 = vmatprep.subr.bf16.mxu0 %v805_v20  ;;  %748 = vmatprep.subr.bf16.mxu1 %v805_v20  ;;  %v807_v35 = vpop.eup %806 }
  0x25   : > { %v329_v39 = vrot.slane %v807_v35, %v328_v27 }
  0x27   : > { %732 = vmatpush3.bf16.msra.mxu0 %v805_v20  ;;  %756 = vmatpush3.bf16.msra.mxu1 %v805_v20  ;;  %v330_v41 = vmul.f32 %v329_v39, %v317_v31  ;;  %v331_v42 = vmul.f32 %v329_v39, %v318_v32  ;;  %v332_v43 = vmul.f32 %v329_v39, %v319_v33 }
  0x28   : > { %v333_v44 = vmul.f32 %v329_v39, %v320_v34  ;;  %v334_v46 = vmul.f32 %v329_v39, %v321_v36  ;;  %v335_v47 = vmul.f32 %v329_v39, %v322_v37  ;;  %v336_v48 = vmul.f32 %v329_v39, %v323_v38 }
  0x29   : > { %v344_v49 = vmul.f32 %v692_v40, %v330_v41  ;;  %v345_v50 = vmul.f32 %v692_v40, %v331_v42  ;;  %v346_v51 = vmul.f32 %v692_v40, %v332_v43 }
  0x2a   : > { %v347_v52 = vmul.f32 %v692_v40, %v333_v44  ;;  %v348_v53 = vmul.f32 %v692_v40, %v334_v46  ;;  %v349_v54 = vmul.f32 %v692_v40, %v335_v47  ;;  %v350_v55 = vmul.f32 %v692_v40, %v336_v48 }
  0x2b   : > { %v358_v56 = vadd.f32 %v693_v45, %v344_v49  ;;  %v359_v57 = vadd.f32 %v693_v45, %v345_v50  ;;  %v360_v58 = vadd.f32 %v693_v45, %v346_v51 }
  0x2c   : > { %v361_v59 = vadd.f32 %v693_v45, %v347_v52  ;;  %v362_v60 = vadd.f32 %v693_v45, %v348_v53  ;;  %v363_v61 = vadd.f32 %v693_v45, %v349_v54  ;;  %v364_v62 = vadd.f32 %v693_v45, %v350_v55 }
  0x2d   : > { %v365_v63 = vmax.f32 %v358_v56, 0.0  ;;  %v366_v0 = vmax.f32 %v359_v57, 0.0  ;;  %v367_v1 = vmax.f32 %v360_v58, 0.0 }
  0x2e   : > { %v368_v2 = vmax.f32 %v361_v59, 0.0  ;;  %v369_v3 = vmax.f32 %v362_v60, 0.0  ;;  %v370_v4 = vmax.f32 %v363_v61, 0.0  ;;  %v371_v5 = vmax.f32 %v364_v62, 0.0 }
  0x2f   : > { %v372_v6 = vpack.c.bf16 %v366_v0, %v365_v63 }
  0x30   : > { %v373_v7 = vpack.c.bf16 %v368_v2, %v367_v1  ;;  %v374_v8 = vpack.c.bf16 %v370_v4, %v369_v3  ;;  %v375_v9 = vpack.c.bf16 %v371_v5, %v371_v5 }
  0x31   : > { %733 = vmatprep.mubr.bf16.mxu0 %v372_v6 }
  0x32   : > { %734 = vmatmul.mubr.bf16.vlgmr.msra.gmra.mrb[0].mxu0 %v373_v7  ;;  %737 = vmatprep.mubr.bf16.mxu1 %v374_v8 }
  0x33   : > { %738 = vmatmul.mubr.bf16.vlgmr.msra.gmra.mrb[0].mxu1 %v375_v9 }
 0x105   : > { %v735_v11 = vpop.f32.mrb[0].mxu0 }
 0x106   : > { %v995_v12 = vadd.f32 %v735_v11, %v694_v10  ;;  %v481_v13 = vpop.f32.mrb[1].mxu0  ;;  %v739_v14 = vpop.f32.mrb[0].mxu1 }
 0x107   : > { %v997_v15 = vadd.f32 %v694_v10, %v481_v13  ;;  %v736_v16 = vpop.f32.mrb[2].mxu0  ;;  %v497_v17 = vpop.f32.mrb[1].mxu1  ;;  %v1013_v25 = vadd.f32 %v739_v14, %v694_v10 }
 0x108   : > { %v740_v18 = vpop.f32.mrb[2].mxu1  ;;  %515 = vmax.xlane.f32.xlu1 %v995_v12  ;;  %v484_v19 = vpop.f32.mrb[3].mxu0  ;;  %v1000_v20 = vadd.f32 %v694_v10, %v497_v17  ;;  %v1003_v22 = vadd.f32 %v736_v16, %v694_v10 }
 0x109   : > { %v500_v21 = vpop.f32.mrb[3].mxu1  ;;  %511 = vmax.xlane.f32.xlu0 %v997_v15  ;;  %v1009_v24 = vadd.f32 %v694_v10, %v484_v19 }
 0x10a   : > { %v1007_v23 = vadd.f32 %v694_v10, %v500_v21 }
 0x10c   : > { %517 = vmax.xlane.f32.xlu1 %v1003_v22 }
 0x10d   : > { %519 = vmax.xlane.f32.xlu0 %v1000_v20 }
 0x110   : > { %521 = vmax.xlane.f32.xlu1 %v1007_v23 }
 0x111   : > { %513 = vmax.xlane.f32.xlu0 %v1009_v24 }
 0x115   : > { %523 = vmax.xlane.f32.xlu0 %v1013_v25 }
 0x195   : > { %v516_v26 = vpop.xlane.xlu1 %515 }
 0x196   : > { %v527_v27 = vsub.f32 %v995_v12, %v516_v26  ;;  %v1017_v28 = vpop.xlane.xlu0 %511 }
 0x197   : > { %v525_v29 = vsub.f32 %v997_v15, %v1017_v28 }
 0x198   : > { %v536_v30 = vmul.f32 1.442695, %v527_v27 }
 0x199   : > { %v532_v31 = vmul.f32 1.442695, %v525_v29  ;;  %v518_v32 = vpop.xlane.xlu1 %517 }
 0x19a   : > { %808 = vpow2.f32 %v536_v30  ;;  %v528_v33 = vsub.f32 %v1003_v22, %v518_v32  ;;  %v1022_v34 = vpop.xlane.xlu0 %519 }
 0x19b   : > { %v529_v35 = vsub.f32 %v1000_v20, %v1022_v34  ;;  %810 = vpow2.f32 %v532_v31 }
 0x19c   : > { %v538_v36 = vmul.f32 1.442695, %v528_v33 }
 0x19d   : > { %v1026_v37 = vpop.xlane.xlu1 %521  ;;  %v540_v38 = vmul.f32 1.442695, %v529_v35 }
 0x19e   : > { %812 = vpow2.f32 %v538_v36  ;;  %v530_v39 = vsub.f32 %v1007_v23, %v1026_v37  ;;  %v514_v40 = vpop.xlane.xlu0 %513 }
 0x19f   : > { %v526_v41 = vsub.f32 %v1009_v24, %v514_v40  ;;  %814 = vpow2.f32 %v540_v38 }
 0x1a0   : > { %v542_v43 = vmul.f32 1.442695, %v530_v39 }
 0x1a1   : > { %v534_v42 = vmul.f32 1.442695, %v526_v41 }
 0x1a2   : > { %v1031_v44 = vpop.xlane.xlu0 %523 }
 0x1a3   : > { %816 = vpow2.f32 %v534_v42  ;;  %v531_v45 = vsub.f32 %v1013_v25, %v1031_v44 }
 0x1a4   : > { %v809_v46 = vpop.eup %808  ;;  %818 = vpow2.f32 %v542_v43 }
 0x1a5   : > { %v544_v47 = vmul.f32 1.442695, %v531_v45  ;;  %550 = vadd.xlane.f32.xlu1 %v809_v46  ;;  %v811_v48 = vpop.eup %810 }
 0x1a7   : > { %820 = vpow2.f32 %v544_v47 }
 0x1a8   : > { %v813_v49 = vpop.eup %812 }
 0x1a9   : > { %552 = vadd.xlane.f32.xlu0 %v813_v49  ;;  %546 = vadd.xlane.f32.xlu1 %v811_v48  ;;  %v815_v50 = vpop.eup %814 }
 0x1ad   : > { %v817_v51 = vpop.eup %816  ;;  %554 = vadd.xlane.f32.xlu1 %v815_v50 }
 0x1ae   : > { %548 = vadd.xlane.f32.xlu0 %v817_v51  ;;  %v819_v52 = vpop.eup %818 }
 0x1b1   : > { %v821_v53 = vpop.eup %820 }
 0x1b2   : > { %556 = vadd.xlane.f32.xlu0 %v819_v52  ;;  %558 = vadd.xlane.f32.xlu1 %v821_v53 }
 0x232   : > { %v551_v54 = vpop.xlane.xlu1 %550 }
 0x233   : > { %822 = vlog2.f32 %v551_v54 }
 0x236   : > { %v547_v55 = vpop.xlane.xlu1 %546  ;;  %v553_v56 = vpop.xlane.xlu0 %552 }
 0x237   : > { %824 = vlog2.f32 %v547_v55 }
 0x238   : > { %826 = vlog2.f32 %v553_v56 }
 0x23a   : > { %v555_v57 = vpop.xlane.xlu1 %554 }
 0x23b   : > { %828 = vlog2.f32 %v555_v57  ;;  %v549_v58 = vpop.xlane.xlu0 %548 }
 0x23c   : > { %830 = vlog2.f32 %v549_v58 }
 0x23d   : > { %v823_v59 = vpop.eup %822 }
 0x23e   : > { %v565_v60 = vmul.f32 0.6931472, %v823_v59 }
 0x23f   : > { %v559_v61 = vpop.xlane.xlu1 %558  ;;  %v557_v62 = vpop.xlane.xlu0 %556 }
 0x240   : > { %v576_v63 = vadd.f32 %v565_v60, %v516_v26  ;;  %832 = vlog2.f32 %v559_v61 }
 0x241   : > { %v825_v0 = vpop.eup %824  ;;  %834 = vlog2.f32 %v557_v62 }
 0x242   : > { %v827_v1 = vpop.eup %826  ;;  %v583_v2 = vsub.f32 %v995_v12, %v576_v63  ;;  %v561_v3 = vmul.f32 0.6931472, %v825_v0 }
 0x243   : > { %v567_v4 = vmul.f32 0.6931472, %v827_v1 }
 0x244   : > { %590 = vst [vmem:[%s1040_s20 + $0x10] sm:$0xff] %v583_v2  ;;  %v574_v5 = vadd.f32 %v561_v3, %v1017_v28 }
 0x245   : > { %v829_v6 = vpop.eup %828  ;;  %v577_v7 = vadd.f32 %v567_v4, %v518_v32 }
 0x246   : > { %v831_v8 = vpop.eup %830  ;;  %v581_v9 = vsub.f32 %v997_v15, %v574_v5  ;;  %v569_v10 = vmul.f32 0.6931472, %v829_v6 }
 0x247   : > { %v584_v11 = vsub.f32 %v1003_v22, %v577_v7  ;;  %v563_v13 = vmul.f32 0.6931472, %v831_v8 }
 0x248   : > { %588 = vst [vmem:[%s1040_s20] sm:$0xff] %v581_v9  ;;  %v578_v12 = vadd.f32 %v569_v10, %v1022_v34 }
 0x249   : > { %591 = vst [vmem:[%s1040_s20 + $0x18] sm:$0xff] %v584_v11  ;;  %v575_v14 = vadd.f32 %v563_v13, %v514_v40 }
 0x24a   : > { %v833_v16 = vpop.eup %832  ;;  %v585_v17 = vsub.f32 %v1000_v20, %v578_v12 }
 0x24b   : > { %v835_v18 = vpop.eup %834  ;;  %v582_v19 = vsub.f32 %v1009_v24, %v575_v14  ;;  %v573_v21 = vmul.f32 0.6931472, %v833_v16 }
 0x24c   : > { %592 = vst [vmem:[%s1040_s20 + $0x20] sm:$0xff] %v585_v17  ;;  %v571_v15 = vmul.f32 0.6931472, %v835_v18 }
 0x24d   : > { %589 = vst [vmem:[%s1040_s20 + $0x8] sm:$0xff] %v582_v19  ;;  %v580_v22 = vadd.f32 %v573_v21, %v1031_v44 }
 0x24e   : > { %v579_v26 = vadd.f32 %v571_v15, %v1026_v37 }
 0x24f   : > { %v587_v27 = vsub.f32 %v1013_v25, %v580_v22 }
 0x250   : > { %v586_v28 = vsub.f32 %v1007_v23, %v579_v26 }
 0x251   : > { %594 = vst [vmem:[%s1040_s20 + $0x30] sm:$0xff] %v587_v27 }
 0x252   : > { %593 = vst [vmem:[%s1040_s20 + $0x28] sm:$0xff] %v586_v28 }
 0x253 PF: > { %s16_s25 = sadd.s32 1, %s874_s25   ;;  %s1082_s21 = smov %s866_s23 }
 0x254   : > { %p13_p7 = scmp.ge.s32.totalorder %s16_s25, 8   ;;  %s1083_s22 = smov %s870_s24 }
 0x255   : > { %s1084_s23 = smov %s1087_s26  ;;  %s1085_s24 = smov %s1091_s27 }
 0x256   :  { %15 = sbr.rel (!%p13_p7) target bundleno = 3 (0x3), region = 74 }

// kernel: _lambda_.6
= control target key start
LH: loop header
LB: loop body
LE: loop exit
PB: predicated region body
PF: predicated region fallthrough
CT: control target
= control target key end

     0   :  { %s15469_s12 = smov 0   ;;  %s20442_s0 = inlined_call_operand.vmem [shape: bf16[2,204,640], index: 0, kind: input, shape index: {}]   ;;  %s20443_s1 = inlined_call_operand.vmem [shape: bf16[9,640,128], index: 1, kind: input, shape index: {}]   ;;  %s20444_s2 = inlined_call_operand.vmem [shape: f32[2,168,128], index: 2, kind: output, shape index: {0}]   ;;  %s20445_s3 = inlined_call_operand.vmem [shape: f32[2,2,128], index: 3, kind: output, shape index: {1}]  }
   0x1 LB: > { %s10518_s13 = sadd.s32 4294967295, %s15444_s12   ;;  %p10522_p0 = scmp.ge.s32.totalorder %s15444_s12, 1  ;;  %s15444_s12 = sphi %s15469_s12, %s14_s12  }
   0x2   : > { %p140_p1 = scmp.lt.s32.totalorder %s15444_s12, 3 }
   0x4   : > { %p141_p2 = pnand %p10522_p0, %p140_p1 }
   0x6   : > { %144 = sbr.rel (%p141_p2) target bundleno = 1464 (0x5b8), region = 28 }
   0xd   : > { %v14614_v0 = vld [vmem:[%s20443_s1 + $0x180] sm:$0xff]   ;;  %p168_p3 = scmp.lt.s32.totalorder %s10518_s13, 1  ;;  %v14616_v2 = vld [vmem:[%s20443_s1 + $0x188] sm:$0xff]   ;;  %v14618_v4 = vld [vmem:[%s20443_s1 + $0x190] sm:$0xff]   ;;  %vm641_vm0 = vsmask.f32 7424 }
   0xe   : > { %v14615_v1 = vld [vmem:[%s20443_s1 + $0x140] sm:$0xff]   ;;  %11794 = vmatprep.subr.bf16.mxu0 %v14614_v0  ;;  %13981 = vmatprep.subr.bf16.mxu1 %v14614_v0  ;;  %v14617_v3 = vld [vmem:[%s20443_s1 + $0x148] sm:$0xff]   ;;  %v14619_v5 = vld [vmem:[%s20443_s1 + $0x150] sm:$0xff]   ;;  %vm15447_vm1 = vmmov 0   ;;  %vm2489_vm2 = vcmask 1046528   ;;  %vm3649_vm3 = vcmask 1044480  }
   0xf   : > { %11795 = vmatpush3.bf16.msra.mxu0 %v14615_v1  ;;  %13989 = vmatpush3.bf16.msra.mxu1 %v14615_v1  ;;  %s20787_s13 = smov (!%p168_p3, %s10518_s13), 1  ;;  %v14620_v6 = vld [vmem:[%s20443_s1 + $0x198] sm:$0xff]   ;;  %v14622_v8 = vld [vmem:[%s20443_s1 + $0x1a0] sm:$0xff]   ;;  %v14624_v10 = vld [vmem:[%s20443_s1 + $0x1a8] sm:$0xff]   ;;  %vm4528_vm4 = vsmask.f32 4352 }
  0x10   : > { %11796 = vmatprep.subr.bf16.mxu0 %v14616_v2  ;;  %13982 = vmatprep.subr.bf16.mxu1 %v14616_v2  ;;  %s14559_s28 = smul.u32 520, %s20787_s13  ;;  %v14621_v7 = vld [vmem:[%s20443_s1 + $0x158] sm:$0xff]   ;;  %v14623_v9 = vld [vmem:[%s20443_s1 + $0x160] sm:$0xff]   ;;  %v14625_v16 = vld [vmem:[%s20443_s1 + $0x168] sm:$0xff]   ;;  %vm6885_vm5 = vcmask 1045504   ;;  %s10525_s20 = sshll.u32 %s20787_s13, 1 }
  0x11   : > { %v14626_v21 = vld [vmem:[%s20443_s1 + $0x1b0] sm:$0xff]   ;;  %v14628_v40 = vld [vmem:[%s20443_s1 + $0x1b8] sm:$0xff]   ;;  %v14641_v49 = vld [vmem:[%s20443_s1 + $0x200] sm:$0xff]   ;;  %vm7764_vm6 = vsmask.f32 5376  ;;  %s181_s23 = scalar_lea.vmem %s20445_s3, %s10525_s20 }
  0x12   : > { %s15510_s8 = scalar_lea.vmem %s20442_s0, %s14559_s28  ;;  %v14627_v35 = vld [vmem:[%s20443_s1 + $0x170] sm:$0xff]   ;;  %v14629_v44 = vld [vmem:[%s20443_s1 + $0x178] sm:$0xff]   ;;  %v14642_v57 = vld [vmem:[%s20443_s1 + $0x240] sm:$0xff]  }
  0x13   : > { %11797 = vmatpush3.bf16.msra.mxu0 %v14617_v3  ;;  %13990 = vmatpush3.bf16.msra.mxu1 %v14617_v3  ;;  %v183_v11 = vld [vmem:[%s15510_s8] sm:$0xff]  ;;  %v186_v12 = vld [vmem:[%s15510_s8 + $0x14] sm:$0xff]  ;;  %v14635_v22 = vld [vmem:[%s15510_s8 + $0x11c] ss:$20 sps:$4 sm:$0xff]  }
  0x14   : > { %11798 = vmatprep.subr.bf16.mxu0 %v14618_v4  ;;  %13983 = vmatprep.subr.bf16.mxu1 %v14618_v4  ;;  %v15520_v13 = vcombine.high %v183_v11, %v186_v12  ;;  %v15523_v14 = vld [vmem:[%s15510_s8 + $0x2c] ss:$20 sps:$4 sm:$0xff]   ;;  %v15525_v15 = vcombine.low %v183_v11, %v186_v12  ;;  %v14633_v20 = vld [vmem:[%s15510_s8 + $0xf4] ss:$20 sps:$4 sm:$0xff]   ;;  %v14639_v29 = vld [vmem:[%s15510_s8 + $0xf0] ss:$20 sps:$4 sm:$0xff]  }
  0x15   : > { %v662_v19 = vshll.u32 %v15523_v14, 16  ;;  %v15539_v23 = vld [vmem:[%s15510_s8 + $0x28] ss:$20 sps:$4 sm:$0xff]   ;;  %v874_v27 = vshll.u32 %v14633_v20, 16  ;;  %v910_v28 = vshrl.u32 %v14633_v20, 16  ;;  %v914_v30 = vshll.u32 %v14635_v22, 16 }
  0x16   : > { %v655_v17 = vshrl.u32 %v15520_v13, 16  ;;  %v657_v18 = vshll.u32 %v15520_v13, 16  ;;  %v645_v24 = vshll.u32 %v15525_v15, 16  ;;  %v643_v31 = vshrl.u32 %v15525_v15, 16  ;;  %v15546_v34 = vld [vmem:[%s15510_s8 + $0x118] ss:$20 sps:$4 sm:$0xff]  }
  0x17   : > { %11799 = vmatpush3.bf16.msra.mxu0 %v14619_v5  ;;  %13991 = vmatpush3.bf16.msra.mxu1 %v14619_v5  ;;  %v664_v26 = vrot.slane %v662_v19, 1  ;;  %v650_v33 = vshll.u32 %v15539_v23, 16  ;;  %v15551_v37 = vrot.slane %v874_v27, 1  ;;  %v866_v38 = vshll.u32 %v14639_v29, 16  ;;  %v14645_v53 = vld [vmem:[%s15510_s8 + $0x54] ss:$20 sps:$4 sm:$0xff]  }
  0x18   : > { %11800 = vmatprep.subr.bf16.mxu0 %v14620_v6  ;;  %13984 = vmatprep.subr.bf16.mxu1 %v14620_v6  ;;  %v659_v25 = vrot.slane %v657_v18, 1  ;;  %v647_v32 = vrot.slane %v645_v24, 1  ;;  %v902_v39 = vshrl.u32 %v14639_v29, 16  ;;  %v916_v41 = vrot.slane %v914_v30, 1  ;;  %v14647_v55 = vld [vmem:[%s15510_s8 + $0x144] ss:$20 sps:$4 sm:$0xff]  }
  0x19   : > { %v652_v42 = vrot.slane %v650_v33, 1  ;;  %v906_v43 = vshll.u32 %v15546_v34, 16  ;;  %v912_v46 = vor.u32 %v910_v28, %v15551_v37  ;;  %v15562_v47 = vrot.slane %v866_v38, 1  ;;  %v14643_v58 = vld [vmem:[%s20443_s1 + $0x1c0] sm:$0xff]   ;;  %v14644_v60 = vld [vmem:[%s20443_s1 + $0x208] sm:$0xff]   ;;  %v14654_v27 = vld [vmem:[%s20443_s1 + $0x1d0] sm:$0xff]  }
  0x1a   : > { %v660_v36 = vor.u32 %v659_v25, %v655_v17  ;;  %v648_v51 = vor.u32 %v647_v32, %v643_v31  ;;  %v710_v54 = vshrl.u32 %v15523_v14, 16  ;;  %v950_v56 = vshrl.u32 %v14635_v22, 16  ;;  %v15584_v3 = vld [vmem:[%s15510_s8 + $0x50] ss:$20 sps:$4 sm:$0xff]   ;;  %v14652_v5 = vld [vmem:[%s15510_s8 + $0x140] ss:$20 sps:$4 sm:$0xff]  }
  0x1b   : > { %11801 = vmatpush3.bf16.msra.mxu0 %v14621_v7  ;;  %13992 = vmatpush3.bf16.msra.mxu1 %v14621_v7  ;;  %v908_v48 = vrot.slane %v906_v43, 1  ;;  %v917_v50 = vsel %vm641_vm0, %v912_v46, %v916_v41  ;;  %v904_v52 = vor.u32 %v902_v39, %v15562_v47  ;;  %v714_v59 = vshll.u32 %v14645_v53, 16  ;;  %v14658_v28 = vld [vmem:[%s15510_s8 + $0x16c] ss:$20 sps:$4 sm:$0xff]   ;;  %v15614_v30 = vld [vmem:[%s15510_s8 + $0x168] ss:$20 sps:$4 sm:$0xff]  }
  0x1c   : > { %11802 = vmatprep.subr.bf16.mxu0 %v14622_v8  ;;  %13985 = vmatprep.subr.bf16.mxu1 %v14622_v8  ;;  %v665_v45 = vsel %vm641_vm0, %v660_v36, %v664_v26  ;;  %v712_v61 = vor.u32 %v710_v54, %v664_v26  ;;  %v952_v62 = vor.u32 %v950_v56, %v916_v41  ;;  %v954_v63 = vshll.u32 %v14647_v55, 16  ;;  %v15611_v29 = vld [vmem:[%s15510_s8 + $0x78] ss:$20 sps:$4 sm:$0xff]   ;;  %v14655_v32 = vld [vmem:[%s20443_s1 + $0x250] sm:$0xff]   ;;  %v14665_v54 = vld [vmem:[%s20443_s1 + $0x220] sm:$0xff]  }
  0x1d   : > { %1404 = vmatprep.mubr.bf16.mxu0 %v665_v45  ;;  %1452 = vmatprep.mubr.bf16.mxu1 %v917_v50  ;;  %v653_v0 = vsel %vm641_vm0, %v648_v51, %v652_v42  ;;  %v909_v1 = vsel %vm641_vm0, %v904_v52, %v908_v48  ;;  %v716_v2 = vrot.slane %v714_v59, 1  ;;  %v702_v4 = vshrl.u32 %v15539_v23, 16  ;;  %v14656_v23 = vld [vmem:[%s15510_s8 + $0x7c] ss:$20 sps:$4 sm:$0xff]  }
  0x1e   : > { %v20447_v6 = vmov 0.0   ;;  %v956_v7 = vrot.slane %v954_v63, 1  ;;  %v942_v8 = vshrl.u32 %v15546_v34, 16  ;;  %v706_v12 = vshll.u32 %v15584_v3, 16  ;;  %v14663_v45 = vld [vmem:[%s20443_s1 + $0x1d8] sm:$0xff]   ;;  %v243_v59 = vld [vmem:[%s15510_s8 + $0x190] sm:$0xff] }
  0x1f   : > { %11803 = vmatpush3.bf16.msra.mxu0 %v14623_v9  ;;  %13993 = vmatpush3.bf16.msra.mxu1 %v14623_v9  ;;  %v14649_v9 = vld [vmem:[%s20443_s1 + $0x1c8] sm:$0xff]   ;;  %v704_v11 = vor.u32 %v702_v4, %v652_v42  ;;  %v946_v14 = vshll.u32 %v14652_v5, 16  ;;  %v750_v22 = vshrl.u32 %v14645_v53, 16  ;;  %v990_v24 = vshrl.u32 %v14647_v55, 16  ;;  %v14667_v55 = vld [vmem:[%s15510_s8 + $0xa4] ss:$20 sps:$4 sm:$0xff]  }
  0x20   : > { %11804 = vmatprep.subr.bf16.mxu0 %v14624_v10  ;;  %13986 = vmatprep.subr.bf16.mxu1 %v14624_v10  ;;  %v14650_v10 = vld [vmem:[%s20443_s1 + $0x248] sm:$0xff]   ;;  %v957_v17 = vsel %vm641_vm0, %v952_v62, %v956_v7  ;;  %v944_v18 = vor.u32 %v942_v8, %v908_v48  ;;  %v708_v19 = vrot.slane %v706_v12, 1  ;;  %v742_v25 = vshrl.u32 %v15584_v3, 16  ;;  %v14664_v48 = vld [vmem:[%s20443_s1 + $0x258] sm:$0xff]  }
  0x21   : > { %v948_v20 = vrot.slane %v946_v14, 1  ;;  %v752_v33 = vor.u32 %v750_v22, %v716_v2  ;;  %v754_v34 = vshll.u32 %v14656_v23, 16  ;;  %v994_v36 = vshll.u32 %v14658_v28, 16  ;;  %v14673_v12 = vld [vmem:[%s20443_s1 + $0x228] sm:$0xff]  }
  0x22   : > { %v709_v26 = vsel %vm641_vm0, %v704_v11, %v708_v19  ;;  %v746_v38 = vshll.u32 %v15611_v29, 16  ;;  %v982_v39 = vshrl.u32 %v14652_v5, 16  ;;  %v744_v51 = vor.u32 %v742_v25, %v708_v19 }
  0x23   : > { %11805 = vmatpush3.bf16.msra.mxu0 %v14625_v16  ;;  %13994 = vmatpush3.bf16.msra.mxu1 %v14625_v16  ;;  %v717_v16 = vsel %vm641_vm0, %v712_v61, %v716_v2  ;;  %v949_v31 = vsel %vm641_vm0, %v944_v18, %v948_v20  ;;  %v756_v41 = vrot.slane %v754_v34, 1  ;;  %v996_v42 = vrot.slane %v994_v36, 1  ;;  %v15645_v61 = vld [vmem:[%s15510_s8 + $0xa0] ss:$20 sps:$4 sm:$0xff]  }
  0x24   : > { %11806 = vmatprep.subr.bf16.mxu0 %v14626_v21  ;;  %13987 = vmatprep.subr.bf16.mxu1 %v14626_v21  ;;  %v14653_v21 = vld [vmem:[%s20443_s1 + $0x210] sm:$0xff]   ;;  %v748_v43 = vrot.slane %v746_v38, 1  ;;  %v984_v52 = vor.u32 %v982_v39, %v948_v20  ;;  %v1030_v56 = vshrl.u32 %v14658_v28, 16  ;;  %v782_v62 = vshrl.u32 %v15611_v29, 16  ;;  %v14678_v29 = vld [vmem:[%s20443_s1 + $0x268] sm:$0xff]  }
  0x25   : > { %v757_v46 = vsel %vm641_vm0, %v752_v33, %v756_v41  ;;  %v794_v63 = vshll.u32 %v14667_v55, 16  ;;  %v1022_v2 = vshrl.u32 %v15614_v30, 16  ;;  %v786_v5 = vshll.u32 %v15645_v61, 16  ;;  %v14680_v34 = vld [vmem:[%s20443_s1 + $0x1f0] sm:$0xff]  }
  0x26   : > { %v749_v3 = vsel %vm641_vm0, %v744_v51, %v748_v43 }
  0x27   : > { %11807 = vmatpush3.bf16.msra.mxu0 %v14627_v35  ;;  %13995 = vmatpush3.bf16.msra.mxu1 %v14627_v35  ;;  %v992_v35 = vor.u32 %v990_v24, %v956_v7  ;;  %v14672_v7 = vld [vmem:[%s20443_s1 + $0x260] sm:$0xff]   ;;  %v796_v8 = vrot.slane %v794_v63, 1  ;;  %v788_v14 = vrot.slane %v786_v5, 1  ;;  %v784_v24 = vor.u32 %v782_v62, %v748_v43 }
  0x28   : > { %11808 = vmatprep.subr.bf16.mxu0 %v14628_v40  ;;  %13988 = vmatprep.subr.bf16.mxu1 %v14628_v40  ;;  %v986_v40 = vshll.u32 %v15614_v30, 16  ;;  %v15679_v30 = vld [vmem:[%s15510_s8 + $0xc8] ss:$20 sps:$4 sm:$0xff]  }
  0x29   : > { %v997_v50 = vsel %vm641_vm0, %v992_v35, %v996_v42  ;;  %v826_v33 = vshll.u32 %v15679_v30, 16  ;;  %v789_v35 = vsel %vm641_vm0, %v784_v24, %v788_v14  ;;  %v862_v51 = vshrl.u32 %v15679_v30, 16 }
  0x2a   : > { %v988_v53 = vrot.slane %v986_v40, 1  ;;  %v14681_v40 = vld [vmem:[%s20443_s1 + $0x238] sm:$0xff]  }
  0x2b   : > { %11809 = vmatpush3.bf16.msra.mxu0 %v14629_v44  ;;  %13996 = vmatpush3.bf16.msra.mxu1 %v14629_v44  ;;  %v14662_v44 = vld [vmem:[%s20443_s1 + $0x218] sm:$0xff]  }
  0x2c   : > { %13441 = vmatprep.subr.bf16.mxu0 %v20447_v6  ;;  %11876 = vmatprep.subr.bf16.mxu1 %v14641_v49  ;;  %v790_v49 = vshrl.u32 %v14656_v23, 16  ;;  %v989_v4 = vsel %vm641_vm0, %v984_v52, %v988_v53  ;;  %v14677_v23 = vld [vmem:[%s20443_s1 + $0x230] sm:$0xff]   ;;  %v1024_v25 = vor.u32 %v1022_v2, %v988_v53 }
  0x2d   : > { %v14688_v53 = vld [vmem:[%s15510_s8 + $0x34] ss:$20 sps:$4 sm:$0xff]  }
  0x2e   : > { %1405 = vmatmul.mubr.bf16.vlgmr.msra.gmra.mrb[0].mxu0 %v653_v0  ;;  %1453 = vmatmul.mubr.bf16.vlgmr.msra.gmra.mrb[0].mxu1 %v909_v1 }
  0x2f   : > { %13442 = vmatpush3.bf16.msra.mxu0 %v14642_v57  ;;  %11877 = vmatpush3.bf16.msra.mxu1 %v14643_v58  ;;  %v14666_v57 = vld [vmem:[%s20443_s1 + $0x1e0] sm:$0xff]   ;;  %v792_v58 = vor.u32 %v790_v49, %v756_v41 }
  0x30   : > { %11878 = vmatprep.subr.bf16.mxu1 %v14644_v60  ;;  %13443 = vmatprep.subr.bf16.mxu0 %v20447_v6  ;;  %v326_v60 = vld [vmem:[%s15510_s8 + $0x1a4] sm:$0x11] }
  0x31   : > { %1412 = vmatprep.mubr.bf16.mxu0 %v717_v16  ;;  %1460 = vmatprep.mubr.bf16.mxu1 %v957_v17  ;;  %v15648_v0 = vcombine.high %v243_v59, %v326_v60  ;;  %v15650_v1 = vcombine.low %v243_v59, %v326_v60  ;;  %v14674_v16 = vld [vmem:[%s20443_s1 + $0x1e8] sm:$0xff]   ;;  %v830_v17 = vshrl.u32 %v14667_v55, 16  ;;  %v797_v18 = vsel %vm641_vm0, %v792_v58, %v796_v8  ;;  %v14689_v60 = vld [vmem:[%s20443_s1 + $0x40] sm:$0xff]  }
  0x32   : > { %v686_v59 = vshll.u32 %v14688_v53, 16 }
  0x33   : > { %11879 = vmatpush3.bf16.msra.mxu1 %v14649_v9  ;;  %13444 = vmatpush3.bf16.msra.mxu0 %v14650_v10  ;;  %v1032_v9 = vor.u32 %v1030_v56, %v996_v42  ;;  %v1034_v10 = vshll.u32 %v15648_v0, 16  ;;  %v1026_v11 = vshll.u32 %v15650_v1, 16  ;;  %v1065_v22 = vshrl.u32 %v15648_v0, 16  ;;  %v14683_v42 = vld [vmem:[%s20443_s1 + $0x270] sm:$0xff]  }
  0x34   : > { %11880 = vmatprep.subr.bf16.mxu1 %v14653_v21  ;;  %13445 = vmatprep.subr.bf16.mxu0 %v20447_v6  ;;  %v14675_v21 = vld [vmem:[%s15510_s8 + $0xcc] ss:$20 sps:$4 sm:$0xff]   ;;  %v1062_v41 = vshrl.u32 %v15650_v1, 16 }
  0x35   : > { %v1036_v19 = vrot.slane %v1034_v10, 1  ;;  %v1028_v20 = vrot.slane %v1026_v11, 1  ;;  %v834_v28 = vshll.u32 %v14675_v21, 16  ;;  %v870_v43 = vshrl.u32 %v14675_v21, 16  ;;  %v14692_v10 = vld [vmem:[%s15510_s8 + $0x5c] ss:$20 sps:$4 sm:$0xff]  }
  0x36   : > { %1413 = vmatmul.mubr.bf16.gmra.mrb[4].mxu0 %v709_v26  ;;  %1461 = vmatmul.mubr.bf16.gmra.mrb[4].mxu1 %v949_v31  ;;  %v726_v11 = vshrl.u32 %v14688_v53, 16 }
  0x37   : > { %11881 = vmatpush3.bf16.msra.mxu1 %v14654_v27  ;;  %13446 = vmatpush3.bf16.msra.mxu0 %v14655_v32  ;;  %v1037_v26 = vsel %vm641_vm0, %v1032_v9, %v1036_v19  ;;  %v832_v27 = vor.u32 %v830_v17, %v796_v8  ;;  %v836_v31 = vrot.slane %v834_v28, 1  ;;  %v822_v32 = vshrl.u32 %v15645_v61, 16  ;;  %v188_v17 = vld [vmem:[%s15510_s8 + $0x24] sm:$0xf] }
  0x38   : > { %1420 = vmatprep.mubr.bf16.mxu0 %v757_v46  ;;  %1468 = vmatprep.mubr.bf16.mxu1 %v997_v50  ;;  %v1029_v36 = vsel %vm641_vm0, %v1024_v25, %v1028_v20  ;;  %v1067_v38 = vor.u32 %v1065_v22, %v1036_v19  ;;  %v828_v46 = vrot.slane %v826_v33, 1  ;;  %v15705_v50 = vld [vmem:[%s15510_s8 + $0x30] ss:$20 sps:$4 sm:$0xff]   ;;  %v1064_v61 = vor.u32 %v1062_v41, %v1028_v20  ;;  %v15738_v20 = vld [vmem:[%s15510_s8 + $0x38] ss:$20 sps:$4 sm:$0xff]  }
  0x39   : > { %11882 = vmatprep.subr.bf16.mxu1 %v14662_v44  ;;  %13447 = vmatprep.subr.bf16.mxu0 %v20447_v6  ;;  %v837_v39 = vsel %vm641_vm0, %v832_v27, %v836_v31  ;;  %v184_v44 = vld [vmem:[%s15510_s8 + $0x8] sm:$0xff]  ;;  %v824_v52 = vor.u32 %v822_v32, %v788_v14  ;;  %v872_v55 = vor.u32 %v870_v43, %v836_v31  ;;  %v674_v5 = vshll.u32 %v15705_v50, 16  ;;  %v14697_v14 = vld [vmem:[%s20443_s1 + $0xc0] sm:$0xff]  }
  0x3a   : > { %v730_v19 = vshll.u32 %v14692_v10, 16  ;;  %v718_v27 = vshrl.u32 %v15705_v50, 16  ;;  %v698_v30 = vshll.u32 %v15738_v20, 16  ;;  %v15762_v43 = vld [vmem:[%s15510_s8 + $0x60] ss:$20 sps:$4 sm:$0xff]   ;;  %v734_v53 = vshrl.u32 %v15738_v20, 16 }
  0x3b   : > { %11883 = vmatpush3.bf16.msra.mxu1 %v14663_v45  ;;  %13448 = vmatpush3.bf16.msra.mxu0 %v14664_v48  ;;  %v187_v45 = vld [vmem:[%s15510_s8 + $0x1c] sm:$0xff]  ;;  %v829_v2 = vsel %vm641_vm0, %v824_v52, %v828_v46  ;;  %v877_v8 = vsel %vm641_vm0, %v872_v55, %v15551_v37  ;;  %v864_v37 = vor.u32 %v862_v51, %v828_v46  ;;  %v676_v22 = vrot.slane %v674_v5, 1  ;;  %v14700_v46 = vld [vmem:[%s20443_s1 + $0x8] sm:$0xff]   ;;  %v14712_v5 = vld [vmem:[%s20443_s1 + $0x10] sm:$0xff]  }
  0x3c   : > { %11884 = vmatprep.subr.bf16.mxu1 %v14665_v54  ;;  %13449 = vmatprep.subr.bf16.mxu0 %v20447_v6  ;;  %v15700_v48 = vcombine.low %v184_v44, %v187_v45  ;;  %v15702_v49 = vcombine.high %v184_v44, %v187_v45  ;;  %v14682_v54 = vld [vmem:[%s20443_s1 + $0x1f8] sm:$0xff]   ;;  %v732_v25 = vrot.slane %v730_v19, 1  ;;  %v700_v45 = vrot.slane %v698_v30, 1 }
  0x3d   : > { %v869_v32 = vsel %vm641_vm0, %v864_v37, %v15562_v47  ;;  %v720_v47 = vor.u32 %v718_v27, %v676_v22  ;;  %v14719_v37 = vld [vmem:[%s20443_s1 + $0x58] sm:$0xff]  }
  0x3e   : > { %1421 = vmatmul.mubr.bf16.gmra.mrb[8].mxu0 %v749_v3  ;;  %1469 = vmatmul.mubr.bf16.gmra.mrb[8].mxu1 %v989_v4  ;;  %v679_v56 = vshrl.u32 %v15702_v49, 16  ;;  %v669_v58 = vshll.u32 %v15700_v48, 16  ;;  %v667_v63 = vshrl.u32 %v15700_v48, 16  ;;  %v688_v3 = vrot.slane %v686_v59, 1  ;;  %v14705_v59 = vld [vmem:[%s20443_s1 + $0xc8] sm:$0xff]  }
  0x3f   : > { %11885 = vmatpush3.bf16.msra.mxu1 %v14666_v57  ;;  %1428 = vmatprep.mubr.bf16.mxu0 %v797_v18  ;;  %v681_v57 = vshll.u32 %v15702_v49, 16 }
  0x40   : > { %13450 = vmatpush3.bf16.msra.mxu0 %v14672_v7  ;;  %11886 = vmatprep.subr.bf16.mxu1 %v14673_v12  ;;  %v671_v4 = vrot.slane %v669_v58, 1  ;;  %v14691_v7 = vld [vmem:[%s20443_s1 + $0x278] sm:$0xff]   ;;  %v728_v24 = vor.u32 %v726_v11, %v688_v3  ;;  %v738_v58 = vshll.u32 %v15762_v43, 16  ;;  %v14706_v11 = vld [vmem:[%s20443_s1 + $0x88] sm:$0xff]  }
  0x41   : > { %1476 = vmatprep.mubr.bf16.mxu1 %v1037_v26  ;;  %13451 = vmatprep.subr.bf16.mxu0 %v20447_v6  ;;  %v683_v62 = vrot.slane %v681_v57, 1  ;;  %v15729_v12 = vld [vmem:[%s15510_s8 + $0x58] ss:$20 sps:$4 sm:$0xff]   ;;  %v14690_v26 = vld [vmem:[%s20443_s1] sm:$0xff]   ;;  %v14709_v57 = vld [vmem:[%s20443_s1 + $0x50] sm:$0xff]  }
  0x42   : > { %v672_v21 = vor.u32 %v671_v4, %v667_v63  ;;  %v722_v28 = vshll.u32 %v15729_v12, 16  ;;  %v758_v52 = vshrl.u32 %v15729_v12, 16  ;;  %v15790_v4 = vld [vmem:[%s15510_s8 + $0x88] ss:$20 sps:$4 sm:$0xff]  }
  0x43   : > { %11887 = vmatpush3.bf16.msra.mxu1 %v14674_v16  ;;  %v684_v9 = vor.u32 %v683_v62, %v679_v56  ;;  %v185_v16 = vld [vmem:[%s15510_s8 + $0x10] sm:$0xf]  ;;  %v14707_v56 = vld [vmem:[%s15510_s8 + $0xac] ss:$20 sps:$4 sm:$0xff]   ;;  %v778_v19 = vshll.u32 %v15790_v4, 16 }
  0x44   : > { %11888 = vmatprep.subr.bf16.mxu1 %v14677_v23  ;;  %13452 = vmatpush3.bf16.msra.mxu0 %v14678_v29  ;;  %v15740_v23 = vcombine.low %v185_v16, %v188_v17  ;;  %v677_v33 = vsel %vm641_vm0, %v672_v21, %v676_v22  ;;  %v810_v63 = vshll.u32 %v14707_v56, 16  ;;  %v15804_v17 = vld [vmem:[%s15510_s8 + $0xd4] ss:$20 sps:$4 sm:$0xff]   ;;  %v846_v27 = vshrl.u32 %v14707_v56, 16  ;;  %v15856_v56 = vld [vmem:[%s15510_s8 + $0xf8] ss:$20 sps:$4 sm:$0xff]  }
  0x45   : > { %13453 = vmatprep.subr.bf16.mxu0 %v20447_v6  ;;  %v689_v18 = vsel %vm641_vm0, %v684_v9, %v688_v3  ;;  %v736_v9 = vor.u32 %v734_v53, %v700_v45  ;;  %v886_v53 = vshrl.u32 %v15804_v17, 16 }
  0x46   : > { %1429 = vmatmul.mubr.bf16.gmra.mrb[12].mxu0 %v789_v35  ;;  %1477 = vmatmul.mubr.bf16.gmra.mrb[12].mxu1 %v1029_v36  ;;  %v693_v29 = vshll.u32 %v15740_v23, 16  ;;  %v691_v31 = vshrl.u32 %v15740_v23, 16  ;;  %v14701_v35 = vld [vmem:[%s15510_s8 + $0x84] ss:$20 sps:$4 sm:$0xff]   ;;  %v733_v36 = vsel %vm641_vm0, %v728_v24, %v732_v25  ;;  %v812_v12 = vrot.slane %v810_v63, 1 }
  0x47   : > { %1436 = vmatprep.mubr.bf16.mxu0 %v837_v39  ;;  %1484 = vmatprep.mubr.bf16.mxu1 %v1067_v38  ;;  %v14699_v38 = vld [vmem:[%s20443_s1 + $0x48] sm:$0xff]   ;;  %v766_v39 = vshrl.u32 %v14692_v10, 16  ;;  %v770_v41 = vshll.u32 %v14701_v35, 16  ;;  %v806_v62 = vshrl.u32 %v14701_v35, 16  ;;  %v740_v10 = vrot.slane %v738_v58, 1  ;;  %v14733_v58 = vld [vmem:[%s20443_s1 + $0xe0] sm:$0xff]  }
  0x48   : > { %11889 = vmatpush3.bf16.msra.mxu1 %v14680_v34  ;;  %13454 = vmatpush3.bf16.msra.mxu0 %v14683_v42  ;;  %v695_v34 = vrot.slane %v693_v29, 1  ;;  %v15759_v42 = vld [vmem:[%s15510_s8 + $0x80] ss:$20 sps:$4 sm:$0xff]   ;;  %v774_v24 = vshrl.u32 %v15762_v43, 16  ;;  %v14720_v29 = vld [vmem:[%s20443_s1 + $0x18] sm:$0xff]  }
  0x49   : > { %11890 = vmatprep.subr.bf16.mxu1 %v14681_v40  ;;  %13455 = vmatprep.subr.bf16.mxu0 %v20447_v6  ;;  %v724_v40 = vrot.slane %v722_v28, 1  ;;  %v768_v50 = vor.u32 %v766_v39, %v732_v25  ;;  %v772_v51 = vrot.slane %v770_v41, 1  ;;  %v762_v55 = vshll.u32 %v15759_v42, 16  ;;  %v14716_v25 = vld [vmem:[%s20443_s1 + $0x90] sm:$0xff]   ;;  %v14727_v43 = vld [vmem:[%s20443_s1 + $0x60] sm:$0xff]  }
  0x4a   : > { %v696_v44 = vor.u32 %v695_v34, %v691_v31  ;;  %v798_v20 = vshrl.u32 %v15759_v42, 16  ;;  %v741_v22 = vsel %vm641_vm0, %v736_v9, %v740_v10  ;;  %v850_v28 = vshll.u32 %v15804_v17, 16  ;;  %v14726_v42 = vld [vmem:[%s20443_s1 + $0x98] sm:$0xff]   ;;  %v14734_v63 = vld [vmem:[%s20443_s1 + $0xa0] sm:$0xff]  }
  0x4b   : > { %v773_v3 = vsel %vm641_vm0, %v768_v50, %v772_v51  ;;  %v808_v16 = vor.u32 %v806_v62, %v772_v51  ;;  %v780_v31 = vrot.slane %v778_v19, 1  ;;  %v776_v35 = vor.u32 %v774_v24, %v740_v10 }
  0x4c   : > { %11891 = vmatpush3.bf16.msra.mxu1 %v14682_v54  ;;  %13456 = vmatpush3.bf16.msra.mxu0 %v14691_v7  ;;  %v14698_v54 = vld [vmem:[%s20443_s1 + $0x80] sm:$0xff]   ;;  %v764_v7 = vrot.slane %v762_v55, 1  ;;  %v852_v39 = vrot.slane %v850_v28, 1  ;;  %v814_v50 = vshrl.u32 %v15790_v4, 16  ;;  %v882_v10 = vshll.u32 %v15856_v56, 16 }
  0x4d   : > { %11977 = vmatprep.subr.bf16.mxu1 %v14689_v60  ;;  %12059 = vmatprep.subr.bf16.mxu0 %v14697_v14  ;;  %v725_v60 = vsel %vm641_vm0, %v720_v47, %v724_v40  ;;  %v14713_v14 = vld [vmem:[%s20443_s1 + $0xd0] sm:$0xff]   ;;  %v15902_v28 = vld [vmem:[%s15510_s8 + $0x14c] ss:$20 sps:$4 sm:$0xff]  }
  0x4e   : > { %1437 = vmatmul.mubr.bf16.gmra.mrb[16].mxu0 %v829_v2  ;;  %1485 = vmatmul.mubr.bf16.gmra.mrb[16].mxu1 %v1064_v61  ;;  %v701_v61 = vsel %vm641_vm0, %v696_v44, %v700_v45  ;;  %v15786_v2 = vld [vmem:[%s15510_s8 + $0xa8] ss:$20 sps:$4 sm:$0xff]   ;;  %v800_v34 = vor.u32 %v798_v20, %v764_v7  ;;  %v14728_v44 = vld [vmem:[%s20443_s1 + $0x20] sm:$0xff]  }
  0x4f   : > { %1444 = vmatprep.mubr.bf16.mxu0 %v877_v8  ;;  %1524 = vmatprep.mubr.bf16.mxu1 %v689_v18  ;;  %v760_v8 = vor.u32 %v758_v52, %v724_v40  ;;  %v802_v18 = vshll.u32 %v15786_v2, 16  ;;  %v14725_v40 = vld [vmem:[%s20443_s1 + $0xd8] sm:$0xff]   ;;  %v838_v47 = vshrl.u32 %v15786_v2, 16  ;;  %v888_v2 = vor.u32 %v886_v53, %v852_v39  ;;  %v15891_v20 = vld [vmem:[%s15510_s8 + $0x100] ss:$20 sps:$4 sm:$0xff]  }
  0x51   : > { %v765_v21 = vsel %vm641_vm0, %v760_v8, %v764_v7  ;;  %v804_v30 = vrot.slane %v802_v18, 1  ;;  %v14739_v8 = vld [vmem:[%s20443_s1 + $0x68] sm:$0xff]   ;;  %v15888_v18 = vld [vmem:[%s15510_s8 + $0x120] ss:$20 sps:$4 sm:$0xff]  }
  0x53   : > { %v805_v45 = vsel %vm641_vm0, %v800_v34, %v804_v30 }
  0x56   : > { %1445 = vmatmul.mubr.bf16.gmra.mrb[20].mxu0 %v869_v32  ;;  %1525 = vmatmul.mubr.bf16.vlgmr.msra.gmra.mrb[20].mxu1 %v677_v33  ;;  %v15824_v32 = vld [vmem:[%s15510_s8 + $0xd0] ss:$20 sps:$4 sm:$0xff]  }
  0x57   : > { %11978 = vmatpush3.bf16.msra.mxu1 %v14690_v26  ;;  %1532 = vmatprep.mubr.bf16.mxu1 %v733_v36  ;;  %v813_v26 = vsel %vm641_vm0, %v808_v16, %v812_v12  ;;  %v15827_v33 = vld [vmem:[%s15510_s8 + $0xb0] ss:$20 sps:$4 sm:$0xff]   ;;  %v842_v41 = vshll.u32 %v15824_v32, 16  ;;  %v878_v4 = vshrl.u32 %v15824_v32, 16  ;;  %v898_v32 = vshll.u32 %v15891_v20, 16 }
  0x58   : > { %13457 = vmatprep.mubr.msk.bf16.mxu0 %vm15447_vm1, %v20447_v6  ;;  %11979 = vmatprep.subr.bf16.mxu1 %v14699_v38  ;;  %v15832_v36 = vld [vmem:[%s15510_s8 + $0xfc] ss:$20 sps:$4 sm:$0xff]   ;;  %v848_v38 = vor.u32 %v846_v27, %v812_v12  ;;  %v818_v51 = vshll.u32 %v15827_v33, 16  ;;  %v854_v7 = vshrl.u32 %v15827_v33, 16 }
  0x59   : > { %v844_v55 = vrot.slane %v842_v41, 1  ;;  %v926_v17 = vshrl.u32 %v15832_v36, 16  ;;  %v14748_v33 = vld [vmem:[%s20443_s1 + $0x30] sm:$0xff]   ;;  %v970_v41 = vshll.u32 %v15902_v28, 16 }
  0x5a   : > { %v853_v52 = vsel %vm641_vm0, %v848_v38, %v852_v39  ;;  %v820_v62 = vrot.slane %v818_v51, 1  ;;  %v15932_v51 = vld [vmem:[%s15510_s8 + $0x174] ss:$20 sps:$4 sm:$0xff]  }
  0x5b   : > { %11980 = vmatpush3.bf16.msra.mxu1 %v14700_v46  ;;  %v781_v46 = vsel %vm641_vm0, %v776_v35, %v780_v31  ;;  %v880_v19 = vor.u32 %v878_v4, %v844_v55  ;;  %v972_v53 = vrot.slane %v970_v41, 1  ;;  %v14757_v4 = vld [vmem:[%s20443_s1 + $0xf8] sm:$0xff]  }
  0x5c   : > { %11981 = vmatprep.subr.bf16.mxu1 %v14709_v57  ;;  %v15859_v57 = vld [vmem:[%s15510_s8 + $0xd8] ss:$20 sps:$4 sm:$0xff]  }
  0x5d   : > { %v894_v38 = vshrl.u32 %v15859_v57, 16 }
  0x5e   : > { %1533 = vmatmul.mubr.bf16.gmra.mrb[24].mxu1 %v725_v60  ;;  %13458 = vmatmul.mubr.bf16.vlgmr.msra.gmra.mrb[24].mxu0 %v701_v61  ;;  %v15865_v60 = vld [vmem:[%s15510_s8 + $0x124] ss:$20 sps:$4 sm:$0xff]   ;;  %v816_v61 = vor.u32 %v814_v50, %v780_v31  ;;  %v14747_v31 = vld [vmem:[%s20443_s1 + $0x70] sm:$0xff]  }
  0x5f   : > { %12060 = vmatpush3.bf16.msra.mxu0 %v14698_v54  ;;  %1540 = vmatprep.mubr.bf16.mxu1 %v773_v3  ;;  %v890_v54 = vshll.u32 %v15832_v36, 16  ;;  %v930_v12 = vshll.u32 %v15865_v60, 16  ;;  %v918_v36 = vshrl.u32 %v15856_v56, 16  ;;  %v934_v56 = vshrl.u32 %v15891_v20, 16 }
  0x60   : > { %13461 = vmatprep.mubr.msk.bf16.mxu0 %vm15447_vm1, %v20447_v6  ;;  %12061 = vmatprep.subr.bf16.mxu0 %v14705_v59  ;;  %v840_v59 = vor.u32 %v838_v47, %v804_v30  ;;  %v821_v9 = vsel %vm641_vm0, %v816_v61, %v820_v62  ;;  %v15906_v30 = vld [vmem:[%s15510_s8 + $0x148] ss:$20 sps:$4 sm:$0xff]   ;;  %v900_v47 = vrot.slane %v898_v32, 1 }
  0x61   : > { %11982 = vmatpush3.bf16.msra.mxu1 %v14712_v5  ;;  %v892_v3 = vrot.slane %v890_v54, 1  ;;  %v932_v24 = vrot.slane %v930_v12, 1  ;;  %v14753_v54 = vld [vmem:[%s20443_s1 + $0xb0] sm:$0xff]   ;;  %v14759_v12 = vld [vmem:[%s20443_s1 + $0x2c0] sm:$0xff]  }
  0x62   : > { %11983 = vmatprep.subr.bf16.mxu1 %v14719_v37  ;;  %v845_v5 = vsel %vm641_vm0, %v840_v59, %v844_v55  ;;  %v884_v37 = vrot.slane %v882_v10, 1  ;;  %v958_v55 = vshrl.u32 %v15888_v18, 16  ;;  %v14755_v59 = vld [vmem:[%s20443_s1 + $0x38] sm:$0xff]  }
  0x63   : > { %12062 = vmatpush3.bf16.msra.mxu0 %v14706_v11  ;;  %v858_v11 = vshll.u32 %v15859_v57, 16  ;;  %v893_v16 = vsel %vm641_vm0, %v888_v2, %v892_v3  ;;  %v928_v27 = vor.u32 %v926_v17, %v892_v3  ;;  %v14754_v57 = vld [vmem:[%s20443_s1 + $0x78] sm:$0xff]   ;;  %v327_v3 = vld [vmem:[%s15510_s8 + $0x1ac] sm:$0x11] }
  0x64   : > { %12063 = vmatprep.subr.bf16.mxu0 %v14713_v14  ;;  %v14740_v14 = vld [vmem:[%s20443_s1 + $0x28] sm:$0xff]   ;;  %v885_v34 = vsel %vm641_vm0, %v880_v19, %v884_v37  ;;  %v15950_v2 = vld [vmem:[%s15510_s8 + $0x198] sm:$0xff] }
  0x65   : > { %11984 = vmatpush3.bf16.msra.mxu1 %v14720_v29  ;;  %v922_v29 = vshll.u32 %v15888_v18, 16  ;;  %v933_v39 = vsel %vm641_vm0, %v928_v27, %v932_v24  ;;  %v15971_v20 = vcombine.high %v15950_v2, %v327_v3  ;;  %v15983_v32 = vcombine.low %v15950_v2, %v327_v3 }
  0x66   : > { %1541 = vmatmul.mubr.bf16.gmra.mrb[28].mxu1 %v765_v21  ;;  %13462 = vmatmul.mubr.bf16.gmra.mrb[28].mxu0 %v741_v22  ;;  %v856_v21 = vor.u32 %v854_v7, %v820_v62  ;;  %v860_v22 = vrot.slane %v858_v11, 1  ;;  %v1010_v7 = vshll.u32 %v15932_v51, 16  ;;  %v14745_v11 = vld [vmem:[%s15510_s8 + $0x150] ss:$20 sps:$4 sm:$0xff]  }
  0x67   : > { %1548 = vmatprep.mubr.bf16.mxu1 %v813_v26  ;;  %13465 = vmatprep.mubr.msk.bf16.mxu0 %vm15447_vm1, %v20447_v6  ;;  %v14746_v26 = vld [vmem:[%s20443_s1 + $0xa8] sm:$0xff]   ;;  %v1014_v41 = vshrl.u32 %v14745_v11, 16 }
  0x68   : > { %12064 = vmatpush3.bf16.msra.mxu0 %v14716_v25  ;;  %11985 = vmatprep.subr.bf16.mxu1 %v14727_v43  ;;  %v14743_v25 = vld [vmem:[%s20443_s1 + $0xe8] sm:$0xff]   ;;  %v861_v35 = vsel %vm641_vm0, %v856_v21, %v860_v22  ;;  %v14752_v43 = vld [vmem:[%s20443_s1 + $0xf0] sm:$0xff]   ;;  %v896_v50 = vor.u32 %v894_v38, %v860_v22  ;;  %v1012_v19 = vrot.slane %v1010_v7, 1 }
  0x69   : > { %12065 = vmatprep.subr.bf16.mxu0 %v14725_v40  ;;  %11986 = vmatpush3.bf16.msra.mxu1 %v14728_v44  ;;  %v966_v40 = vshrl.u32 %v15865_v60, 16  ;;  %v962_v44 = vshll.u32 %v15906_v30, 16 }
  0x6a   : > { %11987 = vmatprep.subr.bf16.mxu1 %v14739_v8  ;;  %v901_v61 = vsel %vm641_vm0, %v896_v50, %v900_v47  ;;  %v14758_v8 = vld [vmem:[%s20443_s1 + $0xb8] sm:$0xff]   ;;  %v328_v50 = vld [vmem:[%s15510_s8 + $0x1b4] sm:$0x1] }
  0x6b   : > { %v964_v62 = vrot.slane %v962_v44, 1 }
  0x6c   : > { %12066 = vmatpush3.bf16.msra.mxu0 %v14726_v42  ;;  %v924_v42 = vrot.slane %v922_v29, 1  ;;  %v1046_v29 = vshrl.u32 %v15932_v51, 16 }
  0x6d   : > { %12067 = vmatprep.subr.bf16.mxu0 %v14733_v58  ;;  %11988 = vmatpush3.bf16.msra.mxu1 %v14740_v14 }
  0x6e   : > { %1549 = vmatmul.mubr.bf16.gmra.mrb[32].mxu1 %v805_v45  ;;  %13466 = vmatmul.mubr.bf16.gmra.mrb[32].mxu0 %v781_v46  ;;  %v15927_v45 = vld [vmem:[%s15510_s8 + $0x128] ss:$20 sps:$4 sm:$0xff]   ;;  %v920_v46 = vor.u32 %v918_v36, %v884_v37  ;;  %v960_v14 = vor.u32 %v958_v55, %v924_v42  ;;  %v998_v37 = vshrl.u32 %v15906_v30, 16  ;;  %v14751_v30 = vld [vmem:[%s15510_s8 + $0x178] ss:$20 sps:$4 sm:$0xff]   ;;  %v1048_v38 = vor.u32 %v1046_v29, %v1012_v19 }
  0x6f   : > { %1556 = vmatprep.mubr.bf16.mxu1 %v853_v52  ;;  %13469 = vmatprep.mubr.msk.bf16.mxu0 %vm15447_vm1, %v20447_v6  ;;  %v968_v52 = vor.u32 %v966_v40, %v932_v24  ;;  %v938_v58 = vshll.u32 %v15927_v45, 16  ;;  %v974_v21 = vshrl.u32 %v15927_v45, 16  ;;  %v245_v45 = vld [vmem:[%s15510_s8 + $0x1a0] sm:$0xf]  ;;  %v16069_v29 = vld [vmem:[%s15510_s8 + $0x50] ss:$20 sps:$4 sm:$0xff]  }
  0x70   : > { %12068 = vmatpush3.bf16.msra.mxu0 %v14734_v63  ;;  %11989 = vmatprep.subr.bf16.mxu1 %v14747_v31  ;;  %v925_v60 = vsel %vm641_vm0, %v920_v46, %v924_v42  ;;  %v1006_v63 = vshrl.u32 %v15902_v28, 16  ;;  %v965_v22 = vsel %vm641_vm0, %v960_v14, %v964_v62  ;;  %v1050_v31 = vshll.u32 %v15971_v20, 16  ;;  %v14763_v14 = vld [vmem:[%s20443_s1 + $0x288] sm:$0xff]  }
  0x71   : > { %12069 = vmatprep.subr.bf16.mxu0 %v14743_v25  ;;  %11990 = vmatpush3.bf16.msra.mxu1 %v14748_v33  ;;  %v940_v10 = vrot.slane %v938_v58, 1  ;;  %v1000_v33 = vor.u32 %v998_v37, %v964_v62  ;;  %v1042_v42 = vshll.u32 %v15983_v32, 16  ;;  %v14768_v37 = vld [vmem:[%s20443_s1 + $0x2d8] sm:$0xff]  }
  0x72   : > { %11991 = vmatprep.subr.bf16.mxu1 %v14754_v57  ;;  %v1008_v17 = vor.u32 %v1006_v63, %v972_v53  ;;  %v15998_v57 = vcombine.low %v245_v45, %v328_v50  ;;  %v1068_v63 = vshrl.u32 %v15983_v32, 16  ;;  %v14782_v45 = vld [vmem:[%s20443_s1 + $0x2b8] sm:$0xff]   ;;  %v14789_v50 = vld [vmem:[%s20443_s1 + $0x340] sm:$0xff]  }
  0x74   : > { %12070 = vmatpush3.bf16.msra.mxu0 %v14746_v26  ;;  %v978_v26 = vshll.u32 %v14745_v11, 16  ;;  %v1013_v27 = vsel %vm641_vm0, %v1008_v17, %v1012_v19  ;;  %v1058_v62 = vshll.u32 %v15998_v57, 16  ;;  %v14761_v17 = vld [vmem:[%s20443_s1 + $0x100] sm:$0xff]   ;;  %v14764_v19 = vld [vmem:[%s20443_s1 + $0x108] sm:$0xff]  }
  0x75   : > { %12071 = vmatprep.subr.bf16.mxu0 %v14752_v43  ;;  %11992 = vmatpush3.bf16.msra.mxu1 %v14755_v59  ;;  %v1018_v43 = vshll.u32 %v14751_v30, 16 }
  0x76   : > { %1557 = vmatmul.mubr.bf16.gmra.mrb[36].mxu1 %v845_v5  ;;  %13470 = vmatmul.mubr.bf16.gmra.mrb[36].mxu0 %v821_v9  ;;  %v973_v5 = vsel %vm641_vm0, %v968_v52, %v972_v53  ;;  %v15962_v9 = vld [vmem:[%s15510_s8 + $0x170] ss:$20 sps:$4 sm:$0xff]   ;;  %v980_v36 = vrot.slane %v978_v26, 1  ;;  %v1044_v53 = vrot.slane %v1042_v42, 1  ;;  %v15264_v42 = vld [vmem:[%s15510_s8 + $0x58] ss:$20 sps:$4 sm:$0xff]  }
  0x77   : > { %1564 = vmatprep.mubr.bf16.mxu1 %v893_v16  ;;  %13473 = vmatprep.mubr.msk.bf16.mxu0 %vm15447_vm1, %v20447_v6  ;;  %v936_v16 = vor.u32 %v934_v56, %v900_v47  ;;  %v1002_v25 = vshll.u32 %v15962_v9, 16  ;;  %v1038_v40 = vshrl.u32 %v15962_v9, 16  ;;  %v1020_v55 = vrot.slane %v1018_v43, 1  ;;  %v14772_v26 = vld [vmem:[%s20443_s1 + $0x2a0] sm:$0xff]  }
  0x78   : > { %12072 = vmatpush3.bf16.msra.mxu0 %v14753_v54  ;;  %12160 = vmatprep.subr.bf16.mxu1 %v14759_v12  ;;  %v1016_v54 = vor.u32 %v1014_v41, %v980_v36  ;;  %v1071_v56 = vshrl.u32 %v15971_v20, 16  ;;  %v14762_v12 = vld [vmem:[%s20443_s1 + $0x2c8] sm:$0xff]   ;;  %v16104_v43 = vld [vmem:[%s15510_s8 + $0xa4] ss:$20 sps:$4 sm:$0xff]  }
  0x79   : > { %12073 = vmatprep.subr.bf16.mxu0 %v14757_v4  ;;  %v941_v24 = vsel %vm641_vm0, %v936_v16, %v940_v10  ;;  %v1060_v4 = vrot.slane %v1058_v62, 1  ;;  %v14765_v16 = vld [vmem:[%s20443_s1 + $0x2d0] sm:$0xff]   ;;  %v16099_v41 = vld [vmem:[%s15510_s8 + $0x78] ss:$20 sps:$4 sm:$0xff]  }
  0x7a   : > { %v1021_v59 = vsel %vm641_vm0, %v1016_v54, %v1020_v55  ;;  %v14784_v54 = vld [vmem:[%s20443_s1 + $0x138] sm:$0xff]   ;;  %v16148_v62 = vld [vmem:[%s15510_s8 + $0xf0] ss:$20 sps:$4 sm:$0xff]  }
  0x7c   : > { %12074 = vmatpush3.bf16.msra.mxu0 %v14758_v8  ;;  %v1074_v8 = vshrl.u32 %v15998_v57, 16 }
  0x7d   : > { %13501 = vmatprep.subr.bf16.mxu0 %v20447_v6 }
  0x7e   : > { %1565 = vmatmul.mubr.bf16.gmra.mrb[40].mxu1 %v885_v34  ;;  %13474 = vmatmul.mubr.bf16.gmra.mrb[40].mxu0 %v861_v35  ;;  %v1004_v34 = vrot.slane %v1002_v25, 1  ;;  %v976_v35 = vor.u32 %v974_v21, %v940_v10  ;;  %v14760_v10 = vld [vmem:[%s20443_s1 + $0x280] sm:$0xff]   ;;  %v1076_v11 = vor.u32 %v1074_v8, %v1060_v4  ;;  %v16047_v21 = vld [vmem:[%s15510_s8 + $0x54] ss:$20 sps:$4 sm:$0xff]  }
  0x7f   : > { %1572 = vmatprep.mubr.bf16.mxu1 %v933_v39  ;;  %13477 = vmatprep.mubr.msk.bf16.mxu0 %vm15447_vm1, %v20447_v6  ;;  %v1052_v39 = vrot.slane %v1050_v31, 1  ;;  %v14771_v25 = vld [vmem:[%s20443_s1 + $0x2e0] sm:$0xff]  }
  0x80   : > { %v1005_v47 = vsel %vm641_vm0, %v1000_v33, %v1004_v34  ;;  %v981_v44 = vsel %vm641_vm0, %v976_v35, %v980_v36  ;;  %v1040_v52 = vor.u32 %v1038_v40, %v1004_v34  ;;  %v15260_v31 = vld [vmem:[%s15510_s8 + $0x30] ss:$20 sps:$4 sm:$0xff]   ;;  %v14770_v34 = vld [vmem:[%s20443_s1 + $0x118] sm:$0xff]   ;;  %v14775_v35 = vld [vmem:[%s20443_s1 + $0x2a8] sm:$0xff]  }
  0x81   : > { %v1053_v46 = vsel %vm641_vm0, %v1048_v38, %v1052_v39  ;;  %v15262_v33 = vld [vmem:[%s15510_s8 + $0x5c] ss:$20 sps:$4 sm:$0xff]   ;;  %v14773_v36 = vld [vmem:[%s20443_s1 + $0x120] sm:$0xff]  }
  0x82   : > { %v1045_v58 = vsel %vm641_vm0, %v1040_v52, %v1044_v53  ;;  %v14777_v38 = vld [vmem:[%s20443_s1 + $0x2f0] sm:$0xff]   ;;  %v14780_v40 = vld [vmem:[%s20443_s1 + $0x2f8] sm:$0xff]  }
  0x83   : > { %v16123_v52 = vld [vmem:[%s15510_s8 + $0xa0] ss:$20 sps:$4 sm:$0xff]   ;;  %v16163_v8 = vld [vmem:[%s15510_s8 + $0x144] ss:$20 sps:$4 sm:$0xff]  }
  0x86   : > { %1573 = vmatmul.mubr.bf16.gmra.mrb[44].mxu1 %v925_v60  ;;  %13478 = vmatmul.mubr.bf16.gmra.mrb[44].mxu0 %v901_v61  ;;  %v1073_v60 = vor.u32 %v1071_v56, %v1052_v39  ;;  %v1054_v61 = vshrl.u32 %v14751_v30, 16  ;;  %v16074_v30 = vld [vmem:[%s15510_s8 + $0x7c] ss:$20 sps:$4 sm:$0xff]   ;;  %v15270_v56 = vld [vmem:[%s15510_s8 + $0xac] ss:$20 sps:$4 sm:$0xff]  }
  0x87   : > { %1580 = vmatprep.mubr.bf16.mxu1 %v973_v5  ;;  %13481 = vmatprep.mubr.msk.bf16.mxu0 %vm15447_vm1, %v20447_v6  ;;  %v1070_v5 = vor.u32 %v1068_v63, %v1044_v53  ;;  %v14778_v39 = vld [vmem:[%s20443_s1 + $0x2b0] sm:$0xff]  }
  0x88   : > { %v1056_v3 = vor.u32 %v1054_v61, %v1020_v55  ;;  %v15268_v53 = vld [vmem:[%s15510_s8 + $0x80] ss:$20 sps:$4 sm:$0xff]   ;;  %v15276_v63 = vld [vmem:[%s15510_s8 + $0xd0] ss:$20 sps:$4 sm:$0xff]  }
  0x89   : > { %v16131_v55 = vld [vmem:[%s15510_s8 + $0xcc] ss:$20 sps:$4 sm:$0xff]   ;;  %v15274_v61 = vld [vmem:[%s15510_s8 + $0xd4] ss:$20 sps:$4 sm:$0xff]  }
  0x8a   : > { %v1061_v7 = vsel %vm641_vm0, %v1056_v3, %v1060_v4  ;;  %v16153_v3 = vld [vmem:[%s15510_s8 + $0x11c] ss:$20 sps:$4 sm:$0xff]  }
  0x8b   : > { %v15278_v4 = vld [vmem:[%s15510_s8 + $0xfc] ss:$20 sps:$4 sm:$0xff]  }
  0x8e   : > { %1581 = vmatmul.mubr.bf16.gmra.mrb[48].mxu1 %v965_v22  ;;  %13482 = vmatmul.mubr.bf16.gmra.mrb[48].mxu0 %v941_v24  ;;  %v14769_v22 = vld [vmem:[%s20443_s1 + $0x298] sm:$0xff]   ;;  %v15258_v24 = vld [vmem:[%s15510_s8 + $0x34] ss:$20 sps:$4 sm:$0xff]  }
  0x8f   : > { %1588 = vmatprep.mubr.bf16.mxu1 %v1013_v27  ;;  %13485 = vmatprep.mubr.msk.bf16.mxu0 %vm15447_vm1, %v20447_v6  ;;  %v14774_v27 = vld [vmem:[%s20443_s1 + $0x2e8] sm:$0xff]  }
  0x96   : > { %1589 = vmatmul.mubr.bf16.gmra.mrb[52].mxu1 %v1005_v47  ;;  %13486 = vmatmul.mubr.bf16.gmra.mrb[52].mxu0 %v981_v44  ;;  %v15266_v47 = vld [vmem:[%s15510_s8 + $0x84] ss:$20 sps:$4 sm:$0xff]   ;;  %v14776_v44 = vld [vmem:[%s20443_s1 + $0x128] sm:$0xff]  }
  0x97   : > { %1596 = vmatprep.mubr.bf16.mxu1 %v1053_v46  ;;  %13489 = vmatprep.mubr.msk.bf16.mxu0 %vm15447_vm1, %v20447_v6  ;;  %v14779_v46 = vld [vmem:[%s20443_s1 + $0x130] sm:$0xff]  }
  0x9e   : > { %1597 = vmatmul.mubr.bf16.gmra.mrb[56].mxu1 %v1045_v58  ;;  %13490 = vmatmul.mubr.bf16.gmra.mrb[56].mxu0 %v1021_v59  ;;  %v16138_v58 = vld [vmem:[%s15510_s8 + $0xc8] ss:$20 sps:$4 sm:$0xff]  }
  0x9f   : > { %1604 = vmatprep.mubr.bf16.mxu1 %v1073_v60  ;;  %13493 = vmatprep.mubr.msk.bf16.mxu0 %vm15447_vm1, %v20447_v6  ;;  %v15272_v59 = vld [vmem:[%s15510_s8 + $0xa8] ss:$20 sps:$4 sm:$0xff]  }
  0xa0   : > { %v16143_v60 = vld [vmem:[%s15510_s8 + $0xf4] ss:$20 sps:$4 sm:$0xff]  }
  0xa6   : > { %1605 = vmatmul.mubr.bf16.gmra.mrb[60].mxu1 %v1070_v5  ;;  %13494 = vmatmul.mubr.bf16.gmra.mrb[60].mxu0 %v1061_v7  ;;  %v16158_v5 = vld [vmem:[%s15510_s8 + $0x118] ss:$20 sps:$4 sm:$0xff]  }
  0xa7   : > { %13497 = vmatprep.mubr.msk.bf16.mxu0 %vm15447_vm1, %v20447_v6  ;;  %2064 = vmatprep.mubr.bf16.mxu1 %v15520_v13  ;;  %v16022_v13 = vld [vmem:[%s15510_s8 + $0x2c] ss:$20 sps:$4 sm:$0xff]  }
  0xa8   : > { %v15280_v7 = vld [vmem:[%s15510_s8 + $0xf8] ss:$20 sps:$4 sm:$0xff]  }
  0xae   : > { %13498 = vmatmul.mubr.bf16.gmra.mrb[64].mxu0 %v1076_v11  ;;  %2065 = vmatmul.mubr.bf16.vlgmr.msra.gmra.mrb[64].mxu1 %v15525_v15  ;;  %v14766_v15 = vld [vmem:[%s20443_s1 + $0x290] sm:$0xff]  }
  0xaf   : > { %12161 = vmatpush3.bf16.msra.mxu1 %v14760_v10  ;;  %2072 = vmatprep.mubr.bf16.mxu1 %v16022_v13  ;;  %v15282_v10 = vld [vmem:[%s15510_s8 + $0x124] ss:$20 sps:$4 sm:$0xff]   ;;  %v16168_v11 = vld [vmem:[%s15510_s8 + $0x140] ss:$20 sps:$4 sm:$0xff]  }
  0xb0   : > { %2184 = vmatprep.mubr.bf16.mxu0 %v15702_v49  ;;  %12162 = vmatprep.subr.bf16.mxu1 %v14762_v12  ;;  %v16042_v49 = vld [vmem:[%s15510_s8 + $0x28] ss:$20 sps:$4 sm:$0xff]   ;;  %v2392_v12 = vld [vmem:[%s15510_s8] sm:$0xee] }
  0xb3   : > { %12163 = vmatpush3.bf16.msra.mxu1 %v14763_v14  ;;  %v16174_v14 = vld [vmem:[%s15510_s8 + $0x16c] ss:$20 sps:$4 sm:$0xff]  }
  0xb4   : > { %12164 = vmatprep.subr.bf16.mxu1 %v14765_v16  ;;  %v15285_v16 = vld [vmem:[%s15510_s8 + $0x190] sm:$0xff] }
  0xb6   : > { %2073 = vmatmul.mubr.bf16.gmra.mrb[68].mxu1 %v16042_v49  ;;  %2185 = vmatmul.mubr.bf16.vlgmr.msra.gmra.mrb[68].mxu0 %v15700_v48  ;;  %v14767_v48 = vld [vmem:[%s20443_s1 + $0x110] sm:$0xff]  }
  0xb7   : > { %13502 = vmatpush3.bf16.msra.mxu0 %v14761_v17  ;;  %2080 = vmatprep.mubr.bf16.mxu1 %v16047_v21  ;;  %v10702_v17 = vcombine.high %v15285_v16, %v15285_v16 }
  0xb8   : > { %2192 = vmatprep.mubr.bf16.mxu0 %v15258_v24  ;;  %13503 = vmatprep.subr.bf16.mxu0 %v20447_v6  ;;  %v2494_v24 = vrot.slane %v16022_v13, 1 }
  0xb9   : > { %12165 = vmatpush3.bf16.msra.mxu1 %v14766_v15  ;;  %v15286_v15 = vld [vmem:[%s15510_s8 + $0x14] sm:$0xff] }
  0xba   : > { %12166 = vmatprep.subr.bf16.mxu1 %v14768_v37  ;;  %v16181_v37 = vld [vmem:[%s15510_s8 + $0x168] ss:$20 sps:$4 sm:$0xff]  }
  0xbb   : > { %13504 = vmatpush3.bf16.msra.mxu0 %v14764_v19  ;;  %v10827_v19 = vcombine.high %v2392_v12, %v15286_v15 }
  0xbc   : > { %13505 = vmatprep.subr.bf16.mxu0 %v20447_v6 }
  0xbd   : > { %12167 = vmatpush3.bf16.msra.mxu1 %v14769_v22  ;;  %v15288_v22 = vld [vmem:[%s15510_s8 + $0x148] ss:$20 sps:$4 sm:$0xff]  }
  0xbe   : > { %2081 = vmatmul.mubr.bf16.gmra.mrb[72].mxu1 %v16069_v29  ;;  %2193 = vmatmul.mubr.bf16.gmra.mrb[72].mxu0 %v15260_v31  ;;  %v2491_v31 = vrot.slane %v16042_v49, 1  ;;  %v14790_v49 = vld [vmem:[%s20443_s1 + $0x300] sm:$0xff]  }
  0xbf   : > { %2088 = vmatprep.mubr.bf16.mxu1 %v16074_v30  ;;  %2200 = vmatprep.mubr.bf16.mxu0 %v15262_v33 }
  0xc0   : > { %13506 = vmatpush3.bf16.msra.mxu0 %v14767_v48  ;;  %12168 = vmatprep.subr.bf16.mxu1 %v14771_v25  ;;  %v10701_v48 = vcombine.low %v15285_v16, %v15285_v16  ;;  %v10826_v25 = vcombine.low %v2392_v12, %v15286_v15  ;;  %v14791_v16 = vld [vmem:[%s20443_s1 + $0x380] sm:$0xff]  }
  0xc1   : > { %13507 = vmatprep.subr.bf16.mxu0 %v20447_v6  ;;  %12169 = vmatpush3.bf16.msra.mxu1 %v14772_v26 }
  0xc2   : > { %12170 = vmatprep.subr.bf16.mxu1 %v14774_v27  ;;  %v2490_v27 = vrot.slane %v10826_v25, 1  ;;  %v14794_v25 = vld [vmem:[%s20443_s1 + $0x388] sm:$0xff]  }
  0xc4   : > { %13508 = vmatpush3.bf16.msra.mxu0 %v14770_v34  ;;  %v2507_v34 = vrot.slane %v16047_v21, 1  ;;  %v14792_v21 = vld [vmem:[%s20443_s1 + $0x348] sm:$0xff]  }
  0xc5   : > { %13509 = vmatprep.subr.bf16.mxu0 %v20447_v6  ;;  %12171 = vmatpush3.bf16.msra.mxu1 %v14775_v35 }
  0xc6   : > { %2089 = vmatmul.mubr.bf16.gmra.mrb[76].mxu1 %v16099_v41  ;;  %2201 = vmatmul.mubr.bf16.gmra.mrb[76].mxu0 %v15264_v42  ;;  %v2492_v42 = vsel %vm2489_vm2, %v2490_v27, %v2491_v31 }
  0xc7   : > { %2096 = vmatprep.mubr.bf16.mxu1 %v16104_v43  ;;  %2208 = vmatprep.mubr.bf16.mxu0 %v15266_v47 }
  0xc8   : > { %13510 = vmatpush3.bf16.msra.mxu0 %v14773_v36  ;;  %12172 = vmatprep.subr.bf16.mxu1 %v14777_v38  ;;  %v10703_v36 = vcombine.low %v15950_v2, %v15950_v2 }
  0xc9   : > { %13511 = vmatprep.subr.bf16.mxu0 %v20447_v6  ;;  %12173 = vmatpush3.bf16.msra.mxu1 %v14778_v39 }
  0xca   : > { %12174 = vmatprep.subr.bf16.mxu1 %v14780_v40 }
  0xcc   : > { %13512 = vmatpush3.bf16.msra.mxu0 %v14776_v44 }
  0xcd   : > { %13513 = vmatprep.subr.bf16.mxu0 %v20447_v6  ;;  %12175 = vmatpush3.bf16.msra.mxu1 %v14782_v45 }
  0xce   : > { %2097 = vmatmul.mubr.bf16.gmra.mrb[80].mxu1 %v16123_v52  ;;  %2209 = vmatmul.mubr.bf16.gmra.mrb[80].mxu0 %v15268_v53  ;;  %v14793_v53 = vld [vmem:[%s20443_s1 + $0x308] sm:$0xff]  }
  0xcf   : > { %2104 = vmatprep.mubr.bf16.mxu1 %v16131_v55  ;;  %2216 = vmatprep.mubr.bf16.mxu0 %v15270_v56  ;;  %v14795_v56 = vld [vmem:[%s20443_s1 + $0x350] sm:$0xff]  }
  0xd0   : > { %13514 = vmatpush3.bf16.msra.mxu0 %v14779_v46  ;;  %12242 = vmatprep.subr.bf16.mxu1 %v14789_v50  ;;  %v2508_v46 = vsel %vm2489_vm2, %v2494_v24, %v2507_v34  ;;  %v2505_v50 = vrot.slane %v16069_v29, 1 }
  0xd1   : > { %13515 = vmatprep.subr.bf16.mxu0 %v20447_v6 }
  0xd2   : > { %v2506_v12 = vsel %vm2489_vm2, %v2491_v31, %v2505_v50 }
  0xd4   : > { %13516 = vmatpush3.bf16.msra.mxu0 %v14784_v54  ;;  %v2517_v54 = vrot.slane %v16074_v30, 1 }
  0xd5   : > { %13561 = vmatprep.subr.bf16.mxu0 %v20447_v6 }
  0xd6   : > { %2105 = vmatmul.mubr.bf16.gmra.mrb[84].mxu1 %v16138_v58  ;;  %2217 = vmatmul.mubr.bf16.gmra.mrb[84].mxu0 %v15272_v59 }
  0xd7   : > { %2112 = vmatprep.mubr.bf16.mxu1 %v16143_v60  ;;  %2224 = vmatprep.mubr.bf16.mxu0 %v15274_v61 }
  0xde   : > { %2113 = vmatmul.mubr.bf16.gmra.mrb[88].mxu1 %v16148_v62  ;;  %2225 = vmatmul.mubr.bf16.gmra.mrb[88].mxu0 %v15276_v63 }
  0xdf   : > { %2120 = vmatprep.mubr.bf16.mxu1 %v16153_v3  ;;  %2232 = vmatprep.mubr.bf16.mxu0 %v15278_v4 }
  0xe6   : > { %2121 = vmatmul.mubr.bf16.gmra.mrb[92].mxu1 %v16158_v5  ;;  %2233 = vmatmul.mubr.bf16.gmra.mrb[92].mxu0 %v15280_v7 }
  0xe7   : > { %2128 = vmatprep.mubr.bf16.mxu1 %v16163_v8  ;;  %2240 = vmatprep.mubr.bf16.mxu0 %v15282_v10 }
  0xee   : > { %2129 = vmatmul.mubr.bf16.gmra.mrb[96].mxu1 %v16168_v11  ;;  %2241 = vmatmul.mubr.bf16.gmra.mrb[96].mxu0 %v15888_v18  ;;  %v2493_v18 = vrot.slane %v10827_v19, 1 }
  0xef   : > { %2136 = vmatprep.mubr.bf16.mxu1 %v16174_v14  ;;  %2248 = vmatprep.mubr.bf16.mxu0 %v15902_v28  ;;  %v10704_v28 = vcombine.high %v15950_v2, %v15950_v2 }
  0xf0   : > { %v2495_v26 = vsel %vm2489_vm2, %v2493_v18, %v2494_v24  ;;  %v2518_v24 = vsel %vm2489_vm2, %v2507_v34, %v2517_v54 }
  0xf6   : > { %2137 = vmatmul.mubr.bf16.gmra.mrb[100].mxu1 %v16181_v37  ;;  %2249 = vmatmul.mubr.bf16.gmra.mrb[100].mxu0 %v15288_v22 }
  0xf7   : > { %2144 = vmatprep.mubr.bf16.mxu1 %v10702_v17  ;;  %2256 = vmatprep.mubr.bf16.mxu0 %v15932_v51  ;;  %v14796_v17 = vld [vmem:[%s20443_s1 + $0x310] sm:$0xff]  }
  0xfe   : > { %2145 = vmatmul.mubr.bf16.gmra.mrb[104].mxu1 %v10701_v48  ;;  %2257 = vmatmul.mubr.bf16.gmra.mrb[104].mxu0 %v15962_v9  ;;  %v2515_v48 = vrot.slane %v16099_v41, 1  ;;  %v14799_v41 = vld [vmem:[%s20443_s1 + $0x318] sm:$0xff]  }
  0xff   : > { %2264 = vmatprep.mubr.bf16.mxu0 %v10704_v28  ;;  %2922 = vmatprep.mubr.bf16.mxu1 %v2495_v26  ;;  %v14798_v28 = vld [vmem:[%s20443_s1 + $0x358] sm:$0xff]   ;;  %v2527_v26 = vrot.slane %v16104_v43, 1 }
 0x101   : > { %v11810_v51 = vpop.f32.mrb[0].mxu0  ;;  %v11846_v33 = vpop.f32.mrb[0].mxu1 }
 0x102   : > { %v11811_v13 = vpop.f32.mrb[1].mxu0  ;;  %v11847_v35 = vpop.f32.mrb[1].mxu1 }
 0x103   : > { %v16195_v38 = vadd.f32 %v11811_v13, %v11810_v51  ;;  %v16197_v39 = vadd.f32 %v11847_v35, %v11846_v33  ;;  %v11813_v40 = vpop.f32.mrb[2].mxu0  ;;  %v11849_v9 = vpop.f32.mrb[2].mxu1  ;;  %v2516_v35 = vsel %vm2489_vm2, %v2505_v50, %v2515_v48  ;;  %v16276_v50 = vld [vmem:[%s15510_s8 + $0x38] ss:$20 sps:$4 sm:$0xff]  }
 0x104   : > { %v11814_v47 = vpop.f32.mrb[3].mxu0  ;;  %v11850_v44 = vpop.f32.mrb[3].mxu1 }
 0x105   : > { %v16206_v45 = vadd.f32 %v11814_v47, %v11813_v40  ;;  %v16208_v2 = vadd.f32 %v11850_v44, %v11849_v9  ;;  %v14801_v40 = vld [vmem:[%s20443_s1 + $0x360] sm:$0xff]  }
 0x106   : > { %2265 = vmatmul.mubr.bf16.gmra.mrb[108].mxu0 %v10703_v36  ;;  %2923 = vmatmul.mubr.bf16.vlgmr.msra.gmra.mrb[108].mxu1 %v2492_v42  ;;  %v14797_v36 = vld [vmem:[%s20443_s1 + $0x390] sm:$0xff]   ;;  %v14802_v44 = vld [vmem:[%s20443_s1 + $0x320] sm:$0xff]  }
 0x107   : > { %12243 = vmatpush3.bf16.msra.mxu1 %v14790_v49  ;;  %13517 = vmatprep.mubr.msk.bf16.mxu0 %vm15447_vm1, %v20447_v6  ;;  %v2528_v49 = vsel %vm2489_vm2, %v2517_v54, %v2527_v26  ;;  %v2537_v54 = vrot.slane %v16131_v55, 1 }
 0x108   : > { %2930 = vmatprep.mubr.bf16.mxu1 %v2508_v46  ;;  %12244 = vmatprep.subr.bf16.mxu1 %v14792_v21  ;;  %v14804_v46 = vld [vmem:[%s20443_s1 + $0x368] sm:$0xff]  }
 0x109   : > { %v11816_v59 = vpop.f32.mrb[4].mxu0  ;;  %v11852_v61 = vpop.f32.mrb[4].mxu1 }
 0x10a   : > { %v11817_v63 = vpop.f32.mrb[5].mxu0  ;;  %v11853_v29 = vpop.f32.mrb[5].mxu1 }
 0x10b   : > { %v16221_v4 = vadd.f32 %v11817_v63, %v11816_v59  ;;  %v16223_v7 = vadd.f32 %v11853_v29, %v11852_v61  ;;  %v11819_v10 = vpop.f32.mrb[6].mxu0  ;;  %v11855_v30 = vpop.f32.mrb[6].mxu1  ;;  %12245 = vmatpush3.bf16.msra.mxu1 %v14793_v53  ;;  %v2525_v53 = vrot.slane %v16123_v52, 1  ;;  %v14805_v59 = vld [vmem:[%s20443_s1 + $0x328] sm:$0xff]   ;;  %v14803_v52 = vld [vmem:[%s20443_s1 + $0x3a0] sm:$0xff]  }
 0x10c   : > { %v11820_v15 = vpop.f32.mrb[7].mxu0  ;;  %v11856_v19 = vpop.f32.mrb[7].mxu1  ;;  %12246 = vmatprep.subr.bf16.mxu1 %v14795_v56  ;;  %v14800_v56 = vld [vmem:[%s20443_s1 + $0x398] sm:$0xff]  }
 0x10d   : > { %v16232_v22 = vadd.f32 %v11820_v15, %v11819_v10  ;;  %v16234_v18 = vadd.f32 %v11856_v19, %v11855_v30  ;;  %v14807_v15 = vld [vmem:[%s20443_s1 + $0x370] sm:$0xff]  }
 0x10e   : > { %13518 = vmatmul.mubr.bf16.vlgmr.msra.gmra.mrb[24].mxu0 %v15740_v23  ;;  %2931 = vmatmul.mubr.bf16.gmra.mrb[112].mxu1 %v2506_v12  ;;  %v14808_v19 = vld [vmem:[%s20443_s1 + $0x330] sm:$0xff]  }
 0x10f   : > { %13562 = vmatpush3.bf16.msra.mxu0 %v14791_v16  ;;  %13521 = vmatprep.mubr.msk.bf16.mxu0 %vm15447_vm1, %v20447_v6 }
 0x110   : > { %2938 = vmatprep.mubr.bf16.mxu1 %v2518_v24  ;;  %13563 = vmatprep.subr.bf16.mxu0 %v20447_v6 }
 0x111   : > { %v11822_v27 = vpop.f32.mrb[8].mxu0  ;;  %v11858_v31 = vpop.f32.mrb[8].mxu1  ;;  %12247 = vmatpush3.bf16.msra.mxu1 %v14796_v17  ;;  %v2526_v17 = vsel %vm2489_vm2, %v2515_v48, %v2525_v53 }
 0x112   : > { %v11823_v51 = vpop.f32.mrb[9].mxu0  ;;  %v11859_v33 = vpop.f32.mrb[9].mxu1  ;;  %12248 = vmatprep.subr.bf16.mxu1 %v14798_v28  ;;  %v2538_v28 = vsel %vm2489_vm2, %v2527_v26, %v2537_v54  ;;  %v2535_v26 = vrot.slane %v16138_v58, 1 }
 0x113   : > { %v16252_v23 = vadd.f32 %v11823_v51, %v11822_v27  ;;  %v16254_v34 = vadd.f32 %v11859_v33, %v11858_v31  ;;  %v11825_v13 = vpop.f32.mrb[10].mxu0  ;;  %v11861_v43 = vpop.f32.mrb[10].mxu1  ;;  %13564 = vmatpush3.bf16.msra.mxu0 %v14794_v25  ;;  %v16314_v31 = vld [vmem:[%s15510_s8 + $0x60] ss:$20 sps:$4 sm:$0xff]   ;;  %v2547_v51 = vrot.slane %v16143_v60, 1  ;;  %v14806_v33 = vld [vmem:[%s20443_s1 + $0x3a8] sm:$0xff]  }
 0x114   : > { %v11826_v9 = vpop.f32.mrb[11].mxu0  ;;  %v11862_v42 = vpop.f32.mrb[11].mxu1  ;;  %13565 = vmatprep.subr.bf16.mxu0 %v20447_v6 }
 0x115   : > { %v16265_v21 = vadd.f32 %v11826_v9, %v11825_v13  ;;  %v16267_v47 = vadd.f32 %v11862_v42, %v11861_v43  ;;  %12249 = vmatpush3.bf16.msra.mxu1 %v14799_v41  ;;  %v14810_v41 = vld [vmem:[%s20443_s1 + $0x378] sm:$0xff]  }
 0x116   : > { %13522 = vmatmul.mubr.bf16.gmra.mrb[28].mxu0 %v16276_v50  ;;  %2939 = vmatmul.mubr.bf16.gmra.mrb[116].mxu1 %v2516_v35  ;;  %v14811_v35 = vld [vmem:[%s20443_s1 + $0x338] sm:$0xff]  }
 0x117   : > { %13525 = vmatprep.mubr.msk.bf16.mxu0 %vm15447_vm1, %v20447_v6  ;;  %2946 = vmatprep.mubr.bf16.mxu1 %v2528_v49  ;;  %v2536_v49 = vsel %vm2489_vm2, %v2525_v53, %v2535_v26  ;;  %v16345_v53 = vld [vmem:[%s15510_s8 + $0x88] ss:$20 sps:$4 sm:$0xff]  }
 0x118   : > { %13566 = vmatpush3.bf16.msra.mxu0 %v14797_v36  ;;  %12250 = vmatprep.subr.bf16.mxu1 %v14801_v40 }
 0x119   : > { %v11828_v61 = vpop.f32.mrb[12].mxu0  ;;  %v11864_v63 = vpop.f32.mrb[12].mxu1  ;;  %13567 = vmatprep.subr.bf16.mxu0 %v20447_v6  ;;  %12251 = vmatpush3.bf16.msra.mxu1 %v14802_v44  ;;  %v14809_v44 = vld [vmem:[%s20443_s1 + $0x3b0] sm:$0xff]  }
 0x11a   : > { %v11829_v29 = vpop.f32.mrb[13].mxu0  ;;  %v11865_v10 = vpop.f32.mrb[13].mxu1  ;;  %12252 = vmatprep.subr.bf16.mxu1 %v14804_v46  ;;  %v14816_v46 = vld [vmem:[%s20443_s1 + $0x400] sm:$0xff]  }
 0x11b   : > { %v16293_v55 = vadd.f32 %v11829_v29, %v11828_v61  ;;  %v16295_v30 = vadd.f32 %v11865_v10, %v11864_v63  ;;  %v11831_v12 = vpop.f32.mrb[14].mxu0  ;;  %v11867_v16 = vpop.f32.mrb[14].mxu1  ;;  %v2548_v61 = vsel %vm2489_vm2, %v2537_v54, %v2547_v51  ;;  %v2545_v29 = vrot.slane %v16148_v62, 1  ;;  %v14812_v54 = vld [vmem:[%s20443_s1 + $0x3b8] sm:$0xff]  }
 0x11c   : > { %v11832_v24 = vpop.f32.mrb[15].mxu0  ;;  %v11868_v25 = vpop.f32.mrb[15].mxu1  ;;  %13568 = vmatpush3.bf16.msra.mxu0 %v14800_v56  ;;  %v2557_v10 = vrot.slane %v16153_v3, 1 }
 0x11d   : > { %v16308_v27 = vadd.f32 %v11832_v24, %v11831_v12  ;;  %v16310_v48 = vadd.f32 %v11868_v25, %v11867_v16  ;;  %13569 = vmatprep.subr.bf16.mxu0 %v20447_v6  ;;  %12253 = vmatpush3.bf16.msra.mxu1 %v14805_v59  ;;  %v14819_v12 = vld [vmem:[%s20443_s1 + $0x480] sm:$0xff]   ;;  %v2546_v25 = vsel %vm2489_vm2, %v2535_v26, %v2545_v29 }
 0x11e   : > { %13526 = vmatmul.mubr.bf16.gmra.mrb[32].mxu0 %v16314_v31  ;;  %2947 = vmatmul.mubr.bf16.gmra.mrb[120].mxu1 %v2526_v17 }
 0x11f   : > { %13529 = vmatprep.mubr.msk.bf16.mxu0 %vm15447_vm1, %v20447_v6  ;;  %2954 = vmatprep.mubr.bf16.mxu1 %v2538_v28 }
 0x120   : > { %13570 = vmatpush3.bf16.msra.mxu0 %v14803_v52  ;;  %12254 = vmatprep.subr.bf16.mxu1 %v14807_v15 }
 0x121   : > { %v11834_v13 = vpop.f32.mrb[16].mxu0  ;;  %v11870_v43 = vpop.f32.mrb[16].mxu1  ;;  %13571 = vmatprep.subr.bf16.mxu0 %v20447_v6  ;;  %12255 = vmatpush3.bf16.msra.mxu1 %v14808_v19 }
 0x122   : > { %v11835_v36 = vpop.f32.mrb[17].mxu0  ;;  %v11871_v40 = vpop.f32.mrb[17].mxu1  ;;  %12256 = vmatprep.subr.bf16.mxu1 %v14810_v41 }
 0x123   : > { %v16328_v58 = vadd.f32 %v11835_v36, %v11834_v13  ;;  %v16330_v60 = vadd.f32 %v11871_v40, %v11870_v43  ;;  %v11837_v9 = vpop.f32.mrb[18].mxu0  ;;  %v11873_v42 = vpop.f32.mrb[18].mxu1  ;;  %v16368_v36 = vld [vmem:[%s15510_s8 + $0xb0] ss:$20 sps:$4 sm:$0xff]  }
 0x124   : > { %v11838_v56 = vpop.f32.mrb[19].mxu0  ;;  %v11874_v59 = vpop.f32.mrb[19].mxu1  ;;  %13572 = vmatpush3.bf16.msra.mxu0 %v14806_v33  ;;  %v2558_v33 = vsel %vm2489_vm2, %v2547_v51, %v2557_v10  ;;  %v2567_v51 = vrot.slane %v16163_v8, 1  ;;  %v2565_v8 = vrot.slane %v16168_v11, 1 }
 0x125   : > { %v16340_v63 = vadd.f32 %v11838_v56, %v11837_v9  ;;  %13573 = vmatprep.subr.bf16.mxu0 %v20447_v6  ;;  %12257 = vmatpush3.bf16.msra.mxu1 %v14811_v35 }
 0x126   : > { %13530 = vmatmul.mubr.bf16.gmra.mrb[36].mxu0 %v16345_v53  ;;  %2955 = vmatmul.mubr.bf16.gmra.mrb[124].mxu1 %v2536_v49  ;;  %v2568_v56 = vsel %vm2489_vm2, %v2557_v10, %v2567_v51 }
 0x127   : > { %13533 = vmatprep.mubr.msk.bf16.mxu0 %vm15447_vm1, %v20447_v6  ;;  %2962 = vmatprep.mubr.bf16.mxu1 %v2548_v61  ;;  %v16384_v61 = vld [vmem:[%s15510_s8 + $0xd8] ss:$20 sps:$4 sm:$0xff]  }
 0x128   : > { %13574 = vmatpush3.bf16.msra.mxu0 %v14809_v44  ;;  %12343 = vmatprep.subr.bf16.mxu1 %v14816_v46 }
 0x129   : > { %v11840_v62 = vpop.f32.mrb[20].mxu0  ;;  %v11892_v52 = vpop.f32.mrb[20].mxu1  ;;  %13575 = vmatprep.subr.bf16.mxu0 %v20447_v6 }
 0x12a   : > { %v11841_v16 = vpop.f32.mrb[21].mxu0  ;;  %v11893_v17 = vpop.f32.mrb[21].mxu1 }
 0x12b   : > { %v16358_v15 = vadd.f32 %v11841_v16, %v11840_v62  ;;  %v11894_v3 = vadd.f32 %v11893_v17, %v11892_v52  ;;  %v11843_v19 = vpop.f32.mrb[22].mxu0  ;;  %v11895_v24 = vpop.f32.mrb[22].mxu1 }
 0x12c   : > { %v11844_v28 = vpop.f32.mrb[23].mxu0  ;;  %v11896_v41 = vpop.f32.mrb[23].mxu1  ;;  %13576 = vmatpush3.bf16.msra.mxu0 %v14812_v54 }
 0x12d   : > { %v16363_v13 = vadd.f32 %v11894_v3, %v16195_v38  ;;  %v16365_v43 = vadd.f32 %v11844_v28, %v11843_v19  ;;  %v11897_v35 = vadd.f32 %v11896_v41, %v11895_v24  ;;  %12425 = vmatprep.subr.bf16.mxu0 %v14819_v12  ;;  %v2555_v38 = vrot.slane %v16158_v5, 1  ;;  %v16400_v3 = vld [vmem:[%s15510_s8 + $0x100] ss:$20 sps:$4 sm:$0xff]  }
 0x12e   : > { %13534 = vmatmul.mubr.bf16.gmra.mrb[40].mxu0 %v16368_v36  ;;  %2963 = vmatmul.mubr.bf16.gmra.mrb[128].mxu1 %v2546_v25  ;;  %v2587_v19 = vrot.slane %v15648_v0, 1 }
 0x12f   : > { %v16372_v26 = vadd.f32 %v11897_v35, %v16206_v45  ;;  %13537 = vmatprep.mubr.msk.bf16.mxu0 %vm15447_vm1, %v20447_v6  ;;  %2970 = vmatprep.mubr.bf16.mxu1 %v2558_v33  ;;  %v2556_v44 = vsel %vm2489_vm2, %v2545_v29, %v2555_v38  ;;  %v2577_v29 = vrot.slane %v16174_v14, 1  ;;  %v2566_v52 = vsel %vm2489_vm2, %v2555_v38, %v2565_v8 }
 0x130   : > { %v2575_v14 = vrot.slane %v16181_v37, 1  ;;  %v2585_v37 = vrot.slane %v15650_v1, 1 }
 0x131   : > { %v11898_v40 = vpop.f32.mrb[24].mxu1  ;;  %v2578_v16 = vsel %vm2489_vm2, %v2567_v51, %v2577_v29  ;;  %v2588_v35 = vsel %vm2489_vm2, %v2577_v29, %v2587_v19  ;;  %v16416_v51 = vld [vmem:[%s15510_s8 + $0x128] ss:$20 sps:$4 sm:$0xff]   ;;  %v16432_v29 = vld [vmem:[%s15510_s8 + $0x150] ss:$20 sps:$4 sm:$0xff]  }
 0x132   : > { %v11899_v9 = vpop.f32.mrb[25].mxu1  ;;  %v2576_v41 = vsel %vm2489_vm2, %v2565_v8, %v2575_v14 }
 0x133   : > { %v11900_v42 = vadd.f32 %v11899_v9, %v11898_v40  ;;  %v11901_v49 = vpop.f32.mrb[26].mxu1 }
 0x134   : > { %v11902_v46 = vpop.f32.mrb[27].mxu1 }
 0x135   : > { %v16381_v45 = vadd.f32 %v11900_v42, %v16221_v4  ;;  %v11903_v59 = vadd.f32 %v11902_v46, %v11901_v49 }
 0x136   : > { %13538 = vmatmul.mubr.bf16.gmra.mrb[44].mxu0 %v16384_v61  ;;  %2971 = vmatmul.mubr.bf16.gmra.mrb[132].mxu1 %v2556_v44  ;;  %v2586_v44 = vsel %vm2489_vm2, %v2575_v14, %v2585_v37 }
 0x137   : > { %v16388_v5 = vadd.f32 %v11903_v59, %v16232_v22  ;;  %13541 = vmatprep.mubr.msk.bf16.mxu0 %vm15447_vm1, %v20447_v6  ;;  %2978 = vmatprep.mubr.bf16.mxu1 %v2568_v56  ;;  %v15296_v56 = vld [vmem:[%s15510_s8 + $0x1c] sm:$0xff] }
 0x139   : > { %v11904_v4 = vpop.f32.mrb[28].mxu1 }
 0x13a   : > { %v11905_v10 = vpop.f32.mrb[29].mxu1 }
 0x13b   : > { %v11906_v54 = vadd.f32 %v11905_v10, %v11904_v4  ;;  %v11907_v62 = vpop.f32.mrb[30].mxu1  ;;  %v15298_v10 = vld [vmem:[%s15510_s8 + $0x34] ss:$20 sps:$4 sm:$0xff]  }
 0x13c   : > { %v11908_v12 = vpop.f32.mrb[31].mxu1 }
 0x13d   : > { %v16397_v22 = vadd.f32 %v11906_v54, %v16252_v23  ;;  %v11909_v17 = vadd.f32 %v11908_v12, %v11907_v62  ;;  %v2500_v54 = vrot.slane %v15298_v10, 1 }
 0x13e   : > { %13542 = vmatmul.mubr.bf16.gmra.mrb[48].mxu0 %v16400_v3  ;;  %2979 = vmatmul.mubr.bf16.gmra.mrb[136].mxu1 %v2566_v52 }
 0x13f   : > { %v16404_v11 = vadd.f32 %v11909_v17, %v16265_v21  ;;  %13545 = vmatprep.mubr.msk.bf16.mxu0 %vm15447_vm1, %v20447_v6  ;;  %2986 = vmatprep.mubr.bf16.mxu1 %v2578_v16 }
 0x141   : > { %v11910_v23 = vpop.f32.mrb[32].mxu1 }
 0x142   : > { %v11911_v24 = vpop.f32.mrb[33].mxu1 }
 0x143   : > { %v11912_v25 = vadd.f32 %v11911_v24, %v11910_v23  ;;  %v11913_v28 = vpop.f32.mrb[34].mxu1 }
 0x144   : > { %v11914_v33 = vpop.f32.mrb[35].mxu1 }
 0x145   : > { %v16413_v21 = vadd.f32 %v11912_v25, %v16293_v55  ;;  %v11915_v38 = vadd.f32 %v11914_v33, %v11913_v28  ;;  %v2393_v55 = vld [vmem:[%s15510_s8 + $0x8] sm:$0xee]  ;;  %v15300_v28 = vld [vmem:[%s15510_s8 + $0x30] ss:$20 sps:$4 sm:$0xff]  }
 0x146   : > { %13546 = vmatmul.mubr.bf16.gmra.mrb[52].mxu0 %v16416_v51  ;;  %2987 = vmatmul.mubr.bf16.gmra.mrb[140].mxu1 %v2576_v41  ;;  %v10829_v59 = vcombine.high %v2393_v55, %v15296_v56  ;;  %v10828_v16 = vcombine.low %v2393_v55, %v15296_v56  ;;  %v2497_v41 = vrot.slane %v15300_v28, 1  ;;  %v15302_v55 = vld [vmem:[%s15510_s8 + $0x1a0] sm:$0xf] }
 0x147   : > { %v16420_v0 = vadd.f32 %v11915_v38, %v16308_v27  ;;  %13549 = vmatprep.mubr.msk.bf16.mxu0 %vm15447_vm1, %v20447_v6  ;;  %2994 = vmatprep.mubr.bf16.mxu1 %v2588_v35  ;;  %v2394_v35 = vld [vmem:[%s15510_s8 + $0x10] sm:$0xe] }
 0x148   : > { %v2499_v4 = vrot.slane %v10829_v59, 1  ;;  %v2496_v25 = vrot.slane %v10828_v16, 1  ;;  %v14822_v16 = vld [vmem:[%s20443_s1 + $0x3c8] sm:$0xff]  }
 0x149   : > { %v11916_v40 = vpop.f32.mrb[36].mxu1 }
 0x14a   : > { %v11917_v9 = vpop.f32.mrb[37].mxu1  ;;  %v2501_v14 = vsel %vm2489_vm2, %v2499_v4, %v2500_v54 }
 0x14b   : > { %v11918_v42 = vadd.f32 %v11917_v9, %v11916_v40  ;;  %v11919_v49 = vpop.f32.mrb[38].mxu1  ;;  %v10705_v9 = vcombine.low %v15302_v55, %v15302_v55  ;;  %v14823_v55 = vld [vmem:[%s20443_s1 + $0x488] sm:$0xff]  }
 0x14c   : > { %v11920_v46 = vpop.f32.mrb[39].mxu1 }
 0x14d   : > { %v16429_v27 = vadd.f32 %v11918_v42, %v16328_v58  ;;  %v11921_v8 = vadd.f32 %v11920_v46, %v11919_v49  ;;  %v14817_v49 = vld [vmem:[%s20443_s1 + $0x3c0] sm:$0xff]  }
 0x14e   : > { %13550 = vmatmul.mubr.bf16.gmra.mrb[56].mxu0 %v16432_v29  ;;  %2995 = vmatmul.mubr.bf16.gmra.mrb[144].mxu1 %v2586_v44  ;;  %v15303_v44 = vld [vmem:[%s15510_s8 + $0x24] sm:$0xf] }
 0x14f   : > { %v16436_v1 = vadd.f32 %v11921_v8, %v16340_v63  ;;  %13553 = vmatprep.mubr.msk.bf16.mxu0 %vm15447_vm1, %v20447_v6  ;;  %3002 = vmatprep.mubr.bf16.mxu1 %v2587_v19  ;;  %v16446_v19 = vld [vmem:[%s15510_s8 + $0x178] ss:$20 sps:$4 sm:$0xff]   ;;  %v10830_v46 = vcombine.low %v2394_v35, %v15303_v44  ;;  %v14820_v35 = vld [vmem:[%s20443_s1 + $0x440] sm:$0xff]  }
 0x150   : > { %v14821_v8 = vld [vmem:[%s20443_s1 + $0x408] sm:$0xff]  }
 0x151   : > { %v11922_v62 = vpop.f32.mrb[40].mxu1  ;;  %v14824_v44 = vld [vmem:[%s20443_s1 + $0x448] sm:$0xff]  }
 0x152   : > { %v11923_v58 = vpop.f32.mrb[41].mxu1 }
 0x153   : > { %v11924_v52 = vadd.f32 %v11923_v58, %v11922_v62  ;;  %v11925_v12 = vpop.f32.mrb[42].mxu1  ;;  %v15304_v58 = vld [vmem:[%s15510_s8 + $0x58] ss:$20 sps:$4 sm:$0xff]  }
 0x154   : > { %v11926_v17 = vpop.f32.mrb[43].mxu1 }
 0x155   : > { %v16443_v63 = vadd.f32 %v11924_v52, %v16358_v15  ;;  %v11927_v23 = vadd.f32 %v11926_v17, %v11925_v12  ;;  %v15301_v15 = vld [vmem:[%s15510_s8 + $0x5c] ss:$20 sps:$4 sm:$0xff]   ;;  %v2509_v52 = vrot.slane %v15304_v58, 1  ;;  %v2502_v12 = vrot.slane %v10830_v46, 1  ;;  %v15307_v46 = vld [vmem:[%s15510_s8 + $0xac] ss:$20 sps:$4 sm:$0xff]  }
 0x156   : > { %13554 = vmatmul.mubr.bf16.gmra.mrb[60].mxu0 %v16446_v19  ;;  %3003 = vmatmul.mubr.bf16.gmra.mrb[148].mxu1 %v2585_v37  ;;  %v2511_v33 = vrot.slane %v15301_v15, 1 }
 0x157   : > { %v16450_v24 = vadd.f32 %v11927_v23, %v16365_v43  ;;  %13557 = vmatprep.mubr.msk.bf16.mxu0 %vm15447_vm1, %v20447_v6  ;;  %3042 = vmatprep.mubr.bf16.mxu1 %v2501_v14  ;;  %v2498_v43 = vsel %vm2489_vm2, %v2496_v25, %v2497_v41 }
 0x158   : > { %v2512_v59 = vsel %vm2489_vm2, %v2500_v54, %v2511_v33  ;;  %v2503_v54 = vrot.slane %v16276_v50, 1  ;;  %v2510_v50 = vsel %vm2489_vm2, %v2497_v41, %v2509_v52 }
 0x159   : > { %v11928_v38 = vpop.f32.mrb[44].mxu1 }
 0x15a   : > { %v11929_v40 = vpop.f32.mrb[45].mxu1  ;;  %v2504_v15 = vsel %vm2489_vm2, %v2502_v12, %v2503_v54 }
 0x15b   : > { %v11930_v42 = vadd.f32 %v11929_v40, %v11928_v38  ;;  %v11931_v37 = vpop.f32.mrb[46].mxu1 }
 0x15c   : > { %v11932_v56 = vpop.f32.mrb[47].mxu1 }
 0x15d   : > { %v16468_v4 = vadd.f32 %v11930_v42, %v16197_v39  ;;  %v11933_v10 = vadd.f32 %v11932_v56, %v11931_v37  ;;  %v15305_v39 = vld [vmem:[%s15510_s8 + $0x84] ss:$20 sps:$4 sm:$0xff]   ;;  %v14826_v42 = vld [vmem:[%s20443_s1 + $0x3d0] sm:$0xff]   ;;  %v2531_v56 = vrot.slane %v15307_v46, 1 }
 0x15e   : > { %13558 = vmatmul.mubr.bf16.gmra.mrb[64].mxu0 %v10705_v9  ;;  %3043 = vmatmul.mubr.bf16.vlgmr.msra.gmra.mrb[152].mxu1 %v2498_v43  ;;  %v2521_v17 = vrot.slane %v15305_v39, 1  ;;  %v15306_v43 = vld [vmem:[%s15510_s8 + $0x80] ss:$20 sps:$4 sm:$0xff]  }
 0x15f   : > { %v16471_v62 = vadd.f32 %v11933_v10, %v16208_v2  ;;  %12344 = vmatpush3.bf16.msra.mxu1 %v14817_v49  ;;  %3050 = vmatprep.mubr.bf16.mxu1 %v2512_v59  ;;  %v14825_v2 = vld [vmem:[%s20443_s1 + $0x410] sm:$0xff]   ;;  %v2519_v49 = vrot.slane %v15306_v43, 1 }
 0x160   : > { %13577 = vmatprep.mubr.msk.bf16.mxu0 %vm15447_vm1, %v20447_v6  ;;  %12345 = vmatprep.subr.bf16.mxu1 %v14821_v8  ;;  %v2522_v40 = vsel %vm2489_vm2, %v2511_v33, %v2521_v17  ;;  %v14829_v33 = vld [vmem:[%s20443_s1 + $0x418] sm:$0xff]   ;;  %v14828_v10 = vld [vmem:[%s20443_s1 + $0x450] sm:$0xff]  }
 0x161   : > { %v11934_v14 = vpop.f32.mrb[48].mxu1 }
 0x162   : > { %v11935_v23 = vpop.f32.mrb[49].mxu1 }
 0x163   : > { %v11936_v25 = vadd.f32 %v11935_v23, %v11934_v14  ;;  %v11937_v28 = vpop.f32.mrb[50].mxu1  ;;  %12346 = vmatpush3.bf16.msra.mxu1 %v14822_v16  ;;  %v2520_v16 = vsel %vm2489_vm2, %v2509_v52, %v2519_v49  ;;  %v14833_v14 = vld [vmem:[%s20443_s1 + $0x420] sm:$0xff]  }
 0x164   : > { %v11938_v38 = vpop.f32.mrb[51].mxu1  ;;  %12347 = vmatprep.subr.bf16.mxu1 %v14825_v2  ;;  %v14831_v2 = vld [vmem:[%s20443_s1 + $0x498] sm:$0xff]   ;;  %v14834_v52 = vld [vmem:[%s20443_s1 + $0x3e0] sm:$0xff]  }
 0x165   : > { %v16494_v9 = vadd.f32 %v11936_v25, %v16223_v7  ;;  %v11939_v41 = vadd.f32 %v11938_v38, %v11937_v28  ;;  %v2513_v7 = vrot.slane %v16314_v31, 1  ;;  %v14830_v31 = vld [vmem:[%s20443_s1 + $0x3d8] sm:$0xff]   ;;  %v2532_v25 = vsel %vm2489_vm2, %v2521_v17, %v2531_v56  ;;  %v15309_v38 = vld [vmem:[%s15510_s8 + $0xd4] ss:$20 sps:$4 sm:$0xff]  }
 0x166   : > { %3051 = vmatmul.mubr.bf16.gmra.mrb[156].mxu1 %v2510_v50  ;;  %13578 = vmatmul.mubr.bf16.vlgmr.msra.gmra.mrb[24].mxu0 %v2504_v15  ;;  %v14837_v50 = vld [vmem:[%s20443_s1 + $0x428] sm:$0xff]  }
 0x167   : > { %v16503_v37 = vadd.f32 %v11939_v41, %v16234_v18  ;;  %12426 = vmatpush3.bf16.msra.mxu0 %v14820_v35  ;;  %3058 = vmatprep.mubr.bf16.mxu1 %v2522_v40  ;;  %v14827_v18 = vld [vmem:[%s20443_s1 + $0x490] sm:$0xff]   ;;  %v2514_v39 = vsel %vm2489_vm2, %v2503_v54, %v2513_v7  ;;  %v15308_v17 = vld [vmem:[%s15510_s8 + $0xa8] ss:$20 sps:$4 sm:$0xff]   ;;  %v2541_v40 = vrot.slane %v15309_v38, 1 }
 0x168   : > { %13581 = vmatprep.mubr.msk.bf16.mxu0 %vm15447_vm1, %v20447_v6  ;;  %12427 = vmatprep.subr.bf16.mxu0 %v14823_v55  ;;  %v2529_v35 = vrot.slane %v15308_v17, 1  ;;  %v14832_v55 = vld [vmem:[%s20443_s1 + $0x458] sm:$0xff]  }
 0x169   : > { %v11940_v59 = vpop.f32.mrb[52].mxu1  ;;  %12348 = vmatpush3.bf16.msra.mxu1 %v14826_v42  ;;  %v14838_v42 = vld [vmem:[%s20443_s1 + $0x3e8] sm:$0xff]  }
 0x16a   : > { %v11941_v8 = vpop.f32.mrb[53].mxu1  ;;  %12349 = vmatprep.subr.bf16.mxu1 %v14829_v33  ;;  %v14836_v33 = vld [vmem:[%s20443_s1 + $0x460] sm:$0xff]   ;;  %v2530_v46 = vsel %vm2489_vm2, %v2519_v49, %v2529_v35  ;;  %v14842_v49 = vld [vmem:[%s20443_s1 + $0x3f0] sm:$0xff]  }
 0x16b   : > { %v11942_v58 = vadd.f32 %v11941_v8, %v11940_v59  ;;  %v11943_v12 = vpop.f32.mrb[54].mxu1  ;;  %12428 = vmatpush3.bf16.msra.mxu0 %v14824_v44  ;;  %v14839_v59 = vld [vmem:[%s20443_s1 + $0x4a8] sm:$0xff]  }
 0x16c   : > { %v11944_v23 = vpop.f32.mrb[55].mxu1  ;;  %12429 = vmatprep.subr.bf16.mxu0 %v14827_v18 }
 0x16d   : > { %v16535_v54 = vadd.f32 %v11942_v58, %v16254_v34  ;;  %v11945_v28 = vadd.f32 %v11944_v23, %v11943_v12  ;;  %12350 = vmatpush3.bf16.msra.mxu1 %v14830_v31  ;;  %v2523_v34 = vrot.slane %v16345_v53, 1  ;;  %v14841_v31 = vld [vmem:[%s20443_s1 + $0x430] sm:$0xff]   ;;  %v14845_v12 = vld [vmem:[%s20443_s1 + $0x438] sm:$0xff]   ;;  %v14840_v23 = vld [vmem:[%s20443_s1 + $0x468] sm:$0xff]  }
 0x16e   : > { %3059 = vmatmul.mubr.bf16.gmra.mrb[160].mxu1 %v2520_v16  ;;  %13582 = vmatmul.mubr.bf16.gmra.mrb[28].mxu0 %v2514_v39  ;;  %v15310_v16 = vld [vmem:[%s15510_s8 + $0xd0] ss:$20 sps:$4 sm:$0xff]  }
 0x16f   : > { %v16541_v15 = vadd.f32 %v11945_v28, %v16267_v47  ;;  %3066 = vmatprep.mubr.bf16.mxu1 %v2532_v25  ;;  %13585 = vmatprep.mubr.msk.bf16.mxu0 %vm15447_vm1, %v20447_v6  ;;  %v14835_v47 = vld [vmem:[%s20443_s1 + $0x4a0] sm:$0xff]   ;;  %v2524_v18 = vsel %vm2489_vm2, %v2513_v7, %v2523_v34  ;;  %v2539_v39 = vrot.slane %v15310_v16, 1 }
 0x170   : > { %12430 = vmatpush3.bf16.msra.mxu0 %v14828_v10  ;;  %12351 = vmatprep.subr.bf16.mxu1 %v14833_v14  ;;  %v2542_v10 = vsel %vm2489_vm2, %v2531_v56, %v2541_v40 }
 0x171   : > { %v11946_v41 = vpop.f32.mrb[56].mxu1  ;;  %12431 = vmatprep.subr.bf16.mxu0 %v14831_v2  ;;  %12352 = vmatpush3.bf16.msra.mxu1 %v14834_v52  ;;  %v15311_v2 = vld [vmem:[%s15510_s8 + $0xfc] ss:$20 sps:$4 sm:$0xff]   ;;  %v2540_v17 = vsel %vm2489_vm2, %v2529_v35, %v2539_v39 }
 0x172   : > { %v11947_v53 = vpop.f32.mrb[57].mxu1  ;;  %12353 = vmatprep.subr.bf16.mxu1 %v14837_v50  ;;  %v2551_v14 = vrot.slane %v15311_v2, 1  ;;  %v14846_v52 = vld [vmem:[%s20443_s1 + $0x3f8] sm:$0xff]  }
 0x173   : > { %v11948_v43 = vadd.f32 %v11947_v53, %v11946_v41  ;;  %v11949_v44 = vpop.f32.mrb[58].mxu1  ;;  %v14847_v41 = vld [vmem:[%s20443_s1 + $0x4b8] sm:$0xff]   ;;  %v14854_v53 = vld [vmem:[%s20443_s1 + $0x540] sm:$0xff]  }
 0x174   : > { %v11950_v8 = vpop.f32.mrb[59].mxu1  ;;  %12432 = vmatpush3.bf16.msra.mxu0 %v14832_v55  ;;  %v14844_v55 = vld [vmem:[%s20443_s1 + $0x470] sm:$0xff]  }
 0x175   : > { %v16573_v7 = vadd.f32 %v11948_v43, %v16295_v30  ;;  %v11951_v58 = vadd.f32 %v11950_v8, %v11949_v44  ;;  %12433 = vmatprep.subr.bf16.mxu0 %v14835_v47  ;;  %12354 = vmatpush3.bf16.msra.mxu1 %v14838_v42  ;;  %v2533_v30 = vrot.slane %v16368_v36, 1  ;;  %v2552_v42 = vsel %vm2489_vm2, %v2541_v40, %v2551_v14  ;;  %v15313_v43 = vld [vmem:[%s15510_s8 + $0x124] ss:$20 sps:$4 sm:$0xff]  }
 0x176   : > { %3067 = vmatmul.mubr.bf16.gmra.mrb[164].mxu1 %v2530_v46  ;;  %13586 = vmatmul.mubr.bf16.gmra.mrb[32].mxu0 %v2524_v18  ;;  %v2543_v40 = vrot.slane %v16384_v61, 1  ;;  %v2561_v44 = vrot.slane %v15313_v43, 1 }
 0x177   : > { %v16579_v56 = vadd.f32 %v11951_v58, %v16310_v48  ;;  %3074 = vmatprep.mubr.bf16.mxu1 %v2542_v10  ;;  %13589 = vmatprep.mubr.msk.bf16.mxu0 %vm15447_vm1, %v20447_v6  ;;  %v14843_v48 = vld [vmem:[%s20443_s1 + $0x4b0] sm:$0xff]   ;;  %v2534_v38 = vsel %vm2489_vm2, %v2523_v34, %v2533_v30  ;;  %v15312_v34 = vld [vmem:[%s15510_s8 + $0xf8] ss:$20 sps:$4 sm:$0xff]  }
 0x178   : > { %12434 = vmatpush3.bf16.msra.mxu0 %v14836_v33  ;;  %12355 = vmatprep.subr.bf16.mxu1 %v14841_v31  ;;  %v2549_v33 = vrot.slane %v15312_v34, 1  ;;  %v2544_v10 = vsel %vm2489_vm2, %v2533_v30, %v2543_v40  ;;  %v2553_v30 = vrot.slane %v16400_v3, 1 }
 0x179   : > { %v11952_v25 = vpop.f32.mrb[60].mxu1  ;;  %12435 = vmatprep.subr.bf16.mxu0 %v14839_v59  ;;  %12356 = vmatpush3.bf16.msra.mxu1 %v14842_v49  ;;  %v2562_v49 = vsel %vm2489_vm2, %v2551_v14, %v2561_v44 }
 0x17a   : > { %v11953_v36 = vpop.f32.mrb[61].mxu1  ;;  %12357 = vmatprep.subr.bf16.mxu1 %v14845_v12  ;;  %v2550_v8 = vsel %vm2489_vm2, %v2539_v39, %v2549_v33  ;;  %v15314_v39 = vld [vmem:[%s15510_s8 + $0x120] ss:$20 sps:$4 sm:$0xff]  }
 0x17b   : > { %v11954_v28 = vadd.f32 %v11953_v36, %v11952_v25  ;;  %v11955_v50 = vpop.f32.mrb[62].mxu1  ;;  %v2559_v2 = vrot.slane %v15314_v39, 1 }
 0x17c   : > { %v11956_v47 = vpop.f32.mrb[63].mxu1  ;;  %12436 = vmatpush3.bf16.msra.mxu0 %v14840_v23  ;;  %v15315_v23 = vld [vmem:[%s15510_s8 + $0x14c] ss:$20 sps:$4 sm:$0xff]  }
 0x17d   : > { %v16608_v35 = vadd.f32 %v11954_v28, %v16330_v60  ;;  %12437 = vmatprep.subr.bf16.mxu0 %v14843_v48  ;;  %12358 = vmatpush3.bf16.msra.mxu1 %v14846_v52  ;;  %v14848_v60 = vld [vmem:[%s20443_s1 + $0x478] sm:$0xff]   ;;  %v2571_v14 = vrot.slane %v15315_v23, 1 }
 0x17e   : > { %3075 = vmatmul.mubr.bf16.gmra.mrb[168].mxu1 %v2540_v17  ;;  %13590 = vmatmul.mubr.bf16.gmra.mrb[36].mxu0 %v2534_v38  ;;  %v2554_v38 = vsel %vm2489_vm2, %v2543_v40, %v2553_v30 }
 0x17f   : > { %3082 = vmatprep.mubr.bf16.mxu1 %v2552_v42  ;;  %13593 = vmatprep.mubr.msk.bf16.mxu0 %vm15447_vm1, %v20447_v6  ;;  %v2572_v3 = vsel %vm2489_vm2, %v2561_v44, %v2571_v14  ;;  %v2563_v44 = vrot.slane %v16416_v51, 1 }
 0x180   : > { %12438 = vmatpush3.bf16.msra.mxu0 %v14844_v55  ;;  %12526 = vmatprep.subr.bf16.mxu1 %v14854_v53 }
 0x181   : > { %v11993_v46 = vpop.f32.mrb[64].mxu1  ;;  %12439 = vmatprep.subr.bf16.mxu0 %v14847_v41 }
 0x182   : > { %v11994_v18 = vpop.f32.mrb[65].mxu1 }
 0x183   : > { %v11995_v59 = vadd.f32 %v11994_v18, %v11993_v46  ;;  %v11996_v31 = vpop.f32.mrb[66].mxu1  ;;  %v15317_v46 = vld [vmem:[%s15510_s8 + $0x174] ss:$20 sps:$4 sm:$0xff]  }
 0x184   : > { %v11997_v61 = vpop.f32.mrb[67].mxu1  ;;  %12440 = vmatpush3.bf16.msra.mxu0 %v14848_v60  ;;  %v2581_v18 = vrot.slane %v15317_v46, 1 }
 0x185   : > { %v11998_v58 = vadd.f32 %v11997_v61, %v11996_v31  ;;  %v13997_v12 = vadd.f32 %v11995_v59, %v16363_v13  ;;  %13621 = vmatprep.subr.bf16.mxu0 %v20447_v6 }
 0x186   : > { %3083 = vmatmul.mubr.bf16.gmra.mrb[172].mxu1 %v2550_v8  ;;  %13594 = vmatmul.mubr.bf16.gmra.mrb[40].mxu0 %v2544_v10  ;;  %v2582_v39 = vsel %vm2489_vm2, %v2571_v14, %v2581_v18 }
 0x187   : > { %v14007_v16 = vadd.f32 %v11998_v58, %v16372_v26  ;;  %3090 = vmatprep.mubr.bf16.mxu1 %v2562_v49  ;;  %13597 = vmatprep.mubr.msk.bf16.mxu0 %vm15447_vm1, %v20447_v6  ;;  %v2560_v26 = vsel %vm2489_vm2, %v2549_v33, %v2559_v2  ;;  %v15316_v33 = vld [vmem:[%s15510_s8 + $0x148] ss:$20 sps:$4 sm:$0xff]  }
 0x188   : > { %v2569_v40 = vrot.slane %v15316_v33, 1 }
 0x189   : > { %v11999_v25 = vpop.f32.mrb[68].mxu1  ;;  %v12075_v48 = vpop.f32.mrb[68].mxu0 }
 0x18a   : > { %v12000_v52 = vpop.f32.mrb[69].mxu1  ;;  %v12076_v13 = vpop.f32.mrb[69].mxu0  ;;  %v2570_v58 = vsel %vm2489_vm2, %v2559_v2, %v2569_v40  ;;  %v15318_v2 = vld [vmem:[%s15510_s8 + $0x170] ss:$20 sps:$4 sm:$0xff]  }
 0x18b   : > { %v12001_v36 = vadd.f32 %v12000_v52, %v11999_v25  ;;  %v12077_v28 = vadd.f32 %v12076_v13, %v12075_v48  ;;  %v12002_v50 = vpop.f32.mrb[70].mxu1  ;;  %v12078_v17 = vpop.f32.mrb[70].mxu0  ;;  %v3271_v13 = vld [vmem:[%s15510_s8 + $0x14] sm:$0x88] }
 0x18c   : > { %v12003_v55 = vpop.f32.mrb[71].mxu1  ;;  %v12079_v41 = vpop.f32.mrb[71].mxu0 }
 0x18d   : > { %v16632_v47 = vadd.f32 %v13997_v12, %v12077_v28  ;;  %v12004_v42 = vadd.f32 %v12003_v55, %v12002_v50  ;;  %v12080_v53 = vadd.f32 %v12079_v41, %v12078_v17  ;;  %v14017_v34 = vadd.f32 %v12001_v36, %v16381_v45  ;;  %v3274_v28 = vld [vmem:[%s15510_s8 + $0x28] sm:$0xff]  ;;  %v3277_v50 = vld [vmem:[%s15510_s8 + $0x3c] sm:$0xff] }
 0x18e   : > { %3091 = vmatmul.mubr.bf16.gmra.mrb[176].mxu1 %v2560_v26  ;;  %13598 = vmatmul.mubr.bf16.gmra.mrb[44].mxu0 %v2554_v38  ;;  %v2564_v12 = vsel %vm2489_vm2, %v2553_v30, %v2563_v44  ;;  %v2579_v36 = vrot.slane %v15318_v2, 1  ;;  %v2573_v30 = vrot.slane %v16432_v29, 1  ;;  %v2591_v26 = vrot.slane %v15971_v20, 1  ;;  %v3272_v2 = vld [vmem:[%s15510_s8 + $0x1c] sm:$0x88] }
 0x18f   : > { %20498 = vst [vmem:[#allocation2_spill] sm:$0xff] %v16632_v47  ;;  %v16635_v43 = vadd.f32 %v14007_v16, %v12080_v53  ;;  %v14027_v60 = vadd.f32 %v12004_v42, %v16388_v5  ;;  %3098 = vmatprep.mubr.bf16.mxu1 %v2572_v3  ;;  %13601 = vmatprep.mubr.msk.bf16.mxu0 %vm15447_vm1, %v20447_v6  ;;  %v20446_v38 = vrot.slane %v15983_v32, 1  ;;  %v3283_v3 = vld [vmem:[%s15510_s8 + $0x64] sm:$0xff]  ;;  %v3286_v42 = vld [vmem:[%s15510_s8 + $0x78] sm:$0xff] }
 0x190   : > { %v16668_v33 = vcombine.high %v3271_v13, %v3274_v28 }
 0x191   : > { %20499 = vst [vmem:[#allocation3_spill] sm:$0xff] %v16635_v43  ;;  %v12005_v59 = vpop.f32.mrb[72].mxu1  ;;  %v12081_v31 = vpop.f32.mrb[72].mxu0 }
 0x192   : > { %v12006_v45 = vpop.f32.mrb[73].mxu1  ;;  %v12082_v8 = vpop.f32.mrb[73].mxu0  ;;  %20502 = vst [vmem:[#allocation6_spill] sm:$0xff] %v16668_v33 }
 0x193   : > { %v12007_v10 = vadd.f32 %v12006_v45, %v12005_v59  ;;  %v12083_v61 = vadd.f32 %v12082_v8, %v12081_v31  ;;  %v12008_v49 = vpop.f32.mrb[74].mxu1  ;;  %v12084_v5 = vpop.f32.mrb[74].mxu0 }
 0x194   : > { %v12009_v16 = vpop.f32.mrb[75].mxu1  ;;  %v12085_v51 = vpop.f32.mrb[75].mxu0 }
 0x195   : > { %v16646_v23 = vadd.f32 %v14017_v34, %v12083_v61  ;;  %v12010_v25 = vadd.f32 %v12009_v16, %v12008_v49  ;;  %v12086_v48 = vadd.f32 %v12085_v51, %v12084_v5  ;;  %v14037_v52 = vadd.f32 %v12007_v10, %v16397_v22  ;;  %v3280_v22 = vld [vmem:[%s15510_s8 + $0x50] sm:$0xff] }
 0x196   : > { %3099 = vmatmul.mubr.bf16.gmra.mrb[180].mxu1 %v2570_v58  ;;  %13602 = vmatmul.mubr.bf16.gmra.mrb[48].mxu0 %v2564_v12  ;;  %v16670_v46 = vcombine.high %v3277_v50, %v3280_v22  ;;  %v2583_v10 = vrot.slane %v16446_v19, 1  ;;  %v20449_v61 = vrot.slane %v15998_v57, 1  ;;  %v16679_v58 = vcombine.low %v3277_v50, %v3280_v22  ;;  %v3275_v22 = vld [vmem:[%s15510_s8 + $0x30] sm:$0xff]  ;;  %v16722_v50 = vld [vmem:[%s15510_s8 + $0x118] sm:$0xff] }
 0x197   : > { %20500 = vst [vmem:[#allocation4_spill] sm:$0xff] %v16646_v23  ;;  %v16654_v17 = vadd.f32 %v14027_v60, %v12086_v48  ;;  %v14047_v14 = vadd.f32 %v12010_v25, %v16404_v11  ;;  %3106 = vmatprep.mubr.bf16.mxu1 %v2582_v39  ;;  %13605 = vmatprep.mubr.msk.bf16.mxu0 %vm15447_vm1, %v20447_v6 }
 0x198   : > { %v2580_v60 = vsel %vm2489_vm2, %v2569_v40, %v2579_v36  ;;  %v2574_v11 = vsel %vm2489_vm2, %v2563_v44, %v2573_v30  ;;  %20503 = vst [vmem:[#allocation7_spill] sm:$0xff] %v16670_v46  ;;  %v2592_v40 = vsel %vm2489_vm2, %v2581_v18, %v2591_v26  ;;  %v16677_v44 = vcombine.low %v3271_v13, %v3274_v28 }
 0x199   : > { %20501 = vst [vmem:[#allocation5_spill] sm:$0xff] %v16654_v17  ;;  %v12011_v55 = vpop.f32.mrb[76].mxu1  ;;  %v12087_v41 = vpop.f32.mrb[76].mxu0  ;;  %20505 = vst [vmem:[#allocation9_spill] sm:$0xff] %v16679_v58  ;;  %v16681_v12 = vcombine.high %v3283_v3, %v3286_v42  ;;  %v20450_v48 = vrot.slane %v16670_v46, 3 }
 0x19a   : > { %v12012_v53 = vpop.f32.mrb[77].mxu1  ;;  %v12088_v34 = vpop.f32.mrb[77].mxu0  ;;  %20504 = vst [vmem:[#allocation8_spill] sm:$0xff] %v16677_v44 }
 0x19b   : > { %v12013_v59 = vadd.f32 %v12012_v53, %v12011_v55  ;;  %v12089_v31 = vadd.f32 %v12088_v34, %v12087_v41  ;;  %v12014_v45 = vpop.f32.mrb[78].mxu1  ;;  %v12090_v8 = vpop.f32.mrb[78].mxu0  ;;  %v3278_v55 = vld [vmem:[%s15510_s8 + $0x44] sm:$0xff]  ;;  %v3281_v41 = vld [vmem:[%s15510_s8 + $0x58] sm:$0xff] }
 0x19c   : > { %v12015_v49 = vpop.f32.mrb[79].mxu1  ;;  %v12091_v5 = vpop.f32.mrb[79].mxu0  ;;  %v16704_v34 = vld [vmem:[%s15510_s8 + $0xa0] sm:$0xff] }
 0x19d   : > { %v16683_v16 = vadd.f32 %v14037_v52, %v12089_v31  ;;  %v12016_v51 = vadd.f32 %v12015_v49, %v12014_v45  ;;  %v12092_v39 = vadd.f32 %v12091_v5, %v12090_v8  ;;  %v14057_v25 = vadd.f32 %v12013_v59, %v16413_v21  ;;  %v16738_v21 = vld [vmem:[%s15510_s8 + $0x6c] sm:$0xff] }
 0x19e   : > { %3107 = vmatmul.mubr.bf16.gmra.mrb[184].mxu1 %v2580_v60  ;;  %13606 = vmatmul.mubr.bf16.gmra.mrb[52].mxu0 %v2574_v11  ;;  %v2590_v59 = vsel %vm2489_vm2, %v2579_v36, %v20446_v38  ;;  %v16709_v31 = vcombine.low %v3283_v3, %v3286_v42  ;;  %v16724_v42 = vcombine.low %v3272_v2, %v3275_v22  ;;  %v16741_v38 = vld [vmem:[%s15510_s8 + $0x80] sm:$0xff] }
 0x19f   : > { %20506 = vst [vmem:[#allocation10_spill] sm:$0xff] %v16683_v16  ;;  %v16688_v13 = vadd.f32 %v14047_v14, %v12092_v39  ;;  %v14067_v52 = vadd.f32 %v12016_v51, %v16420_v0  ;;  %3114 = vmatprep.mubr.bf16.mxu1 %v2592_v40  ;;  %13609 = vmatprep.mubr.msk.bf16.mxu0 %vm15447_vm1, %v20447_v6  ;;  %v16701_v0 = vld [vmem:[%s15510_s8 + $0x8c] sm:$0xff]  ;;  %v16719_v39 = vld [vmem:[%s15510_s8 + $0x104] sm:$0xff] }
 0x1a0   : > { %v2584_v40 = vsel %vm2489_vm2, %v2573_v30, %v2583_v10  ;;  %v16716_v51 = vcombine.high %v3272_v2, %v3275_v22  ;;  %v16732_v29 = vcombine.high %v16701_v0, %v16704_v34  ;;  %v16745_v22 = vld [vmem:[%s15510_s8 + $0xdc] sm:$0xff]  ;;  %v2594_v2 = vsel %vm2489_vm2, %v2583_v10, %v20449_v61 }
 0x1a1   : > { %20507 = vst [vmem:[#allocation11_spill] sm:$0xff] %v16688_v13  ;;  %v12017_v53 = vpop.f32.mrb[80].mxu1  ;;  %v12093_v14 = vpop.f32.mrb[80].mxu0 }
 0x1a2   : > { %v12018_v60 = vpop.f32.mrb[81].mxu1  ;;  %v12094_v11 = vpop.f32.mrb[81].mxu0  ;;  %20508 = vst [vmem:[#allocation12_spill] sm:$0xff] %v16716_v51 }
 0x1a3   : > { %v12019_v45 = vadd.f32 %v12018_v60, %v12017_v53  ;;  %v12095_v8 = vadd.f32 %v12094_v11, %v12093_v14  ;;  %v12020_v49 = vpop.f32.mrb[82].mxu1  ;;  %v12096_v5 = vpop.f32.mrb[82].mxu0  ;;  %v16726_v53 = vcombine.high %v3278_v55, %v3281_v41  ;;  %v16728_v14 = vcombine.low %v3278_v55, %v3281_v41 }
 0x1a4   : > { %v12021_v36 = vpop.f32.mrb[83].mxu1  ;;  %v12097_v3 = vpop.f32.mrb[83].mxu0 }
 0x1a5   : > { %20509 = vst [vmem:[#allocation13_spill] sm:$0xff] %v16726_v53  ;;  %v16734_v30 = vadd.f32 %v14057_v25, %v12095_v8  ;;  %v12022_v60 = vadd.f32 %v12021_v36, %v12020_v49  ;;  %v12098_v11 = vadd.f32 %v12097_v3, %v12096_v5  ;;  %v14077_v28 = vadd.f32 %v12019_v45, %v16429_v27  ;;  %v16756_v25 = vld [vmem:[%s15510_s8 + $0xf0] sm:$0xff]  ;;  %v16785_v45 = vld [vmem:[%s15510_s8 + $0x140] sm:$0xff] }
 0x1a6   : > { %3115 = vmatmul.mubr.bf16.gmra.mrb[188].mxu1 %v2590_v59  ;;  %13610 = vmatmul.mubr.bf16.gmra.mrb[56].mxu0 %v2584_v40  ;;  %v16760_v59 = vcombine.low %v16719_v39, %v16722_v50  ;;  %v16770_v3 = vcombine.high %v16738_v21, %v16741_v38  ;;  %v16782_v27 = vld [vmem:[%s15510_s8 + $0x12c] sm:$0xff] }
 0x1a7   : > { %20510 = vst [vmem:[#allocation14_spill] sm:$0xff] %v16734_v30  ;;  %v16747_v55 = vadd.f32 %v14067_v52, %v12098_v11  ;;  %v14087_v41 = vadd.f32 %v12022_v60, %v16436_v1  ;;  %3122 = vmatprep.mubr.bf16.mxu1 %v2591_v26  ;;  %13613 = vmatprep.mubr.msk.bf16.mxu0 %vm15447_vm1, %v20447_v6  ;;  %v20514_v30 = vrot.slane %v15983_v32, 1 }
 0x1a8   : > { %v4795_v49 = vshrl.u32 %v16760_v59, 16  ;;  %v4798_v5 = vshll.u32 %v16760_v59, 16  ;;  %v16774_v60 = vcombine.low %v16745_v22, %v16756_v25 }
 0x1a9   : > { %20511 = vst [vmem:[#allocation15_spill] sm:$0xff] %v16747_v55  ;;  %v12023_v26 = vpop.f32.mrb[84].mxu1  ;;  %v12099_v8 = vpop.f32.mrb[84].mxu0  ;;  %v20512_v55 = vrot.slane %v16668_v33, 3 }
 0x1aa   : > { %v12024_v40 = vpop.f32.mrb[85].mxu1  ;;  %v12100_v36 = vpop.f32.mrb[85].mxu0  ;;  %v4797_v16 = vrot.slane %v4795_v49, 3  ;;  %v16818_v49 = vld [vmem:[%s15510_s8 + $0x168] sm:$0xff] }
 0x1ab   : > { %v12025_v11 = vadd.f32 %v12024_v40, %v12023_v26  ;;  %v12101_v52 = vadd.f32 %v12100_v36, %v12099_v8  ;;  %v12026_v1 = vpop.f32.mrb[86].mxu1  ;;  %v12102_v20 = vpop.f32.mrb[86].mxu0  ;;  %v3655_v26 = vsel %vm3649_vm3, %v20512_v55, %v20450_v48  ;;  %v4750_v8 = vshrl.u32 %v16774_v60, 16 }
 0x1ac   : > { %v12027_v6 = vpop.f32.mrb[87].mxu1  ;;  %v12103_v18 = vpop.f32.mrb[87].mxu0  ;;  %v4753_v40 = vshll.u32 %v16774_v60, 16  ;;  %v4800_v55 = vrot.slane %v4798_v5, 4  ;;  %v16802_v48 = vcombine.low %v16782_v27, %v16785_v45 }
 0x1ad   : > { %v16794_v36 = vadd.f32 %v14077_v28, %v12101_v52  ;;  %v12028_v19 = vadd.f32 %v12027_v6, %v12026_v1  ;;  %v12104_v10 = vadd.f32 %v12103_v18, %v12102_v20  ;;  %v14097_v61 = vadd.f32 %v12025_v11, %v16443_v63  ;;  %v14855_v20 = vld [vmem:[%s20443_s1 + $0x500] sm:$0xff]  }
 0x1ae   : > { %3123 = vmatmul.mubr.bf16.gmra.mrb[192].mxu1 %v20514_v30  ;;  %13614 = vmatmul.mubr.bf16.gmra.mrb[60].mxu0 %v2594_v2  ;;  %v20516_v18 = vmov 0.0   ;;  %v4752_v32 = vrot.slane %v4750_v8, 3  ;;  %v4755_v63 = vrot.slane %v4753_v40, 4  ;;  %v4840_v30 = vshrl.u32 %v16802_v48, 16  ;;  %v14864_v40 = vld [vmem:[%s20443_s1 + $0x548] sm:$0xff]  }
 0x1af   : > { %20513 = vst [vmem:[#allocation16_spill] sm:$0xff] %v16794_v36  ;;  %v16804_v28 = vadd.f32 %v14087_v41, %v12104_v10  ;;  %v14107_v6 = vadd.f32 %v12028_v19, %v16450_v24  ;;  %13617 = vmatprep.mubr.msk.bf16.mxu0 %vm15447_vm1, %v20516_v18  ;;  %4082 = vmatprep.mubr.bf16.mxu1 %v3655_v26  ;;  %v4843_v2 = vshll.u32 %v16802_v48, 16  ;;  %v16815_v41 = vld [vmem:[%s15510_s8 + $0x154] sm:$0xff]  ;;  %v20517_v11 = vrot.slane %v16679_v58, 3 }
 0x1b0   : > { %v20518_v26 = vrot.slane %v16677_v44, 3  ;;  %v16830_v19 = vcombine.low %v16701_v0, %v16704_v34  ;;  %v16832_v17 = vor.u32 %v4800_v55, %v4797_v16  ;;  %v20521_v0 = vrot.slane %v16726_v53, 3 }
 0x1b1   : > { %20515 = vst [vmem:[#allocation17_spill] sm:$0xff] %v16804_v28  ;;  %v12029_v52 = vpop.f32.mrb[88].mxu1  ;;  %v12105_v1 = vpop.f32.mrb[88].mxu0  ;;  %v20522_v34 = vrot.slane %v16716_v51, 3  ;;  %v16848_v16 = vor.u32 %v4755_v63, %v4752_v32  ;;  %v20525_v51 = vrot.slane %v15998_v57, 1  ;;  %v14875_v32 = vld [vmem:[%s20443_s1 + $0x550] sm:$0xff]  }
 0x1b2   : > { %v12030_v24 = vpop.f32.mrb[89].mxu1  ;;  %v12106_v5 = vpop.f32.mrb[89].mxu0  ;;  %v3652_v8 = vsel %vm3649_vm3, %v20518_v26, %v20517_v11  ;;  %v20519_v11 = vrot.slane %v16681_v12, 3  ;;  %v20520_v26 = vrot.slane %v16670_v46, 3 }
 0x1b3   : > { %v12031_v10 = vadd.f32 %v12030_v24, %v12029_v52  ;;  %v12107_v13 = vadd.f32 %v12106_v5, %v12105_v1  ;;  %v12032_v28 = vpop.f32.mrb[90].mxu1  ;;  %v12108_v36 = vpop.f32.mrb[90].mxu0  ;;  %v3661_v52 = vsel %vm3649_vm3, %v20522_v34, %v20521_v0  ;;  %v16846_v1 = vcombine.low %v16738_v21, %v16741_v38  ;;  %20523 = vst [vmem:[#allocation18_spill] sm:$0xff] %v16848_v16  ;;  %v3298_v21 = vld [vmem:[%s15510_s8 + $0xc8] sm:$0xff] }
 0x1b4   : > { %v12033_v23 = vpop.f32.mrb[91].mxu1  ;;  %v12109_v43 = vpop.f32.mrb[91].mxu0  ;;  %v3668_v47 = vsel %vm3649_vm3, %v20520_v26, %v20519_v11  ;;  %v14865_v11 = vld [vmem:[%s20443_s1 + $0x508] sm:$0xff]   ;;  %v3295_v26 = vld [vmem:[%s15510_s8 + $0xb4] sm:$0xff]  ;;  %v20531_v38 = vrot.slane %v16724_v42, 3 }
 0x1b5   : > { %v16850_v55 = vadd.f32 %v14097_v61, %v12107_v13  ;;  %v12034_v24 = vadd.f32 %v12033_v23, %v12032_v28  ;;  %v12110_v5 = vadd.f32 %v12109_v43, %v12108_v36  ;;  %v14117_v44 = vadd.f32 %v12031_v10, %v16468_v4  ;;  %v3290_v36 = vld [vmem:[%s15510_s8 + $0x94] sm:$0xff]  ;;  %v3293_v28 = vld [vmem:[%s15510_s8 + $0xa8] sm:$0xff] }
 0x1b6   : > { %13618 = vmatmul.mubr.bf16.gmra.mrb[64].mxu0 %v20525_v51  ;;  %4083 = vmatmul.mubr.bf16.vlgmr.msra.gmra.mrb[196].mxu1 %v3652_v8  ;;  %v16863_v23 = vcombine.low %v16815_v41, %v16818_v49  ;;  %v16868_v4 = vsel %vm4528_vm4, %v16848_v16, %v16832_v17  ;;  %v4842_v61 = vrot.slane %v4840_v30, 3  ;;  %v4845_v13 = vrot.slane %v4843_v2, 4  ;;  %v14863_v30 = vld [vmem:[%s20443_s1 + $0x4c0] sm:$0xff]  }
 0x1b7   : > { %20524 = vst [vmem:[#allocation19_spill] sm:$0xff] %v16850_v55  ;;  %20526 = vst [vmem:[#allocation20_spill] sm:$0xff] %v16868_v4  ;;  %v16870_v43 = vadd.f32 %v14107_v6, %v12110_v5  ;;  %12527 = vmatpush3.bf16.msra.mxu1 %v14855_v20  ;;  %v14127_v57 = vadd.f32 %v12034_v24, %v16471_v62  ;;  %4090 = vmatprep.mubr.bf16.mxu1 %v3668_v47  ;;  %v20528_v8 = vrot.slane %v16709_v31, 3  ;;  %v16897_v55 = vld [vmem:[%s15510_s8 + $0x17c] sm:$0xff]  ;;  %v16900_v4 = vld [vmem:[%s15510_s8 + $0x190] sm:$0xff] }
 0x1b8   : > { %4202 = vmatprep.mubr.bf16.mxu0 %v3661_v52  ;;  %12528 = vmatprep.subr.bf16.mxu1 %v14864_v40  ;;  %v4885_v6 = vshrl.u32 %v16863_v23, 16  ;;  %v4888_v63 = vshll.u32 %v16863_v23, 16  ;;  %v20529_v40 = vrot.slane %v16679_v58, 3  ;;  %v16889_v0 = vcombine.high %v3295_v26, %v3298_v21 }
 0x1b9   : > { %20527 = vst [vmem:[#allocation21_spill] sm:$0xff] %v16870_v43  ;;  %v12035_v62 = vpop.f32.mrb[92].mxu1  ;;  %v12111_v47 = vpop.f32.mrb[92].mxu0  ;;  %v20530_v51 = vrot.slane %v16728_v14, 3  ;;  %v16902_v16 = vor.u32 %v4845_v13, %v4842_v61  ;;  %v20535_v58 = vrot.slane %v16726_v53, 3 }
 0x1ba   : > { %v12036_v2 = vpop.f32.mrb[93].mxu1  ;;  %v12112_v20 = vpop.f32.mrb[93].mxu0  ;;  %v3666_v10 = vsel %vm3649_vm3, %v20529_v40, %v20528_v8 }
 0x1bb   : > { %v12037_v34 = vadd.f32 %v12036_v2, %v12035_v62  ;;  %v12113_v52 = vadd.f32 %v12112_v20, %v12111_v47  ;;  %v12038_v24 = vpop.f32.mrb[94].mxu1  ;;  %v12114_v5 = vpop.f32.mrb[94].mxu0  ;;  %v3658_v43 = vsel %vm3649_vm3, %v20531_v38, %v20530_v51  ;;  %12529 = vmatpush3.bf16.msra.mxu1 %v14865_v11  ;;  %v20532_v62 = vrot.slane %v16732_v29, 3 }
 0x1bc   : > { %v12039_v8 = vpop.f32.mrb[95].mxu1  ;;  %v12115_v40 = vpop.f32.mrb[95].mxu0  ;;  %v20533_v47 = vrot.slane %v16681_v12, 3  ;;  %v20534_v20 = vrot.slane %v16770_v3, 3  ;;  %v16914_v38 = vcombine.high %v3290_v36, %v3293_v28  ;;  %12530 = vmatprep.subr.bf16.mxu1 %v14875_v32  ;;  %v16916_v51 = vcombine.low %v3295_v26, %v3298_v21 }
 0x1bd   : > { %v16918_v61 = vadd.f32 %v14117_v44, %v12113_v52  ;;  %v12040_v13 = vadd.f32 %v12039_v8, %v12038_v24  ;;  %v12116_v46 = vadd.f32 %v12115_v40, %v12114_v5  ;;  %v14137_v33 = vadd.f32 %v12037_v34, %v16494_v9  ;;  %v14885_v44 = vld [vmem:[%s20443_s1 + $0x558] sm:$0xff]   ;;  %v3299_v5 = vld [vmem:[%s15510_s8 + $0xd0] sm:$0xff] }
 0x1be   : > { %v3678_v2 = vsel %vm3649_vm3, %v20533_v47, %v20532_v62  ;;  %v3672_v11 = vsel %vm3649_vm3, %v20535_v58, %v20534_v20  ;;  %20536 = vst [vmem:[#allocation22_spill] sm:$0xff] %v16914_v38  ;;  %v14871_v62 = vld [vmem:[%s20443_s1 + $0x4c8] sm:$0xff]   ;;  %v14878_v47 = vld [vmem:[%s20443_s1 + $0x510] sm:$0xff]   ;;  %4091 = vmatmul.mubr.bf16.gmra.mrb[200].mxu1 %v3666_v10  ;;  %4203 = vmatmul.mubr.bf16.vlgmr.msra.gmra.mrb[112].mxu0 %v3658_v43  ;;  %v4887_v32 = vrot.slane %v4885_v6, 3  ;;  %v4890_v10 = vrot.slane %v4888_v63, 4  ;;  %v3296_v24 = vld [vmem:[%s15510_s8 + $0xbc] sm:$0xff] }
 0x1bf   : > { %20537 = vst [vmem:[#allocation23_spill] sm:$0xff] %v16918_v61  ;;  %v16933_v9 = vcombine.low %v16897_v55, %v16900_v4  ;;  %v16938_v26 = vsel %vm4528_vm4, %v16832_v17, %v16902_v16  ;;  %v16940_v21 = vadd.f32 %v14127_v57, %v12116_v46  ;;  %13622 = vmatpush3.bf16.msra.mxu0 %v14863_v30  ;;  %v14886_v17 = vld [vmem:[%s20443_s1 + $0x518] sm:$0xff]   ;;  %v20539_v30 = vrot.slane %v16830_v19, 3 }
 0x1c0   : > { %v14147_v43 = vadd.f32 %v12040_v13, %v16503_v37  ;;  %4098 = vmatprep.mubr.bf16.mxu1 %v3678_v2  ;;  %4210 = vmatprep.mubr.bf16.mxu0 %v3672_v11  ;;  %v20540_v8 = vrot.slane %v16709_v31, 3  ;;  %v20541_v2 = vrot.slane %v16846_v1, 3  ;;  %v20542_v20 = vrot.slane %v16728_v14, 3 }
 0x1c1   : > { %20538 = vst [vmem:[#allocation24_spill] sm:$0xff] %v16940_v21  ;;  %13623 = vmatprep.subr.bf16.mxu0 %v20516_v18  ;;  %v4930_v46 = vshrl.u32 %v16933_v9, 16  ;;  %v12041_v57 = vpop.f32.mrb[96].mxu1  ;;  %v12117_v37 = vpop.f32.mrb[96].mxu0  ;;  %12531 = vmatpush3.bf16.msra.mxu1 %v14878_v47  ;;  %v16962_v13 = vcombine.low %v3290_v36, %v3293_v28  ;;  %v14882_v47 = vld [vmem:[%s20443_s1 + $0x4d0] sm:$0xff]   ;;  %v16971_v61 = vor.u32 %v4890_v10, %v4887_v32 }
 0x1c2   : > { %v12042_v6 = vpop.f32.mrb[97].mxu1  ;;  %v12118_v63 = vpop.f32.mrb[97].mxu0  ;;  %v3676_v40 = vsel %vm3649_vm3, %v20540_v8, %v20539_v30  ;;  %v3670_v11 = vsel %vm3649_vm3, %v20542_v20, %v20541_v2  ;;  %12532 = vmatprep.subr.bf16.mxu1 %v14885_v44  ;;  %v14893_v30 = vld [vmem:[%s20443_s1 + $0x560] sm:$0xff]   ;;  %v4933_v8 = vshll.u32 %v16933_v9, 16  ;;  %v20543_v2 = vrot.slane %v16889_v0, 3 }
 0x1c3   : > { %v12043_v52 = vadd.f32 %v12042_v6, %v12041_v57  ;;  %v12119_v34 = vadd.f32 %v12118_v63, %v12117_v37  ;;  %v12044_v58 = vpop.f32.mrb[98].mxu1  ;;  %v12120_v21 = vpop.f32.mrb[98].mxu0  ;;  %13624 = vmatpush3.bf16.msra.mxu0 %v14871_v62  ;;  %v20544_v20 = vrot.slane %v16732_v29, 3  ;;  %v20545_v57 = vrot.slane %v16914_v38, 3 }
 0x1c4   : > { %v12045_v36 = vpop.f32.mrb[99].mxu1  ;;  %v12121_v28 = vpop.f32.mrb[99].mxu0  ;;  %v20546_v62 = vrot.slane %v16770_v3, 3  ;;  %13625 = vmatprep.subr.bf16.mxu0 %v20516_v18  ;;  %v16986_v32 = vcombine.high %v16745_v22, %v16756_v25  ;;  %v16988_v10 = vcombine.high %v3296_v24, %v3299_v5  ;;  %v3679_v22 = vrot.slane %v16962_v13, 3 }
 0x1c5   : > { %v3688_v44 = vsel %vm3649_vm3, %v20544_v20, %v20543_v2  ;;  %v16990_v6 = vadd.f32 %v14137_v33, %v12119_v34  ;;  %v12046_v63 = vadd.f32 %v12045_v36, %v12044_v58  ;;  %v12122_v53 = vadd.f32 %v12121_v28, %v12120_v21  ;;  %12533 = vmatpush3.bf16.msra.mxu1 %v14886_v17  ;;  %v14894_v20 = vld [vmem:[%s20443_s1 + $0x520] sm:$0xff]   ;;  %v14906_v33 = vld [vmem:[%s20443_s1 + $0x568] sm:$0xff]  }
 0x1c6   : > { %v3682_v37 = vsel %vm3649_vm3, %v20546_v62, %v20545_v57  ;;  %20547 = vst [vmem:[#allocation25_spill] sm:$0xff] %v16988_v10  ;;  %v14157_v2 = vadd.f32 %v12043_v52, %v16535_v54  ;;  %4099 = vmatmul.mubr.bf16.gmra.mrb[204].mxu1 %v3676_v40  ;;  %4211 = vmatmul.mubr.bf16.gmra.mrb[116].mxu0 %v3670_v11  ;;  %v4932_v21 = vrot.slane %v4930_v46, 3  ;;  %v4935_v34 = vrot.slane %v4933_v8, 4  ;;  %v17011_v40 = vld [vmem:[%s15510_s8 + $0xe4] sm:$0xff]  ;;  %v17014_v11 = vld [vmem:[%s15510_s8 + $0xf8] sm:$0xff] }
 0x1c7   : > { %20548 = vst [vmem:[#allocation26_spill] sm:$0xff] %v16990_v6  ;;  %v17003_v25 = vsel %vm4528_vm4, %v16902_v16, %v16971_v61  ;;  %v17005_v54 = vadd.f32 %v14147_v43, %v12122_v53  ;;  %v14167_v58 = vadd.f32 %v12046_v63, %v16541_v15  ;;  %4106 = vmatprep.mubr.bf16.mxu1 %v3688_v44  ;;  %v3697_v52 = vrot.slane %v16986_v32, 3  ;;  %v14892_v53 = vld [vmem:[%s20443_s1 + $0x4d8] sm:$0xff]  }
 0x1c8   : > { %4218 = vmatprep.mubr.bf16.mxu0 %v3682_v37  ;;  %v20464_v17 = vrot.slane %v16988_v10, 3  ;;  %13626 = vmatpush3.bf16.msra.mxu0 %v14882_v47  ;;  %v20550_v8 = vrot.slane %v16916_v51, 3  ;;  %v20551_v47 = vrot.slane %v16830_v19, 3  ;;  %v20552_v28 = vrot.slane %v16846_v1, 3 }
 0x1c9   : > { %20549 = vst [vmem:[#allocation27_spill] sm:$0xff] %v17005_v54  ;;  %12534 = vmatprep.subr.bf16.mxu1 %v14893_v30  ;;  %v12047_v16 = vpop.f32.mrb[100].mxu1  ;;  %v12123_v15 = vpop.f32.mrb[100].mxu0  ;;  %13627 = vmatprep.subr.bf16.mxu0 %v20516_v18  ;;  %v17030_v30 = vcombine.low %v3296_v24, %v3299_v5 }
 0x1ca   : > { %12535 = vmatpush3.bf16.msra.mxu1 %v14894_v20  ;;  %v12048_v43 = vpop.f32.mrb[101].mxu1  ;;  %v12124_v46 = vpop.f32.mrb[101].mxu0  ;;  %v3686_v36 = vsel %vm3649_vm3, %v20551_v47, %v20550_v8  ;;  %v3680_v44 = vsel %vm3649_vm3, %v20552_v28, %v3679_v22  ;;  %v17034_v20 = vcombine.high %v16719_v39, %v16722_v50  ;;  %v14900_v8 = vld [vmem:[%s20443_s1 + $0x4e0] sm:$0xff]   ;;  %v14907_v47 = vld [vmem:[%s20443_s1 + $0x528] sm:$0xff]   ;;  %v17042_v28 = vor.u32 %v4935_v34, %v4932_v21 }
 0x1cb   : > { %12536 = vmatprep.subr.bf16.mxu1 %v14906_v33  ;;  %v12049_v57 = vadd.f32 %v12048_v43, %v12047_v16  ;;  %v12125_v62 = vadd.f32 %v12124_v46, %v12123_v15  ;;  %v12050_v37 = vpop.f32.mrb[102].mxu1  ;;  %v12126_v63 = vpop.f32.mrb[102].mxu0  ;;  %v20553_v33 = vrot.slane %v16889_v0, 3  ;;  %v20554_v50 = vrot.slane %v16914_v38, 3 }
 0x1cc   : > { %v12051_v24 = vpop.f32.mrb[103].mxu1  ;;  %v12127_v5 = vpop.f32.mrb[103].mxu0  ;;  %v17056_v15 = vcombine.high %v17011_v40, %v17014_v11  ;;  %13628 = vmatpush3.bf16.msra.mxu0 %v14892_v53  ;;  %v3689_v53 = vrot.slane %v17030_v30, 3 }
 0x1cd   : > { %v3698_v16 = vsel %vm3649_vm3, %v20553_v33, %v3697_v52  ;;  %v3692_v39 = vsel %vm3649_vm3, %v20554_v50, %v20464_v17  ;;  %v17058_v21 = vadd.f32 %v14157_v2, %v12125_v62  ;;  %v12052_v34 = vadd.f32 %v12051_v24, %v12050_v37  ;;  %13629 = vmatprep.subr.bf16.mxu0 %v20516_v18  ;;  %v14914_v33 = vld [vmem:[%s20443_s1 + $0x570] sm:$0xff]   ;;  %v14913_v62 = vld [vmem:[%s20443_s1 + $0x4e8] sm:$0xff]  }
 0x1ce   : > { %20555 = vst [vmem:[#allocation28_spill] sm:$0xff] %v17056_v15  ;;  %v12128_v43 = vadd.f32 %v12127_v5, %v12126_v63  ;;  %v14177_v46 = vadd.f32 %v12049_v57, %v16573_v7  ;;  %4107 = vmatmul.mubr.bf16.gmra.mrb[208].mxu1 %v3686_v36  ;;  %4219 = vmatmul.mubr.bf16.gmra.mrb[120].mxu0 %v3680_v44  ;;  %v20465_v50 = vrot.slane %v16774_v60, 3  ;;  %v20466_v36 = vrot.slane %v17034_v20, 3  ;;  %v17084_v63 = vld [vmem:[%s15510_s8 + $0x10c] sm:$0xff] }
 0x1cf   : > { %20556 = vst [vmem:[#allocation29_spill] sm:$0xff] %v17058_v21  ;;  %v17070_v2 = vsel %vm4528_vm4, %v16971_v61, %v17042_v28  ;;  %v14187_v57 = vadd.f32 %v12052_v34, %v16579_v56  ;;  %4114 = vmatprep.mubr.bf16.mxu1 %v3698_v16  ;;  %4226 = vmatprep.mubr.bf16.mxu0 %v3692_v39  ;;  %v14915_v61 = vld [vmem:[%s20443_s1 + $0x530] sm:$0xff]   ;;  %v3311_v56 = vld [vmem:[%s15510_s8 + $0x120] sm:$0xff]  ;;  %v20558_v5 = vrot.slane %v16916_v51, 3  ;;  %v20559_v21 = vrot.slane %v17056_v15, 3 }
 0x1d0   : > { %v17072_v7 = vadd.f32 %v14167_v58, %v12128_v43  ;;  %13630 = vmatpush3.bf16.msra.mxu0 %v14900_v8  ;;  %12537 = vmatpush3.bf16.msra.mxu1 %v14907_v47  ;;  %v14921_v8 = vld [vmem:[%s20443_s1 + $0x578] sm:$0xff]   ;;  %v3690_v39 = vsel %vm3649_vm3, %v3679_v22, %v3689_v53  ;;  %v3708_v44 = vsel %vm3649_vm3, %v3697_v52, %v20466_v36  ;;  %v20560_v22 = vrot.slane %v16988_v10, 3  ;;  %v14920_v52 = vld [vmem:[%s20443_s1 + $0x4f0] sm:$0xff]  }
 0x1d1   : > { %v12053_v58 = vpop.f32.mrb[104].mxu1  ;;  %v12129_v37 = vpop.f32.mrb[104].mxu0  ;;  %13631 = vmatprep.subr.bf16.mxu0 %v20516_v18  ;;  %12538 = vmatprep.subr.bf16.mxu1 %v14914_v33  ;;  %v3696_v16 = vsel %vm3649_vm3, %v20558_v5, %v20465_v50 }
 0x1d2   : > { %20557 = vst [vmem:[#allocation30_spill] sm:$0xff] %v17072_v7  ;;  %v12054_v47 = vpop.f32.mrb[105].mxu1  ;;  %v12130_v24 = vpop.f32.mrb[105].mxu0  ;;  %v17108_v7 = vcombine.low %v17011_v40, %v17014_v11  ;;  %v14923_v40 = vld [vmem:[%s20443_s1 + $0x538] sm:$0xff]  }
 0x1d3   : > { %v12055_v34 = vadd.f32 %v12054_v47, %v12053_v58  ;;  %v12131_v43 = vadd.f32 %v12130_v24, %v12129_v37  ;;  %v12056_v33 = vpop.f32.mrb[106].mxu1  ;;  %v12132_v17 = vpop.f32.mrb[106].mxu0  ;;  %v3702_v58 = vsel %vm3649_vm3, %v20560_v22, %v20559_v21  ;;  %v17117_v37 = vcombine.high %v16782_v27, %v16785_v45  ;;  %v14926_v27 = vld [vmem:[%s20443_s1 + $0x5c0] sm:$0xff]  }
 0x1d4   : > { %v12057_v5 = vpop.f32.mrb[107].mxu1  ;;  %v12133_v50 = vpop.f32.mrb[107].mxu0  ;;  %v17120_v47 = vcombine.high %v17084_v63, %v3311_v56  ;;  %13632 = vmatpush3.bf16.msra.mxu0 %v14913_v62  ;;  %12539 = vmatpush3.bf16.msra.mxu1 %v14915_v61  ;;  %v4564_v45 = vshrl.u32 %v16724_v42, 16  ;;  %v4567_v62 = vshll.u32 %v16724_v42, 16  ;;  %v14925_v42 = vld [vmem:[%s20443_s1 + $0x4f8] sm:$0xff]   ;;  %v20564_v22 = vrot.slane %v16774_v60, 3 }
 0x1d5   : > { %v17128_v11 = vadd.f32 %v14177_v46, %v12131_v43  ;;  %v12134_v21 = vadd.f32 %v12133_v50, %v12132_v17  ;;  %v14197_v24 = vadd.f32 %v12055_v34, %v16608_v35  ;;  %13633 = vmatprep.subr.bf16.mxu0 %v20516_v18  ;;  %12540 = vmatprep.subr.bf16.mxu1 %v14921_v8  ;;  %v3705_v46 = vrot.slane %v16760_v59, 3 }
 0x1d6   : > { %20561 = vst [vmem:[#allocation31_spill] sm:$0xff] %v17120_v47  ;;  %4115 = vmatmul.mubr.bf16.gmra.mrb[212].mxu1 %v3696_v16  ;;  %4227 = vmatmul.mubr.bf16.gmra.mrb[124].mxu0 %v3690_v39  ;;  %v3699_v35 = vrot.slane %v17108_v7, 3  ;;  %v3717_v50 = vrot.slane %v17117_v37, 3  ;;  %v3711_v61 = vrot.slane %v17120_v47, 3  ;;  %v4572_v8 = vshrl.u32 %v16728_v14, 16  ;;  %v3317_v39 = vld [vmem:[%s15510_s8 + $0x148] sm:$0xff] }
 0x1d7   : > { %20562 = vst [vmem:[#allocation32_spill] sm:$0xff] %v17128_v11  ;;  %v17138_v17 = vadd.f32 %v14187_v57, %v12134_v21  ;;  %4122 = vmatprep.mubr.bf16.mxu1 %v3708_v44  ;;  %4234 = vmatprep.mubr.bf16.mxu0 %v3702_v58  ;;  %v4575_v59 = vshll.u32 %v16728_v14, 16  ;;  %v3314_v44 = vld [vmem:[%s15510_s8 + $0x134] sm:$0xff]  ;;  %v4566_v34 = vrot.slane %v4564_v45, 3  ;;  %v4569_v43 = vrot.slane %v4567_v62, 4 }
 0x1d8   : > { %13634 = vmatpush3.bf16.msra.mxu0 %v14920_v52  ;;  %12541 = vmatpush3.bf16.msra.mxu1 %v14923_v40  ;;  %v3706_v58 = vsel %vm3649_vm3, %v20564_v22, %v3705_v46  ;;  %v3700_v36 = vsel %vm3649_vm3, %v3689_v53, %v3699_v35  ;;  %v20565_v62 = vrot.slane %v17034_v20, 3  ;;  %v20566_v22 = vrot.slane %v17056_v15, 3 }
 0x1d9   : > { %20563 = vst [vmem:[#allocation33_spill] sm:$0xff] %v17138_v17  ;;  %v12135_v57 = vpop.f32.mrb[108].mxu0  ;;  %v12176_v16 = vpop.f32.mrb[108].mxu1  ;;  %13635 = vmatprep.subr.bf16.mxu0 %v20516_v18  ;;  %12608 = vmatprep.subr.bf16.mxu1 %v14926_v27  ;;  %v17160_v17 = vcombine.low %v17084_v63, %v3311_v56  ;;  %v4574_v53 = vrot.slane %v4572_v8, 3  ;;  %v4577_v63 = vrot.slane %v4575_v59, 4  ;;  %v4570_v59 = vor.u32 %v4569_v43, %v4566_v34 }
 0x1da   : > { %v12136_v33 = vpop.f32.mrb[109].mxu0  ;;  %v12177_v5 = vpop.f32.mrb[109].mxu1  ;;  %v3718_v60 = vsel %vm3649_vm3, %v20565_v62, %v3717_v50 }
 0x1db   : > { %v12137_v52 = vadd.f32 %v12136_v33, %v12135_v57  ;;  %v17154_v40 = vadd.f32 %v12177_v5, %v12176_v16  ;;  %v12138_v21 = vpop.f32.mrb[110].mxu0  ;;  %v12179_v14 = vpop.f32.mrb[110].mxu1  ;;  %v3712_v57 = vsel %vm3649_vm3, %v20566_v22, %v3711_v61  ;;  %v17170_v16 = vcombine.high %v16815_v41, %v16818_v49 }
 0x1dc   : > { %v12139_v27 = vpop.f32.mrb[111].mxu0  ;;  %v12180_v45 = vpop.f32.mrb[111].mxu1  ;;  %v17172_v33 = vcombine.high %v3314_v44, %v3317_v39  ;;  %13636 = vmatpush3.bf16.msra.mxu0 %v14925_v42  ;;  %v3715_v41 = vrot.slane %v16802_v48, 3  ;;  %v3709_v49 = vrot.slane %v17160_v17, 3  ;;  %v4578_v21 = vor.u32 %v4577_v63, %v4574_v53 }
 0x1dd   : > { %v17174_v56 = vadd.f32 %v14197_v24, %v12137_v52  ;;  %v17176_v5 = vadd.f32 %v12180_v45, %v12179_v14  ;;  %13681 = vmatprep.subr.bf16.mxu0 %v20516_v18  ;;  %v3727_v42 = vrot.slane %v17170_v16, 3  ;;  %v3320_v52 = vld [vmem:[%s15510_s8 + $0x15c] sm:$0xff]  ;;  %v3323_v14 = vld [vmem:[%s15510_s8 + $0x170] sm:$0xff]  ;;  %v4633_v27 = vshrl.u32 %v16846_v1, 16 }
 0x1de   : > { %20567 = vst [vmem:[#allocation34_spill] sm:$0xff] %v17172_v33  ;;  %4123 = vmatmul.mubr.bf16.gmra.mrb[216].mxu1 %v3706_v58  ;;  %4235 = vmatmul.mubr.bf16.gmra.mrb[128].mxu0 %v3700_v36  ;;  %v3721_v8 = vrot.slane %v17172_v33, 3  ;;  %v4636_v58 = vshll.u32 %v16846_v1, 16  ;;  %v3716_v48 = vsel %vm3649_vm3, %v3705_v46, %v3715_v41  ;;  %v17191_v22 = vcombine.low %v3314_v44, %v3317_v39  ;;  %v17211_v39 = vld [vmem:[%s15510_s8 + $0x1a4] sm:$0xff] }
 0x1df   : > { %20568 = vst [vmem:[#allocation35_spill] sm:$0xff] %v17174_v56  ;;  %4130 = vmatprep.mubr.bf16.mxu1 %v3718_v60  ;;  %4242 = vmatprep.mubr.bf16.mxu0 %v3712_v57  ;;  %v3710_v60 = vsel %vm3649_vm3, %v3699_v35, %v3709_v49  ;;  %v3728_v34 = vsel %vm3649_vm3, %v3717_v50, %v3727_v42  ;;  %v3725_v35 = vrot.slane %v16863_v23, 3  ;;  %v4635_v50 = vrot.slane %v4633_v27, 3 }
 0x1e0   : > { %v3722_v43 = vsel %vm3649_vm3, %v3711_v61, %v3721_v8  ;;  %v17197_v53 = vcombine.high %v16897_v55, %v16900_v4  ;;  %v17199_v1 = vcombine.high %v3320_v52, %v3323_v14  ;;  %v17204_v46 = vsel %vm4528_vm4, %v4570_v59, %v4578_v21  ;;  %v3326_v59 = vld [vmem:[%s15510_s8 + $0x184] sm:$0xff] }
 0x1e1   : > { %v12182_v24 = vpop.f32.mrb[112].mxu1  ;;  %20570 = vst [vmem:[#allocation37_spill] sm:$0xff] %v17204_v46  ;;  %v4638_v61 = vrot.slane %v4636_v58, 4  ;;  %v3719_v55 = vrot.slane %v17191_v22, 3  ;;  %v4681_v23 = vshll.u32 %v16962_v13, 16  ;;  %v3726_v58 = vsel %vm3649_vm3, %v3715_v41, %v3725_v35 }
 0x1e2   : > { %v12183_v36 = vpop.f32.mrb[113].mxu1  ;;  %20569 = vst [vmem:[#allocation36_spill] sm:$0xff] %v17199_v1  ;;  %v3737_v4 = vrot.slane %v17197_v53, 3  ;;  %v3731_v44 = vrot.slane %v17199_v1, 3 }
 0x1e3   : > { %v17187_v45 = vadd.f32 %v12183_v36, %v12182_v24  ;;  %v12185_v62 = vpop.f32.mrb[114].mxu1  ;;  %v3334_v36 = vld [vmem:[%s15510_s8 + $0x1b8] sm:$0x77]  ;;  %v4639_v1 = vor.u32 %v4638_v61, %v4635_v50  ;;  %v3332_v61 = vld [vmem:[%s15510_s8 + $0x1ac] sm:$0xff] }
 0x1e4   : > { %v12186_v57 = vpop.f32.mrb[115].mxu1  ;;  %v3738_v33 = vsel %vm3649_vm3, %v3727_v42, %v3737_v4  ;;  %v3732_v11 = vsel %vm3649_vm3, %v3721_v8, %v3731_v44 }
 0x1e5   : > { %v17201_v63 = vadd.f32 %v12186_v57, %v12185_v62  ;;  %v3329_v62 = vld [vmem:[%s15510_s8 + $0x198] sm:$0xff] }
 0x1e6   : > { %4131 = vmatmul.mubr.bf16.gmra.mrb[220].mxu1 %v3716_v48  ;;  %4243 = vmatmul.mubr.bf16.gmra.mrb[132].mxu0 %v3710_v60  ;;  %v4678_v48 = vshrl.u32 %v16962_v13, 16  ;;  %v11002_v13 = vcombine.high %v17211_v39, %v3334_v36  ;;  %v17227_v47 = vcombine.high %v3326_v59, %v3329_v62 }
 0x1e7   : > { %4138 = vmatprep.mubr.bf16.mxu1 %v3728_v34  ;;  %4250 = vmatprep.mubr.bf16.mxu0 %v3722_v43  ;;  %v3720_v34 = vsel %vm3649_vm3, %v3709_v49, %v3719_v55  ;;  %v17222_v43 = vcombine.low %v3320_v52, %v3323_v14  ;;  %v3735_v49 = vrot.slane %v16933_v9, 3  ;;  %v4683_v14 = vrot.slane %v4681_v23, 4 }
 0x1e8   : > { %20571 = vst [vmem:[#allocation38_spill] sm:$0xff] %v17227_v47  ;;  %v4680_v52 = vrot.slane %v4678_v48, 3  ;;  %v3747_v8 = vrot.slane %v11002_v13, 3  ;;  %v3741_v50 = vrot.slane %v17227_v47, 3  ;;  %v11001_v9 = vcombine.low %v17211_v39, %v3334_v36 }
 0x1e9   : > { %v12188_v24 = vpop.f32.mrb[116].mxu1  ;;  %v3729_v42 = vrot.slane %v17222_v43, 3  ;;  %v17243_v48 = vcombine.low %v3326_v59, %v3329_v62 }
 0x1ea   : > { %v12189_v27 = vpop.f32.mrb[117].mxu1  ;;  %v4684_v47 = vor.u32 %v4683_v14, %v4680_v52  ;;  %v3748_v15 = vsel %vm3649_vm3, %v3737_v4, %v3747_v8  ;;  %v3742_v6 = vsel %vm3649_vm3, %v3731_v44, %v3741_v50  ;;  %v17255_v36 = vrot.slane %v11001_v9, 3  ;;  %v20574_v4 = vld [vmem:[#allocation6_spill] sm:$0xff]  ;;  %v20575_v44 = vld [vmem:[#allocation7_spill] sm:$0xff] }
 0x1eb   : > { %v17219_v60 = vadd.f32 %v12189_v27, %v12188_v24  ;;  %v12191_v57 = vpop.f32.mrb[118].mxu1  ;;  %v17232_v24 = vsel %vm4528_vm4, %v4578_v21, %v4639_v1  ;;  %v3335_v27 = vld [vmem:[%s15510_s8 + $0x1c0] sm:$0x77]  ;;  %v4726_v21 = vshll.u32 %v17030_v30, 16  ;;  %v3730_v23 = vsel %vm3649_vm3, %v3719_v55, %v3729_v42 }
 0x1ec   : > { %v12192_v56 = vpop.f32.mrb[119].mxu1  ;;  %20572 = vst [vmem:[#allocation39_spill] sm:$0xff] %v17232_v24  ;;  %v11004_v13 = vcombine.high %v3332_v61, %v3335_v27  ;;  %v3739_v59 = vrot.slane %v17243_v48, 3  ;;  %v4547_v14 = vshrl.u32 %v20574_v4, 16  ;;  %v4771_v9 = vshll.u32 %v17108_v7, 16 }
 0x1ed   : > { %v17229_v41 = vadd.f32 %v12192_v56, %v12191_v57  ;;  %v4723_v56 = vshrl.u32 %v17030_v30, 16  ;;  %v4728_v55 = vrot.slane %v4726_v21, 4 }
 0x1ee   : > { %4139 = vmatmul.mubr.bf16.gmra.mrb[224].mxu1 %v3726_v58  ;;  %4251 = vmatmul.mubr.bf16.gmra.mrb[136].mxu0 %v3720_v34  ;;  %v3736_v34 = vsel %vm3649_vm3, %v3725_v35, %v3735_v49  ;;  %v17253_v35 = vsel %vm4528_vm4, %v4639_v1, %v4684_v47  ;;  %v17258_v52 = vrot.slane %v11004_v13, 3  ;;  %v4558_v1 = vshll.u32 %v20575_v44, 16 }
 0x1ef   : > { %4146 = vmatprep.mubr.bf16.mxu1 %v3738_v33  ;;  %4258 = vmatprep.mubr.bf16.mxu0 %v3732_v11  ;;  %20573 = vst [vmem:[#allocation40_spill] sm:$0xff] %v17253_v35  ;;  %v4725_v62 = vrot.slane %v4723_v56, 3  ;;  %v11003_v13 = vcombine.low %v3332_v61, %v3335_v27  ;;  %v4549_v35 = vrot.slane %v4547_v14, 3 }
 0x1f0   : > { %v4560_v46 = vrot.slane %v4558_v1, 4  ;;  %v4813_v1 = vshrl.u32 %v17160_v17, 16 }
 0x1f1   : > { %v12194_v57 = vpop.f32.mrb[120].mxu1 }
 0x1f2   : > { %v12195_v58 = vpop.f32.mrb[121].mxu1 }
 0x1f3   : > { %v17245_v11 = vadd.f32 %v12195_v58, %v12194_v57  ;;  %v12197_v33 = vpop.f32.mrb[122].mxu1  ;;  %v4555_v57 = vshrl.u32 %v20575_v44, 16 }
 0x1f4   : > { %v12198_v54 = vpop.f32.mrb[123].mxu1 }
 0x1f5   : > { %v17250_v30 = vadd.f32 %v12198_v54, %v12197_v33  ;;  %v4550_v54 = vshll.u32 %v20574_v4, 16  ;;  %v4729_v4 = vor.u32 %v4728_v55, %v4725_v62  ;;  %v4557_v10 = vrot.slane %v4555_v57, 3 }
 0x1f6   : > { %4147 = vmatmul.mubr.bf16.gmra.mrb[228].mxu1 %v3736_v34  ;;  %4259 = vmatmul.mubr.bf16.gmra.mrb[140].mxu0 %v3730_v23  ;;  %v4768_v34 = vshrl.u32 %v17108_v7, 16  ;;  %v3752_v23 = vsel %vm3649_vm3, %v3741_v50, %v17258_v52  ;;  %v4773_v62 = vrot.slane %v4771_v9, 4  ;;  %v3749_v55 = vrot.slane %v11003_v13, 3 }
 0x1f7   : > { %4154 = vmatprep.mubr.bf16.mxu1 %v3748_v15  ;;  %4266 = vmatprep.mubr.bf16.mxu0 %v3742_v6  ;;  %v3746_v15 = vsel %vm3649_vm3, %v3735_v49, %v17255_v36  ;;  %v3740_v6 = vsel %vm3649_vm3, %v3729_v42, %v3739_v59  ;;  %v4552_v24 = vrot.slane %v4550_v54, 4  ;;  %v17276_v38 = vsel %vm4528_vm4, %v4684_v47, %v4729_v4  ;;  %v20576_v49 = vld [vmem:[#allocation8_spill] sm:$0xff] }
 0x1f8   : > { %v4530_v42 = vshrl.u32 %v20576_v49, 16  ;;  %v4770_v27 = vrot.slane %v4768_v34, 3  ;;  %v4561_v54 = vor.u32 %v4560_v46, %v4557_v10  ;;  %v4624_v47 = vshrl.u32 %v16681_v12, 16 }
 0x1f9   : > { %v12200_v58 = vpop.f32.mrb[124].mxu1  ;;  %v4553_v14 = vor.u32 %v4552_v24, %v4549_v35  ;;  %v4627_v57 = vshll.u32 %v16681_v12, 16  ;;  %v3750_v10 = vsel %vm3649_vm3, %v3739_v59, %v3749_v55 }
 0x1fa   : > { %v12201_v33 = vpop.f32.mrb[125].mxu1  ;;  %v4774_v46 = vor.u32 %v4773_v62, %v4770_v27  ;;  %v4626_v35 = vrot.slane %v4624_v47, 3  ;;  %v4615_v27 = vshrl.u32 %v16709_v31, 16  ;;  %v4618_v62 = vshll.u32 %v16709_v31, 16  ;;  %v3279_v47 = vld [vmem:[%s15510_s8 + $0x4c] sm:$0xf] }
 0x1fb   : > { %v17269_v56 = vadd.f32 %v12201_v33, %v12200_v58  ;;  %v12203_v21 = vpop.f32.mrb[126].mxu1  ;;  %v4533_v58 = vshll.u32 %v20576_v49, 16  ;;  %v20577_v33 = vld [vmem:[#allocation9_spill] sm:$0xff]  ;;  %v4562_v12 = vsel %vm4528_vm4, %v4553_v14, %v4561_v54 }
 0x1fc   : > { %v12204_v44 = vpop.f32.mrb[127].mxu1  ;;  %v4538_v50 = vshrl.u32 %v20577_v33, 16  ;;  %v4541_v61 = vshll.u32 %v20577_v33, 16  ;;  %v3276_v14 = vld [vmem:[%s15510_s8 + $0x38] sm:$0xf] }
 0x1fd   : > { %v17273_v7 = vadd.f32 %v12204_v44, %v12203_v21  ;;  %v4532_v44 = vrot.slane %v4530_v42, 3  ;;  %v4535_v49 = vrot.slane %v4533_v58, 4  ;;  %v17293_v58 = vsel %vm4528_vm4, %v4729_v4, %v4774_v46 }
 0x1fe   : > { %4155 = vmatmul.mubr.bf16.gmra.mrb[232].mxu1 %v3746_v15  ;;  %4267 = vmatmul.mubr.bf16.gmra.mrb[144].mxu0 %v3740_v6  ;;  %v4816_v15 = vshll.u32 %v17160_v17, 16  ;;  %v4540_v33 = vrot.slane %v4538_v50, 3  ;;  %v4543_v34 = vrot.slane %v4541_v61, 4  ;;  %v4629_v17 = vrot.slane %v4627_v57, 4  ;;  %20578 = vst [vmem:[#allocation6_spill] sm:$0xff] %v17293_v58 }
 0x1ff   : > { %4162 = vmatprep.mubr.bf16.mxu1 %v3747_v8  ;;  %4274 = vmatprep.mubr.bf16.mxu0 %v3752_v23  ;;  %v4815_v23 = vrot.slane %v4813_v1, 3  ;;  %v4536_v59 = vor.u32 %v4535_v49, %v4532_v44  ;;  %v3273_v61 = vld [vmem:[%s15510_s8 + $0x24] sm:$0x8]  ;;  %v3282_v57 = vld [vmem:[%s15510_s8 + $0x60] sm:$0xf]  ;;  %v4858_v4 = vshrl.u32 %v17191_v22, 16 }
 0x200   : > { %v4818_v13 = vrot.slane %v4816_v15, 4  ;;  %v17296_v50 = vor.u32 %v4543_v34, %v4540_v33  ;;  %v17306_v1 = vor.u32 %v4629_v17, %v4626_v35  ;;  %v4669_v15 = vshrl.u32 %v16732_v29, 16  ;;  %v14931_v17 = vld [vmem:[%s20443_s1 + $0x5c8] sm:$0xff]  }
 0x201   : > { %v12206_v6 = vpop.f32.mrb[128].mxu1  ;;  %v17315_v49 = vcombine.low %v3279_v47, %v3282_v57 }
 0x202   : > { %v12207_v21 = vpop.f32.mrb[129].mxu1  ;;  %v4545_v31 = vsel %vm4528_vm4, %v4536_v59, %v17296_v50  ;;  %v4631_v35 = vsel %vm4528_vm4, %v4561_v54, %v17306_v1  ;;  %v4660_v54 = vshrl.u32 %v16830_v19, 16 }
 0x203   : > { %v17286_v9 = vadd.f32 %v12207_v21, %v12206_v6  ;;  %v12209_v8 = vpop.f32.mrb[130].mxu1  ;;  %v4672_v6 = vshll.u32 %v16732_v29, 16  ;;  %v4861_v21 = vshll.u32 %v17191_v22, 16  ;;  %v4819_v29 = vor.u32 %v4818_v13, %v4815_v23 }
 0x204   : > { %v12210_v24 = vpop.f32.mrb[131].mxu1  ;;  %v4663_v13 = vshll.u32 %v16830_v19, 16  ;;  %v14935_v19 = vld [vmem:[%s20443_s1 + $0x5d0] sm:$0xff]  }
 0x205   : > { %v17290_v42 = vadd.f32 %v12210_v24, %v12209_v8  ;;  %v14927_v8 = vld [vmem:[%s20443_s1 + $0x580] sm:$0xff]   ;;  %v4620_v24 = vrot.slane %v4618_v62, 4  ;;  %v17330_v47 = vsel %vm4528_vm4, %v4774_v46, %v4819_v29  ;;  %v3663_v62 = vrot.slane %v17315_v49, 3  ;;  %v14932_v46 = vld [vmem:[%s20443_s1 + $0x588] sm:$0xff]  }
 0x206   : > { %4163 = vmatmul.mubr.bf16.gmra.mrb[236].mxu1 %v17255_v36  ;;  %4275 = vmatmul.mubr.bf16.gmra.mrb[148].mxu0 %v3750_v10  ;;  %v4617_v10 = vrot.slane %v4615_v27, 3  ;;  %20579 = vst [vmem:[#allocation7_spill] sm:$0xff] %v17330_v47  ;;  %v4863_v27 = vrot.slane %v4861_v21, 4  ;;  %v14930_v47 = vld [vmem:[%s20443_s1 + $0x600] sm:$0xff]  }
 0x207   : > { %4282 = vmatprep.mubr.bf16.mxu0 %v17258_v52  ;;  %5346 = vmatprep.mubr.bf16.mxu1 %v4562_v12  ;;  %v17313_v52 = vcombine.low %v3273_v61, %v3276_v14  ;;  %v4860_v12 = vrot.slane %v4858_v4, 3  ;;  %v4671_v61 = vrot.slane %v4669_v15, 3  ;;  %v4674_v14 = vrot.slane %v4672_v6, 4  ;;  %v3285_v4 = vld [vmem:[%s15510_s8 + $0x74] sm:$0xf] }
 0x208   : > { %v4621_v57 = vor.u32 %v4620_v24, %v4617_v10  ;;  %v4717_v15 = vshll.u32 %v16889_v0, 16  ;;  %v4903_v6 = vshrl.u32 %v17222_v43, 16  ;;  %v4662_v10 = vrot.slane %v4660_v54, 3 }
 0x209   : > { %v12212_v36 = vpop.f32.mrb[132].mxu1  ;;  %v3662_v23 = vrot.slane %v17313_v52, 3  ;;  %v4665_v24 = vrot.slane %v4663_v13, 4 }
 0x20a   : > { %v12213_v44 = vpop.f32.mrb[133].mxu1  ;;  %v4905_v54 = vrot.slane %v4903_v6, 3  ;;  %v4708_v6 = vshll.u32 %v16916_v51, 16 }
 0x20b   : > { %v17317_v33 = vadd.f32 %v12213_v44, %v12212_v36  ;;  %v12215_v34 = vpop.f32.mrb[134].mxu1  ;;  %v4714_v36 = vshrl.u32 %v16889_v0, 16  ;;  %v4675_v44 = vor.u32 %v4674_v14, %v4671_v61  ;;  %v3664_v0 = vsel %vm3649_vm3, %v3662_v23, %v3663_v62 }
 0x20c   : > { %v12216_v22 = vpop.f32.mrb[135].mxu1  ;;  %v4864_v61 = vor.u32 %v4863_v27, %v4860_v12 }
 0x20d   : > { %v17327_v59 = vadd.f32 %v12216_v22, %v12215_v34  ;;  %v4716_v14 = vrot.slane %v4714_v36, 3  ;;  %v4676_v23 = vsel %vm4528_vm4, %v17306_v1, %v4675_v44  ;;  %v4705_v36 = vshrl.u32 %v16916_v51, 16  ;;  %v14940_v1 = vld [vmem:[%s20443_s1 + $0x5d8] sm:$0xff]  }
 0x20e   : > { %4283 = vmatmul.mubr.bf16.gmra.mrb[152].mxu0 %v3749_v55  ;;  %5347 = vmatmul.mubr.bf16.vlgmr.msra.gmra.mrb[240].mxu1 %v4545_v31  ;;  %v3288_v55 = vld [vmem:[%s15510_s8 + $0x88] sm:$0xf]  ;;  %v4906_v31 = vshll.u32 %v17222_v43, 16 }
 0x20f   : > { %12609 = vmatpush3.bf16.msra.mxu1 %v14927_v8  ;;  %13637 = vmatprep.mubr.msk.bf16.mxu0 %vm15447_vm1, %v20516_v18  ;;  %v17350_v8 = vcombine.low %v3285_v4, %v3288_v55  ;;  %v4719_v4 = vrot.slane %v4717_v15, 4  ;;  %v17368_v55 = vsel %vm4528_vm4, %v4819_v29, %v4864_v61  ;;  %v14934_v29 = vld [vmem:[%s20443_s1 + $0x608] sm:$0xff]   ;;  %v3291_v15 = vld [vmem:[%s15510_s8 + $0x9c] sm:$0xf] }
 0x210   : > { %5354 = vmatprep.mubr.bf16.mxu1 %v4631_v35  ;;  %12610 = vmatprep.subr.bf16.mxu1 %v14931_v17  ;;  %v4622_v17 = vsel %vm4528_vm4, %v17296_v50, %v4621_v57  ;;  %v14937_v50 = vld [vmem:[%s20443_s1 + $0x590] sm:$0xff]   ;;  %20580 = vst [vmem:[#allocation8_spill] sm:$0xff] %v17368_v55  ;;  %v4908_v12 = vrot.slane %v4906_v31, 4  ;;  %v4759_v31 = vshrl.u32 %v16986_v32, 16 }
 0x211   : > { %v12218_v21 = vpop.f32.mrb[136].mxu1  ;;  %v3673_v27 = vrot.slane %v17350_v8, 3 }
 0x212   : > { %v12219_v34 = vpop.f32.mrb[137].mxu1  ;;  %v4761_v58 = vrot.slane %v4759_v31, 3 }
 0x213   : > { %v17352_v22 = vadd.f32 %v12219_v34, %v12218_v21  ;;  %v12221_v35 = vpop.f32.mrb[138].mxu1  ;;  %12611 = vmatpush3.bf16.msra.mxu1 %v14932_v46  ;;  %v17371_v46 = vor.u32 %v4665_v24, %v4662_v10  ;;  %v4720_v21 = vor.u32 %v4719_v4, %v4716_v14  ;;  %v4762_v34 = vshll.u32 %v16986_v32, 16  ;;  %v14941_v24 = vld [vmem:[%s20443_s1 + $0x598] sm:$0xff]  }
 0x214   : > { %v12222_v43 = vpop.f32.mrb[139].mxu1  ;;  %12612 = vmatprep.subr.bf16.mxu1 %v14935_v19  ;;  %v3294_v19 = vld [vmem:[%s15510_s8 + $0xb0] sm:$0xf]  ;;  %v3674_v51 = vsel %vm3649_vm3, %v3663_v62, %v3673_v27  ;;  %v4707_v4 = vrot.slane %v4705_v36, 3  ;;  %v14949_v36 = vld [vmem:[%s20443_s1 + $0x5e8] sm:$0xff]  }
 0x215   : > { %v17360_v13 = vadd.f32 %v12222_v43, %v12221_v35  ;;  %v4951_v35 = vshll.u32 %v17243_v48, 16  ;;  %v17398_v43 = vcombine.low %v3291_v15, %v3294_v19  ;;  %v4764_v62 = vrot.slane %v4762_v34, 4 }
 0x216   : > { %13638 = vmatmul.mubr.bf16.vlgmr.msra.gmra.mrb[24].mxu0 %v3664_v0  ;;  %5355 = vmatmul.mubr.bf16.gmra.mrb[244].mxu1 %v4622_v17  ;;  %v4667_v17 = vsel %vm4528_vm4, %v4621_v57, %v17371_v46  ;;  %v14938_v57 = vld [vmem:[%s20443_s1 + $0x610] sm:$0xff]   ;;  %v4804_v34 = vshrl.u32 %v17034_v20, 16 }
 0x217   : > { %13682 = vmatpush3.bf16.msra.mxu0 %v14930_v47  ;;  %13641 = vmatprep.mubr.msk.bf16.mxu0 %vm15447_vm1, %v20516_v18  ;;  %v4948_v47 = vshrl.u32 %v17243_v48, 16  ;;  %v4721_v48 = vsel %vm4528_vm4, %v4675_v44, %v4720_v21  ;;  %v14945_v44 = vld [vmem:[%s20443_s1 + $0x5a0] sm:$0xff]   ;;  %v4765_v31 = vor.u32 %v4764_v62, %v4761_v58 }
 0x218   : > { %5362 = vmatprep.mubr.bf16.mxu1 %v4676_v23  ;;  %13683 = vmatprep.subr.bf16.mxu0 %v20516_v18  ;;  %v4710_v23 = vrot.slane %v4708_v6, 4  ;;  %v3297_v6 = vld [vmem:[%s15510_s8 + $0xc4] sm:$0xf]  ;;  %v4806_v62 = vrot.slane %v4804_v34, 3  ;;  %v4849_v34 = vshrl.u32 %v17117_v37, 16 }
 0x219   : > { %v12224_v10 = vpop.f32.mrb[140].mxu1  ;;  %12613 = vmatpush3.bf16.msra.mxu1 %v14937_v50  ;;  %v4909_v50 = vor.u32 %v4908_v12, %v4905_v54  ;;  %v3683_v12 = vrot.slane %v17398_v43, 3  ;;  %v4950_v15 = vrot.slane %v4948_v47, 3 }
 0x21a   : > { %v12225_v0 = vpop.f32.mrb[141].mxu1  ;;  %12614 = vmatprep.subr.bf16.mxu1 %v14940_v1  ;;  %v14944_v1 = vld [vmem:[%s20443_s1 + $0x5e0] sm:$0xff]   ;;  %v4711_v19 = vor.u32 %v4710_v23, %v4707_v4 }
 0x21b   : > { %v17400_v32 = vadd.f32 %v12225_v0, %v12224_v10  ;;  %v12227_v14 = vpop.f32.mrb[142].mxu1  ;;  %13684 = vmatpush3.bf16.msra.mxu0 %v14934_v29  ;;  %v17416_v54 = vsel %vm4528_vm4, %v4864_v61, %v4909_v50  ;;  %v3300_v61 = vld [vmem:[%s15510_s8 + $0xd8] sm:$0xf]  ;;  %v4807_v10 = vshll.u32 %v17034_v20, 16  ;;  %v3684_v20 = vsel %vm3649_vm3, %v3673_v27, %v3683_v12  ;;  %v14947_v27 = vld [vmem:[%s20443_s1 + $0x620] sm:$0xff]  }
 0x21c   : > { %v12228_v55 = vpop.f32.mrb[143].mxu1  ;;  %13685 = vmatprep.subr.bf16.mxu0 %v20516_v18 }
 0x21d   : > { %v17410_v29 = vadd.f32 %v12228_v55, %v12227_v14  ;;  %12615 = vmatpush3.bf16.msra.mxu1 %v14941_v24  ;;  %v4953_v55 = vrot.slane %v4951_v35, 4  ;;  %v14943_v24 = vld [vmem:[%s20443_s1 + $0x618] sm:$0xff]   ;;  %v14950_v35 = vld [vmem:[%s20443_s1 + $0x5a8] sm:$0xff]   ;;  %v17444_v14 = vcombine.low %v3297_v6, %v3300_v61  ;;  %v3306_v61 = vld [vmem:[%s15510_s8 + $0x100] sm:$0xf] }
 0x21e   : > { %13642 = vmatmul.mubr.bf16.gmra.mrb[28].mxu0 %v3674_v51  ;;  %5363 = vmatmul.mubr.bf16.gmra.mrb[248].mxu1 %v4667_v17  ;;  %v4712_v17 = vsel %vm4528_vm4, %v17371_v46, %v4711_v19  ;;  %v14953_v46 = vld [vmem:[%s20443_s1 + $0x5f0] sm:$0xff]  }
 0x21f   : > { %13645 = vmatprep.mubr.msk.bf16.mxu0 %vm15447_vm1, %v20516_v18  ;;  %5370 = vmatprep.mubr.bf16.mxu1 %v4721_v48  ;;  %v17446_v4 = vor.u32 %v4953_v55, %v4950_v15  ;;  %v4766_v48 = vsel %vm4528_vm4, %v4720_v21, %v4765_v31  ;;  %v14954_v21 = vld [vmem:[%s20443_s1 + $0x5b0] sm:$0xff]   ;;  %v3693_v15 = vrot.slane %v17444_v14, 3  ;;  %v3303_v55 = vld [vmem:[%s15510_s8 + $0xec] sm:$0xf] }
 0x220   : > { %13686 = vmatpush3.bf16.msra.mxu0 %v14938_v57  ;;  %12616 = vmatprep.subr.bf16.mxu1 %v14944_v1  ;;  %v4809_v57 = vrot.slane %v4807_v10, 4  ;;  %v14952_v10 = vld [vmem:[%s20443_s1 + $0x628] sm:$0xff]  }
 0x221   : > { %v12230_v47 = vpop.f32.mrb[144].mxu1  ;;  %13687 = vmatprep.subr.bf16.mxu0 %v20516_v18  ;;  %12617 = vmatpush3.bf16.msra.mxu1 %v14945_v44  ;;  %v17463_v44 = vsel %vm4528_vm4, %v4909_v50, %v17446_v4  ;;  %v4852_v50 = vshll.u32 %v17117_v37, 16 }
 0x222   : > { %v12231_v58 = vpop.f32.mrb[145].mxu1  ;;  %12618 = vmatprep.subr.bf16.mxu1 %v14949_v36  ;;  %v14960_v36 = vld [vmem:[%s20443_s1 + $0x5f8] sm:$0xff]   ;;  %v4810_v6 = vor.u32 %v4809_v57, %v4806_v62  ;;  %v4851_v57 = vrot.slane %v4849_v34, 3 }
 0x223   : > { %v17440_v0 = vadd.f32 %v12231_v58, %v12230_v47  ;;  %v12233_v51 = vpop.f32.mrb[146].mxu1  ;;  %v14961_v47 = vld [vmem:[%s20443_s1 + $0x5b8] sm:$0xff]   ;;  %v20581_v58 = vld [vmem:[#allocation18_spill] sm:$0xff] }
 0x224   : > { %v12234_v23 = vpop.f32.mrb[147].mxu1  ;;  %13688 = vmatpush3.bf16.msra.mxu0 %v14943_v24  ;;  %v4811_v62 = vsel %vm4528_vm4, %v4765_v31, %v4810_v6  ;;  %v3309_v31 = vld [vmem:[%s15510_s8 + $0x114] sm:$0xf]  ;;  %v14963_v34 = vld [vmem:[%s20443_s1 + $0x638] sm:$0xff]  }
 0x225   : > { %v17455_v1 = vadd.f32 %v12234_v23, %v12233_v51  ;;  %13689 = vmatprep.subr.bf16.mxu0 %v20516_v18  ;;  %12619 = vmatpush3.bf16.msra.mxu1 %v14950_v35  ;;  %v17489_v23 = vcombine.low %v3303_v55, %v3306_v61  ;;  %v4894_v55 = vshrl.u32 %v17170_v16, 16  ;;  %v4897_v61 = vshll.u32 %v17170_v16, 16 }
 0x226   : > { %13646 = vmatmul.mubr.bf16.gmra.mrb[32].mxu0 %v3684_v20  ;;  %5371 = vmatmul.mubr.bf16.gmra.mrb[252].mxu1 %v4712_v17  ;;  %v4757_v20 = vsel %vm4528_vm4, %v4711_v19, %v20581_v58  ;;  %v3694_v17 = vsel %vm3649_vm3, %v3683_v12, %v3693_v15  ;;  %v14959_v19 = vld [vmem:[%s20443_s1 + $0x630] sm:$0xff]  }
 0x227   : > { %13649 = vmatprep.mubr.msk.bf16.mxu0 %vm15447_vm1, %v20516_v18  ;;  %5378 = vmatprep.mubr.bf16.mxu1 %v4766_v48  ;;  %v3703_v12 = vrot.slane %v17489_v23, 3 }
 0x228   : > { %13690 = vmatpush3.bf16.msra.mxu0 %v14947_v27  ;;  %12620 = vmatprep.subr.bf16.mxu1 %v14953_v46  ;;  %v4854_v27 = vrot.slane %v4852_v50, 4  ;;  %v14964_v46 = vld [vmem:[%s20443_s1 + $0x680] sm:$0xff]  }
 0x229   : > { %v12236_v24 = vpop.f32.mrb[148].mxu1  ;;  %13691 = vmatprep.subr.bf16.mxu0 %v20516_v18  ;;  %12621 = vmatpush3.bf16.msra.mxu1 %v14954_v21  ;;  %v3704_v58 = vsel %vm3649_vm3, %v3693_v15, %v3703_v12 }
 0x22a   : > { %v12237_v35 = vpop.f32.mrb[149].mxu1  ;;  %12622 = vmatprep.subr.bf16.mxu1 %v14960_v36  ;;  %v4855_v21 = vor.u32 %v4854_v27, %v4851_v57  ;;  %v3312_v36 = vld [vmem:[%s15510_s8 + $0x128] sm:$0xf]  ;;  %v20582_v27 = vld [vmem:[#allocation20_spill] sm:$0xff] }
 0x22b   : > { %v17484_v37 = vadd.f32 %v12237_v35, %v12236_v24  ;;  %v12239_v51 = vpop.f32.mrb[150].mxu1 }
 0x22c   : > { %v12240_v48 = vpop.f32.mrb[151].mxu1  ;;  %13692 = vmatpush3.bf16.msra.mxu0 %v14952_v10  ;;  %v14966_v10 = vld [vmem:[%s20443_s1 + $0x700] sm:$0xff]   ;;  %v4856_v51 = vsel %vm4528_vm4, %v4810_v6, %v4855_v21 }
 0x22d   : > { %13693 = vmatprep.subr.bf16.mxu0 %v20516_v18  ;;  %12623 = vmatpush3.bf16.msra.mxu1 %v14961_v47  ;;  %v4899_v48 = vrot.slane %v4897_v61, 4  ;;  %v4942_v61 = vshll.u32 %v17197_v53, 16 }
 0x22e   : > { %13650 = vmatmul.mubr.bf16.gmra.mrb[36].mxu0 %v3694_v17  ;;  %5379 = vmatmul.mubr.bf16.gmra.mrb[0].mxu1 %v4757_v20  ;;  %v17514_v20 = vcombine.low %v3309_v31, %v3312_v36  ;;  %v4896_v17 = vrot.slane %v4894_v55, 3  ;;  %v3315_v36 = vld [vmem:[%s15510_s8 + $0x13c] sm:$0xf]  ;;  %v4939_v55 = vshrl.u32 %v17197_v53, 16 }
 0x22f   : > { %13653 = vmatprep.mubr.msk.bf16.mxu0 %vm15447_vm1, %v20516_v18  ;;  %5386 = vmatprep.mubr.bf16.mxu1 %v4811_v62 }
 0x230   : > { %13694 = vmatpush3.bf16.msra.mxu0 %v14959_v19  ;;  %12709 = vmatprep.subr.bf16.mxu1 %v14964_v46  ;;  %v3713_v6 = vrot.slane %v17514_v20, 3  ;;  %v20583_v19 = vld [vmem:[#allocation2_spill] sm:$0xff]  ;;  %v4900_v31 = vor.u32 %v4899_v48, %v4896_v17  ;;  %v4941_v48 = vrot.slane %v4939_v55, 3 }
 0x231   : > { %v12258_v50 = vpop.f32.mrb[152].mxu1  ;;  %13695 = vmatprep.subr.bf16.mxu0 %v20516_v18 }
 0x232   : > { %v12259_v24 = vpop.f32.mrb[153].mxu1  ;;  %v4901_v17 = vsel %vm4528_vm4, %v4855_v21, %v4900_v31  ;;  %v3324_v21 = vld [vmem:[%s15510_s8 + $0x178] sm:$0xf] }
 0x233   : > { %v12260_v47 = vadd.f32 %v12259_v24, %v12258_v50  ;;  %v12261_v35 = vpop.f32.mrb[154].mxu1  ;;  %v4431_v50 = vld [vmem:[%s15510_s8 + $0x1b8] sm:$0xff] }
 0x234   : > { %v12262_v16 = vpop.f32.mrb[155].mxu1  ;;  %13696 = vmatpush3.bf16.msra.mxu0 %v14963_v34  ;;  %v11127_v53 = vcombine.high %v17211_v39, %v4431_v50 }
 0x235   : > { %v3045_v62 = vadd.f32 %v12260_v47, %v17154_v40  ;;  %v12263_v57 = vadd.f32 %v12262_v16, %v12261_v35  ;;  %12791 = vmatprep.subr.bf16.mxu0 %v14966_v10  ;;  %v3318_v40 = vld [vmem:[%s15510_s8 + $0x150] sm:$0xf]  ;;  %v20584_v10 = vld [vmem:[#allocation3_spill] sm:$0xff] }
 0x236   : > { %13654 = vmatmul.mubr.bf16.gmra.mrb[40].mxu0 %v3704_v58  ;;  %5387 = vmatmul.mubr.bf16.gmra.mrb[4].mxu1 %v20582_v27  ;;  %v3714_v58 = vsel %vm3649_vm3, %v3703_v12, %v3713_v6  ;;  %v17535_v16 = vcombine.low %v3315_v36, %v3318_v40  ;;  %v20585_v36 = vld [vmem:[#allocation4_spill] sm:$0xff] }
 0x237   : > { %v3048_v15 = vadd.f32 %v12263_v57, %v17176_v5  ;;  %13657 = vmatprep.mubr.msk.bf16.mxu0 %vm15447_vm1, %v20516_v18  ;;  %5394 = vmatprep.mubr.bf16.mxu1 %v4856_v51  ;;  %v17524_v46 = vadd.f32 %v20583_v19, %v3045_v62  ;;  %v4944_v62 = vrot.slane %v4942_v61, 4  ;;  %v3321_v19 = vld [vmem:[%s15510_s8 + $0x164] sm:$0xf]  ;;  %v4984_v61 = vshrl.u32 %v11127_v53, 16 }
 0x238   : > { %v3723_v12 = vrot.slane %v17535_v16, 3 }
 0x239   : > { %v12264_v34 = vpop.f32.mrb[156].mxu1  ;;  %v17532_v5 = vadd.f32 %v20584_v10, %v3048_v15  ;;  %v4945_v55 = vor.u32 %v4944_v62, %v4941_v48  ;;  %v20586_v10 = vld [vmem:[#allocation5_spill] sm:$0xff]  ;;  %v4986_v48 = vrot.slane %v4984_v61, 3 }
 0x23a   : > { %v12265_v24 = vpop.f32.mrb[157].mxu1 }
 0x23b   : > { %v12266_v47 = vadd.f32 %v12265_v24, %v12264_v34  ;;  %v12267_v35 = vpop.f32.mrb[158].mxu1 }
 0x23c   : > { %v12268_v51 = vpop.f32.mrb[159].mxu1 }
 0x23d   : > { %v3053_v57 = vadd.f32 %v12266_v47, %v17187_v45  ;;  %v12269_v27 = vadd.f32 %v12268_v51, %v12267_v35  ;;  %v4987_v45 = vshll.u32 %v11127_v53, 16  ;;  %v11126_v51 = vcombine.low %v17211_v39, %v4431_v50 }
 0x23e   : > { %13658 = vmatmul.mubr.bf16.gmra.mrb[44].mxu0 %v3714_v58  ;;  %5395 = vmatmul.mubr.bf16.gmra.mrb[8].mxu1 %v16938_v26  ;;  %v3724_v58 = vsel %vm3649_vm3, %v3713_v6, %v3723_v12 }
 0x23f   : > { %v3056_v15 = vadd.f32 %v12269_v27, %v17201_v63  ;;  %13661 = vmatprep.mubr.msk.bf16.mxu0 %vm15447_vm1, %v20516_v18  ;;  %5402 = vmatprep.mubr.bf16.mxu1 %v4901_v17  ;;  %v17548_v40 = vadd.f32 %v20585_v36, %v3053_v57  ;;  %v17553_v63 = vcombine.low %v3321_v19, %v3324_v21  ;;  %v4989_v62 = vrot.slane %v4987_v45, 4  ;;  %v3327_v36 = vld [vmem:[%s15510_s8 + $0x18c] sm:$0xf] }
 0x240   : > { %v4946_v57 = vsel %vm4528_vm4, %v4900_v31, %v4945_v55  ;;  %v4975_v39 = vshrl.u32 %v11126_v51, 16  ;;  %v4978_v6 = vshll.u32 %v11126_v51, 16  ;;  %v20587_v31 = vld [vmem:[#allocation10_spill] sm:$0xff]  ;;  %v20588_v45 = vld [vmem:[#allocation11_spill] sm:$0xff] }
 0x241   : > { %v12270_v34 = vpop.f32.mrb[160].mxu1  ;;  %v17551_v24 = vadd.f32 %v20586_v10, %v3056_v15  ;;  %v3733_v15 = vrot.slane %v17553_v63, 3  ;;  %v4990_v21 = vor.u32 %v4989_v62, %v4986_v48 }
 0x242   : > { %v12271_v26 = vpop.f32.mrb[161].mxu1 }
 0x243   : > { %v12272_v47 = vadd.f32 %v12271_v26, %v12270_v34  ;;  %v12273_v35 = vpop.f32.mrb[162].mxu1  ;;  %v3734_v10 = vsel %vm3649_vm3, %v3723_v12, %v3733_v15 }
 0x244   : > { %v12274_v17 = vpop.f32.mrb[163].mxu1 }
 0x245   : > { %v3061_v53 = vadd.f32 %v12272_v47, %v17219_v60  ;;  %v12275_v27 = vadd.f32 %v12274_v17, %v12273_v35  ;;  %v3330_v60 = vld [vmem:[%s15510_s8 + $0x1a0] sm:$0xf]  ;;  %v4977_v35 = vrot.slane %v4975_v39, 3  ;;  %v4991_v17 = vsel %vm4528_vm4, %v4945_v55, %v4990_v21  ;;  %v3336_v55 = vld [vmem:[%s15510_s8 + $0x1c8] sm:$0x7] }
 0x246   : > { %13662 = vmatmul.mubr.bf16.gmra.mrb[48].mxu0 %v3724_v58  ;;  %5403 = vmatmul.mubr.bf16.gmra.mrb[12].mxu1 %v17003_v25  ;;  %v17573_v47 = vcombine.low %v3327_v36, %v3330_v60  ;;  %v4980_v58 = vrot.slane %v4978_v6, 4 }
 0x247   : > { %v3064_v19 = vadd.f32 %v12275_v27, %v17229_v41  ;;  %13665 = vmatprep.mubr.msk.bf16.mxu0 %vm15447_vm1, %v20516_v18  ;;  %5410 = vmatprep.mubr.bf16.mxu1 %v4946_v57  ;;  %v17565_v50 = vadd.f32 %v20587_v31, %v3061_v53  ;;  %v17583_v27 = vld [vmem:[%s15510_s8 + $0x1b4] sm:$0xf] }
 0x248   : > { %v3743_v12 = vrot.slane %v17573_v47, 3  ;;  %v4981_v53 = vor.u32 %v4980_v58, %v4977_v35  ;;  %v11005_v58 = vcombine.low %v17583_v27, %v3336_v55 }
 0x249   : > { %v12276_v61 = vpop.f32.mrb[164].mxu1  ;;  %v17570_v34 = vadd.f32 %v20588_v45, %v3064_v19  ;;  %v20589_v19 = vld [vmem:[#allocation14_spill] sm:$0xff] }
 0x24a   : > { %v12277_v25 = vpop.f32.mrb[165].mxu1  ;;  %v4982_v35 = vsel %vm4528_vm4, %v17042_v28, %v4981_v53  ;;  %v20593_v28 = vld [vmem:[#allocation16_spill] sm:$0xff] }
 0x24b   : > { %v12278_v41 = vadd.f32 %v12277_v25, %v12276_v61  ;;  %v12279_v26 = vpop.f32.mrb[166].mxu1  ;;  %v20592_v61 = vld [vmem:[#allocation15_spill] sm:$0xff] }
 0x24c   : > { %v12280_v51 = vpop.f32.mrb[167].mxu1 }
 0x24d   : > { %v3069_v57 = vadd.f32 %v12278_v41, %v17245_v11  ;;  %v12281_v48 = vadd.f32 %v12280_v51, %v12279_v26  ;;  %v20590_v11 = vld [vmem:[#allocation12_spill] sm:$0xff]  ;;  %v3744_v26 = vsel %vm3649_vm3, %v3733_v15, %v3743_v12  ;;  %v3753_v15 = vrot.slane %v11005_v58, 3 }
 0x24e   : > { %13666 = vmatmul.mubr.bf16.gmra.mrb[52].mxu0 %v3734_v10  ;;  %5411 = vmatmul.mubr.bf16.gmra.mrb[16].mxu1 %v17070_v2  ;;  %v4581_v6 = vshrl.u32 %v20590_v11, 16  ;;  %v4584_v31 = vshll.u32 %v20590_v11, 16  ;;  %v20591_v2 = vld [vmem:[#allocation13_spill] sm:$0xff] }
 0x24f   : > { %v3072_v62 = vadd.f32 %v12281_v48, %v17250_v30  ;;  %13669 = vmatprep.mubr.msk.bf16.mxu0 %vm15447_vm1, %v20516_v18  ;;  %5418 = vmatprep.mubr.bf16.mxu1 %v4991_v17  ;;  %v17586_v39 = vadd.f32 %v20589_v19, %v3069_v57  ;;  %v4589_v36 = vshrl.u32 %v20591_v2, 16  ;;  %v4592_v30 = vshll.u32 %v20591_v2, 16 }
 0x250   : > { %v4583_v17 = vrot.slane %v4581_v6, 3  ;;  %v4586_v57 = vrot.slane %v4584_v31, 4  ;;  %v4642_v31 = vshrl.u32 %v16770_v3, 16 }
 0x251   : > { %v12282_v60 = vpop.f32.mrb[168].mxu1  ;;  %v17594_v45 = vadd.f32 %v20592_v61, %v3072_v62  ;;  %v4591_v48 = vrot.slane %v4589_v36, 3  ;;  %v4594_v19 = vrot.slane %v4592_v30, 4  ;;  %v4645_v36 = vshll.u32 %v16770_v3, 16  ;;  %v20594_v30 = vld [vmem:[#allocation17_spill] sm:$0xff] }
 0x252   : > { %v12283_v25 = vpop.f32.mrb[169].mxu1  ;;  %v4587_v55 = vor.u32 %v4586_v57, %v4583_v17  ;;  %v4598_v3 = vshrl.u32 %v17313_v52, 16  ;;  %v4601_v57 = vshll.u32 %v17313_v52, 16  ;;  %v20597_v52 = vld [vmem:[#allocation21_spill] sm:$0xff] }
 0x253   : > { %v12284_v10 = vadd.f32 %v12283_v25, %v12282_v60  ;;  %v12285_v41 = vpop.f32.mrb[170].mxu1  ;;  %v4595_v6 = vor.u32 %v4594_v19, %v4591_v48  ;;  %v4647_v58 = vrot.slane %v4645_v36, 4  ;;  %v4609_v19 = vshll.u32 %v17315_v49, 16 }
 0x254   : > { %v12286_v51 = vpop.f32.mrb[171].mxu1  ;;  %v4600_v36 = vrot.slane %v4598_v3, 3  ;;  %v20598_v3 = vld [vmem:[#allocation37_spill] sm:$0xff] }
 0x255   : > { %v3077_v11 = vadd.f32 %v12284_v10, %v17269_v56  ;;  %v12287_v2 = vadd.f32 %v12286_v51, %v12285_v41  ;;  %v3754_v41 = vsel %vm3649_vm3, %v3743_v12, %v3753_v15  ;;  %v4606_v12 = vshrl.u32 %v17315_v49, 16  ;;  %v14965_v49 = vld [vmem:[%s20443_s1 + $0x640] sm:$0xff]  }
 0x256   : > { %13670 = vmatmul.mubr.bf16.gmra.mrb[56].mxu0 %v3744_v26  ;;  %5419 = vmatmul.mubr.bf16.gmra.mrb[20].mxu1 %v4982_v35  ;;  %v4596_v26 = vsel %vm4528_vm4, %v4587_v55, %v4595_v6  ;;  %v4644_v35 = vrot.slane %v4642_v31, 3 }
 0x257   : > { %v3080_v62 = vadd.f32 %v12287_v2, %v17273_v7  ;;  %13673 = vmatprep.mubr.msk.bf16.mxu0 %vm15447_vm1, %v20516_v18  ;;  %5426 = vmatprep.mubr.bf16.mxu1 %v4990_v21  ;;  %v17605_v60 = vadd.f32 %v20593_v28, %v3077_v11  ;;  %v20595_v11 = vld [vmem:[#allocation19_spill] sm:$0xff] }
 0x259   : > { %v12288_v56 = vpop.f32.mrb[172].mxu1  ;;  %v17610_v61 = vadd.f32 %v20594_v30, %v3080_v62  ;;  %v20596_v62 = vld [vmem:[#allocation22_spill] sm:$0xff] }
 0x25a   : > { %v12289_v25 = vpop.f32.mrb[173].mxu1  ;;  %v4690_v28 = vshll.u32 %v20596_v62, 16 }
 0x25b   : > { %v12290_v7 = vadd.f32 %v12289_v25, %v12288_v56  ;;  %v12291_v10 = vpop.f32.mrb[174].mxu1  ;;  %v4603_v56 = vrot.slane %v4601_v57, 4 }
 0x25c   : > { %v12292_v21 = vpop.f32.mrb[175].mxu1 }
 0x25d   : > { %v3085_v51 = vadd.f32 %v12290_v7, %v17286_v9  ;;  %v12293_v17 = vadd.f32 %v12292_v21, %v12291_v10  ;;  %v4648_v9 = vor.u32 %v4647_v58, %v4644_v35  ;;  %v4608_v7 = vrot.slane %v4606_v12, 3 }
 0x25e   : > { %13674 = vmatmul.mubr.bf16.gmra.mrb[60].mxu0 %v3754_v41  ;;  %5427 = vmatmul.mubr.bf16.gmra.mrb[24].mxu1 %v4981_v53  ;;  %v4687_v53 = vshrl.u32 %v20596_v62, 16  ;;  %v4611_v10 = vrot.slane %v4609_v19, 4  ;;  %v4692_v58 = vrot.slane %v4690_v28, 4  ;;  %v4604_v57 = vor.u32 %v4603_v56, %v4600_v36  ;;  %v20599_v62 = vld [vmem:[#allocation23_spill] sm:$0xff] }
 0x25f   : > { %v3088_v48 = vadd.f32 %v12293_v17, %v17290_v42  ;;  %13677 = vmatprep.mubr.msk.bf16.mxu0 %vm15447_vm1, %v20516_v18  ;;  %5466 = vmatprep.mubr.bf16.mxu1 %v4596_v26  ;;  %v17623_v2 = vadd.f32 %v20595_v11, %v3085_v51  ;;  %v4649_v21 = vsel %vm4528_vm4, %v4595_v6, %v4648_v9  ;;  %v14968_v26 = vld [vmem:[%s20443_s1 + $0x688] sm:$0xff]   ;;  %v4654_v12 = vshll.u32 %v17350_v8, 16 }
 0x260   : > { %v4689_v35 = vrot.slane %v4687_v53, 3  ;;  %v4612_v6 = vor.u32 %v4611_v10, %v4608_v7  ;;  %v14969_v11 = vld [vmem:[%s20443_s1 + $0x648] sm:$0xff]   ;;  %v20600_v53 = vld [vmem:[#allocation25_spill] sm:$0xff]  ;;  %v14967_v10 = vld [vmem:[%s20443_s1 + $0x6c0] sm:$0xff]  }
 0x261   : > { %v12294_v55 = vpop.f32.mrb[176].mxu1  ;;  %v17628_v31 = vadd.f32 %v20597_v52, %v3088_v48  ;;  %v4651_v48 = vshrl.u32 %v17350_v8, 16  ;;  %v4732_v28 = vshrl.u32 %v20600_v53, 16  ;;  %v4735_v8 = vshll.u32 %v20600_v53, 16  ;;  %v20601_v52 = vld [vmem:[#allocation24_spill] sm:$0xff] }
 0x262   : > { %v12295_v42 = vpop.f32.mrb[177].mxu1  ;;  %v4613_v7 = vsel %vm4528_vm4, %v4604_v57, %v4612_v6  ;;  %v20602_v57 = vld [vmem:[#allocation39_spill] sm:$0xff] }
 0x263   : > { %v12296_v30 = vadd.f32 %v12295_v42, %v12294_v55  ;;  %v12297_v25 = vpop.f32.mrb[178].mxu1  ;;  %v4653_v56 = vrot.slane %v4651_v48, 3 }
 0x264   : > { %v12298_v41 = vpop.f32.mrb[179].mxu1 }
 0x265   : > { %v3093_v51 = vadd.f32 %v12296_v30, %v17317_v33  ;;  %v12299_v17 = vadd.f32 %v12298_v41, %v12297_v25  ;;  %v4656_v30 = vrot.slane %v4654_v12, 4 }
 0x266   : > { %13678 = vmatmul.mubr.bf16.gmra.mrb[64].mxu0 %v3753_v15  ;;  %5467 = vmatmul.mubr.bf16.vlgmr.msra.gmra.mrb[28].mxu1 %v20598_v3  ;;  %v4693_v15 = vor.u32 %v4692_v58, %v4689_v35  ;;  %v4734_v35 = vrot.slane %v4732_v28, 3  ;;  %v4737_v58 = vrot.slane %v4735_v8, 4  ;;  %v14973_v3 = vld [vmem:[%s20443_s1 + $0x650] sm:$0xff]  }
 0x267   : > { %v3096_v19 = vadd.f32 %v12299_v17, %v17327_v59  ;;  %12710 = vmatpush3.bf16.msra.mxu1 %v14965_v49  ;;  %5474 = vmatprep.mubr.bf16.mxu1 %v4649_v21  ;;  %v17646_v33 = vadd.f32 %v20599_v62, %v3093_v51  ;;  %v14972_v59 = vld [vmem:[%s20443_s1 + $0x690] sm:$0xff]   ;;  %v17671_v48 = vor.u32 %v4656_v30, %v4653_v56  ;;  %v20603_v62 = vld [vmem:[#allocation26_spill] sm:$0xff] }
 0x268   : > { %13697 = vmatprep.mubr.msk.bf16.mxu0 %vm15447_vm1, %v20516_v18  ;;  %12711 = vmatprep.subr.bf16.mxu1 %v14968_v26  ;;  %v4694_v21 = vsel %vm4528_vm4, %v4648_v9, %v4693_v15  ;;  %v14970_v26 = vld [vmem:[%s20443_s1 + $0x708] sm:$0xff]   ;;  %v14976_v9 = vld [vmem:[%s20443_s1 + $0x698] sm:$0xff]   ;;  %v4738_v28 = vor.u32 %v4737_v58, %v4734_v35  ;;  %v20604_v8 = vld [vmem:[#allocation28_spill] sm:$0xff] }
 0x269   : > { %v12300_v55 = vpop.f32.mrb[180].mxu1  ;;  %v17656_v42 = vadd.f32 %v20601_v52, %v3096_v19  ;;  %v4696_v19 = vshrl.u32 %v17398_v43, 16 }
 0x26a   : > { %v12301_v36 = vpop.f32.mrb[181].mxu1 }
 0x26b   : > { %v12302_v25 = vadd.f32 %v12301_v36, %v12300_v55  ;;  %v12303_v49 = vpop.f32.mrb[182].mxu1  ;;  %12712 = vmatpush3.bf16.msra.mxu1 %v14969_v11  ;;  %v4699_v11 = vshll.u32 %v17398_v43, 16  ;;  %v4780_v55 = vshll.u32 %v20604_v8, 16  ;;  %v14977_v43 = vld [vmem:[%s20443_s1 + $0x658] sm:$0xff]   ;;  %v20605_v36 = vld [vmem:[#allocation27_spill] sm:$0xff] }
 0x26c   : > { %v12304_v41 = vpop.f32.mrb[183].mxu1  ;;  %12713 = vmatprep.subr.bf16.mxu1 %v14972_v59  ;;  %v4777_v59 = vshrl.u32 %v20604_v8, 16 }
 0x26d   : > { %v3101_v51 = vadd.f32 %v12302_v25, %v17352_v22  ;;  %v12305_v17 = vadd.f32 %v12304_v41, %v12303_v49  ;;  %v14971_v22 = vld [vmem:[%s20443_s1 + $0x6c8] sm:$0xff]   ;;  %v4701_v41 = vrot.slane %v4699_v11, 4  ;;  %v4782_v58 = vrot.slane %v4780_v55, 4 }
 0x26e   : > { %5475 = vmatmul.mubr.bf16.gmra.mrb[32].mxu1 %v20602_v57  ;;  %13698 = vmatmul.mubr.bf16.vlgmr.msra.gmra.mrb[24].mxu0 %v4613_v7  ;;  %v4658_v7 = vsel %vm4528_vm4, %v4612_v6, %v17671_v48  ;;  %v4779_v35 = vrot.slane %v4777_v59, 3  ;;  %v14978_v57 = vld [vmem:[%s20443_s1 + $0x718] sm:$0xff]   ;;  %v20608_v59 = vld [vmem:[#allocation31_spill] sm:$0xff] }
 0x26f   : > { %v3104_v12 = vadd.f32 %v12305_v17, %v17360_v13  ;;  %12792 = vmatpush3.bf16.msra.mxu0 %v14967_v10  ;;  %5482 = vmatprep.mubr.bf16.mxu1 %v4694_v21  ;;  %v17683_v53 = vadd.f32 %v20603_v62, %v3101_v51  ;;  %v14974_v13 = vld [vmem:[%s20443_s1 + $0x710] sm:$0xff]   ;;  %v4698_v10 = vrot.slane %v4696_v19, 3  ;;  %v14980_v17 = vld [vmem:[%s20443_s1 + $0x6a0] sm:$0xff]   ;;  %v20607_v62 = vld [vmem:[#allocation29_spill] sm:$0xff]  ;;  %v4822_v55 = vshrl.u32 %v20608_v59, 16 }
 0x270   : > { %13701 = vmatprep.mubr.msk.bf16.mxu0 %vm15447_vm1, %v20516_v18  ;;  %12793 = vmatprep.subr.bf16.mxu0 %v14970_v26  ;;  %v4739_v26 = vsel %vm4528_vm4, %v4693_v15, %v4738_v28  ;;  %v14975_v51 = vld [vmem:[%s20443_s1 + $0x6d0] sm:$0xff]   ;;  %v14981_v15 = vld [vmem:[%s20443_s1 + $0x660] sm:$0xff]   ;;  %v17726_v8 = vor.u32 %v4782_v58, %v4779_v35 }
 0x271   : > { %v12306_v52 = vpop.f32.mrb[184].mxu1  ;;  %12714 = vmatpush3.bf16.msra.mxu1 %v14973_v3  ;;  %v17696_v56 = vadd.f32 %v20605_v36, %v3104_v12  ;;  %v4741_v12 = vshrl.u32 %v17444_v14, 16  ;;  %v4702_v11 = vor.u32 %v4701_v41, %v4698_v10  ;;  %v14985_v36 = vld [vmem:[%s20443_s1 + $0x668] sm:$0xff]  }
 0x272   : > { %v12307_v30 = vpop.f32.mrb[185].mxu1  ;;  %12715 = vmatprep.subr.bf16.mxu1 %v14976_v9  ;;  %v20606_v9 = vld [vmem:[#allocation40_spill] sm:$0xff]  ;;  %v4784_v58 = vsel %vm4528_vm4, %v4738_v28, %v17726_v8 }
 0x273   : > { %v12308_v25 = vadd.f32 %v12307_v30, %v12306_v52  ;;  %v12309_v49 = vpop.f32.mrb[186].mxu1  ;;  %12794 = vmatpush3.bf16.msra.mxu0 %v14971_v22  ;;  %v4744_v22 = vshll.u32 %v17444_v14, 16  ;;  %v4825_v14 = vshll.u32 %v20608_v59, 16  ;;  %v14979_v52 = vld [vmem:[%s20443_s1 + $0x6d8] sm:$0xff]   ;;  %v20609_v30 = vld [vmem:[#allocation30_spill] sm:$0xff]  ;;  %v14989_v28 = vld [vmem:[%s20443_s1 + $0x670] sm:$0xff]  }
 0x274   : > { %v12310_v21 = vpop.f32.mrb[187].mxu1  ;;  %12795 = vmatprep.subr.bf16.mxu0 %v14974_v13  ;;  %v20611_v59 = vld [vmem:[#allocation34_spill] sm:$0xff] }
 0x275   : > { %v3109_v3 = vadd.f32 %v12308_v25, %v17400_v32  ;;  %v12311_v6 = vadd.f32 %v12310_v21, %v12309_v49  ;;  %12716 = vmatpush3.bf16.msra.mxu1 %v14977_v43  ;;  %v14984_v32 = vld [vmem:[%s20443_s1 + $0x6a8] sm:$0xff]   ;;  %v14982_v43 = vld [vmem:[%s20443_s1 + $0x720] sm:$0xff]   ;;  %v4746_v10 = vrot.slane %v4744_v22, 4  ;;  %v4786_v22 = vshrl.u32 %v17489_v23, 16 }
 0x276   : > { %5483 = vmatmul.mubr.bf16.gmra.mrb[36].mxu1 %v20606_v9  ;;  %13702 = vmatmul.mubr.bf16.gmra.mrb[28].mxu0 %v4658_v7  ;;  %v4743_v7 = vrot.slane %v4741_v12, 3  ;;  %v14994_v12 = vld [vmem:[%s20443_s1 + $0x6b8] sm:$0xff]  }
 0x277   : > { %v3112_v19 = vadd.f32 %v12311_v6, %v17410_v29  ;;  %5490 = vmatprep.mubr.bf16.mxu1 %v4739_v26  ;;  %13705 = vmatprep.mubr.msk.bf16.mxu0 %vm15447_vm1, %v20516_v18  ;;  %v17724_v13 = vadd.f32 %v20607_v62, %v3109_v3  ;;  %v4703_v26 = vsel %vm4528_vm4, %v17671_v48, %v4702_v11  ;;  %v14983_v3 = vld [vmem:[%s20443_s1 + $0x6e0] sm:$0xff]   ;;  %v14988_v6 = vld [vmem:[%s20443_s1 + $0x6b0] sm:$0xff]   ;;  %v14986_v48 = vld [vmem:[%s20443_s1 + $0x728] sm:$0xff]  }
 0x278   : > { %12796 = vmatpush3.bf16.msra.mxu0 %v14975_v51  ;;  %12717 = vmatprep.subr.bf16.mxu1 %v14980_v17  ;;  %v4824_v51 = vrot.slane %v4822_v55, 3  ;;  %v4827_v17 = vrot.slane %v4825_v14, 4  ;;  %v4747_v9 = vor.u32 %v4746_v10, %v4743_v7  ;;  %v4867_v55 = vshrl.u32 %v20611_v59, 16 }
 0x279   : > { %v12312_v29 = vpop.f32.mrb[188].mxu1  ;;  %12797 = vmatprep.subr.bf16.mxu0 %v14978_v57  ;;  %12718 = vmatpush3.bf16.msra.mxu1 %v14981_v15  ;;  %v17740_v25 = vadd.f32 %v20609_v30, %v3112_v19  ;;  %v20610_v19 = vld [vmem:[#allocation32_spill] sm:$0xff]  ;;  %v4870_v14 = vshll.u32 %v20611_v59, 16 }
 0x27a   : > { %v12313_v49 = vpop.f32.mrb[189].mxu1  ;;  %12719 = vmatprep.subr.bf16.mxu1 %v14984_v32  ;;  %v4789_v32 = vshll.u32 %v17489_v23, 16  ;;  %v14992_v23 = vld [vmem:[%s20443_s1 + $0x730] sm:$0xff]   ;;  %v4748_v10 = vsel %vm4528_vm4, %v4702_v11, %v4747_v9  ;;  %v14997_v11 = vld [vmem:[%s20443_s1 + $0x738] sm:$0xff]  }
 0x27b   : > { %v12314_v41 = vadd.f32 %v12313_v49, %v12312_v29  ;;  %v12315_v21 = vpop.f32.mrb[190].mxu1  ;;  %v14995_v29 = vld [vmem:[%s20443_s1 + $0x678] sm:$0xff]  }
 0x27c   : > { %v12316_v35 = vpop.f32.mrb[191].mxu1  ;;  %12798 = vmatpush3.bf16.msra.mxu0 %v14979_v52 }
 0x27d   : > { %v3117_v57 = vadd.f32 %v12314_v41, %v17440_v0  ;;  %v12317_v15 = vadd.f32 %v12316_v35, %v12315_v21  ;;  %12799 = vmatprep.subr.bf16.mxu0 %v14982_v43  ;;  %12720 = vmatpush3.bf16.msra.mxu1 %v14985_v36  ;;  %v20612_v43 = vld [vmem:[#allocation33_spill] sm:$0xff]  ;;  %v4788_v41 = vrot.slane %v4786_v22, 3  ;;  %v4791_v21 = vrot.slane %v4789_v32, 4 }
 0x27e   : > { %5491 = vmatmul.mubr.bf16.gmra.mrb[40].mxu1 %v17276_v38  ;;  %13706 = vmatmul.mubr.bf16.gmra.mrb[32].mxu0 %v4703_v26  ;;  %v4828_v38 = vor.u32 %v4827_v17, %v4824_v51  ;;  %v4872_v51 = vrot.slane %v4870_v14, 4  ;;  %v14993_v17 = vld [vmem:[%s20443_s1 + $0x6f0] sm:$0xff]  }
 0x27f   : > { %v3120_v0 = vadd.f32 %v12317_v15, %v17455_v1  ;;  %5498 = vmatprep.mubr.bf16.mxu1 %v4784_v58  ;;  %13709 = vmatprep.mubr.msk.bf16.mxu0 %vm15447_vm1, %v20516_v18  ;;  %v17769_v62 = vadd.f32 %v20610_v19, %v3117_v57  ;;  %v14987_v1 = vld [vmem:[%s20443_s1 + $0x6e8] sm:$0xff]   ;;  %v4869_v58 = vrot.slane %v4867_v55, 3  ;;  %v4792_v57 = vor.u32 %v4791_v21, %v4788_v41  ;;  %v14998_v19 = vld [vmem:[%s20443_s1 + $0x6f8] sm:$0xff]  }
 0x280   : > { %12800 = vmatpush3.bf16.msra.mxu0 %v14983_v3  ;;  %12721 = vmatprep.subr.bf16.mxu1 %v14988_v6  ;;  %v4829_v35 = vsel %vm4528_vm4, %v17726_v8, %v4828_v38  ;;  %v15000_v3 = vld [vmem:[%s20443_s1 + $0x7c0] sm:$0xff]   ;;  %v4831_v15 = vshrl.u32 %v17514_v20, 16  ;;  %v4876_v41 = vshrl.u32 %v17535_v16, 16  ;;  %v4879_v21 = vshll.u32 %v17535_v16, 16 }
 0x281   : > { %v12318_v52 = vpop.f32.mrb[192].mxu1  ;;  %12801 = vmatprep.subr.bf16.mxu0 %v14986_v48  ;;  %12722 = vmatpush3.bf16.msra.mxu1 %v14989_v28  ;;  %v17783_v36 = vadd.f32 %v20612_v43, %v3120_v0  ;;  %v20613_v8 = vld [vmem:[#allocation6_spill] sm:$0xff]  ;;  %v4834_v48 = vshll.u32 %v17514_v20, 16  ;;  %v20614_v28 = vld [vmem:[#allocation35_spill] sm:$0xff]  ;;  %v20615_v0 = vld [vmem:[#allocation36_spill] sm:$0xff]  ;;  %v4793_v20 = vsel %vm4528_vm4, %v4747_v9, %v4792_v57 }
 0x282   : > { %v12319_v30 = vpop.f32.mrb[193].mxu1  ;;  %12723 = vmatprep.subr.bf16.mxu1 %v14994_v12  ;;  %v4873_v12 = vor.u32 %v4872_v51, %v4869_v58  ;;  %v4912_v22 = vshrl.u32 %v20615_v0, 16  ;;  %v4915_v32 = vshll.u32 %v20615_v0, 16 }
 0x283   : > { %v12320_v49 = vadd.f32 %v12319_v30, %v12318_v52  ;;  %v12321_v7 = vpop.f32.mrb[194].mxu1  ;;  %v4833_v52 = vrot.slane %v4831_v15, 3  ;;  %v4881_v15 = vrot.slane %v4879_v21, 4 }
 0x284   : > { %v12322_v26 = vpop.f32.mrb[195].mxu1  ;;  %12802 = vmatpush3.bf16.msra.mxu0 %v14987_v1  ;;  %v4874_v43 = vsel %vm4528_vm4, %v4828_v38, %v4873_v12  ;;  %v4914_v30 = vrot.slane %v4912_v22, 3 }
 0x285   : > { %v3125_v6 = vadd.f32 %v12320_v49, %v17484_v37  ;;  %12803 = vmatprep.subr.bf16.mxu0 %v14992_v23  ;;  %12724 = vmatpush3.bf16.msra.mxu1 %v14995_v29  ;;  %v4836_v23 = vrot.slane %v4834_v48, 4  ;;  %v4917_v49 = vrot.slane %v4915_v32, 4  ;;  %v20617_v26 = vld [vmem:[#allocation38_spill] sm:$0xff] }
 0x286   : > { %5499 = vmatmul.mubr.bf16.gmra.mrb[44].mxu1 %v20613_v8  ;;  %13710 = vmatmul.mubr.bf16.gmra.mrb[36].mxu0 %v4748_v10  ;;  %v20616_v10 = vld [vmem:[#allocation7_spill] sm:$0xff]  ;;  %v4960_v58 = vshll.u32 %v20617_v26, 16  ;;  %v4878_v8 = vrot.slane %v4876_v41, 3  ;;  %v4924_v41 = vshll.u32 %v17553_v63, 16 }
 0x287   : > { %5506 = vmatprep.mubr.bf16.mxu1 %v4829_v35  ;;  %13713 = vmatprep.mubr.msk.bf16.mxu0 %vm15447_vm1, %v20516_v18  ;;  %v17804_v37 = vadd.f32 %v20614_v28, %v3125_v6  ;;  %v4837_v9 = vor.u32 %v4836_v23, %v4833_v52  ;;  %v4918_v38 = vor.u32 %v4917_v49, %v4914_v30  ;;  %v4957_v35 = vshrl.u32 %v20617_v26, 16  ;;  %v20618_v30 = vld [vmem:[#allocation8_spill] sm:$0xff] }
 0x288   : > { %12804 = vmatpush3.bf16.msra.mxu0 %v14993_v17  ;;  %12892 = vmatprep.subr.bf16.mxu1 %v15000_v3  ;;  %v17822_v3 = vld [vmem:[%s15510_s8 + $0x1c0] sm:$0xff]  ;;  %v4882_v49 = vor.u32 %v4881_v15, %v4878_v8 }
 0x289   : > { %v12359_v59 = vpop.f32.mrb[196].mxu1  ;;  %12805 = vmatprep.subr.bf16.mxu0 %v14997_v11  ;;  %v4838_v22 = vsel %vm4528_vm4, %v4792_v57, %v4837_v9 }
 0x28a   : > { %v12360_v55 = vpop.f32.mrb[197].mxu1 }
 0x28b   : > { %v12361_v14 = vadd.f32 %v12360_v55, %v12359_v59  ;;  %v12362_v1 = vpop.f32.mrb[198].mxu1  ;;  %v4919_v59 = vsel %vm4528_vm4, %v4873_v12, %v4918_v38  ;;  %v4959_v55 = vrot.slane %v4957_v35, 3  ;;  %v4921_v12 = vshrl.u32 %v17553_v63, 16 }
 0x28c   : > { %v12363_v29 = vpop.f32.mrb[199].mxu1  ;;  %12806 = vmatpush3.bf16.msra.mxu0 %v14998_v19 }
 0x28d   : > { %v12364_v7 = vadd.f32 %v12363_v29, %v12362_v1  ;;  %13741 = vmatprep.subr.bf16.mxu0 %v20516_v18  ;;  %v4962_v1 = vrot.slane %v4960_v58, 4  ;;  %v4923_v63 = vrot.slane %v4921_v12, 3  ;;  %v4433_v12 = vld [vmem:[%s15510_s8 + $0x1c8] sm:$0xf] }
 0x28e   : > { %5507 = vmatmul.mubr.bf16.gmra.mrb[48].mxu1 %v20616_v10  ;;  %13714 = vmatmul.mubr.bf16.gmra.mrb[40].mxu0 %v4793_v20  ;;  %v17827_v20 = vld [vmem:[%s15510_s8 + $0x1ac] sm:$0xff] }
 0x28f   : > { %5514 = vmatprep.mubr.bf16.mxu1 %v4874_v43  ;;  %13717 = vmatprep.mubr.msk.bf16.mxu0 %vm15447_vm1, %v20516_v18  ;;  %v11129_v52 = vcombine.high %v17827_v20, %v17822_v3  ;;  %v4963_v21 = vor.u32 %v4962_v1, %v4959_v55 }
 0x291   : > { %v12365_v51 = vpop.f32.mrb[200].mxu1  ;;  %v12441_v17 = vpop.f32.mrb[112].mxu0  ;;  %v5005_v26 = vshll.u32 %v11129_v52, 16 }
 0x292   : > { %v12366_v6 = vpop.f32.mrb[201].mxu1  ;;  %v12442_v11 = vpop.f32.mrb[113].mxu0 }
 0x293   : > { %v12367_v16 = vadd.f32 %v12366_v6, %v12365_v51  ;;  %v12443_v48 = vadd.f32 %v12442_v11, %v12441_v17  ;;  %v12368_v28 = vpop.f32.mrb[202].mxu1  ;;  %v12444_v0 = vpop.f32.mrb[114].mxu0  ;;  %v11128_v6 = vcombine.low %v17827_v20, %v17822_v3 }
 0x294   : > { %v12369_v32 = vpop.f32.mrb[203].mxu1  ;;  %v12445_v19 = vpop.f32.mrb[115].mxu0 }
 0x295   : > { %v4205_v23 = vadd.f32 %v12443_v48, %v12361_v14  ;;  %v12370_v29 = vadd.f32 %v12369_v32, %v12368_v28  ;;  %v12446_v43 = vadd.f32 %v12445_v19, %v12444_v0  ;;  %v5002_v14 = vshrl.u32 %v11129_v52, 16 }
 0x296   : > { %5515 = vmatmul.mubr.bf16.gmra.mrb[52].mxu1 %v20618_v30  ;;  %13718 = vmatmul.mubr.bf16.gmra.mrb[44].mxu0 %v4838_v22  ;;  %v4926_v28 = vrot.slane %v4924_v41, 4  ;;  %v5007_v19 = vrot.slane %v5005_v26, 4  ;;  %v4996_v52 = vshll.u32 %v11128_v6, 16 }
 0x297   : > { %v17833_v57 = vadd.f32 %v17524_v46, %v4205_v23  ;;  %v4208_v10 = vadd.f32 %v12446_v43, %v12364_v7  ;;  %5522 = vmatprep.mubr.bf16.mxu1 %v4919_v59  ;;  %13721 = vmatprep.mubr.msk.bf16.mxu0 %vm15447_vm1, %v20516_v18  ;;  %v4883_v7 = vsel %vm4528_vm4, %v4837_v9, %v4882_v49  ;;  %v5004_v32 = vrot.slane %v5002_v14, 3 }
 0x298   : > { %v4993_v9 = vshrl.u32 %v11128_v6, 16  ;;  %v4966_v23 = vshrl.u32 %v17573_v47, 16  ;;  %v4969_v43 = vshll.u32 %v17573_v47, 16  ;;  %v4998_v47 = vrot.slane %v4996_v52, 4 }
 0x299   : > { %v17840_v35 = vadd.f32 %v17532_v5, %v4208_v10  ;;  %v12371_v58 = vpop.f32.mrb[204].mxu1  ;;  %v12447_v51 = vpop.f32.mrb[116].mxu0  ;;  %v4964_v5 = vsel %vm4528_vm4, %v4918_v38, %v4963_v21  ;;  %v4927_v38 = vor.u32 %v4926_v28, %v4923_v63 }
 0x29a   : > { %v12372_v17 = vpop.f32.mrb[205].mxu1  ;;  %v12448_v46 = vpop.f32.mrb[117].mxu0 }
 0x29b   : > { %v12373_v11 = vadd.f32 %v12372_v17, %v12371_v58  ;;  %v12449_v8 = vadd.f32 %v12448_v46, %v12447_v51  ;;  %v12374_v15 = vpop.f32.mrb[206].mxu1  ;;  %v12450_v48 = vpop.f32.mrb[118].mxu0  ;;  %v4995_v51 = vrot.slane %v4993_v9, 3  ;;  %v4968_v17 = vrot.slane %v4966_v23, 3 }
 0x29c   : > { %v12375_v0 = vpop.f32.mrb[207].mxu1  ;;  %v12451_v22 = vpop.f32.mrb[119].mxu0 }
 0x29d   : > { %v4213_v59 = vadd.f32 %v12449_v8, %v12367_v16  ;;  %v12376_v55 = vadd.f32 %v12375_v0, %v12374_v15  ;;  %v12452_v1 = vadd.f32 %v12451_v22, %v12450_v48  ;;  %v5008_v16 = vor.u32 %v5007_v19, %v5004_v32 }
 0x29e   : > { %5523 = vmatmul.mubr.bf16.gmra.mrb[56].mxu1 %v17416_v54  ;;  %13722 = vmatmul.mubr.bf16.gmra.mrb[48].mxu0 %v4883_v7  ;;  %v4928_v8 = vsel %vm4528_vm4, %v4882_v49, %v4927_v38  ;;  %v11130_v15 = vcombine.low %v17583_v27, %v4433_v12 }
 0x29f   : > { %v17850_v30 = vadd.f32 %v17548_v40, %v4213_v59  ;;  %v4216_v10 = vadd.f32 %v12452_v1, %v12370_v29  ;;  %5530 = vmatprep.mubr.bf16.mxu1 %v4964_v5  ;;  %13725 = vmatprep.mubr.msk.bf16.mxu0 %vm15447_vm1, %v20516_v18  ;;  %v4971_v40 = vrot.slane %v4969_v43, 4  ;;  %v4999_v5 = vor.u32 %v4998_v47, %v4995_v51 }
 0x2a0   : > { %v5011_v27 = vshrl.u32 %v11130_v15, 16  ;;  %v5014_v49 = vshll.u32 %v11130_v15, 16 }
 0x2a1   : > { %v17856_v54 = vadd.f32 %v17551_v24, %v4216_v10  ;;  %v12377_v41 = vpop.f32.mrb[208].mxu1  ;;  %v12453_v14 = vpop.f32.mrb[120].mxu0  ;;  %v5009_v24 = vsel %vm4528_vm4, %v4963_v21, %v5008_v16  ;;  %v4972_v32 = vor.u32 %v4971_v40, %v4968_v17  ;;  %v5000_v52 = vsel %vm4528_vm4, %v17446_v4, %v4999_v5 }
 0x2a2   : > { %v12378_v26 = vpop.f32.mrb[209].mxu1  ;;  %v12454_v58 = vpop.f32.mrb[121].mxu0  ;;  %v5013_v12 = vrot.slane %v5011_v27, 3 }
 0x2a3   : > { %v12379_v46 = vadd.f32 %v12378_v26, %v12377_v41  ;;  %v12455_v29 = vadd.f32 %v12454_v58, %v12453_v14  ;;  %v12380_v7 = vpop.f32.mrb[210].mxu1  ;;  %v12456_v6 = vpop.f32.mrb[122].mxu0  ;;  %v5016_v41 = vrot.slane %v5014_v49, 4 }
 0x2a4   : > { %v12381_v48 = vpop.f32.mrb[211].mxu1  ;;  %v12457_v63 = vpop.f32.mrb[123].mxu0 }
 0x2a5   : > { %v4221_v28 = vadd.f32 %v12455_v29, %v12373_v11  ;;  %v12382_v0 = vadd.f32 %v12381_v48, %v12380_v7  ;;  %v12458_v22 = vadd.f32 %v12457_v63, %v12456_v6  ;;  %v15320_v63 = vld [vmem:[%s15510_s8 + $0x28] sm:$0xff] }
 0x2a6   : > { %5531 = vmatmul.mubr.bf16.gmra.mrb[60].mxu1 %v17463_v44  ;;  %13726 = vmatmul.mubr.bf16.gmra.mrb[52].mxu0 %v4928_v8 }
 0x2a7   : > { %v17863_v19 = vadd.f32 %v17565_v50, %v4221_v28  ;;  %v4224_v59 = vadd.f32 %v12458_v22, %v12376_v55  ;;  %5538 = vmatprep.mubr.bf16.mxu1 %v5009_v24  ;;  %13729 = vmatprep.mubr.msk.bf16.mxu0 %vm15447_vm1, %v20516_v18  ;;  %v4973_v50 = vsel %vm4528_vm4, %v4927_v38, %v4972_v32  ;;  %v15321_v24 = vld [vmem:[%s15510_s8 + $0x3c] sm:$0xff] }
 0x2a8   : > { %v5017_v38 = vor.u32 %v5016_v41, %v5013_v12 }
 0x2a9   : > { %v17868_v21 = vadd.f32 %v17570_v34, %v4224_v59  ;;  %v12383_v11 = vpop.f32.mrb[212].mxu1  ;;  %v12459_v1 = vpop.f32.mrb[124].mxu0 }
 0x2aa   : > { %v12384_v9 = vpop.f32.mrb[213].mxu1  ;;  %v12460_v44 = vpop.f32.mrb[125].mxu0 }
 0x2ab   : > { %v12385_v23 = vadd.f32 %v12384_v9, %v12383_v11  ;;  %v12461_v55 = vadd.f32 %v12460_v44, %v12459_v1  ;;  %v12386_v43 = vpop.f32.mrb[214].mxu1  ;;  %v12462_v10 = vpop.f32.mrb[126].mxu0  ;;  %v11251_v9 = vcombine.low %v15320_v63, %v15321_v24 }
 0x2ac   : > { %v12387_v14 = vpop.f32.mrb[215].mxu1  ;;  %v12463_v26 = vpop.f32.mrb[127].mxu0 }
 0x2ad   : > { %v4229_v58 = vadd.f32 %v12461_v55, %v12379_v46  ;;  %v12388_v34 = vadd.f32 %v12387_v14, %v12386_v43  ;;  %v12464_v51 = vadd.f32 %v12463_v26, %v12462_v10  ;;  %v15001_v55 = vld [vmem:[%s20443_s1 + $0x780] sm:$0xff]   ;;  %v15322_v43 = vld [vmem:[%s15510_s8 + $0x50] sm:$0xff] }
 0x2ae   : > { %5539 = vmatmul.mubr.bf16.gmra.mrb[64].mxu1 %v5000_v52  ;;  %13730 = vmatmul.mubr.bf16.gmra.mrb[56].mxu0 %v4973_v50  ;;  %v15323_v10 = vld [vmem:[%s15510_s8 + $0x64] sm:$0xff]  ;;  %v15324_v14 = vld [vmem:[%s15510_s8 + $0x30] sm:$0xff] }
 0x2af   : > { %v17874_v47 = vadd.f32 %v17586_v39, %v4229_v58  ;;  %v4232_v4 = vadd.f32 %v12464_v51, %v12382_v0  ;;  %5546 = vmatprep.mubr.bf16.mxu1 %v5008_v16  ;;  %13733 = vmatprep.mubr.msk.bf16.mxu0 %vm15447_vm1, %v20516_v18  ;;  %v5018_v39 = vsel %vm4528_vm4, %v4972_v32, %v5017_v38  ;;  %v15325_v26 = vld [vmem:[%s15510_s8 + $0x44] sm:$0xff] }
 0x2b0   : > { %v11252_v16 = vcombine.high %v15320_v63, %v15321_v24  ;;  %v11257_v12 = vcombine.high %v15322_v43, %v15323_v10  ;;  %v11254_v58 = vcombine.high %v15324_v14, %v15325_v26  ;;  %v11253_v63 = vcombine.low %v15324_v14, %v15325_v26 }
 0x2b1   : > { %v17879_v17 = vadd.f32 %v17594_v45, %v4232_v4  ;;  %v12389_v40 = vpop.f32.mrb[216].mxu1  ;;  %v12465_v46 = vpop.f32.mrb[128].mxu0 }
 0x2b2   : > { %v12390_v29 = vpop.f32.mrb[217].mxu1  ;;  %v12466_v7 = vpop.f32.mrb[129].mxu0 }
 0x2b3   : > { %v12391_v6 = vadd.f32 %v12390_v29, %v12389_v40  ;;  %v12467_v8 = vadd.f32 %v12466_v7, %v12465_v46  ;;  %v12392_v15 = vpop.f32.mrb[218].mxu1  ;;  %v12468_v48 = vpop.f32.mrb[130].mxu0  ;;  %v15007_v7 = vld [vmem:[%s20443_s1 + $0x788] sm:$0xff]  }
 0x2b4   : > { %v12393_v28 = vpop.f32.mrb[219].mxu1  ;;  %v12469_v0 = vpop.f32.mrb[131].mxu0 }
 0x2b5   : > { %v4237_v22 = vadd.f32 %v12467_v8, %v12385_v23  ;;  %v12394_v59 = vadd.f32 %v12393_v28, %v12392_v15  ;;  %v12470_v27 = vadd.f32 %v12469_v0, %v12468_v48  ;;  %v11256_v15 = vcombine.low %v15322_v43, %v15323_v10 }
 0x2b6   : > { %5547 = vmatmul.mubr.bf16.gmra.mrb[68].mxu1 %v4999_v5  ;;  %13734 = vmatmul.mubr.bf16.gmra.mrb[60].mxu0 %v5018_v39 }
 0x2b7   : > { %v17885_v45 = vadd.f32 %v17605_v60, %v4237_v22  ;;  %v4240_v49 = vadd.f32 %v12470_v27, %v12388_v34  ;;  %13737 = vmatprep.mubr.msk.bf16.mxu0 %vm15447_vm1, %v20516_v18  ;;  %6158 = vmatprep.mubr.bf16.mxu1 %v11252_v16  ;;  %v15006_v34 = vld [vmem:[%s20443_s1 + $0x7c8] sm:$0xff]   ;;  %v15005_v22 = vld [vmem:[%s20443_s1 + $0x740] sm:$0xff]  }
 0x2b9   : > { %v17890_v32 = vadd.f32 %v17610_v61, %v4240_v49  ;;  %v12395_v11 = vpop.f32.mrb[220].mxu1  ;;  %v12471_v1 = vpop.f32.mrb[132].mxu0 }
 0x2ba   : > { %v12396_v5 = vpop.f32.mrb[221].mxu1  ;;  %v12472_v44 = vpop.f32.mrb[133].mxu0 }
 0x2bb   : > { %v12397_v52 = vadd.f32 %v12396_v5, %v12395_v11  ;;  %v12473_v50 = vadd.f32 %v12472_v44, %v12471_v1  ;;  %v12398_v60 = vpop.f32.mrb[222].mxu1  ;;  %v12474_v23 = vpop.f32.mrb[134].mxu0  ;;  %v15328_v1 = vld [vmem:[%s15510_s8 + $0x58] sm:$0xff] }
 0x2bc   : > { %v12399_v61 = vpop.f32.mrb[223].mxu1  ;;  %v12475_v41 = vpop.f32.mrb[135].mxu0 }
 0x2bd   : > { %v4245_v51 = vadd.f32 %v12473_v50, %v12391_v6  ;;  %v12400_v4 = vadd.f32 %v12399_v61, %v12398_v60  ;;  %v12476_v40 = vadd.f32 %v12475_v41, %v12474_v23  ;;  %v15014_v6 = vld [vmem:[%s20443_s1 + $0x7d0] sm:$0xff]  }
 0x2be   : > { %13738 = vmatmul.mubr.bf16.gmra.mrb[64].mxu0 %v5017_v38  ;;  %6159 = vmatmul.mubr.bf16.vlgmr.msra.gmra.mrb[72].mxu1 %v11251_v9  ;;  %v15329_v9 = vld [vmem:[%s15510_s8 + $0x6c] sm:$0xff] }
 0x2bf   : > { %v17903_v46 = vadd.f32 %v17623_v2, %v4245_v51  ;;  %v4248_v29 = vadd.f32 %v12476_v40, %v12394_v59  ;;  %12893 = vmatpush3.bf16.msra.mxu1 %v15001_v55  ;;  %6166 = vmatprep.mubr.bf16.mxu1 %v11257_v12  ;;  %v15326_v59 = vld [vmem:[%s15510_s8 + $0x78] sm:$0xff]  ;;  %v11259_v5 = vcombine.high %v15328_v1, %v15329_v9  ;;  %v15016_v23 = vld [vmem:[%s20443_s1 + $0x790] sm:$0xff]  }
 0x2c0   : > { %6278 = vmatprep.mubr.bf16.mxu0 %v11254_v58  ;;  %12894 = vmatprep.subr.bf16.mxu1 %v15006_v34  ;;  %v15021_v55 = vld [vmem:[%s20443_s1 + $0x7d8] sm:$0xff]   ;;  %v11258_v34 = vcombine.low %v15328_v1, %v15329_v9 }
 0x2c1   : > { %v17912_v38 = vadd.f32 %v17628_v31, %v4248_v29  ;;  %v12401_v2 = vpop.f32.mrb[224].mxu1  ;;  %v12477_v8 = vpop.f32.mrb[136].mxu0  ;;  %v15327_v31 = vld [vmem:[%s15510_s8 + $0x8c] sm:$0xff]  ;;  %v15330_v29 = vld [vmem:[%s15510_s8 + $0xa0] sm:$0xff] }
 0x2c2   : > { %v12402_v48 = vpop.f32.mrb[225].mxu1  ;;  %v12478_v39 = vpop.f32.mrb[137].mxu0  ;;  %v11262_v27 = vcombine.high %v15326_v59, %v15327_v31  ;;  %v11261_v14 = vcombine.low %v15326_v59, %v15327_v31  ;;  %v15028_v59 = vld [vmem:[%s20443_s1 + $0x7a0] sm:$0xff]   ;;  %v15036_v31 = vld [vmem:[%s20443_s1 + $0x7e8] sm:$0xff]  }
 0x2c3   : > { %v12403_v24 = vadd.f32 %v12402_v48, %v12401_v2  ;;  %v12479_v16 = vadd.f32 %v12478_v39, %v12477_v8  ;;  %v12404_v28 = vpop.f32.mrb[226].mxu1  ;;  %v12480_v0 = vpop.f32.mrb[138].mxu0  ;;  %12895 = vmatpush3.bf16.msra.mxu1 %v15007_v7  ;;  %v15331_v7 = vld [vmem:[%s15510_s8 + $0xb4] sm:$0xff]  ;;  %v15332_v2 = vld [vmem:[%s15510_s8 + $0x80] sm:$0xff] }
 0x2c4   : > { %v12405_v49 = vpop.f32.mrb[227].mxu1  ;;  %v12481_v11 = vpop.f32.mrb[139].mxu0  ;;  %12896 = vmatprep.subr.bf16.mxu1 %v15014_v6  ;;  %v11267_v6 = vcombine.high %v15330_v29, %v15331_v7  ;;  %v15333_v8 = vld [vmem:[%s15510_s8 + $0x94] sm:$0xff] }
 0x2c5   : > { %v4253_v44 = vadd.f32 %v12479_v16, %v12397_v52  ;;  %v12406_v50 = vadd.f32 %v12405_v49, %v12404_v28  ;;  %v12482_v60 = vadd.f32 %v12481_v11, %v12480_v0  ;;  %v15011_v52 = vld [vmem:[%s20443_s1 + $0x748] sm:$0xff]   ;;  %v15027_v16 = vld [vmem:[%s20443_s1 + $0x7e0] sm:$0xff]  }
 0x2c6   : > { %6167 = vmatmul.mubr.bf16.gmra.mrb[76].mxu1 %v11256_v15  ;;  %6279 = vmatmul.mubr.bf16.vlgmr.msra.gmra.mrb[156].mxu0 %v11253_v63  ;;  %v11264_v15 = vcombine.high %v15332_v2, %v15333_v8  ;;  %v15019_v63 = vld [vmem:[%s20443_s1 + $0x750] sm:$0xff]  }
 0x2c7   : > { %v17928_v43 = vadd.f32 %v17646_v33, %v4253_v44  ;;  %v4256_v10 = vadd.f32 %v12482_v60, %v12400_v4  ;;  %13742 = vmatpush3.bf16.msra.mxu0 %v15005_v22  ;;  %6174 = vmatprep.mubr.bf16.mxu1 %v11262_v27  ;;  %v15022_v33 = vld [vmem:[%s20443_s1 + $0x798] sm:$0xff]   ;;  %v11263_v60 = vcombine.low %v15332_v2, %v15333_v8 }
 0x2c8   : > { %6286 = vmatprep.mubr.bf16.mxu0 %v11259_v5  ;;  %13743 = vmatprep.subr.bf16.mxu0 %v20516_v18  ;;  %v11266_v5 = vcombine.low %v15330_v29, %v15331_v7  ;;  %v15049_v2 = vld [vmem:[%s20443_s1 + $0x7f8] sm:$0xff]  }
 0x2c9   : > { %v17935_v12 = vadd.f32 %v17656_v42, %v4256_v10  ;;  %v12407_v61 = vpop.f32.mrb[228].mxu1  ;;  %v12483_v41 = vpop.f32.mrb[140].mxu0  ;;  %12897 = vmatpush3.bf16.msra.mxu1 %v15016_v23 }
 0x2ca   : > { %v12408_v26 = vpop.f32.mrb[229].mxu1  ;;  %v12484_v58 = vpop.f32.mrb[141].mxu0  ;;  %12898 = vmatprep.subr.bf16.mxu1 %v15021_v55 }
 0x2cb   : > { %v12409_v51 = vadd.f32 %v12408_v26, %v12407_v61  ;;  %v12485_v4 = vadd.f32 %v12484_v58, %v12483_v41  ;;  %v12410_v40 = vpop.f32.mrb[230].mxu1  ;;  %v12486_v42 = vpop.f32.mrb[142].mxu0  ;;  %13744 = vmatpush3.bf16.msra.mxu0 %v15011_v52  ;;  %v15334_v52 = vld [vmem:[%s15510_s8 + $0xdc] sm:$0xff]  ;;  %v15335_v61 = vld [vmem:[%s15510_s8 + $0xc8] sm:$0xff] }
 0x2cc   : > { %v12411_v48 = vpop.f32.mrb[231].mxu1  ;;  %v12487_v39 = vpop.f32.mrb[143].mxu0  ;;  %13745 = vmatprep.subr.bf16.mxu0 %v20516_v18  ;;  %v11272_v41 = vcombine.high %v15335_v61, %v15334_v52 }
 0x2cd   : > { %v4261_v28 = vadd.f32 %v12485_v4, %v12403_v24  ;;  %v12412_v0 = vadd.f32 %v12411_v48, %v12410_v40  ;;  %v12488_v22 = vadd.f32 %v12487_v39, %v12486_v42  ;;  %12899 = vmatpush3.bf16.msra.mxu1 %v15022_v33  ;;  %v15026_v24 = vld [vmem:[%s20443_s1 + $0x758] sm:$0xff]   ;;  %v15336_v33 = vld [vmem:[%s15510_s8 + $0xa8] sm:$0xff]  ;;  %v15032_v4 = vld [vmem:[%s20443_s1 + $0x760] sm:$0xff]  }
 0x2ce   : > { %6175 = vmatmul.mubr.bf16.gmra.mrb[80].mxu1 %v11261_v14  ;;  %6287 = vmatmul.mubr.bf16.gmra.mrb[160].mxu0 %v11258_v34  ;;  %v15337_v14 = vld [vmem:[%s15510_s8 + $0xbc] sm:$0xff]  ;;  %v15042_v40 = vld [vmem:[%s20443_s1 + $0x7f0] sm:$0xff]  }
 0x2cf   : > { %v17958_v27 = vadd.f32 %v17683_v53, %v4261_v28  ;;  %v4264_v49 = vadd.f32 %v12488_v22, %v12406_v50  ;;  %6182 = vmatprep.mubr.bf16.mxu1 %v11267_v6  ;;  %6294 = vmatprep.mubr.bf16.mxu0 %v11264_v15  ;;  %v15037_v53 = vld [vmem:[%s20443_s1 + $0x7a8] sm:$0xff]   ;;  %v11269_v26 = vcombine.high %v15336_v33, %v15337_v14  ;;  %v15043_v6 = vld [vmem:[%s20443_s1 + $0x7b0] sm:$0xff]  }
 0x2d0   : > { %13746 = vmatpush3.bf16.msra.mxu0 %v15019_v63  ;;  %12900 = vmatprep.subr.bf16.mxu1 %v15027_v16  ;;  %v11271_v16 = vcombine.low %v15335_v61, %v15334_v52  ;;  %v11268_v22 = vcombine.low %v15336_v33, %v15337_v14  ;;  %v15054_v33 = vld [vmem:[%s20443_s1 + $0x778] sm:$0xff]  }
 0x2d1   : > { %v17964_v11 = vadd.f32 %v17696_v56, %v4264_v49  ;;  %v12413_v1 = vpop.f32.mrb[232].mxu1  ;;  %v12489_v9 = vpop.f32.mrb[144].mxu0  ;;  %13747 = vmatprep.subr.bf16.mxu0 %v20516_v18  ;;  %12901 = vmatpush3.bf16.msra.mxu1 %v15028_v59 }
 0x2d2   : > { %v12414_v44 = vpop.f32.mrb[233].mxu1  ;;  %v12490_v50 = vpop.f32.mrb[145].mxu0  ;;  %12902 = vmatprep.subr.bf16.mxu1 %v15036_v31 }
 0x2d3   : > { %v12415_v23 = vadd.f32 %v12414_v44, %v12413_v1  ;;  %v12491_v56 = vadd.f32 %v12490_v50, %v12489_v9  ;;  %v12416_v55 = vpop.f32.mrb[234].mxu1  ;;  %v12492_v10 = vpop.f32.mrb[146].mxu0  ;;  %v15339_v1 = vld [vmem:[%s15510_s8 + $0xf0] sm:$0xff] }
 0x2d4   : > { %v12417_v58 = vpop.f32.mrb[235].mxu1  ;;  %v12493_v34 = vpop.f32.mrb[147].mxu0  ;;  %13748 = vmatpush3.bf16.msra.mxu0 %v15026_v24  ;;  %v15338_v24 = vld [vmem:[%s15510_s8 + $0x104] sm:$0xff] }
 0x2d5   : > { %v4269_v42 = vadd.f32 %v12491_v56, %v12409_v51  ;;  %v12418_v29 = vadd.f32 %v12417_v58, %v12416_v55  ;;  %v12494_v7 = vadd.f32 %v12493_v34, %v12492_v10  ;;  %13749 = vmatprep.subr.bf16.mxu0 %v20516_v18  ;;  %12903 = vmatpush3.bf16.msra.mxu1 %v15037_v53  ;;  %v15041_v51 = vld [vmem:[%s20443_s1 + $0x768] sm:$0xff]   ;;  %v15340_v53 = vld [vmem:[%s15510_s8 + $0xd0] sm:$0xff]  ;;  %v15062_v55 = vld [vmem:[%s20443_s1 + $0x840] sm:$0xff]  }
 0x2d6   : > { %6183 = vmatmul.mubr.bf16.gmra.mrb[84].mxu1 %v11266_v5  ;;  %6295 = vmatmul.mubr.bf16.gmra.mrb[164].mxu0 %v11263_v60  ;;  %v11277_v9 = vcombine.high %v15339_v1, %v15338_v24  ;;  %v15341_v5 = vld [vmem:[%s15510_s8 + $0xe4] sm:$0xff]  ;;  %v15048_v56 = vld [vmem:[%s20443_s1 + $0x770] sm:$0xff]  }
 0x2d7   : > { %v17988_v8 = vadd.f32 %v17724_v13, %v4269_v42  ;;  %v4272_v15 = vadd.f32 %v12494_v7, %v12412_v0  ;;  %6190 = vmatprep.mubr.bf16.mxu1 %v11272_v41  ;;  %6302 = vmatprep.mubr.bf16.mxu0 %v11269_v26  ;;  %v15052_v13 = vld [vmem:[%s20443_s1 + $0x7b8] sm:$0xff]   ;;  %v11274_v44 = vcombine.high %v15340_v53, %v15341_v5 }
 0x2d8   : > { %13750 = vmatpush3.bf16.msra.mxu0 %v15032_v4  ;;  %12904 = vmatprep.subr.bf16.mxu1 %v15042_v40  ;;  %v11273_v4 = vcombine.low %v15340_v53, %v15341_v5  ;;  %v15348_v5 = vld [vmem:[%s15510_s8 + $0x120] sm:$0xff] }
 0x2d9   : > { %v17994_v48 = vadd.f32 %v17740_v25, %v4272_v15  ;;  %v12419_v39 = vpop.f32.mrb[236].mxu1  ;;  %v12495_v63 = vpop.f32.mrb[148].mxu0  ;;  %13751 = vmatprep.subr.bf16.mxu0 %v20516_v18  ;;  %12905 = vmatpush3.bf16.msra.mxu1 %v15043_v6  ;;  %v15342_v6 = vld [vmem:[%s15510_s8 + $0x118] sm:$0xff] }
 0x2da   : > { %v12420_v28 = vpop.f32.mrb[237].mxu1  ;;  %v12496_v0 = vpop.f32.mrb[149].mxu0  ;;  %12906 = vmatprep.subr.bf16.mxu1 %v15049_v2  ;;  %v15343_v2 = vld [vmem:[%s15510_s8 + $0x12c] sm:$0xff] }
 0x2db   : > { %v12421_v59 = vadd.f32 %v12420_v28, %v12419_v39  ;;  %v12497_v25 = vadd.f32 %v12496_v0, %v12495_v63  ;;  %v12422_v31 = vpop.f32.mrb[238].mxu1  ;;  %v12498_v49 = vpop.f32.mrb[150].mxu0  ;;  %v11282_v15 = vcombine.high %v15342_v6, %v15343_v2 }
 0x2dc   : > { %v12423_v50 = vpop.f32.mrb[239].mxu1  ;;  %v12499_v60 = vpop.f32.mrb[151].mxu0  ;;  %13752 = vmatpush3.bf16.msra.mxu0 %v15041_v51  ;;  %v15344_v51 = vld [vmem:[%s15510_s8 + $0xf8] sm:$0xff] }
 0x2dd   : > { %v4277_v10 = vadd.f32 %v12497_v25, %v12415_v23  ;;  %v12500_v52 = vadd.f32 %v12499_v60, %v12498_v49  ;;  %13753 = vmatprep.subr.bf16.mxu0 %v20516_v18  ;;  %12907 = vmatpush3.bf16.msra.mxu1 %v15052_v13  ;;  %v11281_v25 = vcombine.low %v15342_v6, %v15343_v2 }
 0x2de   : > { %6191 = vmatmul.mubr.bf16.gmra.mrb[88].mxu1 %v11271_v16  ;;  %6303 = vmatmul.mubr.bf16.gmra.mrb[168].mxu0 %v11268_v22 }
 0x2df   : > { %v18012_v61 = vadd.f32 %v17769_v62, %v4277_v10  ;;  %v4280_v41 = vadd.f32 %v12500_v52, %v12418_v29  ;;  %6198 = vmatprep.mubr.bf16.mxu1 %v11277_v9  ;;  %6310 = vmatprep.mubr.bf16.mxu0 %v11274_v44  ;;  %v11276_v62 = vcombine.low %v15339_v1, %v15338_v24  ;;  %v15346_v1 = vld [vmem:[%s15510_s8 + $0x140] sm:$0xff]  ;;  %v15347_v9 = vld [vmem:[%s15510_s8 + $0x154] sm:$0xff] }
 0x2e0   : > { %13754 = vmatpush3.bf16.msra.mxu0 %v15048_v56  ;;  %12974 = vmatprep.subr.bf16.mxu1 %v15062_v55  ;;  %v11287_v53 = vcombine.high %v15346_v1, %v15347_v9  ;;  %v15349_v44 = vld [vmem:[%s15510_s8 + $0x134] sm:$0xff]  ;;  %v11286_v55 = vcombine.low %v15346_v1, %v15347_v9  ;;  %v6507_v1 = vld [vmem:[%s15510_s8 + $0x3c] sm:$0xcc] }
 0x2e1   : > { %v18018_v23 = vadd.f32 %v17783_v36, %v4280_v41  ;;  %v12501_v14 = vpop.f32.mrb[152].mxu0  ;;  %v12542_v26 = vpop.f32.mrb[240].mxu1  ;;  %13755 = vmatprep.subr.bf16.mxu0 %v20516_v18  ;;  %v15345_v36 = vld [vmem:[%s15510_s8 + $0x10c] sm:$0xff]  ;;  %v11284_v50 = vcombine.high %v15348_v5, %v15349_v44  ;;  %v11283_v52 = vcombine.low %v15348_v5, %v15349_v44 }
 0x2e2   : > { %v12502_v58 = vpop.f32.mrb[153].mxu0  ;;  %v12543_v34 = vpop.f32.mrb[241].mxu1  ;;  %v11279_v39 = vcombine.high %v15344_v51, %v15345_v36  ;;  %v11278_v49 = vcombine.low %v15344_v51, %v15345_v36  ;;  %v6510_v9 = vld [vmem:[%s15510_s8 + $0x50] sm:$0xff] }
 0x2e3   : > { %v12503_v40 = vadd.f32 %v12502_v58, %v12501_v14  ;;  %v18021_v42 = vadd.f32 %v12543_v34, %v12542_v26  ;;  %v12504_v29 = vpop.f32.mrb[154].mxu0  ;;  %v12545_v7 = vpop.f32.mrb[242].mxu1  ;;  %v15350_v14 = vld [vmem:[%s15510_s8 + $0x168] sm:$0xff]  ;;  %v15351_v26 = vld [vmem:[%s15510_s8 + $0x17c] sm:$0xff] }
 0x2e4   : > { %v12505_v63 = vpop.f32.mrb[155].mxu0  ;;  %v12546_v13 = vpop.f32.mrb[243].mxu1  ;;  %13756 = vmatpush3.bf16.msra.mxu0 %v15054_v33  ;;  %v15352_v58 = vld [vmem:[%s15510_s8 + $0x148] sm:$0xff]  ;;  %v15353_v34 = vld [vmem:[%s15510_s8 + $0x15c] sm:$0xff]  ;;  %v11291_v6 = vcombine.low %v15350_v14, %v15351_v26 }
 0x2e5   : > { %v4285_v16 = vadd.f32 %v12503_v40, %v12421_v59  ;;  %v18027_v28 = vadd.f32 %v12546_v13, %v12545_v7  ;;  %13801 = vmatprep.subr.bf16.mxu0 %v20516_v18  ;;  %v15355_v63 = vld [vmem:[%s15510_s8 + $0x1a4] sm:$0xff] }
 0x2e6   : > { %6199 = vmatmul.mubr.bf16.gmra.mrb[92].mxu1 %v11276_v62  ;;  %6311 = vmatmul.mubr.bf16.gmra.mrb[172].mxu0 %v11273_v4  ;;  %v11292_v62 = vcombine.high %v15350_v14, %v15351_v26  ;;  %v11289_v4 = vcombine.high %v15352_v58, %v15353_v34  ;;  %v18064_v14 = vcombine.high %v6507_v1, %v6510_v9  ;;  %v15060_v26 = vld [vmem:[%s15510_s8 + $0x68] ss:$20 sps:$4 sm:$0xff]  }
 0x2e7   : > { %v18031_v0 = vadd.f32 %v17804_v37, %v4285_v16  ;;  %6206 = vmatprep.mubr.bf16.mxu1 %v11282_v15  ;;  %6318 = vmatprep.mubr.bf16.mxu0 %v11279_v39  ;;  %v11288_v15 = vcombine.low %v15352_v58, %v15353_v34  ;;  %v15354_v39 = vld [vmem:[%s15510_s8 + $0x190] sm:$0xff]  ;;  %v6890_v34 = vrot.slane %v15060_v26, 2  ;;  %v15073_v26 = vld [vmem:[%s15510_s8 + $0xb8] ss:$20 sps:$4 sm:$0xff]  }
 0x2e8   : > { %v11297_v13 = vcombine.high %v15354_v39, %v15355_v63  ;;  %v15356_v16 = vld [vmem:[%s15510_s8 + $0x170] sm:$0xff]  ;;  %v11296_v5 = vcombine.low %v15354_v39, %v15355_v63  ;;  %20619 = vst [vmem:[#allocation9_spill] sm:$0xff] %v18064_v14  ;;  %v6889_v58 = vrot.slane %v18064_v14, 2  ;;  %v18075_v39 = vcombine.low %v6507_v1, %v6510_v9  ;;  %v15058_v63 = vld [vmem:[%s15510_s8 + $0x64] ss:$20 sps:$4 sm:$0xff]  }
 0x2e9   : > { %v12548_v22 = vpop.f32.mrb[244].mxu1  ;;  %v11303_v9 = vcombine.low %v17822_v3, %v17822_v3 }
 0x2ea   : > { %v12549_v31 = vpop.f32.mrb[245].mxu1 }
 0x2eb   : > { %v18033_v24 = vadd.f32 %v12549_v31, %v12548_v22  ;;  %v12551_v59 = vpop.f32.mrb[246].mxu1  ;;  %v15357_v22 = vld [vmem:[%s15510_s8 + $0x184] sm:$0xff] }
 0x2ec   : > { %v12552_v37 = vpop.f32.mrb[247].mxu1  ;;  %v11293_v44 = vcombine.low %v15356_v16, %v15357_v22 }
 0x2ed   : > { %v18039_v60 = vadd.f32 %v12552_v37, %v12551_v59 }
 0x2ee   : > { %6207 = vmatmul.mubr.bf16.gmra.mrb[96].mxu1 %v11281_v25  ;;  %6319 = vmatmul.mubr.bf16.gmra.mrb[176].mxu0 %v11278_v49  ;;  %v11294_v25 = vcombine.high %v15356_v16, %v15357_v22  ;;  %v6891_v16 = vsel %vm6885_vm5, %v6889_v58, %v6890_v34 }
 0x2ef   : > { %6214 = vmatprep.mubr.bf16.mxu1 %v11287_v53  ;;  %6326 = vmatprep.mubr.bf16.mxu0 %v11284_v50 }
 0x2f1   : > { %v12554_v56 = vpop.f32.mrb[248].mxu1 }
 0x2f2   : > { %v12555_v10 = vpop.f32.mrb[249].mxu1 }
 0x2f3   : > { %v18041_v41 = vadd.f32 %v12555_v10, %v12554_v56  ;;  %v12557_v33 = vpop.f32.mrb[250].mxu1  ;;  %v15358_v56 = vld [vmem:[%s15510_s8 + $0x1b8] sm:$0xff] }
 0x2f4   : > { %v12558_v40 = vpop.f32.mrb[251].mxu1  ;;  %v15359_v10 = vld [vmem:[%s15510_s8 + $0x198] sm:$0xff] }
 0x2f5   : > { %v18047_v29 = vadd.f32 %v12558_v40, %v12557_v33  ;;  %v11301_v40 = vcombine.low %v15358_v56, %v15358_v56 }
 0x2f6   : > { %6215 = vmatmul.mubr.bf16.gmra.mrb[100].mxu1 %v11286_v55  ;;  %6327 = vmatmul.mubr.bf16.gmra.mrb[180].mxu0 %v11283_v52  ;;  %v11302_v55 = vcombine.high %v15358_v56, %v15358_v56  ;;  %v11299_v52 = vcombine.high %v15359_v10, %v17827_v20  ;;  %v15063_v56 = vld [vmem:[%s20443_s1 + $0x800] sm:$0xff]  }
 0x2f7   : > { %6222 = vmatprep.mubr.bf16.mxu1 %v11292_v62  ;;  %6334 = vmatprep.mubr.bf16.mxu0 %v11289_v4 }
 0x2f9   : > { %v12560_v7 = vpop.f32.mrb[252].mxu1 }
 0x2fa   : > { %v12561_v2 = vpop.f32.mrb[253].mxu1 }
 0x2fb   : > { %v18049_v51 = vadd.f32 %v12561_v2, %v12560_v7  ;;  %v12563_v36 = vpop.f32.mrb[254].mxu1 }
 0x2fc   : > { %v12564_v31 = vpop.f32.mrb[255].mxu1 }
 0x2fd   : > { %v18055_v49 = vadd.f32 %v12564_v31, %v12563_v36  ;;  %v11304_v36 = vcombine.high %v17822_v3, %v17822_v3  ;;  %v6887_v31 = vrot.slane %v15058_v63, 2 }
 0x2fe   : > { %6223 = vmatmul.mubr.bf16.gmra.mrb[104].mxu1 %v11291_v6  ;;  %6335 = vmatmul.mubr.bf16.gmra.mrb[184].mxu0 %v11288_v15  ;;  %v11298_v6 = vcombine.low %v15359_v10, %v17827_v20  ;;  %v6886_v20 = vrot.slane %v18075_v39, 2 }
 0x2ff   : > { %6230 = vmatprep.mubr.bf16.mxu1 %v11297_v13  ;;  %6342 = vmatprep.mubr.bf16.mxu0 %v11294_v25  ;;  %v15066_v25 = vld [vmem:[%s15510_s8 + $0x90] ss:$20 sps:$4 sm:$0xff]  }
 0x301   : > { %v12566_v59 = vpop.f32.mrb[0].mxu1 }
 0x302   : > { %v12567_v53 = vpop.f32.mrb[1].mxu1 }
 0x303   : > { %v18059_v50 = vadd.f32 %v12567_v53, %v12566_v59  ;;  %v12569_v37 = vpop.f32.mrb[2].mxu1  ;;  %v6903_v53 = vrot.slane %v15066_v25, 2 }
 0x304   : > { %v12570_v33 = vpop.f32.mrb[3].mxu1 }
 0x305   : > { %v18067_v62 = vadd.f32 %v12570_v33, %v12569_v37  ;;  %v6888_v37 = vsel %vm6885_vm5, %v6886_v20, %v6887_v31  ;;  %v6904_v3 = vsel %vm6885_vm5, %v6890_v34, %v6903_v53  ;;  %v15079_v34 = vld [vmem:[%s20443_s1 + $0x850] sm:$0xff]   ;;  %v15068_v20 = vld [vmem:[%s20443_s1 + $0x880] sm:$0xff]  }
 0x306   : > { %6231 = vmatmul.mubr.bf16.gmra.mrb[108].mxu1 %v11296_v5  ;;  %6343 = vmatmul.mubr.bf16.gmra.mrb[188].mxu0 %v11293_v44 }
 0x307   : > { %6238 = vmatprep.mubr.bf16.mxu1 %v11302_v55  ;;  %6350 = vmatprep.mubr.bf16.mxu0 %v11299_v52  ;;  %v15064_v55 = vld [vmem:[%s15510_s8 + $0x8c] ss:$20 sps:$4 sm:$0xff]  }
 0x308   : > { %v15069_v52 = vld [vmem:[%s20443_s1 + $0x848] sm:$0xff]   ;;  %v6901_v58 = vrot.slane %v15064_v55, 2 }
 0x309   : > { %v12572_v4 = vpop.f32.mrb[4].mxu1 }
 0x30a   : > { %v12573_v7 = vpop.f32.mrb[5].mxu1  ;;  %v6902_v25 = vsel %vm6885_vm5, %v6887_v31, %v6901_v58  ;;  %v15087_v31 = vld [vmem:[%s20443_s1 + $0x858] sm:$0xff]  }
 0x30b   : > { %v18071_v2 = vadd.f32 %v12573_v7, %v12572_v4  ;;  %v12575_v15 = vpop.f32.mrb[6].mxu1  ;;  %v15070_v4 = vld [vmem:[%s20443_s1 + $0x808] sm:$0xff]   ;;  %v6913_v7 = vrot.slane %v15073_v26, 2 }
 0x30c   : > { %v12576_v13 = vpop.f32.mrb[7].mxu1 }
 0x30d   : > { %v18079_v22 = vadd.f32 %v12576_v13, %v12575_v15  ;;  %v15360_v15 = vld [vmem:[%s15510_s8 + $0x38] sm:$0xf] }
 0x30e   : > { %6239 = vmatmul.mubr.bf16.gmra.mrb[112].mxu1 %v11301_v40  ;;  %6351 = vmatmul.mubr.bf16.gmra.mrb[192].mxu0 %v11298_v6 }
 0x30f   : > { %6358 = vmatprep.mubr.bf16.mxu0 %v11304_v36  ;;  %7318 = vmatprep.mubr.bf16.mxu1 %v6891_v16  ;;  %v15361_v36 = vld [vmem:[%s15510_s8 + $0x4c] sm:$0xf] }
 0x310   : > { %v11255_v63 = vcombine.low %v15360_v15, %v15361_v36 }
 0x311   : > { %v12578_v59 = vpop.f32.mrb[8].mxu1 }
 0x312   : > { %v12579_v1 = vpop.f32.mrb[9].mxu1 }
 0x313   : > { %v18085_v5 = vadd.f32 %v12579_v1, %v12578_v59  ;;  %v12581_v44 = vpop.f32.mrb[10].mxu1  ;;  %v15071_v59 = vld [vmem:[%s15510_s8 + $0xb4] ss:$20 sps:$4 sm:$0xff]  }
 0x314   : > { %v12582_v10 = vpop.f32.mrb[11].mxu1  ;;  %v6911_v55 = vrot.slane %v15071_v59, 2  ;;  %v15085_v59 = vld [vmem:[%s20443_s1 + $0x890] sm:$0xff]  }
 0x315   : > { %v18095_v33 = vadd.f32 %v12582_v10, %v12581_v44 }
 0x316   : > { %6359 = vmatmul.mubr.bf16.gmra.mrb[196].mxu0 %v11303_v9  ;;  %7319 = vmatmul.mubr.bf16.vlgmr.msra.gmra.mrb[116].mxu1 %v6888_v37  ;;  %v18117_v9 = vld [vmem:[%s15510_s8 + $0xe0] ss:$20 sps:$4 sm:$0xff]   ;;  %v6914_v37 = vsel %vm6885_vm5, %v6903_v53, %v6913_v7  ;;  %v15075_v53 = vld [vmem:[%s20443_s1 + $0x888] sm:$0xff]   ;;  %v6912_v36 = vsel %vm6885_vm5, %v6901_v58, %v6911_v55 }
 0x317   : > { %12975 = vmatpush3.bf16.msra.mxu1 %v15063_v56  ;;  %13757 = vmatprep.mubr.msk.bf16.mxu0 %vm15447_vm1, %v20516_v18  ;;  %v15081_v56 = vld [vmem:[%s20443_s1 + $0x810] sm:$0xff]   ;;  %v6923_v10 = vrot.slane %v18117_v9, 2  ;;  %v15095_v58 = vld [vmem:[%s20443_s1 + $0x820] sm:$0xff]  }
 0x318   : > { %7326 = vmatprep.mubr.bf16.mxu1 %v6904_v3  ;;  %12976 = vmatprep.subr.bf16.mxu1 %v15069_v52  ;;  %v15088_v3 = vld [vmem:[%s20443_s1 + $0x818] sm:$0xff]  }
 0x319   : > { %v12584_v40 = vpop.f32.mrb[12].mxu1 }
 0x31a   : > { %v12585_v6 = vpop.f32.mrb[13].mxu1 }
 0x31b   : > { %v18109_v13 = vadd.f32 %v12585_v6, %v12584_v40  ;;  %v12587_v16 = vpop.f32.mrb[14].mxu1  ;;  %12977 = vmatpush3.bf16.msra.mxu1 %v15070_v4  ;;  %v15362_v4 = vld [vmem:[%s15510_s8 + $0x60] sm:$0xf] }
 0x31c   : > { %v12588_v1 = vpop.f32.mrb[15].mxu1  ;;  %12978 = vmatprep.subr.bf16.mxu1 %v15079_v34  ;;  %v15363_v34 = vld [vmem:[%s15510_s8 + $0x74] sm:$0xf] }
 0x31d   : > { %v18119_v44 = vadd.f32 %v12588_v1, %v12587_v16  ;;  %v11260_v40 = vcombine.low %v15362_v4, %v15363_v34  ;;  %v15094_v1 = vld [vmem:[%s20443_s1 + $0x860] sm:$0xff]   ;;  %v15365_v4 = vld [vmem:[%s15510_s8 + $0x9c] sm:$0xf] }
 0x31e   : > { %13758 = vmatmul.mubr.bf16.vlgmr.msra.gmra.mrb[24].mxu0 %v11255_v63  ;;  %7327 = vmatmul.mubr.bf16.gmra.mrb[120].mxu1 %v6902_v25  ;;  %v18144_v63 = vld [vmem:[%s15510_s8 + $0xdc] ss:$20 sps:$4 sm:$0xff]   ;;  %v6924_v25 = vsel %vm6885_vm5, %v6913_v7, %v6923_v10  ;;  %v15105_v7 = vld [vmem:[%s20443_s1 + $0x868] sm:$0xff]  }
 0x31f   : > { %13802 = vmatpush3.bf16.msra.mxu0 %v15068_v20  ;;  %13761 = vmatprep.mubr.msk.bf16.mxu0 %vm15447_vm1, %v20516_v18  ;;  %v18149_v20 = vld [vmem:[%s15510_s8 + $0x108] ss:$20 sps:$4 sm:$0xff]  }
 0x320   : > { %7334 = vmatprep.mubr.bf16.mxu1 %v6914_v37  ;;  %13803 = vmatprep.subr.bf16.mxu0 %v20516_v18  ;;  %v6921_v37 = vrot.slane %v18144_v63, 2  ;;  %v15082_v63 = vld [vmem:[%s15510_s8 + $0x104] ss:$20 sps:$4 sm:$0xff]  }
 0x321   : > { %v12590_v52 = vpop.f32.mrb[16].mxu1  ;;  %12979 = vmatpush3.bf16.msra.mxu1 %v15081_v56  ;;  %v6933_v56 = vrot.slane %v18149_v20, 2  ;;  %v15091_v20 = vld [vmem:[%s15510_s8 + $0x130] ss:$20 sps:$4 sm:$0xff]  }
 0x322   : > { %v12591_v26 = vpop.f32.mrb[17].mxu1  ;;  %12980 = vmatprep.subr.bf16.mxu1 %v15087_v31  ;;  %v15093_v31 = vld [vmem:[%s20443_s1 + $0x898] sm:$0xff]  }
 0x323   : > { %v18140_v6 = vadd.f32 %v12591_v26, %v12590_v52  ;;  %v12593_v15 = vpop.f32.mrb[18].mxu1  ;;  %13804 = vmatpush3.bf16.msra.mxu0 %v15075_v53  ;;  %v15106_v52 = vld [vmem:[%s20443_s1 + $0x828] sm:$0xff]  }
 0x324   : > { %v12594_v16 = vpop.f32.mrb[19].mxu1  ;;  %13805 = vmatprep.subr.bf16.mxu0 %v20516_v18  ;;  %v15364_v26 = vld [vmem:[%s15510_s8 + $0x88] sm:$0xf] }
 0x325   : > { %v18157_v9 = vadd.f32 %v12594_v16, %v12593_v15  ;;  %12981 = vmatpush3.bf16.msra.mxu1 %v15088_v3  ;;  %v11265_v34 = vcombine.low %v15364_v26, %v15365_v4  ;;  %v15366_v4 = vld [vmem:[%s15510_s8 + $0xb0] sm:$0xf] }
 0x326   : > { %13762 = vmatmul.mubr.bf16.gmra.mrb[28].mxu0 %v11260_v40  ;;  %7335 = vmatmul.mubr.bf16.gmra.mrb[124].mxu1 %v6912_v36  ;;  %v6922_v36 = vsel %vm6885_vm5, %v6911_v55, %v6921_v37  ;;  %v15113_v55 = vld [vmem:[%s20443_s1 + $0x830] sm:$0xff]  }
 0x327   : > { %13765 = vmatprep.mubr.msk.bf16.mxu0 %vm15447_vm1, %v20516_v18  ;;  %7342 = vmatprep.mubr.bf16.mxu1 %v6924_v25  ;;  %v6934_v25 = vsel %vm6885_vm5, %v6923_v10, %v6933_v56  ;;  %v15118_v10 = vld [vmem:[%s20443_s1 + $0x878] sm:$0xff]  }
 0x328   : > { %13806 = vmatpush3.bf16.msra.mxu0 %v15085_v59  ;;  %12982 = vmatprep.subr.bf16.mxu1 %v15094_v1  ;;  %v15100_v59 = vld [vmem:[%s20443_s1 + $0x8a0] sm:$0xff]   ;;  %v15112_v1 = vld [vmem:[%s20443_s1 + $0x870] sm:$0xff]  }
 0x329   : > { %v12596_v53 = vpop.f32.mrb[20].mxu1  ;;  %13807 = vmatprep.subr.bf16.mxu0 %v20516_v18  ;;  %12983 = vmatpush3.bf16.msra.mxu1 %v15095_v58 }
 0x32a   : > { %v12597_v3 = vpop.f32.mrb[21].mxu1  ;;  %12984 = vmatprep.subr.bf16.mxu1 %v15105_v7  ;;  %v6931_v7 = vrot.slane %v15082_v63, 2 }
 0x32b   : > { %v18178_v40 = vadd.f32 %v12597_v3, %v12596_v53  ;;  %v12599_v15 = vpop.f32.mrb[22].mxu1  ;;  %v15111_v53 = vld [vmem:[%s20443_s1 + $0x8a8] sm:$0xff]   ;;  %v15119_v3 = vld [vmem:[%s20443_s1 + $0x838] sm:$0xff]  }
 0x32c   : > { %v12600_v16 = vpop.f32.mrb[23].mxu1  ;;  %13808 = vmatpush3.bf16.msra.mxu0 %v15093_v31  ;;  %v6943_v31 = vrot.slane %v15091_v20, 2 }
 0x32d   : > { %v18190_v58 = vadd.f32 %v12600_v16, %v12599_v15  ;;  %13809 = vmatprep.subr.bf16.mxu0 %v20516_v18  ;;  %12985 = vmatpush3.bf16.msra.mxu1 %v15106_v52  ;;  %v6932_v16 = vsel %vm6885_vm5, %v6921_v37, %v6931_v7 }
 0x32e   : > { %13766 = vmatmul.mubr.bf16.gmra.mrb[32].mxu0 %v11265_v34  ;;  %7343 = vmatmul.mubr.bf16.gmra.mrb[128].mxu1 %v6922_v36  ;;  %v15367_v34 = vld [vmem:[%s15510_s8 + $0xc4] sm:$0xf] }
 0x32f   : > { %13769 = vmatprep.mubr.msk.bf16.mxu0 %vm15447_vm1, %v20516_v18  ;;  %7350 = vmatprep.mubr.bf16.mxu1 %v6934_v25  ;;  %v11270_v15 = vcombine.low %v15366_v4, %v15367_v34  ;;  %v15089_v25 = vld [vmem:[%s15510_s8 + $0x12c] ss:$20 sps:$4 sm:$0xff]  }
 0x330   : > { %13810 = vmatpush3.bf16.msra.mxu0 %v15100_v59  ;;  %12986 = vmatprep.subr.bf16.mxu1 %v15112_v1  ;;  %v6944_v59 = vsel %vm6885_vm5, %v6933_v56, %v6943_v31  ;;  %v15098_v1 = vld [vmem:[%s15510_s8 + $0x158] ss:$20 sps:$4 sm:$0xff]   ;;  %v15128_v4 = vld [vmem:[%s20443_s1 + $0x900] sm:$0xff]   ;;  %v6941_v37 = vrot.slane %v15089_v25, 2 }
 0x331   : > { %v12602_v52 = vpop.f32.mrb[24].mxu1  ;;  %13811 = vmatprep.subr.bf16.mxu0 %v20516_v18  ;;  %12987 = vmatpush3.bf16.msra.mxu1 %v15113_v55  ;;  %v15117_v55 = vld [vmem:[%s20443_s1 + $0x8b0] sm:$0xff]   ;;  %v6953_v56 = vrot.slane %v15098_v1, 2  ;;  %v15369_v34 = vld [vmem:[%s15510_s8 + $0xec] sm:$0xf] }
 0x332   : > { %v12603_v26 = vpop.f32.mrb[25].mxu1  ;;  %12988 = vmatprep.subr.bf16.mxu1 %v15118_v10  ;;  %v15121_v10 = vld [vmem:[%s20443_s1 + $0x8b8] sm:$0xff]   ;;  %v6942_v25 = vsel %vm6885_vm5, %v6931_v7, %v6941_v37 }
 0x333   : > { %v18210_v36 = vadd.f32 %v12603_v26, %v12602_v52  ;;  %v12605_v63 = vpop.f32.mrb[26].mxu1  ;;  %v15135_v52 = vld [vmem:[%s20443_s1 + $0x980] sm:$0xff]   ;;  %v15368_v26 = vld [vmem:[%s15510_s8 + $0xd8] sm:$0xf]  ;;  %v6954_v1 = vsel %vm6885_vm5, %v6943_v31, %v6953_v56 }
 0x334   : > { %v12606_v20 = vpop.f32.mrb[27].mxu1  ;;  %13812 = vmatpush3.bf16.msra.mxu0 %v15111_v53 }
 0x335   : > { %13813 = vmatprep.subr.bf16.mxu0 %v20516_v18  ;;  %12989 = vmatpush3.bf16.msra.mxu1 %v15119_v3  ;;  %v15096_v20 = vld [vmem:[%s15510_s8 + $0x154] ss:$20 sps:$4 sm:$0xff]  }
 0x336   : > { %13770 = vmatmul.mubr.bf16.gmra.mrb[36].mxu0 %v11270_v15  ;;  %7351 = vmatmul.mubr.bf16.gmra.mrb[132].mxu1 %v6932_v16  ;;  %v11275_v15 = vcombine.low %v15368_v26, %v15369_v34  ;;  %v6951_v7 = vrot.slane %v15096_v20, 2  ;;  %v15370_v26 = vld [vmem:[%s15510_s8 + $0x100] sm:$0xf]  ;;  %v15371_v34 = vld [vmem:[%s15510_s8 + $0x114] sm:$0xf] }
 0x337   : > { %13773 = vmatprep.mubr.msk.bf16.mxu0 %vm15447_vm1, %v20516_v18  ;;  %7358 = vmatprep.mubr.bf16.mxu1 %v6944_v59  ;;  %v15109_v20 = vld [vmem:[%s15510_s8 + $0x1a8] ss:$20 sps:$4 sm:$0xff]  }
 0x338   : > { %13814 = vmatpush3.bf16.msra.mxu0 %v15117_v55  ;;  %13075 = vmatprep.subr.bf16.mxu1 %v15128_v4  ;;  %v15103_v55 = vld [vmem:[%s15510_s8 + $0x180] ss:$20 sps:$4 sm:$0xff]  }
 0x339   : > { %v12624_v53 = vpop.f32.mrb[28].mxu1  ;;  %13815 = vmatprep.subr.bf16.mxu0 %v20516_v18 }
 0x33a   : > { %v12625_v3 = vpop.f32.mrb[29].mxu1 }
 0x33b   : > { %v12626_v63 = vadd.f32 %v12625_v3, %v12624_v53  ;;  %v12627_v16 = vpop.f32.mrb[30].mxu1 }
 0x33c   : > { %v12628_v59 = vpop.f32.mrb[31].mxu1  ;;  %13816 = vmatpush3.bf16.msra.mxu0 %v15121_v10  ;;  %v6963_v10 = vrot.slane %v15103_v55, 2 }
 0x33d   : > { %v5469_v4 = vadd.f32 %v12626_v63, %v18021_v42  ;;  %v12629_v14 = vadd.f32 %v12628_v59, %v12627_v16  ;;  %13157 = vmatprep.subr.bf16.mxu0 %v15135_v52  ;;  %v15101_v16 = vld [vmem:[%s15510_s8 + $0x17c] ss:$20 sps:$4 sm:$0xff]  }
 0x33e   : > { %13774 = vmatmul.mubr.bf16.gmra.mrb[40].mxu0 %v11275_v15  ;;  %7359 = vmatmul.mubr.bf16.gmra.mrb[136].mxu1 %v6942_v25  ;;  %v11280_v15 = vcombine.low %v15370_v26, %v15371_v34  ;;  %v15372_v26 = vld [vmem:[%s15510_s8 + $0x128] sm:$0xf]  ;;  %v15373_v34 = vld [vmem:[%s15510_s8 + $0x13c] sm:$0xf] }
 0x33f   : > { %v5472_v53 = vadd.f32 %v12629_v14, %v18027_v28  ;;  %13777 = vmatprep.mubr.msk.bf16.mxu0 %vm15447_vm1, %v20516_v18  ;;  %7366 = vmatprep.mubr.bf16.mxu1 %v6954_v1  ;;  %v18243_v31 = vadd.f32 %v17833_v57, %v5469_v4  ;;  %v6952_v14 = vsel %vm6885_vm5, %v6941_v37, %v6951_v7  ;;  %v6961_v37 = vrot.slane %v15101_v16, 2 }
 0x340   : > { %v6964_v57 = vsel %vm6885_vm5, %v6953_v56, %v6963_v10  ;;  %v6973_v56 = vrot.slane %v15109_v20, 2 }
 0x341   : > { %v12630_v3 = vpop.f32.mrb[32].mxu1  ;;  %v18246_v42 = vadd.f32 %v17840_v35, %v5472_v53  ;;  %v6567_v53 = vld [vmem:[%s15510_s8 + $0x1cc] sm:$0xff] }
 0x342   : > { %v12631_v52 = vpop.f32.mrb[33].mxu1 }
 0x343   : > { %v12632_v63 = vadd.f32 %v12631_v52, %v12630_v3  ;;  %v12633_v28 = vpop.f32.mrb[34].mxu1  ;;  %v6570_v3 = vld [vmem:[%s15510_s8 + $0x1e0] sm:$0x33] }
 0x344   : > { %v12634_v25 = vpop.f32.mrb[35].mxu1 }
 0x345   : > { %v5477_v59 = vadd.f32 %v12632_v63, %v18033_v24  ;;  %v12635_v35 = vadd.f32 %v12634_v25, %v12633_v28  ;;  %v6962_v28 = vsel %vm6885_vm5, %v6951_v7, %v6961_v37  ;;  %v11477_v25 = vcombine.high %v6567_v53, %v6570_v3 }
 0x346   : > { %13778 = vmatmul.mubr.bf16.gmra.mrb[44].mxu0 %v11280_v15  ;;  %7367 = vmatmul.mubr.bf16.gmra.mrb[140].mxu1 %v6952_v14  ;;  %v15107_v14 = vld [vmem:[%s15510_s8 + $0x1a4] ss:$20 sps:$4 sm:$0xff]  }
 0x347   : > { %v5480_v1 = vadd.f32 %v12635_v35, %v18039_v60  ;;  %13781 = vmatprep.mubr.msk.bf16.mxu0 %vm15447_vm1, %v20516_v18  ;;  %7374 = vmatprep.mubr.bf16.mxu1 %v6964_v57  ;;  %v18259_v55 = vadd.f32 %v17850_v30, %v5477_v59  ;;  %v11285_v60 = vcombine.low %v15372_v26, %v15373_v34  ;;  %v6971_v59 = vrot.slane %v15107_v14, 2 }
 0x348   : > { %v6974_v30 = vsel %vm6885_vm5, %v6963_v10, %v6973_v56  ;;  %v6983_v35 = vrot.slane %v11477_v25, 2  ;;  %v15376_v25 = vld [vmem:[%s15510_s8 + $0x178] sm:$0xf] }
 0x349   : > { %v12636_v4 = vpop.f32.mrb[36].mxu1  ;;  %v18264_v24 = vadd.f32 %v17856_v54, %v5480_v1 }
 0x34a   : > { %v12637_v52 = vpop.f32.mrb[37].mxu1 }
 0x34b   : > { %v12638_v15 = vadd.f32 %v12637_v52, %v12636_v4  ;;  %v12639_v63 = vpop.f32.mrb[38].mxu1  ;;  %v15375_v52 = vld [vmem:[%s15510_s8 + $0x164] sm:$0xf] }
 0x34c   : > { %v12640_v16 = vpop.f32.mrb[39].mxu1 }
 0x34d   : > { %v5485_v57 = vadd.f32 %v12638_v15, %v18041_v41  ;;  %v12641_v20 = vadd.f32 %v12640_v16, %v12639_v63  ;;  %v15374_v41 = vld [vmem:[%s15510_s8 + $0x150] sm:$0xf]  ;;  %v11476_v15 = vcombine.low %v6567_v53, %v6570_v3  ;;  %v6508_v3 = vld [vmem:[%s15510_s8 + $0x44] sm:$0xcc] }
 0x34e   : > { %13782 = vmatmul.mubr.bf16.gmra.mrb[48].mxu0 %v11285_v60  ;;  %7375 = vmatmul.mubr.bf16.gmra.mrb[144].mxu1 %v6962_v28  ;;  %v11290_v26 = vcombine.low %v15374_v41, %v15375_v52  ;;  %v6972_v60 = vsel %vm6885_vm5, %v6961_v37, %v6971_v59 }
 0x34f   : > { %v5488_v54 = vadd.f32 %v12641_v20, %v18047_v29  ;;  %13785 = vmatprep.mubr.msk.bf16.mxu0 %vm15447_vm1, %v20516_v18  ;;  %7382 = vmatprep.mubr.bf16.mxu1 %v6974_v30  ;;  %v18276_v7 = vadd.f32 %v17863_v19, %v5485_v57  ;;  %v6984_v19 = vsel %vm6885_vm5, %v6973_v56, %v6983_v35  ;;  %v6981_v16 = vrot.slane %v11476_v15, 2  ;;  %v6511_v56 = vld [vmem:[%s15510_s8 + $0x58] sm:$0xff]  ;;  %v15377_v57 = vld [vmem:[%s15510_s8 + $0x18c] sm:$0xf] }
 0x350   : > { %v11295_v20 = vcombine.low %v15376_v25, %v15377_v57  ;;  %v18300_v41 = vcombine.high %v6508_v3, %v6511_v56 }
 0x351   : > { %v12642_v1 = vpop.f32.mrb[40].mxu1  ;;  %v18279_v10 = vadd.f32 %v17868_v21, %v5488_v54 }
 0x352   : > { %v12643_v4 = vpop.f32.mrb[41].mxu1 }
 0x353   : > { %v12644_v34 = vadd.f32 %v12643_v4, %v12642_v1  ;;  %v12645_v29 = vpop.f32.mrb[42].mxu1  ;;  %v6982_v1 = vsel %vm6885_vm5, %v6971_v59, %v6981_v16 }
 0x354   : > { %v12646_v63 = vpop.f32.mrb[43].mxu1 }
 0x355   : > { %v5493_v28 = vadd.f32 %v12644_v34, %v18049_v51  ;;  %v12647_v21 = vadd.f32 %v12646_v63, %v12645_v29  ;;  %v6895_v34 = vrot.slane %v18300_v41, 2  ;;  %v15378_v63 = vld [vmem:[%s15510_s8 + $0x1a0] sm:$0xf] }
 0x356   : > { %13786 = vmatmul.mubr.bf16.gmra.mrb[52].mxu0 %v11290_v26  ;;  %7383 = vmatmul.mubr.bf16.gmra.mrb[148].mxu1 %v6972_v60 }
 0x357   : > { %v5496_v14 = vadd.f32 %v12647_v21, %v18055_v49  ;;  %13789 = vmatprep.mubr.msk.bf16.mxu0 %vm15447_vm1, %v20516_v18  ;;  %7390 = vmatprep.mubr.bf16.mxu1 %v6984_v19  ;;  %v18290_v37 = vadd.f32 %v17874_v47, %v5493_v28  ;;  %v18303_v47 = vld [vmem:[%s15510_s8 + $0x70] ss:$20 sps:$4 sm:$0xff]   ;;  %v15379_v19 = vld [vmem:[%s15510_s8 + $0x1b4] sm:$0xf] }
 0x358   : > { %v6896_v29 = vrot.slane %v18303_v47, 2 }
 0x359   : > { %v12648_v53 = vpop.f32.mrb[44].mxu1  ;;  %v18295_v30 = vadd.f32 %v17879_v17, %v5496_v14  ;;  %v18319_v14 = vcombine.low %v6508_v3, %v6511_v56 }
 0x35a   : > { %v12649_v51 = vpop.f32.mrb[45].mxu1 }
 0x35b   : > { %v12650_v49 = vadd.f32 %v12649_v51, %v12648_v53  ;;  %v12651_v54 = vpop.f32.mrb[46].mxu1  ;;  %v6897_v53 = vsel %vm6885_vm5, %v6895_v34, %v6896_v29  ;;  %v18326_v51 = vld [vmem:[%s15510_s8 + $0x98] ss:$20 sps:$4 sm:$0xff]   ;;  %v6892_v3 = vrot.slane %v18319_v14, 2 }
 0x35c   : > { %v12652_v4 = vpop.f32.mrb[47].mxu1 }
 0x35d   : > { %v5501_v52 = vadd.f32 %v12650_v49, %v18059_v50  ;;  %v12653_v26 = vadd.f32 %v12652_v4, %v12651_v54  ;;  %v6509_v49 = vld [vmem:[%s15510_s8 + $0x4c] sm:$0xc]  ;;  %v6512_v54 = vld [vmem:[%s15510_s8 + $0x60] sm:$0xf]  ;;  %v15380_v4 = vld [vmem:[%s15510_s8 + $0x1c8] sm:$0xf] }
 0x35e   : > { %13790 = vmatmul.mubr.bf16.gmra.mrb[56].mxu0 %v11295_v20  ;;  %7391 = vmatmul.mubr.bf16.gmra.mrb[152].mxu1 %v6982_v1 }
 0x35f   : > { %v5504_v17 = vadd.f32 %v12653_v26, %v18067_v62  ;;  %13793 = vmatprep.mubr.msk.bf16.mxu0 %vm15447_vm1, %v20516_v18  ;;  %7398 = vmatprep.mubr.bf16.mxu1 %v6983_v35  ;;  %v18310_v59 = vadd.f32 %v17885_v45, %v5501_v52  ;;  %v11300_v62 = vcombine.low %v15378_v63, %v15379_v19  ;;  %v18322_v35 = vld [vmem:[%s15510_s8 + $0x6c] ss:$20 sps:$4 sm:$0xff]   ;;  %v18345_v26 = vld [vmem:[%s15510_s8 + $0x94] ss:$20 sps:$4 sm:$0xff]  }
 0x360   : > { %v6893_v56 = vrot.slane %v18322_v35, 2  ;;  %v11305_v52 = vcombine.low %v15380_v4, %v15380_v4  ;;  %v18354_v63 = vld [vmem:[%s15510_s8 + $0x74] ss:$20 sps:$4 sm:$0xff]  }
 0x361   : > { %v12654_v60 = vpop.f32.mrb[48].mxu1  ;;  %v18315_v50 = vadd.f32 %v17890_v32, %v5504_v17 }
 0x362   : > { %v12655_v15 = vpop.f32.mrb[49].mxu1 }
 0x363   : > { %v12656_v28 = vadd.f32 %v12655_v15, %v12654_v60  ;;  %v12657_v21 = vpop.f32.mrb[50].mxu1  ;;  %v6894_v60 = vsel %vm6885_vm5, %v6892_v3, %v6893_v56  ;;  %v18351_v15 = vcombine.low %v6509_v49, %v6512_v54  ;;  %v15148_v3 = vld [vmem:[%s20443_s1 + $0x910] sm:$0xff]  }
 0x364   : > { %v12658_v45 = vpop.f32.mrb[51].mxu1 }
 0x365   : > { %v5509_v32 = vadd.f32 %v12656_v28, %v18071_v2  ;;  %v12659_v25 = vadd.f32 %v12658_v45, %v12657_v21  ;;  %v6907_v2 = vrot.slane %v18326_v51, 2  ;;  %20620 = vst [vmem:[#allocation18_spill] sm:$0xff] %v18351_v15  ;;  %v18361_v28 = vld [vmem:[%s15510_s8 + $0xc0] ss:$20 sps:$4 sm:$0xff]  }
 0x366   : > { %13794 = vmatmul.mubr.bf16.gmra.mrb[60].mxu0 %v11300_v62  ;;  %7399 = vmatmul.mubr.bf16.gmra.mrb[156].mxu1 %v6981_v16  ;;  %v15137_v62 = vld [vmem:[%s20443_s1 + $0x908] sm:$0xff]  }
 0x367   : > { %v5512_v57 = vadd.f32 %v12659_v25, %v18079_v22  ;;  %13797 = vmatprep.mubr.msk.bf16.mxu0 %vm15447_vm1, %v20516_v18  ;;  %7438 = vmatprep.mubr.bf16.mxu1 %v6897_v53  ;;  %v18335_v20 = vadd.f32 %v17903_v46, %v5509_v32  ;;  %v15129_v46 = vld [vmem:[%s20443_s1 + $0x8c0] sm:$0xff]   ;;  %v6905_v53 = vrot.slane %v18345_v26, 2  ;;  %v6898_v25 = vrot.slane %v18351_v15, 2 }
 0x368   : > { %v18582_v15 = vld [vmem:[%s15510_s8 + $0x1b0] ss:$20 sps:$4 sm:$0xff]  }
 0x369   : > { %v12660_v16 = vpop.f32.mrb[52].mxu1  ;;  %v18341_v22 = vadd.f32 %v17912_v38, %v5512_v57  ;;  %v6908_v38 = vsel %vm6885_vm5, %v6896_v29, %v6907_v2  ;;  %v6899_v29 = vrot.slane %v18354_v63, 2  ;;  %v15138_v57 = vld [vmem:[%s20443_s1 + $0x8c8] sm:$0xff]  }
 0x36a   : > { %v12661_v1 = vpop.f32.mrb[53].mxu1  ;;  %v15143_v63 = vld [vmem:[%s20443_s1 + $0x988] sm:$0xff]  }
 0x36b   : > { %v12662_v17 = vadd.f32 %v12661_v1, %v12660_v16  ;;  %v12663_v34 = vpop.f32.mrb[54].mxu1 }
 0x36c   : > { %v12664_v19 = vpop.f32.mrb[55].mxu1 }
 0x36d   : > { %v5517_v21 = vadd.f32 %v12662_v17, %v18085_v5  ;;  %v12665_v45 = vadd.f32 %v12664_v19, %v12663_v34  ;;  %v15136_v17 = vld [vmem:[%s20443_s1 + $0x940] sm:$0xff]   ;;  %v18389_v34 = vld [vmem:[%s15510_s8 + $0xbc] ss:$20 sps:$4 sm:$0xff]  }
 0x36e   : > { %13798 = vmatmul.mubr.bf16.gmra.mrb[64].mxu0 %v11305_v52  ;;  %7439 = vmatmul.mubr.bf16.vlgmr.msra.gmra.mrb[160].mxu1 %v6894_v60  ;;  %v6900_v52 = vsel %vm6885_vm5, %v6898_v25, %v6899_v29  ;;  %v18392_v60 = vld [vmem:[%s15510_s8 + $0x9c] ss:$20 sps:$4 sm:$0xff]  }
 0x36f   : > { %v5520_v32 = vadd.f32 %v12665_v45, %v18095_v33  ;;  %13076 = vmatpush3.bf16.msra.mxu1 %v15129_v46  ;;  %7446 = vmatprep.mubr.bf16.mxu1 %v6908_v38  ;;  %v18372_v5 = vadd.f32 %v17928_v43, %v5517_v21  ;;  %v6917_v33 = vrot.slane %v18361_v28, 2  ;;  %v6906_v43 = vsel %vm6885_vm5, %v6893_v56, %v6905_v53  ;;  %v18399_v19 = vld [vmem:[%s15510_s8 + $0xe8] ss:$20 sps:$4 sm:$0xff]  }
 0x370   : > { %13817 = vmatprep.mubr.msk.bf16.mxu0 %vm15447_vm1, %v20516_v18  ;;  %13077 = vmatprep.subr.bf16.mxu1 %v15137_v62  ;;  %v15150_v62 = vld [vmem:[%s20443_s1 + $0x8d0] sm:$0xff]   ;;  %v6915_v45 = vrot.slane %v18389_v34, 2 }
 0x371   : > { %v12666_v49 = vpop.f32.mrb[56].mxu1  ;;  %v18381_v54 = vadd.f32 %v17935_v12, %v5520_v32  ;;  %v6918_v12 = vsel %vm6885_vm5, %v6907_v2, %v6917_v33  ;;  %v15157_v2 = vld [vmem:[%s20443_s1 + $0x918] sm:$0xff]   ;;  %v6909_v32 = vrot.slane %v18392_v60, 2 }
 0x372   : > { %v12667_v16 = vpop.f32.mrb[57].mxu1  ;;  %v18435_v60 = vld [vmem:[%s15510_s8 + $0xc4] ss:$20 sps:$4 sm:$0xff]  }
 0x373   : > { %v12668_v1 = vadd.f32 %v12667_v16, %v12666_v49  ;;  %v12669_v4 = vpop.f32.mrb[58].mxu1  ;;  %13078 = vmatpush3.bf16.msra.mxu1 %v15138_v57  ;;  %v15151_v57 = vld [vmem:[%s20443_s1 + $0x990] sm:$0xff]  }
 0x374   : > { %v12670_v46 = vpop.f32.mrb[59].mxu1  ;;  %13079 = vmatprep.subr.bf16.mxu1 %v15148_v3 }
 0x375   : > { %v5525_v56 = vadd.f32 %v12668_v1, %v18109_v13  ;;  %v12671_v38 = vadd.f32 %v12670_v46, %v12669_v4  ;;  %v15144_v13 = vld [vmem:[%s20443_s1 + $0x948] sm:$0xff]  }
 0x376   : > { %7447 = vmatmul.mubr.bf16.gmra.mrb[164].mxu1 %v6906_v43  ;;  %13818 = vmatmul.mubr.bf16.vlgmr.msra.gmra.mrb[24].mxu0 %v6900_v52  ;;  %v6916_v43 = vsel %vm6885_vm5, %v6905_v53, %v6915_v45  ;;  %v6910_v52 = vsel %vm6885_vm5, %v6899_v29, %v6909_v32  ;;  %v15165_v53 = vld [vmem:[%s20443_s1 + $0x920] sm:$0xff]  }
 0x377   : > { %v5528_v21 = vadd.f32 %v12671_v38, %v18119_v44  ;;  %13158 = vmatpush3.bf16.msra.mxu0 %v15136_v17  ;;  %7454 = vmatprep.mubr.bf16.mxu1 %v6918_v12  ;;  %v18415_v25 = vadd.f32 %v17958_v27, %v5525_v56  ;;  %v6927_v44 = vrot.slane %v18399_v19, 2  ;;  %v15158_v27 = vld [vmem:[%s20443_s1 + $0x8d8] sm:$0xff]  }
 0x378   : > { %13821 = vmatprep.mubr.msk.bf16.mxu0 %vm15447_vm1, %v20516_v18  ;;  %13159 = vmatprep.subr.bf16.mxu0 %v15143_v63  ;;  %v18432_v17 = vld [vmem:[%s15510_s8 + $0xe4] ss:$20 sps:$4 sm:$0xff]  }
 0x379   : > { %v12672_v3 = vpop.f32.mrb[60].mxu1  ;;  %13080 = vmatpush3.bf16.msra.mxu1 %v15150_v62  ;;  %v18427_v49 = vadd.f32 %v17964_v11, %v5528_v21  ;;  %v6928_v12 = vsel %vm6885_vm5, %v6917_v33, %v6927_v44  ;;  %v18439_v63 = vld [vmem:[%s15510_s8 + $0x110] ss:$20 sps:$4 sm:$0xff]   ;;  %v15163_v38 = vld [vmem:[%s20443_s1 + $0x998] sm:$0xff]   ;;  %v15177_v62 = vld [vmem:[%s20443_s1 + $0x928] sm:$0xff]   ;;  %v6919_v21 = vrot.slane %v18435_v60, 2 }
 0x37a   : > { %v12673_v16 = vpop.f32.mrb[61].mxu1  ;;  %13081 = vmatprep.subr.bf16.mxu1 %v15157_v2  ;;  %v15155_v11 = vld [vmem:[%s20443_s1 + $0x950] sm:$0xff]   ;;  %v15166_v33 = vld [vmem:[%s20443_s1 + $0x8e0] sm:$0xff]  }
 0x37b   : > { %v12674_v1 = vadd.f32 %v12673_v16, %v12672_v3  ;;  %v12675_v4 = vpop.f32.mrb[62].mxu1  ;;  %13160 = vmatpush3.bf16.msra.mxu0 %v15144_v13  ;;  %v6920_v60 = vsel %vm6885_vm5, %v6909_v32, %v6919_v21 }
 0x37c   : > { %v12676_v46 = vpop.f32.mrb[63].mxu1  ;;  %13161 = vmatprep.subr.bf16.mxu0 %v15151_v57  ;;  %v6937_v57 = vrot.slane %v18439_v63, 2 }
 0x37d   : > { %v5533_v29 = vadd.f32 %v12674_v1, %v18140_v6  ;;  %v12677_v56 = vadd.f32 %v12676_v46, %v12675_v4  ;;  %13082 = vmatpush3.bf16.msra.mxu1 %v15158_v27  ;;  %v6925_v6 = vrot.slane %v18432_v17, 2  ;;  %v15171_v27 = vld [vmem:[%s20443_s1 + $0x9a0] sm:$0xff]  }
 0x37e   : > { %7455 = vmatmul.mubr.bf16.gmra.mrb[168].mxu1 %v6916_v43  ;;  %13822 = vmatmul.mubr.bf16.gmra.mrb[28].mxu0 %v6910_v52  ;;  %v18481_v46 = vld [vmem:[%s15510_s8 + $0x10c] ss:$20 sps:$4 sm:$0xff]  }
 0x37f   : > { %v5536_v2 = vadd.f32 %v12677_v56, %v18157_v9  ;;  %7462 = vmatprep.mubr.bf16.mxu1 %v6928_v12  ;;  %13825 = vmatprep.mubr.msk.bf16.mxu0 %vm15447_vm1, %v20516_v18  ;;  %v18463_v13 = vadd.f32 %v17988_v8, %v5533_v29  ;;  %v15164_v9 = vld [vmem:[%s20443_s1 + $0x958] sm:$0xff]   ;;  %v15178_v8 = vld [vmem:[%s20443_s1 + $0x8e8] sm:$0xff]   ;;  %v6926_v52 = vsel %vm6885_vm5, %v6915_v45, %v6925_v6  ;;  %v15185_v45 = vld [vmem:[%s20443_s1 + $0x930] sm:$0xff]  }
 0x380   : > { %13162 = vmatpush3.bf16.msra.mxu0 %v15155_v11  ;;  %13083 = vmatprep.subr.bf16.mxu1 %v15165_v53  ;;  %v18484_v12 = vld [vmem:[%s15510_s8 + $0xec] ss:$20 sps:$4 sm:$0xff]   ;;  %v6938_v53 = vsel %vm6885_vm5, %v6927_v44, %v6937_v57 }
 0x381   : > { %v12678_v3 = vpop.f32.mrb[64].mxu1  ;;  %13163 = vmatprep.subr.bf16.mxu0 %v15163_v38  ;;  %13084 = vmatpush3.bf16.msra.mxu1 %v15166_v33  ;;  %v18476_v16 = vadd.f32 %v17994_v48, %v5536_v2  ;;  %v18488_v29 = vld [vmem:[%s15510_s8 + $0x138] ss:$20 sps:$4 sm:$0xff]   ;;  %v15172_v48 = vld [vmem:[%s20443_s1 + $0x960] sm:$0xff]   ;;  %v15186_v38 = vld [vmem:[%s20443_s1 + $0x8f0] sm:$0xff]   ;;  %v6929_v2 = vrot.slane %v18484_v12, 2 }
 0x382   : > { %v12679_v1 = vpop.f32.mrb[65].mxu1  ;;  %13085 = vmatprep.subr.bf16.mxu1 %v15177_v62  ;;  %v15182_v44 = vld [vmem:[%s20443_s1 + $0x9a8] sm:$0xff]   ;;  %v15192_v33 = vld [vmem:[%s20443_s1 + $0x938] sm:$0xff]  }
 0x383   : > { %v12680_v4 = vadd.f32 %v12679_v1, %v12678_v3  ;;  %v12681_v43 = vpop.f32.mrb[66].mxu1  ;;  %v6947_v3 = vrot.slane %v18488_v29, 2  ;;  %v6930_v12 = vsel %vm6885_vm5, %v6919_v21, %v6929_v2  ;;  %v15196_v21 = vld [vmem:[%s20443_s1 + $0x9b8] sm:$0xff]  }
 0x384   : > { %v12682_v11 = vpop.f32.mrb[67].mxu1  ;;  %13164 = vmatpush3.bf16.msra.mxu0 %v15164_v9 }
 0x385   : > { %v5541_v32 = vadd.f32 %v12680_v4, %v18178_v40  ;;  %v12683_v56 = vadd.f32 %v12682_v11, %v12681_v43  ;;  %13165 = vmatprep.subr.bf16.mxu0 %v15171_v27  ;;  %13086 = vmatpush3.bf16.msra.mxu1 %v15178_v8  ;;  %v6935_v40 = vrot.slane %v18481_v46, 2  ;;  %v15190_v8 = vld [vmem:[%s20443_s1 + $0x9b0] sm:$0xff]  }
 0x386   : > { %7463 = vmatmul.mubr.bf16.gmra.mrb[172].mxu1 %v6926_v52  ;;  %13826 = vmatmul.mubr.bf16.gmra.mrb[32].mxu0 %v6920_v60  ;;  %v18530_v11 = vld [vmem:[%s15510_s8 + $0x134] ss:$20 sps:$4 sm:$0xff]  }
 0x387   : > { %v5544_v62 = vadd.f32 %v12683_v56, %v18190_v58  ;;  %7470 = vmatprep.mubr.bf16.mxu1 %v6938_v53  ;;  %13829 = vmatprep.mubr.msk.bf16.mxu0 %vm15447_vm1, %v20516_v18  ;;  %v18512_v9 = vadd.f32 %v18012_v61, %v5541_v32  ;;  %v15184_v58 = vld [vmem:[%s20443_s1 + $0x968] sm:$0xff]   ;;  %v15193_v61 = vld [vmem:[%s20443_s1 + $0x8f8] sm:$0xff]   ;;  %v6936_v60 = vsel %vm6885_vm5, %v6925_v6, %v6935_v40  ;;  %v18535_v32 = vld [vmem:[%s15510_s8 + $0x160] ss:$20 sps:$4 sm:$0xff]  }
 0x388   : > { %13166 = vmatpush3.bf16.msra.mxu0 %v15172_v48  ;;  %13087 = vmatprep.subr.bf16.mxu1 %v15185_v45  ;;  %20623 = vst [vmem:[#allocation3_spill] sm:$0xff] %v18530_v11  ;;  %v15162_v53 = vld [vmem:[%s15510_s8 + $0x114] ss:$20 sps:$4 sm:$0xff]   ;;  %v6948_v45 = vsel %vm6885_vm5, %v6937_v57, %v6947_v3  ;;  %20624 = vst [vmem:[#allocation4_spill] sm:$0xff] %v18535_v32  ;;  %v15198_v56 = vld [vmem:[%s20443_s1 + $0xa40] sm:$0xff]   ;;  %v6945_v57 = vrot.slane %v18530_v11, 2 }
 0x389   : > { %20621 = vst [vmem:[#allocation20_spill] sm:$0xff] %v18512_v9  ;;  %v12684_v27 = vpop.f32.mrb[68].mxu1  ;;  %13167 = vmatprep.subr.bf16.mxu0 %v15182_v44  ;;  %13088 = vmatpush3.bf16.msra.mxu1 %v15186_v38  ;;  %v18525_v1 = vadd.f32 %v18018_v23, %v5544_v62  ;;  %v15191_v23 = vld [vmem:[%s20443_s1 + $0x970] sm:$0xff]   ;;  %v6939_v44 = vrot.slane %v15162_v53, 2 }
 0x38a   : > { %v12685_v4 = vpop.f32.mrb[69].mxu1  ;;  %13089 = vmatprep.subr.bf16.mxu1 %v15192_v33  ;;  %v15197_v33 = vld [vmem:[%s20443_s1 + $0x978] sm:$0xff]  }
 0x38b   : > { %20622 = vst [vmem:[#allocation2_spill] sm:$0xff] %v18525_v1  ;;  %v12686_v43 = vadd.f32 %v12685_v4, %v12684_v27  ;;  %v12687_v52 = vpop.f32.mrb[70].mxu1  ;;  %v6940_v4 = vsel %vm6885_vm5, %v6929_v2, %v6939_v44  ;;  %v7766_v1 = vshrl.u32 %v18075_v39, 16 }
 0x38c   : > { %v12688_v48 = vpop.f32.mrb[71].mxu1  ;;  %13168 = vmatpush3.bf16.msra.mxu0 %v15184_v58 }
 0x38d   : > { %v5549_v6 = vadd.f32 %v12686_v43, %v18210_v36  ;;  %13169 = vmatprep.subr.bf16.mxu0 %v15190_v8  ;;  %13090 = vmatpush3.bf16.msra.mxu1 %v15193_v61  ;;  %v6957_v36 = vrot.slane %v18535_v32, 2  ;;  %v6946_v61 = vsel %vm6885_vm5, %v6935_v40, %v6945_v57  ;;  %v15170_v43 = vld [vmem:[%s15510_s8 + $0x13c] ss:$20 sps:$4 sm:$0xff]  }
 0x38e   : > { %7471 = vmatmul.mubr.bf16.gmra.mrb[176].mxu1 %v6936_v60  ;;  %13830 = vmatmul.mubr.bf16.gmra.mrb[36].mxu0 %v6930_v12  ;;  %v18565_v12 = vld [vmem:[%s15510_s8 + $0x188] ss:$20 sps:$4 sm:$0xff]   ;;  %v6949_v2 = vrot.slane %v15170_v43, 2 }
 0x38f   : > { %7478 = vmatprep.mubr.bf16.mxu1 %v6948_v45  ;;  %13833 = vmatprep.mubr.msk.bf16.mxu0 %vm15447_vm1, %v20516_v18  ;;  %v18551_v38 = vadd.f32 %v18031_v0, %v5549_v6  ;;  %v18560_v0 = vld [vmem:[%s15510_s8 + $0x15c] ss:$20 sps:$4 sm:$0xff]   ;;  %v6958_v60 = vsel %vm6885_vm5, %v6947_v3, %v6957_v36  ;;  %20627 = vst [vmem:[#allocation11_spill] sm:$0xff] %v18565_v12  ;;  %v6967_v48 = vrot.slane %v18565_v12, 2 }
 0x390   : > { %13170 = vmatpush3.bf16.msra.mxu0 %v15191_v23  ;;  %13258 = vmatprep.subr.bf16.mxu1 %v15198_v56  ;;  %20626 = vst [vmem:[#allocation10_spill] sm:$0xff] %v18560_v0  ;;  %v6955_v40 = vrot.slane %v18560_v0, 2 }
 0x391   : > { %20625 = vst [vmem:[#allocation5_spill] sm:$0xff] %v18551_v38  ;;  %v12725_v62 = vpop.f32.mrb[72].mxu1  ;;  %13171 = vmatprep.subr.bf16.mxu0 %v15196_v21 }
 0x392   : > { %v12726_v58 = vpop.f32.mrb[73].mxu1 }
 0x393   : > { %v12727_v27 = vadd.f32 %v12726_v58, %v12725_v62  ;;  %v12728_v8 = vpop.f32.mrb[74].mxu1  ;;  %v6956_v58 = vsel %vm6885_vm5, %v6945_v57, %v6955_v40 }
 0x394   : > { %v12729_v52 = vpop.f32.mrb[75].mxu1  ;;  %13172 = vmatpush3.bf16.msra.mxu0 %v15197_v33 }
 0x395   : > { %v12730_v53 = vadd.f32 %v12729_v52, %v12728_v8  ;;  %13861 = vmatprep.subr.bf16.mxu0 %v20516_v18  ;;  %v6950_v8 = vsel %vm6885_vm5, %v6939_v44, %v6949_v2 }
 0x396   : > { %7479 = vmatmul.mubr.bf16.gmra.mrb[180].mxu1 %v6946_v61  ;;  %13834 = vmatmul.mubr.bf16.gmra.mrb[40].mxu0 %v6940_v4  ;;  %v18575_v61 = vld [vmem:[%s15510_s8 + $0x184] ss:$20 sps:$4 sm:$0xff]  }
 0x397   : > { %7486 = vmatprep.mubr.bf16.mxu1 %v6958_v60  ;;  %13837 = vmatprep.mubr.msk.bf16.mxu0 %vm15447_vm1, %v20516_v18  ;;  %v18578_v4 = vld [vmem:[%s15510_s8 + $0x164] ss:$20 sps:$4 sm:$0xff]   ;;  %v6968_v60 = vsel %vm6885_vm5, %v6957_v36, %v6967_v48  ;;  %v6965_v36 = vrot.slane %v18575_v61, 2 }
 0x399   : > { %v12731_v3 = vpop.f32.mrb[76].mxu1  ;;  %v12807_v45 = vpop.f32.mrb[156].mxu0 }
 0x39a   : > { %v12732_v23 = vpop.f32.mrb[77].mxu1  ;;  %v12808_v56 = vpop.f32.mrb[157].mxu0 }
 0x39b   : > { %v12733_v6 = vadd.f32 %v12732_v23, %v12731_v3  ;;  %v12809_v21 = vadd.f32 %v12808_v56, %v12807_v45  ;;  %v12734_v33 = vpop.f32.mrb[78].mxu1  ;;  %v12810_v62 = vpop.f32.mrb[158].mxu0  ;;  %v6959_v23 = vrot.slane %v18578_v4, 2  ;;  %v6966_v4 = vsel %vm6885_vm5, %v6955_v40, %v6965_v36 }
 0x39c   : > { %v12735_v43 = vpop.f32.mrb[79].mxu1  ;;  %v12811_v52 = vpop.f32.mrb[159].mxu0 }
 0x39d   : > { %v6281_v12 = vadd.f32 %v12809_v21, %v12727_v27  ;;  %v12736_v3 = vadd.f32 %v12735_v43, %v12734_v33  ;;  %v12812_v45 = vadd.f32 %v12811_v52, %v12810_v62  ;;  %v6977_v27 = vrot.slane %v18582_v15, 2  ;;  %v6568_v62 = vld [vmem:[%s15510_s8 + $0x1d4] sm:$0xff] }
 0x39e   : > { %7487 = vmatmul.mubr.bf16.gmra.mrb[184].mxu1 %v6956_v58  ;;  %13838 = vmatmul.mubr.bf16.gmra.mrb[44].mxu0 %v6950_v8  ;;  %v6571_v58 = vld [vmem:[%s15510_s8 + $0x1e8] sm:$0x33]  ;;  %v6960_v15 = vsel %vm6885_vm5, %v6949_v2, %v6959_v23 }
 0x39f   : > { %v18585_v57 = vadd.f32 %v18243_v31, %v6281_v12  ;;  %v6284_v44 = vadd.f32 %v12812_v45, %v12730_v53  ;;  %7494 = vmatprep.mubr.bf16.mxu1 %v6968_v60  ;;  %13841 = vmatprep.mubr.msk.bf16.mxu0 %vm15447_vm1, %v20516_v18  ;;  %v18598_v53 = vld [vmem:[%s15510_s8 + $0x1ac] ss:$20 sps:$4 sm:$0xff]  }
 0x3a0   : > { %v18601_v8 = vld [vmem:[%s15510_s8 + $0x18c] ss:$20 sps:$4 sm:$0xff]   ;;  %v6975_v40 = vrot.slane %v18598_v53, 2 }
 0x3a1   : > { %20628 = vst [vmem:[#allocation14_spill] sm:$0xff] %v18585_v57  ;;  %v18593_v56 = vadd.f32 %v18246_v42, %v6284_v44  ;;  %v12737_v21 = vpop.f32.mrb[80].mxu1  ;;  %v12813_v33 = vpop.f32.mrb[160].mxu0  ;;  %v6978_v44 = vsel %vm6885_vm5, %v6967_v48, %v6977_v27  ;;  %v6969_v2 = vrot.slane %v18601_v8, 2 }
 0x3a2   : > { %v12738_v31 = vpop.f32.mrb[81].mxu1  ;;  %v12814_v12 = vpop.f32.mrb[161].mxu0 }
 0x3a3   : > { %20629 = vst [vmem:[#allocation12_spill] sm:$0xff] %v18593_v56  ;;  %v12739_v43 = vadd.f32 %v12738_v31, %v12737_v21  ;;  %v12815_v52 = vadd.f32 %v12814_v12, %v12813_v33  ;;  %v12740_v61 = vpop.f32.mrb[82].mxu1  ;;  %v12816_v60 = vpop.f32.mrb[162].mxu0  ;;  %v11479_v56 = vcombine.high %v6568_v62, %v6571_v58  ;;  %v7769_v21 = vshll.u32 %v18075_v39, 16  ;;  %v15381_v39 = vld [vmem:[%s15510_s8 + $0x64] ss:$20 sps:$4 sm:$0xff]  }
 0x3a4   : > { %v12741_v42 = vpop.f32.mrb[83].mxu1  ;;  %v12817_v45 = vpop.f32.mrb[163].mxu0  ;;  %v7774_v12 = vshrl.u32 %v15381_v39, 16 }
 0x3a5   : > { %v6289_v57 = vadd.f32 %v12815_v52, %v12733_v6  ;;  %v12742_v38 = vadd.f32 %v12741_v42, %v12740_v61  ;;  %v12818_v0 = vadd.f32 %v12817_v45, %v12816_v60  ;;  %v11478_v6 = vcombine.low %v6568_v62, %v6571_v58  ;;  %v6569_v60 = vld [vmem:[%s15510_s8 + $0x1dc] sm:$0xf]  ;;  %v6572_v45 = vld [vmem:[%s15510_s8 + $0x1f0] sm:$0x3] }
 0x3a6   : > { %7495 = vmatmul.mubr.bf16.gmra.mrb[188].mxu1 %v6966_v4  ;;  %13842 = vmatmul.mubr.bf16.gmra.mrb[48].mxu0 %v6960_v15  ;;  %v18615_v31 = vrot.slane %v11479_v56, 2  ;;  %v7777_v52 = vshll.u32 %v15381_v39, 16  ;;  %v6976_v56 = vsel %vm6885_vm5, %v6965_v36, %v6975_v40  ;;  %v6970_v58 = vsel %vm6885_vm5, %v6959_v23, %v6969_v2  ;;  %v15382_v36 = vld [vmem:[%s15510_s8 + $0x68] ss:$20 sps:$4 sm:$0xff]  }
 0x3a7   : > { %v18611_v33 = vadd.f32 %v18259_v55, %v6289_v57  ;;  %v6292_v48 = vadd.f32 %v12818_v0, %v12736_v3  ;;  %7502 = vmatprep.mubr.bf16.mxu1 %v6978_v44  ;;  %13845 = vmatprep.mubr.msk.bf16.mxu0 %vm15447_vm1, %v20516_v18  ;;  %v18622_v55 = vld [vmem:[%s15510_s8 + $0x1b4] ss:$20 sps:$4 sm:$0xff]   ;;  %v18624_v0 = vrot.slane %v7766_v1, 2  ;;  %v18626_v3 = vrot.slane %v7769_v21, 3  ;;  %v20632_v44 = vld [vmem:[#allocation9_spill] sm:$0xff] }
 0x3a8   : > { %v7786_v1 = vshll.u32 %v20632_v44, 16  ;;  %v7791_v32 = vshrl.u32 %v15382_v36, 16  ;;  %v7794_v23 = vshll.u32 %v15382_v36, 16  ;;  %v7776_v36 = vrot.slane %v7774_v12, 2 }
 0x3a9   : > { %20630 = vst [vmem:[#allocation13_spill] sm:$0xff] %v18611_v33  ;;  %v18619_v53 = vadd.f32 %v18264_v24, %v6292_v48  ;;  %v12743_v8 = vpop.f32.mrb[84].mxu1  ;;  %v12819_v61 = vpop.f32.mrb[164].mxu0  ;;  %v7783_v48 = vshrl.u32 %v20632_v44, 16  ;;  %v6988_v33 = vsel %vm6885_vm5, %v6977_v27, %v18615_v31 }
 0x3aa   : > { %v12744_v57 = vpop.f32.mrb[85].mxu1  ;;  %v12820_v62 = vpop.f32.mrb[165].mxu0 }
 0x3ab   : > { %20631 = vst [vmem:[#allocation15_spill] sm:$0xff] %v18619_v53  ;;  %v12745_v4 = vadd.f32 %v12744_v57, %v12743_v8  ;;  %v12821_v15 = vadd.f32 %v12820_v62, %v12819_v61  ;;  %v12746_v24 = vpop.f32.mrb[86].mxu1  ;;  %v12822_v42 = vpop.f32.mrb[166].mxu0  ;;  %v18634_v53 = vrot.slane %v11478_v6, 2  ;;  %v6979_v57 = vrot.slane %v18622_v55, 2 }
 0x3ac   : > { %v12747_v39 = vpop.f32.mrb[87].mxu1  ;;  %v12823_v21 = vpop.f32.mrb[167].mxu0  ;;  %v11480_v62 = vcombine.low %v6569_v60, %v6572_v45  ;;  %v7785_v27 = vrot.slane %v7783_v48, 2  ;;  %v7788_v6 = vrot.slane %v7786_v1, 3  ;;  %v7772_v55 = vor.u32 %v18626_v3, %v18624_v0 }
 0x3ad   : > { %v6297_v9 = vadd.f32 %v12821_v15, %v12739_v43  ;;  %v12748_v8 = vadd.f32 %v12747_v39, %v12746_v24  ;;  %v12824_v61 = vadd.f32 %v12823_v21, %v12822_v42  ;;  %v7779_v43 = vrot.slane %v7777_v52, 3  ;;  %v15383_v42 = vld [vmem:[%s15510_s8 + $0x90] ss:$20 sps:$4 sm:$0xff]  }
 0x3ae   : > { %7503 = vmatmul.mubr.bf16.gmra.mrb[192].mxu1 %v6976_v56  ;;  %13846 = vmatmul.mubr.bf16.gmra.mrb[52].mxu0 %v6970_v58  ;;  %v7793_v15 = vrot.slane %v7791_v32, 2  ;;  %v7796_v24 = vrot.slane %v7794_v23, 3  ;;  %v7860_v12 = vshrl.u32 %v15383_v42, 16  ;;  %v7863_v52 = vshll.u32 %v15383_v42, 16 }
 0x3af   : > { %v18641_v44 = vadd.f32 %v18276_v7, %v6297_v9  ;;  %v6300_v11 = vadd.f32 %v12824_v61, %v12742_v38  ;;  %7510 = vmatprep.mubr.bf16.mxu1 %v6988_v33  ;;  %13849 = vmatprep.mubr.msk.bf16.mxu0 %vm15447_vm1, %v20516_v18  ;;  %v6986_v38 = vsel %vm6885_vm5, %v6975_v40, %v18634_v53  ;;  %v7817_v32 = vshrl.u32 %v18300_v41, 16 }
 0x3b0   : > { %v6980_v33 = vsel %vm6885_vm5, %v6969_v2, %v6979_v57  ;;  %v7820_v45 = vshll.u32 %v18300_v41, 16  ;;  %v18656_v48 = vrot.slane %v11480_v62, 2  ;;  %v7789_v1 = vor.u32 %v7788_v6, %v7785_v27 }
 0x3b1   : > { %v18648_v56 = vadd.f32 %v18279_v10, %v6300_v11  ;;  %v12749_v7 = vpop.f32.mrb[88].mxu1  ;;  %v12825_v9 = vpop.f32.mrb[168].mxu0  ;;  %v18658_v2 = vor.u32 %v7796_v24, %v7793_v15  ;;  %v7825_v21 = vshrl.u32 %v18303_v47, 16  ;;  %v7828_v23 = vshll.u32 %v18303_v47, 16 }
 0x3b2   : > { %v12750_v58 = vpop.f32.mrb[89].mxu1  ;;  %v12826_v60 = vpop.f32.mrb[169].mxu0  ;;  %v7862_v62 = vrot.slane %v7860_v12, 2  ;;  %v7819_v27 = vrot.slane %v7817_v32, 2  ;;  %v7822_v6 = vrot.slane %v7820_v45, 3  ;;  %v6990_v47 = vsel %vm6885_vm5, %v6979_v57, %v18656_v48 }
 0x3b3   : > { %v12751_v0 = vadd.f32 %v12750_v58, %v12749_v7  ;;  %v12827_v3 = vadd.f32 %v12826_v60, %v12825_v9  ;;  %v12752_v10 = vpop.f32.mrb[90].mxu1  ;;  %v12828_v11 = vpop.f32.mrb[170].mxu0  ;;  %v18662_v7 = vor.u32 %v7779_v43, %v7776_v36  ;;  %v7865_v9 = vrot.slane %v7863_v52, 3  ;;  %v18673_v43 = vld [vmem:[%s15510_s8 + $0x8c] ss:$20 sps:$4 sm:$0xff]  }
 0x3b4   : > { %v12753_v39 = vpop.f32.mrb[91].mxu1  ;;  %v12829_v40 = vpop.f32.mrb[171].mxu0  ;;  %v7830_v36 = vrot.slane %v7828_v23, 3  ;;  %v7851_v24 = vshrl.u32 %v18673_v43, 16  ;;  %v7854_v57 = vshll.u32 %v18673_v43, 16  ;;  %v7823_v32 = vor.u32 %v7822_v6, %v7819_v27 }
 0x3b5   : > { %v6305_v61 = vadd.f32 %v12827_v3, %v12745_v4  ;;  %v12754_v42 = vadd.f32 %v12753_v39, %v12752_v10  ;;  %v12830_v41 = vadd.f32 %v12829_v40, %v12828_v11  ;;  %v7827_v4 = vrot.slane %v7825_v21, 2 }
 0x3b6   : > { %7511 = vmatmul.mubr.bf16.gmra.mrb[196].mxu1 %v6986_v38  ;;  %13850 = vmatmul.mubr.bf16.gmra.mrb[56].mxu0 %v6980_v33  ;;  %v18686_v52 = vor.u32 %v7865_v9, %v7862_v62  ;;  %v7803_v45 = vshll.u32 %v18319_v14, 16  ;;  %v7808_v39 = vshrl.u32 %v18322_v35, 16 }
 0x3b7   : > { %v18665_v58 = vadd.f32 %v18290_v37, %v6305_v61  ;;  %v6308_v15 = vadd.f32 %v12830_v41, %v12748_v8  ;;  %7518 = vmatprep.mubr.bf16.mxu1 %v18615_v31  ;;  %13853 = vmatprep.mubr.msk.bf16.mxu0 %vm15447_vm1, %v20516_v18  ;;  %v7798_v31 = vsel %vm7764_vm6, %v7789_v1, %v18658_v2  ;;  %v7853_v61 = vrot.slane %v7851_v24, 2  ;;  %v18695_v41 = vld [vmem:[%s15510_s8 + $0xb8] ss:$20 sps:$4 sm:$0xff]  }
 0x3b8   : > { %v18683_v8 = vsel %vm7764_vm6, %v7772_v55, %v18662_v7  ;;  %v7811_v55 = vshll.u32 %v18322_v35, 16  ;;  %v18692_v23 = vor.u32 %v7830_v36, %v7827_v4  ;;  %v7905_v62 = vshrl.u32 %v18695_v41, 16 }
 0x3b9   : > { %v18677_v38 = vadd.f32 %v18295_v30, %v6308_v15  ;;  %v12755_v37 = vpop.f32.mrb[92].mxu1  ;;  %v12831_v33 = vpop.f32.mrb[172].mxu0  ;;  %v7800_v30 = vshrl.u32 %v18319_v14, 16  ;;  %v7908_v9 = vshll.u32 %v18695_v41, 16  ;;  %v7856_v15 = vrot.slane %v7854_v57, 3 }
 0x3ba   : > { %v12756_v60 = vpop.f32.mrb[93].mxu1  ;;  %v12832_v12 = vpop.f32.mrb[173].mxu0  ;;  %v7878_v4 = vshrl.u32 %v18326_v51, 16  ;;  %v7881_v36 = vshll.u32 %v18326_v51, 16  ;;  %v7813_v57 = vrot.slane %v7811_v55, 3 }
 0x3bb   : > { %v12757_v3 = vadd.f32 %v12756_v60, %v12755_v37  ;;  %v12833_v10 = vadd.f32 %v12832_v12, %v12831_v33  ;;  %v12758_v11 = vpop.f32.mrb[94].mxu1  ;;  %v12834_v1 = vpop.f32.mrb[174].mxu0  ;;  %v7802_v35 = vrot.slane %v7800_v30, 2  ;;  %v7805_v37 = vrot.slane %v7803_v45, 3  ;;  %v18711_v12 = vld [vmem:[%s15510_s8 + $0xb4] ss:$20 sps:$4 sm:$0xff]  }
 0x3bc   : > { %v12759_v40 = vpop.f32.mrb[95].mxu1  ;;  %v12835_v21 = vpop.f32.mrb[175].mxu0  ;;  %v7910_v60 = vrot.slane %v7908_v9, 3  ;;  %v7896_v51 = vshrl.u32 %v18711_v12, 16  ;;  %v18719_v45 = vor.u32 %v7856_v15, %v7853_v61  ;;  %v7883_v55 = vrot.slane %v7881_v36, 3 }
 0x3bd   : > { %v6313_v14 = vadd.f32 %v12833_v10, %v12751_v0  ;;  %v12760_v27 = vadd.f32 %v12759_v40, %v12758_v11  ;;  %v12836_v6 = vadd.f32 %v12835_v21, %v12834_v1  ;;  %v7810_v0 = vrot.slane %v7808_v39, 2  ;;  %v18737_v36 = vld [vmem:[%s15510_s8 + $0xe0] ss:$20 sps:$4 sm:$0xff]  }
 0x3be   : > { %7519 = vmatmul.mubr.bf16.gmra.mrb[200].mxu1 %v18634_v53  ;;  %13854 = vmatmul.mubr.bf16.gmra.mrb[60].mxu0 %v6990_v47  ;;  %v7867_v53 = vsel %vm7764_vm6, %v18658_v2, %v18686_v52  ;;  %v7907_v47 = vrot.slane %v7905_v62, 2  ;;  %v7899_v10 = vshll.u32 %v18711_v12, 16  ;;  %v7806_v1 = vor.u32 %v7805_v37, %v7802_v35  ;;  %v15201_v35 = vld [vmem:[%s20443_s1 + $0xa48] sm:$0xff]  }
 0x3bf   : > { %v18703_v24 = vadd.f32 %v18310_v59, %v6313_v14  ;;  %v6316_v33 = vadd.f32 %v12836_v6, %v12754_v42  ;;  %13857 = vmatprep.mubr.msk.bf16.mxu0 %vm15447_vm1, %v20516_v18  ;;  %8582 = vmatprep.mubr.bf16.mxu1 %v7798_v31  ;;  %v7832_v31 = vsel %vm7764_vm6, %v7823_v32, %v18692_v23  ;;  %v7880_v39 = vrot.slane %v7878_v4, 2  ;;  %v15199_v32 = vld [vmem:[%s20443_s1 + $0xa00] sm:$0xff]  }
 0x3c0   : > { %v7869_v40 = vshrl.u32 %v18345_v26, 16  ;;  %v18728_v61 = vor.u32 %v7813_v57, %v7810_v0  ;;  %v7872_v14 = vshll.u32 %v18345_v26, 16  ;;  %v18734_v37 = vor.u32 %v7910_v60, %v7907_v47 }
 0x3c1   : > { %v18715_v59 = vadd.f32 %v18315_v50, %v6316_v33  ;;  %v12761_v42 = vpop.f32.mrb[96].mxu1  ;;  %v12837_v30 = vpop.f32.mrb[176].mxu0  ;;  %v7898_v4 = vrot.slane %v7896_v51, 2  ;;  %v7950_v33 = vshrl.u32 %v18737_v36, 16  ;;  %v7901_v26 = vrot.slane %v7899_v10, 3 }
 0x3c2   : > { %v12762_v11 = vpop.f32.mrb[97].mxu1  ;;  %v12838_v2 = vpop.f32.mrb[177].mxu0  ;;  %v7858_v47 = vsel %vm7764_vm6, %v18662_v7, %v18719_v45  ;;  %v18748_v60 = vor.u32 %v7883_v55, %v7880_v39  ;;  %v7871_v51 = vrot.slane %v7869_v40, 2  ;;  %v7815_v7 = vsel %vm7764_vm6, %v7806_v1, %v18728_v61  ;;  %v18772_v1 = vld [vmem:[%s15510_s8 + $0xdc] ss:$20 sps:$4 sm:$0xff]  }
 0x3c3   : > { %v18723_v21 = vadd.f32 %v12762_v11, %v12761_v42  ;;  %v12839_v50 = vadd.f32 %v12838_v2, %v12837_v30  ;;  %v12764_v62 = vpop.f32.mrb[98].mxu1  ;;  %v12840_v9 = vpop.f32.mrb[178].mxu0  ;;  %v7953_v42 = vshll.u32 %v18737_v36, 16  ;;  %v7952_v10 = vrot.slane %v7950_v33, 2  ;;  %v15200_v33 = vld [vmem:[%s20443_s1 + $0x9c0] sm:$0xff]  }
 0x3c4   : > { %v12765_v6 = vpop.f32.mrb[99].mxu1  ;;  %v12841_v15 = vpop.f32.mrb[179].mxu0 }
 0x3c5   : > { %v6321_v30 = vadd.f32 %v12839_v50, %v12757_v3  ;;  %v18741_v0 = vadd.f32 %v12765_v6, %v12764_v62  ;;  %v12842_v57 = vadd.f32 %v12841_v15, %v12840_v9  ;;  %v7874_v3 = vrot.slane %v7872_v14, 3 }
 0x3c6   : > { %13858 = vmatmul.mubr.bf16.gmra.mrb[64].mxu0 %v18656_v48  ;;  %8583 = vmatmul.mubr.bf16.vlgmr.msra.gmra.mrb[204].mxu1 %v18683_v8  ;;  %v15202_v48 = vld [vmem:[%s20443_s1 + $0xa08] sm:$0xff]   ;;  %v7923_v8 = vshrl.u32 %v18361_v28, 16  ;;  %v7955_v39 = vrot.slane %v7953_v42, 3  ;;  %v18769_v50 = vor.u32 %v7901_v26, %v7898_v4  ;;  %v7941_v62 = vshrl.u32 %v18772_v1, 16 }
 0x3c7   : > { %v18751_v11 = vadd.f32 %v18335_v20, %v6321_v30  ;;  %v6324_v2 = vadd.f32 %v12842_v57, %v12760_v27  ;;  %13259 = vmatpush3.bf16.msra.mxu1 %v15199_v32  ;;  %8590 = vmatprep.mubr.bf16.mxu1 %v7867_v53  ;;  %v7926_v20 = vshll.u32 %v18361_v28, 16  ;;  %v15204_v27 = vld [vmem:[%s20443_s1 + $0xa50] sm:$0xff]   ;;  %v7885_v32 = vsel %vm7764_vm6, %v18692_v23, %v18748_v60 }
 0x3c8   : > { %8702 = vmatprep.mubr.bf16.mxu0 %v7832_v31  ;;  %13260 = vmatprep.subr.bf16.mxu1 %v15201_v35  ;;  %v7912_v31 = vsel %vm7764_vm6, %v18686_v52, %v18734_v37  ;;  %v7914_v14 = vshrl.u32 %v18389_v34, 16  ;;  %v7917_v6 = vshll.u32 %v18389_v34, 16  ;;  %v18786_v42 = vor.u32 %v7874_v3, %v7871_v51  ;;  %v18791_v34 = vld [vmem:[%s15510_s8 + $0x108] ss:$20 sps:$4 sm:$0xff]   ;;  %v15205_v3 = vld [vmem:[%s20443_s1 + $0xa10] sm:$0xff]  }
 0x3c9   : > { %v18764_v53 = vadd.f32 %v18341_v22, %v6324_v2  ;;  %v12767_v55 = vpop.f32.mrb[100].mxu1  ;;  %v12843_v40 = vpop.f32.mrb[180].mxu0  ;;  %v7944_v22 = vshll.u32 %v18772_v1, 16  ;;  %v7925_v23 = vrot.slane %v7923_v8, 2  ;;  %v18788_v26 = vor.u32 %v7955_v39, %v7952_v10 }
 0x3ca   : > { %v12768_v28 = vpop.f32.mrb[101].mxu1  ;;  %v12844_v9 = vpop.f32.mrb[181].mxu0  ;;  %v7928_v2 = vrot.slane %v7926_v20, 3  ;;  %v7943_v51 = vrot.slane %v7941_v62, 2  ;;  %v7916_v10 = vrot.slane %v7914_v14, 2  ;;  %v7919_v39 = vrot.slane %v7917_v6, 3 }
 0x3cb   : > { %20633 = vst [vmem:[#allocation16_spill] sm:$0xff] %v18764_v53  ;;  %v18781_v52 = vadd.f32 %v12768_v28, %v12767_v55  ;;  %v12845_v15 = vadd.f32 %v12844_v9, %v12843_v40  ;;  %v12770_v35 = vpop.f32.mrb[102].mxu1  ;;  %v12846_v4 = vpop.f32.mrb[182].mxu0  ;;  %13261 = vmatpush3.bf16.msra.mxu1 %v15202_v48  ;;  %v7995_v55 = vshrl.u32 %v18791_v34, 16  ;;  %v7998_v40 = vshll.u32 %v18791_v34, 16 }
 0x3cc   : > { %v12771_v30 = vpop.f32.mrb[103].mxu1  ;;  %v12847_v57 = vpop.f32.mrb[183].mxu0  ;;  %13262 = vmatprep.subr.bf16.mxu1 %v15204_v27  ;;  %v7946_v8 = vrot.slane %v7944_v22, 3  ;;  %v7968_v20 = vshrl.u32 %v18399_v19, 16  ;;  %v15207_v27 = vld [vmem:[%s20443_s1 + $0xa58] sm:$0xff]   ;;  %v7971_v6 = vshll.u32 %v18399_v19, 16 }
 0x3cd   : > { %v6329_v28 = vadd.f32 %v12845_v15, %v18723_v21  ;;  %v18796_v9 = vadd.f32 %v12771_v30, %v12770_v35  ;;  %v12848_v48 = vadd.f32 %v12847_v57, %v12846_v4  ;;  %v7997_v22 = vrot.slane %v7995_v55, 2  ;;  %v18836_v30 = vld [vmem:[%s15510_s8 + $0x104] ss:$20 sps:$4 sm:$0xff]  }
 0x3ce   : > { %8591 = vmatmul.mubr.bf16.gmra.mrb[208].mxu1 %v7858_v47  ;;  %8703 = vmatmul.mubr.bf16.vlgmr.msra.gmra.mrb[200].mxu0 %v7815_v7  ;;  %v15203_v47 = vld [vmem:[%s20443_s1 + $0x9c8] sm:$0xff]   ;;  %v18813_v7 = vor.u32 %v7928_v2, %v7925_v23  ;;  %v8000_v14 = vrot.slane %v7998_v40, 3  ;;  %v7957_v35 = vsel %vm7764_vm6, %v18734_v37, %v18788_v26  ;;  %v18833_v23 = vor.u32 %v7919_v39, %v7916_v10  ;;  %v15206_v39 = vld [vmem:[%s20443_s1 + $0x9d0] sm:$0xff]  }
 0x3cf   : > { %v18806_v21 = vadd.f32 %v18372_v5, %v6329_v28  ;;  %v6332_v62 = vadd.f32 %v12848_v48, %v18741_v0  ;;  %13862 = vmatpush3.bf16.msra.mxu0 %v15200_v33  ;;  %8598 = vmatprep.mubr.bf16.mxu1 %v7912_v31  ;;  %v7903_v31 = vsel %vm7764_vm6, %v18719_v45, %v18769_v50  ;;  %v7970_v45 = vrot.slane %v7968_v20, 2 }
 0x3d0   : > { %8710 = vmatprep.mubr.bf16.mxu0 %v7885_v32  ;;  %13863 = vmatprep.subr.bf16.mxu0 %v20516_v18  ;;  %v7876_v32 = vsel %vm7764_vm6, %v18728_v61, %v18786_v42  ;;  %v18831_v33 = vor.u32 %v7946_v8, %v7943_v51  ;;  %v7986_v61 = vshrl.u32 %v18836_v30, 16  ;;  %v7989_v40 = vshll.u32 %v18836_v30, 16 }
 0x3d1   : > { %20634 = vst [vmem:[#allocation17_spill] sm:$0xff] %v18806_v21  ;;  %v18817_v5 = vadd.f32 %v18381_v54, %v6332_v62  ;;  %v12773_v0 = vpop.f32.mrb[104].mxu1  ;;  %v12849_v15 = vpop.f32.mrb[184].mxu0  ;;  %13263 = vmatpush3.bf16.msra.mxu1 %v15205_v3  ;;  %v15208_v54 = vld [vmem:[%s20443_s1 + $0xa18] sm:$0xff]   ;;  %v7959_v28 = vshrl.u32 %v18432_v17, 16  ;;  %v7930_v3 = vsel %vm7764_vm6, %v18748_v60, %v18813_v7  ;;  %v18847_v8 = vor.u32 %v8000_v14, %v7997_v22  ;;  %v15211_v14 = vld [vmem:[%s20443_s1 + $0xa20] sm:$0xff]  }
 0x3d2   : > { %v12774_v19 = vpop.f32.mrb[105].mxu1  ;;  %v12850_v4 = vpop.f32.mrb[185].mxu0  ;;  %13264 = vmatprep.subr.bf16.mxu1 %v15207_v27  ;;  %v7973_v10 = vrot.slane %v7971_v6, 3  ;;  %v7962_v20 = vshll.u32 %v18432_v17, 16  ;;  %v15210_v27 = vld [vmem:[%s20443_s1 + $0xa60] sm:$0xff]   ;;  %v7948_v17 = vsel %vm7764_vm6, %v18769_v50, %v18831_v33  ;;  %v8013_v6 = vshrl.u32 %v18439_v63, 16 }
 0x3d3   : > { %20635 = vst [vmem:[#allocation19_spill] sm:$0xff] %v18817_v5  ;;  %v18839_v57 = vadd.f32 %v12774_v19, %v12773_v0  ;;  %v12851_v37 = vadd.f32 %v12850_v4, %v12849_v15  ;;  %v12776_v2 = vpop.f32.mrb[106].mxu1  ;;  %v12852_v55 = vpop.f32.mrb[186].mxu0  ;;  %13864 = vmatpush3.bf16.msra.mxu0 %v15203_v47  ;;  %v18860_v0 = vld [vmem:[%s15510_s8 + $0x130] ss:$20 sps:$4 sm:$0xff]   ;;  %v8016_v15 = vshll.u32 %v18439_v63, 16  ;;  %v7921_v50 = vsel %vm7764_vm6, %v18786_v42, %v18833_v23 }
 0x3d4   : > { %v12777_v48 = vpop.f32.mrb[107].mxu1  ;;  %v12853_v51 = vpop.f32.mrb[187].mxu0  ;;  %13865 = vmatprep.subr.bf16.mxu0 %v20516_v18  ;;  %v8040_v22 = vshrl.u32 %v18860_v0, 16  ;;  %v18885_v63 = vor.u32 %v7973_v10, %v7970_v45  ;;  %v7988_v4 = vrot.slane %v7986_v61, 2  ;;  %v15402_v21 = vld [vmem:[%s15510_s8 + $0x1d4] sm:$0xff] }
 0x3d5   : > { %v6337_v62 = vadd.f32 %v12851_v37, %v18781_v52  ;;  %v18857_v47 = vadd.f32 %v12777_v48, %v12776_v2  ;;  %v12854_v60 = vadd.f32 %v12853_v51, %v12852_v55  ;;  %13265 = vmatpush3.bf16.msra.mxu1 %v15208_v54  ;;  %v8043_v52 = vshll.u32 %v18860_v0, 16  ;;  %v15213_v54 = vld [vmem:[%s20443_s1 + $0xa68] sm:$0xff]  }
 0x3d6   : > { %8599 = vmatmul.mubr.bf16.gmra.mrb[212].mxu1 %v7903_v31  ;;  %8711 = vmatmul.mubr.bf16.gmra.mrb[204].mxu0 %v7876_v32  ;;  %v8002_v32 = vsel %vm7764_vm6, %v18788_v26, %v18847_v8  ;;  %v7991_v37 = vrot.slane %v7989_v40, 3  ;;  %v7961_v2 = vrot.slane %v7959_v28, 2  ;;  %v7964_v55 = vrot.slane %v7962_v20, 3  ;;  %v15214_v26 = vld [vmem:[%s20443_s1 + $0xa28] sm:$0xff]  }
 0x3d7   : > { %v18876_v19 = vadd.f32 %v18415_v25, %v6337_v62  ;;  %v6340_v31 = vadd.f32 %v12854_v60, %v18796_v9  ;;  %8606 = vmatprep.mubr.bf16.mxu1 %v7957_v35  ;;  %8718 = vmatprep.mubr.bf16.mxu0 %v7930_v3  ;;  %v15209_v25 = vld [vmem:[%s20443_s1 + $0x9d8] sm:$0xff]   ;;  %v8042_v48 = vrot.slane %v8040_v22, 2  ;;  %v8045_v40 = vrot.slane %v8043_v52, 3 }
 0x3d8   : > { %13866 = vmatpush3.bf16.msra.mxu0 %v15206_v39  ;;  %13266 = vmatprep.subr.bf16.mxu1 %v15210_v27  ;;  %v8015_v51 = vrot.slane %v8013_v6, 2  ;;  %v8018_v3 = vrot.slane %v8016_v15, 3  ;;  %v8004_v60 = vshrl.u32 %v18481_v46, 16  ;;  %v7975_v52 = vsel %vm7764_vm6, %v18813_v7, %v18885_v63 }
 0x3d9   : > { %20636 = vst [vmem:[#allocation22_spill] sm:$0xff] %v18876_v19  ;;  %v18891_v9 = vadd.f32 %v18427_v49, %v6340_v31  ;;  %v12779_v35 = vpop.f32.mrb[108].mxu1  ;;  %v12855_v42 = vpop.f32.mrb[188].mxu0  ;;  %13867 = vmatprep.subr.bf16.mxu0 %v20516_v18  ;;  %13267 = vmatpush3.bf16.msra.mxu1 %v15211_v14  ;;  %v18898_v49 = vld [vmem:[%s15510_s8 + $0x12c] ss:$20 sps:$4 sm:$0xff]   ;;  %v18908_v6 = vor.u32 %v7991_v37, %v7988_v4  ;;  %v8007_v15 = vshll.u32 %v18481_v46, 16 }
 0x3da   : > { %v12780_v45 = vpop.f32.mrb[109].mxu1  ;;  %v12856_v61 = vpop.f32.mrb[189].mxu0  ;;  %v8031_v10 = vshrl.u32 %v18898_v49, 16  ;;  %13268 = vmatprep.subr.bf16.mxu1 %v15213_v54  ;;  %v8034_v62 = vshll.u32 %v18898_v49, 16  ;;  %v18912_v54 = vld [vmem:[%s15510_s8 + $0x158] ss:$20 sps:$4 sm:$0xff]  }
 0x3db   : > { %20637 = vst [vmem:[#allocation21_spill] sm:$0xff] %v18891_v9  ;;  %v18901_v28 = vadd.f32 %v12780_v45, %v12779_v35  ;;  %v12857_v39 = vadd.f32 %v12856_v61, %v12855_v42  ;;  %v12782_v20 = vpop.f32.mrb[110].mxu1  ;;  %v12858_v27 = vpop.f32.mrb[190].mxu0  ;;  %v8085_v31 = vshrl.u32 %v18912_v54, 16  ;;  %v15212_v35 = vld [vmem:[%s20443_s1 + $0x9e0] sm:$0xff]   ;;  %v15216_v42 = vld [vmem:[%s20443_s1 + $0xa70] sm:$0xff]   ;;  %v18931_v61 = vor.u32 %v8045_v40, %v8042_v48 }
 0x3dc   : > { %v12783_v22 = vpop.f32.mrb[111].mxu1  ;;  %v12859_v14 = vpop.f32.mrb[191].mxu0  ;;  %13868 = vmatpush3.bf16.msra.mxu0 %v15209_v25  ;;  %v8088_v46 = vshll.u32 %v18912_v54, 16  ;;  %v15217_v37 = vld [vmem:[%s20443_s1 + $0xa30] sm:$0xff]   ;;  %v18929_v25 = vor.u32 %v7964_v55, %v7961_v2  ;;  %v8036_v2 = vrot.slane %v8034_v62, 3  ;;  %v8006_v55 = vrot.slane %v8004_v60, 2 }
 0x3dd   : > { %v6345_v45 = vadd.f32 %v12857_v39, %v18839_v57  ;;  %v18922_v7 = vadd.f32 %v12783_v22, %v12782_v20  ;;  %v12860_v4 = vadd.f32 %v12859_v14, %v12858_v27  ;;  %13869 = vmatprep.subr.bf16.mxu0 %v20516_v18  ;;  %13269 = vmatpush3.bf16.msra.mxu1 %v15214_v26  ;;  %v8058_v57 = vshrl.u32 %v18488_v29, 16  ;;  %v15221_v20 = vld [vmem:[%s20443_s1 + $0xa78] sm:$0xff]  }
 0x3de   : > { %8607 = vmatmul.mubr.bf16.gmra.mrb[216].mxu1 %v7948_v17  ;;  %8719 = vmatmul.mubr.bf16.gmra.mrb[208].mxu0 %v7921_v50  ;;  %v8061_v39 = vshll.u32 %v18488_v29, 16  ;;  %v18942_v17 = vor.u32 %v8018_v3, %v8015_v51  ;;  %v8033_v50 = vrot.slane %v8031_v10, 2  ;;  %v8009_v48 = vrot.slane %v8007_v15, 3  ;;  %v15215_v29 = vld [vmem:[%s20443_s1 + $0x9e8] sm:$0xff]   ;;  %v15223_v51 = vld [vmem:[%s20443_s1 + $0xa38] sm:$0xff]  }
 0x3df   : > { %v18939_v26 = vadd.f32 %v18463_v13, %v6345_v45  ;;  %v6348_v27 = vadd.f32 %v12860_v4, %v18857_v47  ;;  %8614 = vmatprep.mubr.bf16.mxu1 %v8002_v32  ;;  %8726 = vmatprep.mubr.bf16.mxu0 %v7975_v52  ;;  %v8087_v47 = vrot.slane %v8085_v31, 2  ;;  %v8090_v32 = vrot.slane %v8088_v46, 3 }
 0x3e0   : > { %13870 = vmatpush3.bf16.msra.mxu0 %v15212_v35  ;;  %13270 = vmatprep.subr.bf16.mxu1 %v15216_v42  ;;  %v8060_v62 = vrot.slane %v8058_v57, 2  ;;  %v8063_v60 = vrot.slane %v8061_v39, 3  ;;  %v7993_v31 = vsel %vm7764_vm6, %v18831_v33, %v18908_v6  ;;  %v7966_v35 = vsel %vm7764_vm6, %v18833_v23, %v18929_v25  ;;  %v15220_v33 = vld [vmem:[%s20443_s1 + $0x9f0] sm:$0xff]   ;;  %v15228_v23 = vld [vmem:[%s20443_s1 + $0xac0] sm:$0xff]  }
 0x3e1   : > { %20638 = vst [vmem:[#allocation37_spill] sm:$0xff] %v18939_v26  ;;  %v18948_v40 = vadd.f32 %v18476_v16, %v6348_v27  ;;  %v12785_v13 = vpop.f32.mrb[112].mxu1  ;;  %v12861_v22 = vpop.f32.mrb[192].mxu0  ;;  %13871 = vmatprep.subr.bf16.mxu0 %v20516_v18  ;;  %13271 = vmatpush3.bf16.msra.mxu1 %v15217_v37  ;;  %v8047_v4 = vsel %vm7764_vm6, %v18847_v8, %v18931_v61  ;;  %v7668_v26 = vld [vmem:[%s15510_s8 + $0x1e8] sm:$0x77] }
 0x3e2   : > { %v12786_v3 = vpop.f32.mrb[113].mxu1  ;;  %v12862_v10 = vpop.f32.mrb[193].mxu0  ;;  %13272 = vmatprep.subr.bf16.mxu1 %v15221_v20  ;;  %v8020_v46 = vsel %vm7764_vm6, %v18885_v63, %v18942_v17  ;;  %v18968_v37 = vor.u32 %v8036_v2, %v8033_v50  ;;  %v18970_v57 = vor.u32 %v8009_v48, %v8006_v55  ;;  %v18979_v20 = vor.u32 %v8090_v32, %v8087_v47  ;;  %v18982_v63 = vld [vmem:[%s15510_s8 + $0x154] ss:$20 sps:$4 sm:$0xff]  }
 0x3e3   : > { %20639 = vst [vmem:[#allocation23_spill] sm:$0xff] %v18948_v40  ;;  %v18954_v14 = vadd.f32 %v12786_v3, %v12785_v13  ;;  %v12863_v16 = vadd.f32 %v12862_v10, %v12861_v22  ;;  %v12788_v52 = vpop.f32.mrb[114].mxu1  ;;  %v12864_v15 = vpop.f32.mrb[194].mxu0  ;;  %v8076_v27 = vshrl.u32 %v18982_v63, 16  ;;  %v18986_v50 = vor.u32 %v8063_v60, %v8060_v62  ;;  %v20640_v55 = vld [vmem:[#allocation3_spill] sm:$0xff]  ;;  %v20643_v10 = vld [vmem:[#allocation4_spill] sm:$0xff] }
 0x3e4   : > { %v12789_v42 = vpop.f32.mrb[115].mxu1  ;;  %v12865_v45 = vpop.f32.mrb[195].mxu0  ;;  %13872 = vmatpush3.bf16.msra.mxu0 %v15215_v29  ;;  %v8079_v2 = vshll.u32 %v18982_v63, 16  ;;  %v8049_v48 = vshrl.u32 %v20640_v55, 16  ;;  %v20641_v29 = vld [vmem:[#allocation20_spill] sm:$0xff]  ;;  %v8038_v3 = vsel %vm7764_vm6, %v18908_v6, %v18968_v37  ;;  %v8103_v62 = vshrl.u32 %v20643_v10, 16 }
 0x3e5   : > { %v6353_v39 = vadd.f32 %v12863_v16, %v18901_v28  ;;  %v12866_v8 = vadd.f32 %v12865_v45, %v12864_v15  ;;  %13873 = vmatprep.subr.bf16.mxu0 %v20516_v18  ;;  %13273 = vmatpush3.bf16.msra.mxu1 %v15223_v51  ;;  %v8052_v28 = vshll.u32 %v20640_v55, 16  ;;  %v18996_v47 = vld [vmem:[%s15510_s8 + $0x180] ss:$20 sps:$4 sm:$0xff]   ;;  %v8106_v60 = vshll.u32 %v20643_v10, 16 }
 0x3e6   : > { %8615 = vmatmul.mubr.bf16.gmra.mrb[220].mxu1 %v7993_v31  ;;  %8727 = vmatmul.mubr.bf16.gmra.mrb[212].mxu0 %v7966_v35  ;;  %v8130_v32 = vshrl.u32 %v18996_v47, 16  ;;  %v8133_v51 = vshll.u32 %v18996_v47, 16  ;;  %v20644_v16 = vld [vmem:[#allocation2_spill] sm:$0xff]  ;;  %v8011_v35 = vsel %vm7764_vm6, %v18929_v25, %v18970_v57  ;;  %v8092_v6 = vsel %vm7764_vm6, %v18931_v61, %v18979_v20 }
 0x3e7   : > { %v18992_v13 = vadd.f32 %v20641_v29, %v6353_v39  ;;  %v6356_v22 = vadd.f32 %v12866_v8, %v18922_v7  ;;  %8622 = vmatprep.mubr.bf16.mxu1 %v8047_v4  ;;  %8734 = vmatprep.mubr.bf16.mxu0 %v8020_v46  ;;  %v15225_v7 = vld [vmem:[%s20443_s1 + $0x9f8] sm:$0xff]   ;;  %v8078_v42 = vrot.slane %v8076_v27, 2  ;;  %v8065_v46 = vsel %vm7764_vm6, %v18942_v17, %v18986_v50 }
 0x3e8   : > { %13874 = vmatpush3.bf16.msra.mxu0 %v15220_v33  ;;  %13340 = vmatprep.subr.bf16.mxu1 %v15228_v23  ;;  %v8081_v33 = vrot.slane %v8079_v2, 3  ;;  %v8051_v23 = vrot.slane %v8049_v48, 2  ;;  %v8054_v39 = vrot.slane %v8052_v28, 3  ;;  %v8135_v61 = vrot.slane %v8133_v51, 3  ;;  %v20646_v28 = vld [vmem:[#allocation10_spill] sm:$0xff] }
 0x3e9   : > { %20642 = vst [vmem:[#allocation25_spill] sm:$0xff] %v18992_v13  ;;  %v19009_v52 = vadd.f32 %v20644_v16, %v6356_v22  ;;  %v12867_v15 = vpop.f32.mrb[196].mxu0  ;;  %v12908_v31 = vpop.f32.mrb[116].mxu1  ;;  %13875 = vmatprep.subr.bf16.mxu0 %v20516_v18  ;;  %v8132_v22 = vrot.slane %v8130_v32, 2  ;;  %v8105_v16 = vrot.slane %v8103_v62, 2  ;;  %v8097_v32 = vshll.u32 %v20646_v28, 16 }
 0x3ea   : > { %v12868_v45 = vpop.f32.mrb[197].mxu0  ;;  %v12909_v4 = vpop.f32.mrb[117].mxu1  ;;  %v19024_v13 = vld [vmem:[%s15510_s8 + $0x17c] ss:$20 sps:$4 sm:$0xff]   ;;  %v8082_v51 = vor.u32 %v8081_v33, %v8078_v42  ;;  %v8055_v62 = vor.u32 %v8054_v39, %v8051_v23  ;;  %v19079_v53 = vcombine.high %v15402_v21, %v7668_v26 }
 0x3eb   : > { %20645 = vst [vmem:[#allocation24_spill] sm:$0xff] %v19009_v52  ;;  %v12869_v8 = vadd.f32 %v12868_v45, %v12867_v15  ;;  %v19021_v55 = vadd.f32 %v12909_v4, %v12908_v31  ;;  %v12870_v25 = vpop.f32.mrb[198].mxu0  ;;  %v12911_v29 = vpop.f32.mrb[118].mxu1  ;;  %v8108_v52 = vrot.slane %v8106_v60, 3  ;;  %v8121_v40 = vshrl.u32 %v19024_v13, 16  ;;  %v20649_v4 = vld [vmem:[#allocation11_spill] sm:$0xff] }
 0x3ec   : > { %v12871_v27 = vpop.f32.mrb[199].mxu0  ;;  %v12912_v10 = vpop.f32.mrb[119].mxu1  ;;  %v8124_v17 = vshll.u32 %v19024_v13, 16  ;;  %13876 = vmatpush3.bf16.msra.mxu0 %v15225_v7  ;;  %v8094_v15 = vshrl.u32 %v20646_v28, 16  ;;  %v19035_v60 = vld [vmem:[%s15510_s8 + $0x1a8] ss:$20 sps:$4 sm:$0xff]  }
 0x3ed   : > { %v6361_v2 = vadd.f32 %v12869_v8, %v18954_v14  ;;  %v19029_v48 = vadd.f32 %v12912_v10, %v12911_v29  ;;  %13921 = vmatprep.subr.bf16.mxu0 %v20516_v18  ;;  %v8175_v31 = vshrl.u32 %v19035_v60, 16  ;;  %v20647_v7 = vld [vmem:[#allocation5_spill] sm:$0xff]  ;;  %v8178_v14 = vshll.u32 %v19035_v60, 16  ;;  %v7667_v27 = vld [vmem:[%s15510_s8 + $0x1e0] sm:$0x77]  ;;  %20650 = vst [vmem:[#allocation26_spill] sm:$0xff] %v19079_v53 }
 0x3ee   : > { %8623 = vmatmul.mubr.bf16.gmra.mrb[224].mxu1 %v8038_v3  ;;  %8735 = vmatmul.mubr.bf16.gmra.mrb[216].mxu0 %v8011_v35  ;;  %v8148_v8 = vshrl.u32 %v20649_v4, 16  ;;  %v8151_v25 = vshll.u32 %v20649_v4, 16  ;;  %v8136_v3 = vor.u32 %v8135_v61, %v8132_v22  ;;  %v8109_v35 = vor.u32 %v8108_v52, %v8105_v16  ;;  %v19061_v4 = vld [vmem:[%s15510_s8 + $0x1a4] ss:$20 sps:$4 sm:$0xff]  }
 0x3ef   : > { %v19039_v45 = vadd.f32 %v20647_v7, %v6361_v2  ;;  %8630 = vmatprep.mubr.bf16.mxu1 %v8092_v6  ;;  %8742 = vmatprep.mubr.bf16.mxu0 %v8065_v46  ;;  %v8123_v42 = vrot.slane %v8121_v40, 2  ;;  %v8126_v23 = vrot.slane %v8124_v17, 3  ;;  %v8096_v39 = vrot.slane %v8094_v15, 2 }
 0x3f0   : > { %v8099_v29 = vrot.slane %v8097_v32, 3  ;;  %v8083_v6 = vsel %vm7764_vm6, %v18968_v37, %v8082_v51  ;;  %v8056_v46 = vsel %vm7764_vm6, %v18970_v57, %v8055_v62  ;;  %v8177_v2 = vrot.slane %v8175_v31, 2  ;;  %v15398_v37 = vld [vmem:[%s15510_s8 + $0x1cc] sm:$0xff] }
 0x3f1   : > { %20648 = vst [vmem:[#allocation39_spill] sm:$0xff] %v19039_v45  ;;  %v12914_v33 = vpop.f32.mrb[120].mxu1  ;;  %v8180_v52 = vrot.slane %v8178_v14, 3  ;;  %v8150_v40 = vrot.slane %v8148_v8, 2  ;;  %v8153_v61 = vrot.slane %v8151_v25, 3  ;;  %v8137_v17 = vsel %vm7764_vm6, %v18979_v20, %v8136_v3 }
 0x3f2   : > { %v12915_v10 = vpop.f32.mrb[121].mxu1  ;;  %v8110_v15 = vsel %vm7764_vm6, %v18986_v50, %v8109_v35  ;;  %v19056_v32 = vcombine.high %v15398_v37, %v7667_v27  ;;  %v8127_v31 = vor.u32 %v8126_v23, %v8123_v42  ;;  %v8100_v7 = vor.u32 %v8099_v29, %v8096_v39  ;;  %v15400_v20 = vld [vmem:[%s15510_s8 + $0x184] ss:$20 sps:$4 sm:$0xff]  }
 0x3f3   : > { %v19049_v28 = vadd.f32 %v12915_v10, %v12914_v33  ;;  %v12917_v22 = vpop.f32.mrb[122].mxu1  ;;  %v8166_v14 = vshrl.u32 %v19061_v4, 16  ;;  %v8169_v8 = vshll.u32 %v19061_v4, 16  ;;  %v8139_v25 = vshrl.u32 %v15400_v20, 16 }
 0x3f4   : > { %v12918_v16 = vpop.f32.mrb[123].mxu1  ;;  %v8142_v50 = vshll.u32 %v15400_v20, 16  ;;  %v8181_v33 = vor.u32 %v8180_v52, %v8177_v2  ;;  %v8154_v10 = vor.u32 %v8153_v61, %v8150_v40  ;;  %v8220_v42 = vshrl.u32 %v19056_v32, 16 }
 0x3f5   : > { %v19058_v57 = vadd.f32 %v12918_v16, %v12917_v22  ;;  %v15401_v22 = vld [vmem:[%s15510_s8 + $0x1b0] ss:$20 sps:$4 sm:$0xff]   ;;  %v8223_v23 = vshll.u32 %v19056_v32, 16  ;;  %v8168_v45 = vrot.slane %v8166_v14, 2  ;;  %v19072_v52 = vcombine.low %v15398_v37, %v7667_v27 }
 0x3f6   : > { %8631 = vmatmul.mubr.bf16.gmra.mrb[228].mxu1 %v8083_v6  ;;  %8743 = vmatmul.mubr.bf16.gmra.mrb[220].mxu0 %v8056_v46  ;;  %v8193_v16 = vshrl.u32 %v15401_v22, 16  ;;  %v8196_v39 = vshll.u32 %v15401_v22, 16  ;;  %v8128_v6 = vsel %vm7764_vm6, %v8082_v51, %v8127_v31  ;;  %v8101_v46 = vsel %vm7764_vm6, %v8055_v62, %v8100_v7 }
 0x3f7   : > { %8638 = vmatprep.mubr.bf16.mxu1 %v8137_v17  ;;  %8750 = vmatprep.mubr.bf16.mxu0 %v8110_v15  ;;  %v8171_v17 = vrot.slane %v8169_v8, 3  ;;  %v8141_v15 = vrot.slane %v8139_v25, 2  ;;  %v8144_v2 = vrot.slane %v8142_v50, 3  ;;  %v8182_v9 = vsel %vm7764_vm6, %v8136_v3, %v8181_v33 }
 0x3f8   : > { %v8155_v22 = vsel %vm7764_vm6, %v8109_v35, %v8154_v10  ;;  %v8195_v19 = vrot.slane %v8193_v16, 2  ;;  %v8222_v62 = vrot.slane %v8220_v42, 2  ;;  %v8225_v14 = vrot.slane %v8223_v23, 3  ;;  %v15403_v35 = vld [vmem:[%s15510_s8 + $0x1ac] ss:$20 sps:$4 sm:$0xff]  }
 0x3f9   : > { %v12920_v29 = vpop.f32.mrb[124].mxu1  ;;  %v8198_v5 = vrot.slane %v8196_v39, 3  ;;  %v8172_v27 = vor.u32 %v8171_v17, %v8168_v45  ;;  %v8145_v37 = vor.u32 %v8144_v2, %v8141_v15  ;;  %v8211_v25 = vshrl.u32 %v19072_v52, 16 }
 0x3fa   : > { %v12921_v20 = vpop.f32.mrb[125].mxu1  ;;  %v8214_v3 = vshll.u32 %v19072_v52, 16  ;;  %v8184_v50 = vshrl.u32 %v15403_v35, 16  ;;  %v8187_v16 = vshll.u32 %v15403_v35, 16  ;;  %v8226_v42 = vor.u32 %v8225_v14, %v8222_v62 }
 0x3fb   : > { %v19074_v40 = vadd.f32 %v12921_v20, %v12920_v29  ;;  %v12923_v61 = vpop.f32.mrb[126].mxu1  ;;  %v8199_v23 = vor.u32 %v8198_v5, %v8195_v19  ;;  %v8238_v39 = vshrl.u32 %v19079_v53, 16  ;;  %v8241_v29 = vshll.u32 %v19079_v53, 16 }
 0x3fc   : > { %v12924_v51 = vpop.f32.mrb[127].mxu1  ;;  %v8173_v45 = vsel %vm7764_vm6, %v8127_v31, %v8172_v27  ;;  %v8213_v17 = vrot.slane %v8211_v25, 2  ;;  %v8216_v15 = vrot.slane %v8214_v3, 3  ;;  %v8227_v19 = vsel %vm7764_vm6, %v8181_v33, %v8226_v42  ;;  %v8931_v33 = vld [vmem:[%s15510_s8 + $0x3c] sm:$0x88] }
 0x3fd   : > { %v19081_v8 = vadd.f32 %v12924_v51, %v12923_v61  ;;  %v8186_v61 = vrot.slane %v8184_v50, 2  ;;  %v19092_v51 = vcombine.low %v15402_v21, %v7668_v26  ;;  %v8200_v62 = vsel %vm7764_vm6, %v8154_v10, %v8199_v23 }
 0x3fe   : > { %8639 = vmatmul.mubr.bf16.gmra.mrb[232].mxu1 %v8128_v6  ;;  %8751 = vmatmul.mubr.bf16.gmra.mrb[224].mxu0 %v8101_v46  ;;  %v8146_v46 = vsel %vm7764_vm6, %v8100_v7, %v8145_v37  ;;  %v8240_v14 = vrot.slane %v8238_v39, 2  ;;  %v8243_v35 = vrot.slane %v8241_v29, 3  ;;  %v8217_v7 = vor.u32 %v8216_v15, %v8213_v17  ;;  %v15404_v15 = vld [vmem:[%s15510_s8 + $0x50] sm:$0xff] }
 0x3ff   : > { %8646 = vmatprep.mubr.bf16.mxu1 %v8182_v9  ;;  %8758 = vmatprep.mubr.bf16.mxu0 %v8155_v22  ;;  %v8189_v22 = vrot.slane %v8187_v16, 3  ;;  %20651 = vst [vmem:[#allocation28_spill] sm:$0xff] %v19092_v51  ;;  %v8229_v21 = vshrl.u32 %v19092_v51, 16  ;;  %v8232_v26 = vshll.u32 %v19092_v51, 16 }
 0x400   : > { %v8244_v3 = vor.u32 %v8243_v35, %v8240_v14  ;;  %v8218_v10 = vsel %vm7764_vm6, %v8172_v27, %v8217_v7  ;;  %v11726_v14 = vcombine.low %v8931_v33, %v15404_v15 }
 0x401   : > { %v12926_v20 = vpop.f32.mrb[128].mxu1  ;;  %v8190_v25 = vor.u32 %v8189_v22, %v8186_v61 }
 0x402   : > { %v12927_v6 = vpop.f32.mrb[129].mxu1  ;;  %v8245_v17 = vsel %vm7764_vm6, %v8199_v23, %v8244_v3 }
 0x403   : > { %v19090_v2 = vadd.f32 %v12927_v6, %v12926_v20  ;;  %v12929_v9 = vpop.f32.mrb[130].mxu1  ;;  %v8191_v20 = vsel %vm7764_vm6, %v8145_v37, %v8190_v25  ;;  %v8231_v6 = vrot.slane %v8229_v21, 2 }
 0x404   : > { %v12930_v5 = vpop.f32.mrb[131].mxu1 }
 0x405   : > { %v19096_v31 = vadd.f32 %v12930_v5, %v12929_v9  ;;  %v11727_v9 = vcombine.high %v8931_v33, %v15404_v15  ;;  %v15405_v5 = vld [vmem:[%s15510_s8 + $0x68] ss:$20 sps:$4 sm:$0xff]   ;;  %v15408_v15 = vld [vmem:[%s15510_s8 + $0x90] ss:$20 sps:$4 sm:$0xff]  }
 0x406   : > { %8647 = vmatmul.mubr.bf16.gmra.mrb[236].mxu1 %v8173_v45  ;;  %8759 = vmatmul.mubr.bf16.gmra.mrb[228].mxu0 %v8146_v46  ;;  %v8234_v45 = vrot.slane %v8232_v26, 3 }
 0x407   : > { %8654 = vmatprep.mubr.bf16.mxu1 %v8227_v19  ;;  %8766 = vmatprep.mubr.bf16.mxu0 %v8200_v62  ;;  %v9031_v22 = vrot.slane %v11727_v9, 3  ;;  %v9032_v19 = vrot.slane %v15405_v5, 3  ;;  %v9045_v9 = vrot.slane %v15408_v15, 3  ;;  %v9055_v15 = vrot.slane %v18695_v41, 3 }
 0x408   : > { %v8235_v27 = vor.u32 %v8234_v45, %v8231_v6  ;;  %v19120_v45 = vld [vmem:[%s15510_s8 + $0x74] ss:$20 sps:$4 sm:$0xff]  }
 0x409   : > { %v12932_v50 = vpop.f32.mrb[132].mxu1  ;;  %v9056_v41 = vsel %vm3649_vm3, %v9045_v9, %v9055_v15 }
 0x40a   : > { %v12933_v16 = vpop.f32.mrb[133].mxu1  ;;  %v8236_v21 = vsel %vm7764_vm6, %v8190_v25, %v8235_v27  ;;  %v7842_v25 = vshrl.u32 %v19120_v45, 16 }
 0x40b   : > { %v19102_v39 = vadd.f32 %v12933_v16, %v12932_v50  ;;  %v12935_v29 = vpop.f32.mrb[134].mxu1  ;;  %v9033_v50 = vsel %vm3649_vm3, %v9031_v22, %v9032_v19  ;;  %v9028_v16 = vrot.slane %v11726_v14, 3 }
 0x40c   : > { %v12936_v46 = vpop.f32.mrb[135].mxu1 }
 0x40d   : > { %v19107_v61 = vadd.f32 %v12936_v46, %v12935_v29  ;;  %v7845_v46 = vshll.u32 %v19120_v45, 16 }
 0x40e   : > { %8655 = vmatmul.mubr.bf16.gmra.mrb[240].mxu1 %v8218_v10  ;;  %8767 = vmatmul.mubr.bf16.gmra.mrb[232].mxu0 %v8191_v20  ;;  %v15406_v10 = vld [vmem:[%s15510_s8 + $0x64] ss:$20 sps:$4 sm:$0xff]  }
 0x40f   : > { %8662 = vmatprep.mubr.bf16.mxu1 %v8226_v42  ;;  %8774 = vmatprep.mubr.bf16.mxu0 %v8245_v17  ;;  %v9029_v29 = vrot.slane %v15406_v10, 3  ;;  %v20652_v20 = vld [vmem:[#allocation18_spill] sm:$0xff] }
 0x410   : > { %v7834_v6 = vshrl.u32 %v20652_v20, 16  ;;  %v7837_v33 = vshll.u32 %v20652_v20, 16  ;;  %v9043_v20 = vrot.slane %v18673_v43, 3  ;;  %v15234_v43 = vld [vmem:[%s20443_s1 + $0xad0] sm:$0xff]  }
 0x411   : > { %v12938_v62 = vpop.f32.mrb[136].mxu1  ;;  %v9030_v22 = vsel %vm3649_vm3, %v9028_v16, %v9029_v29  ;;  %v9046_v16 = vsel %vm3649_vm3, %v9032_v19, %v9045_v9 }
 0x412   : > { %v12939_v37 = vpop.f32.mrb[137].mxu1  ;;  %v7836_v5 = vrot.slane %v7834_v6, 2  ;;  %v7839_v14 = vrot.slane %v7837_v33, 3 }
 0x413   : > { %v19110_v35 = vadd.f32 %v12939_v37, %v12938_v62  ;;  %v12941_v23 = vpop.f32.mrb[138].mxu1 }
 0x414   : > { %v12942_v26 = vpop.f32.mrb[139].mxu1  ;;  %v7840_v6 = vor.u32 %v7839_v14, %v7836_v5  ;;  %v15230_v14 = vld [vmem:[%s20443_s1 + $0xb00] sm:$0xff]  }
 0x415   : > { %v19114_v42 = vadd.f32 %v12942_v26, %v12941_v23  ;;  %v7844_v23 = vrot.slane %v7842_v25, 2  ;;  %v15232_v25 = vld [vmem:[%s20443_s1 + $0xa88] sm:$0xff]  }
 0x416   : > { %8663 = vmatmul.mubr.bf16.gmra.mrb[244].mxu1 %v8217_v7  ;;  %8775 = vmatmul.mubr.bf16.gmra.mrb[236].mxu0 %v8236_v21  ;;  %v7847_v21 = vrot.slane %v7845_v46, 3  ;;  %v19144_v46 = vld [vmem:[%s15510_s8 + $0x9c] ss:$20 sps:$4 sm:$0xff]  }
 0x417   : > { %8782 = vmatprep.mubr.bf16.mxu0 %v8244_v3  ;;  %9460 = vmatprep.mubr.bf16.mxu1 %v9033_v50  ;;  %v15229_v3 = vld [vmem:[%s20443_s1 + $0xa80] sm:$0xff]   ;;  %v15231_v50 = vld [vmem:[%s20443_s1 + $0xac8] sm:$0xff]   ;;  %v7890_v19 = vshll.u32 %v19144_v46, 16 }
 0x418   : > { %v7848_v33 = vor.u32 %v7847_v21, %v7844_v23 }
 0x419   : > { %v12944_v17 = vpop.f32.mrb[140].mxu1  ;;  %v7892_v21 = vrot.slane %v7890_v19, 3  ;;  %v9053_v19 = vrot.slane %v18711_v12, 3 }
 0x41a   : > { %v12945_v7 = vpop.f32.mrb[141].mxu1 }
 0x41b   : > { %v19126_v62 = vadd.f32 %v12945_v7, %v12944_v17  ;;  %v12947_v37 = vpop.f32.mrb[142].mxu1  ;;  %v7887_v17 = vshrl.u32 %v19144_v46, 16 }
 0x41c   : > { %v12948_v26 = vpop.f32.mrb[143].mxu1 }
 0x41d   : > { %v19134_v10 = vadd.f32 %v12948_v26, %v12947_v37  ;;  %v7889_v23 = vrot.slane %v7887_v17, 2  ;;  %v15237_v17 = vld [vmem:[%s20443_s1 + $0xad8] sm:$0xff]  }
 0x41e   : > { %8783 = vmatmul.mubr.bf16.gmra.mrb[240].mxu0 %v8235_v27  ;;  %9461 = vmatmul.mubr.bf16.vlgmr.msra.gmra.mrb[248].mxu1 %v9030_v22  ;;  %v9044_v22 = vsel %vm3649_vm3, %v9029_v29, %v9043_v20  ;;  %v15235_v29 = vld [vmem:[%s20443_s1 + $0xa90] sm:$0xff]  }
 0x41f   : > { %13341 = vmatpush3.bf16.msra.mxu1 %v15229_v3  ;;  %13877 = vmatprep.mubr.msk.bf16.mxu0 %vm15447_vm1, %v20516_v18  ;;  %v7849_v3 = vsel %vm7764_vm6, %v7840_v6, %v7848_v33  ;;  %v7893_v9 = vor.u32 %v7892_v21, %v7889_v23 }
 0x420   : > { %9468 = vmatprep.mubr.bf16.mxu1 %v9046_v16  ;;  %13342 = vmatprep.subr.bf16.mxu1 %v15231_v50  ;;  %v19166_v16 = vld [vmem:[%s15510_s8 + $0xc4] ss:$20 sps:$4 sm:$0xff]  }
 0x421   : > { %v12950_v27 = vpop.f32.mrb[144].mxu1  ;;  %v7932_v6 = vshrl.u32 %v19166_v16, 16  ;;  %v7894_v21 = vsel %vm7764_vm6, %v7848_v33, %v7893_v9 }
 0x422   : > { %v12951_v7 = vpop.f32.mrb[145].mxu1 }
 0x423   : > { %v19153_v5 = vadd.f32 %v12951_v7, %v12950_v27  ;;  %v12953_v37 = vpop.f32.mrb[146].mxu1  ;;  %13343 = vmatpush3.bf16.msra.mxu1 %v15232_v25  ;;  %v7935_v25 = vshll.u32 %v19166_v16, 16  ;;  %v9065_v27 = vrot.slane %v18737_v36, 3 }
 0x424   : > { %v12954_v26 = vpop.f32.mrb[147].mxu1  ;;  %13344 = vmatprep.subr.bf16.mxu1 %v15234_v43  ;;  %v15233_v43 = vld [vmem:[%s20443_s1 + $0xb08] sm:$0xff]  }
 0x425   : > { %v19159_v50 = vadd.f32 %v12954_v26, %v12953_v37  ;;  %v9054_v26 = vsel %vm3649_vm3, %v9043_v20, %v9053_v19  ;;  %v15241_v20 = vld [vmem:[%s20443_s1 + $0xaa0] sm:$0xff]  }
 0x426   : > { %13878 = vmatmul.mubr.bf16.vlgmr.msra.gmra.mrb[24].mxu0 %v7849_v3  ;;  %9469 = vmatmul.mubr.bf16.gmra.mrb[252].mxu1 %v9044_v22  ;;  %v15238_v22 = vld [vmem:[%s20443_s1 + $0xa98] sm:$0xff]   ;;  %v7934_v3 = vrot.slane %v7932_v6, 2  ;;  %v15240_v6 = vld [vmem:[%s20443_s1 + $0xae0] sm:$0xff]  }
 0x427   : > { %13922 = vmatpush3.bf16.msra.mxu0 %v15230_v14  ;;  %13881 = vmatprep.mubr.msk.bf16.mxu0 %vm15447_vm1, %v20516_v18  ;;  %v7937_v14 = vrot.slane %v7935_v25, 3 }
 0x428   : > { %9476 = vmatprep.mubr.bf16.mxu1 %v9056_v41  ;;  %13923 = vmatprep.subr.bf16.mxu0 %v20516_v18  ;;  %v9066_v41 = vsel %vm3649_vm3, %v9055_v15, %v9065_v27  ;;  %v15243_v15 = vld [vmem:[%s20443_s1 + $0xae8] sm:$0xff]  }
 0x429   : > { %v12956_v7 = vpop.f32.mrb[148].mxu1  ;;  %13345 = vmatpush3.bf16.msra.mxu1 %v15235_v29  ;;  %v15236_v29 = vld [vmem:[%s20443_s1 + $0xb10] sm:$0xff]   ;;  %v7938_v33 = vor.u32 %v7937_v14, %v7934_v3  ;;  %v15239_v3 = vld [vmem:[%s20443_s1 + $0xb18] sm:$0xff]  }
 0x42a   : > { %v12957_v37 = vpop.f32.mrb[149].mxu1  ;;  %13346 = vmatprep.subr.bf16.mxu1 %v15237_v17  ;;  %v9063_v17 = vrot.slane %v18772_v1, 3  ;;  %v15244_v1 = vld [vmem:[%s20443_s1 + $0xaa8] sm:$0xff]  }
 0x42b   : > { %v19184_v12 = vadd.f32 %v12957_v37, %v12956_v7  ;;  %v12959_v23 = vpop.f32.mrb[150].mxu1  ;;  %13924 = vmatpush3.bf16.msra.mxu0 %v15233_v43  ;;  %v19208_v43 = vld [vmem:[%s15510_s8 + $0xec] ss:$20 sps:$4 sm:$0xff]   ;;  %v9075_v37 = vrot.slane %v18791_v34, 3 }
 0x42c   : > { %v12960_v36 = vpop.f32.mrb[151].mxu1  ;;  %13925 = vmatprep.subr.bf16.mxu0 %v20516_v18  ;;  %v7977_v7 = vshrl.u32 %v19208_v43, 16 }
 0x42d   : > { %v19196_v25 = vadd.f32 %v12960_v36, %v12959_v23  ;;  %13347 = vmatpush3.bf16.msra.mxu1 %v15238_v22  ;;  %v7980_v22 = vshll.u32 %v19208_v43, 16  ;;  %v9064_v36 = vsel %vm3649_vm3, %v9053_v19, %v9063_v17  ;;  %v9076_v51 = vsel %vm3649_vm3, %v9065_v27, %v9075_v37  ;;  %v15247_v19 = vld [vmem:[%s20443_s1 + $0xab0] sm:$0xff]  }
 0x42e   : > { %13882 = vmatmul.mubr.bf16.gmra.mrb[28].mxu0 %v7894_v21  ;;  %9477 = vmatmul.mubr.bf16.gmra.mrb[0].mxu1 %v9054_v26  ;;  %v7939_v21 = vsel %vm7764_vm6, %v7893_v9, %v7938_v33  ;;  %v15246_v9 = vld [vmem:[%s20443_s1 + $0xaf0] sm:$0xff]  }
 0x42f   : > { %13885 = vmatprep.mubr.msk.bf16.mxu0 %vm15447_vm1, %v20516_v18  ;;  %9484 = vmatprep.mubr.bf16.mxu1 %v9066_v41  ;;  %v7979_v41 = vrot.slane %v7977_v7, 2  ;;  %v19238_v27 = vld [vmem:[%s15510_s8 + $0x114] ss:$20 sps:$4 sm:$0xff]  }
 0x430   : > { %13926 = vmatpush3.bf16.msra.mxu0 %v15236_v29  ;;  %13348 = vmatprep.subr.bf16.mxu1 %v15240_v6  ;;  %v7982_v29 = vrot.slane %v7980_v22, 3  ;;  %v8022_v7 = vshrl.u32 %v19238_v27, 16  ;;  %v8025_v22 = vshll.u32 %v19238_v27, 16 }
 0x431   : > { %v12962_v14 = vpop.f32.mrb[152].mxu1  ;;  %13927 = vmatprep.subr.bf16.mxu0 %v20516_v18  ;;  %13349 = vmatpush3.bf16.msra.mxu1 %v15241_v20  ;;  %v15242_v20 = vld [vmem:[%s20443_s1 + $0xb20] sm:$0xff]  }
 0x432   : > { %v12963_v23 = vpop.f32.mrb[153].mxu1  ;;  %13350 = vmatprep.subr.bf16.mxu1 %v15243_v15 }
 0x433   : > { %v19221_v26 = vadd.f32 %v12963_v23, %v12962_v14  ;;  %v12965_v34 = vpop.f32.mrb[154].mxu1  ;;  %v7983_v14 = vor.u32 %v7982_v29, %v7979_v41  ;;  %v9085_v23 = vrot.slane %v18860_v0, 3  ;;  %v8024_v41 = vrot.slane %v8022_v7, 2 }
 0x434   : > { %v12966_v6 = vpop.f32.mrb[155].mxu1  ;;  %13928 = vmatpush3.bf16.msra.mxu0 %v15239_v3  ;;  %v15249_v3 = vld [vmem:[%s20443_s1 + $0xaf8] sm:$0xff]   ;;  %v8027_v29 = vrot.slane %v8025_v22, 3 }
 0x435   : > { %v19231_v15 = vadd.f32 %v12966_v6, %v12965_v34  ;;  %13929 = vmatprep.subr.bf16.mxu0 %v20516_v18  ;;  %13351 = vmatpush3.bf16.msra.mxu1 %v15244_v1  ;;  %v9073_v1 = vrot.slane %v18836_v30, 3  ;;  %v7984_v6 = vsel %vm7764_vm6, %v7938_v33, %v7983_v14  ;;  %v9086_v53 = vsel %vm3649_vm3, %v9075_v37, %v9085_v23 }
 0x436   : > { %13886 = vmatmul.mubr.bf16.gmra.mrb[32].mxu0 %v7939_v21  ;;  %9485 = vmatmul.mubr.bf16.gmra.mrb[4].mxu1 %v9064_v36  ;;  %v15245_v21 = vld [vmem:[%s20443_s1 + $0xb28] sm:$0xff]   ;;  %v15250_v36 = vld [vmem:[%s20443_s1 + $0xab8] sm:$0xff]   ;;  %v8028_v7 = vor.u32 %v8027_v29, %v8024_v41  ;;  %v9083_v33 = vrot.slane %v18898_v49, 3 }
 0x437   : > { %13889 = vmatprep.mubr.msk.bf16.mxu0 %vm15447_vm1, %v20516_v18  ;;  %9492 = vmatprep.mubr.bf16.mxu1 %v9076_v51 }
 0x438   : > { %13930 = vmatpush3.bf16.msra.mxu0 %v15242_v20  ;;  %13352 = vmatprep.subr.bf16.mxu1 %v15246_v9  ;;  %v9074_v20 = vsel %vm3649_vm3, %v9063_v17, %v9073_v1  ;;  %v19269_v17 = vld [vmem:[%s15510_s8 + $0x13c] ss:$20 sps:$4 sm:$0xff]   ;;  %v8029_v49 = vsel %vm7764_vm6, %v7983_v14, %v8028_v7  ;;  %v9084_v41 = vsel %vm3649_vm3, %v9073_v1, %v9083_v33 }
 0x439   : > { %v12968_v34 = vpop.f32.mrb[156].mxu1  ;;  %13931 = vmatprep.subr.bf16.mxu0 %v20516_v18  ;;  %13353 = vmatpush3.bf16.msra.mxu1 %v15247_v19  ;;  %v15248_v19 = vld [vmem:[%s20443_s1 + $0xb30] sm:$0xff]   ;;  %20653 = vst [vmem:[#allocation27_spill] sm:$0xff] %v19269_v17  ;;  %v8067_v37 = vshrl.u32 %v19269_v17, 16  ;;  %v8070_v22 = vshll.u32 %v19269_v17, 16 }
 0x43a   : > { %v12969_v51 = vpop.f32.mrb[157].mxu1  ;;  %13354 = vmatprep.subr.bf16.mxu1 %v15249_v3  ;;  %v9095_v3 = vrot.slane %v18912_v54, 3 }
 0x43b   : > { %v19256_v30 = vadd.f32 %v12969_v51, %v12968_v34  ;;  %v12971_v0 = vpop.f32.mrb[158].mxu1  ;;  %v8069_v29 = vrot.slane %v8067_v37, 2  ;;  %v9105_v37 = vrot.slane %v18996_v47, 3 }
 0x43c   : > { %v12972_v9 = vpop.f32.mrb[159].mxu1  ;;  %13932 = vmatpush3.bf16.msra.mxu0 %v15245_v21  ;;  %v15251_v21 = vld [vmem:[%s20443_s1 + $0xb38] sm:$0xff]   ;;  %v8072_v0 = vrot.slane %v8070_v22, 3  ;;  %v9096_v54 = vsel %vm3649_vm3, %v9085_v23, %v9095_v3  ;;  %v20655_v22 = vld [vmem:[#allocation12_spill] sm:$0xff] }
 0x43d   : > { %13933 = vmatprep.subr.bf16.mxu0 %v20516_v18  ;;  %13355 = vmatpush3.bf16.msra.mxu1 %v15250_v36 }
 0x43e   : > { %13890 = vmatmul.mubr.bf16.gmra.mrb[36].mxu0 %v7984_v6  ;;  %9493 = vmatmul.mubr.bf16.gmra.mrb[8].mxu1 %v9074_v20  ;;  %v8073_v23 = vor.u32 %v8072_v0, %v8069_v29  ;;  %v9106_v29 = vsel %vm3649_vm3, %v9095_v3, %v9105_v37  ;;  %v9115_v3 = vrot.slane %v19035_v60, 3 }
 0x43f   : > { %13893 = vmatprep.mubr.msk.bf16.mxu0 %vm15447_vm1, %v20516_v18  ;;  %9500 = vmatprep.mubr.bf16.mxu1 %v9086_v53 }
 0x440   : > { %13934 = vmatpush3.bf16.msra.mxu0 %v15248_v19  ;;  %v19283_v19 = vld [vmem:[%s15510_s8 + $0x164] ss:$20 sps:$4 sm:$0xff]  }
 0x441   : > { %v12990_v34 = vpop.f32.mrb[160].mxu1  ;;  %13935 = vmatprep.subr.bf16.mxu0 %v20516_v18  ;;  %v8112_v17 = vshrl.u32 %v19283_v19, 16  ;;  %v8115_v14 = vshll.u32 %v19283_v19, 16 }
 0x442   : > { %v12991_v53 = vpop.f32.mrb[161].mxu1 }
 0x443   : > { %v12992_v36 = vadd.f32 %v12991_v53, %v12990_v34  ;;  %v12993_v51 = vpop.f32.mrb[162].mxu1  ;;  %v20654_v34 = vld [vmem:[#allocation14_spill] sm:$0xff] }
 0x444   : > { %v12994_v6 = vpop.f32.mrb[163].mxu1  ;;  %13936 = vmatpush3.bf16.msra.mxu0 %v15251_v21 }
 0x445   : > { %v7441_v20 = vadd.f32 %v12992_v36, %v19021_v55  ;;  %v12995_v9 = vadd.f32 %v12994_v6, %v12993_v51  ;;  %v9093_v55 = vrot.slane %v18982_v63, 3  ;;  %v8114_v51 = vrot.slane %v8112_v17, 2  ;;  %v20656_v17 = vld [vmem:[#allocation13_spill] sm:$0xff] }
 0x446   : > { %13894 = vmatmul.mubr.bf16.gmra.mrb[40].mxu0 %v8029_v49  ;;  %9501 = vmatmul.mubr.bf16.gmra.mrb[12].mxu1 %v9084_v41  ;;  %v8117_v41 = vrot.slane %v8115_v14, 3 }
 0x447   : > { %v19288_v53 = vadd.f32 %v20654_v34, %v7441_v20  ;;  %v7444_v1 = vadd.f32 %v12995_v9, %v19029_v48  ;;  %13897 = vmatprep.mubr.msk.bf16.mxu0 %vm15447_vm1, %v20516_v18  ;;  %9508 = vmatprep.mubr.bf16.mxu1 %v9096_v54  ;;  %v8074_v48 = vsel %vm7764_vm6, %v8028_v7, %v8073_v23  ;;  %v9103_v34 = vrot.slane %v19024_v13, 3  ;;  %v19310_v7 = vld [vmem:[%s15510_s8 + $0x18c] ss:$20 sps:$4 sm:$0xff]  }
 0x448   : > { %v9094_v9 = vsel %vm3649_vm3, %v9083_v33, %v9093_v55  ;;  %v8118_v0 = vor.u32 %v8117_v41, %v8114_v51  ;;  %v8157_v33 = vshrl.u32 %v19310_v7, 16 }
 0x449   : > { %v19296_v21 = vadd.f32 %v20655_v22, %v7444_v1  ;;  %v12996_v49 = vpop.f32.mrb[164].mxu1  ;;  %v20657_v22 = vld [vmem:[#allocation15_spill] sm:$0xff] }
 0x44a   : > { %v12997_v36 = vpop.f32.mrb[165].mxu1 }
 0x44b   : > { %v12998_v6 = vadd.f32 %v12997_v36, %v12996_v49  ;;  %v12999_v20 = vpop.f32.mrb[166].mxu1 }
 0x44c   : > { %v13000_v54 = vpop.f32.mrb[167].mxu1 }
 0x44d   : > { %v7449_v63 = vadd.f32 %v12998_v6, %v19049_v28  ;;  %v13001_v47 = vadd.f32 %v13000_v54, %v12999_v20  ;;  %v8160_v28 = vshll.u32 %v19310_v7, 16  ;;  %v9104_v6 = vsel %vm3649_vm3, %v9093_v55, %v9103_v34 }
 0x44e   : > { %13898 = vmatmul.mubr.bf16.gmra.mrb[44].mxu0 %v8074_v48  ;;  %9509 = vmatmul.mubr.bf16.gmra.mrb[16].mxu1 %v9094_v9  ;;  %v8159_v20 = vrot.slane %v8157_v33, 2  ;;  %v9116_v54 = vsel %vm3649_vm3, %v9105_v37, %v9115_v3  ;;  %v9113_v37 = vrot.slane %v19061_v4, 3  ;;  %v9125_v33 = vrot.slane %v19056_v32, 3 }
 0x44f   : > { %v19304_v14 = vadd.f32 %v20656_v17, %v7449_v63  ;;  %v7452_v1 = vadd.f32 %v13001_v47, %v19058_v57  ;;  %13901 = vmatprep.mubr.msk.bf16.mxu0 %vm15447_vm1, %v20516_v18  ;;  %9516 = vmatprep.mubr.bf16.mxu1 %v9106_v29  ;;  %v8119_v57 = vsel %vm7764_vm6, %v8073_v23, %v8118_v0  ;;  %v8162_v48 = vrot.slane %v8160_v28, 3  ;;  %v19323_v63 = vld [vmem:[%s15510_s8 + $0x1b4] ss:$20 sps:$4 sm:$0xff]  }
 0x450   : > { %v8202_v23 = vshrl.u32 %v19323_v63, 16  ;;  %v8205_v47 = vshll.u32 %v19323_v63, 16  ;;  %v9126_v32 = vsel %vm3649_vm3, %v9115_v3, %v9125_v33 }
 0x451   : > { %v19316_v13 = vadd.f32 %v20657_v22, %v7452_v1  ;;  %v13002_v49 = vpop.f32.mrb[168].mxu1  ;;  %v7669_v1 = vld [vmem:[%s15510_s8 + $0x1f0] sm:$0x7] }
 0x452   : > { %v13003_v36 = vpop.f32.mrb[169].mxu1 }
 0x453   : > { %v13004_v51 = vadd.f32 %v13003_v36, %v13002_v49  ;;  %v13005_v41 = vpop.f32.mrb[170].mxu1  ;;  %v8204_v36 = vrot.slane %v8202_v23, 2  ;;  %v8932_v23 = vld [vmem:[%s15510_s8 + $0x44] sm:$0x88] }
 0x454   : > { %v13006_v9 = vpop.f32.mrb[171].mxu1 }
 0x455   : > { %v7457_v60 = vadd.f32 %v13004_v51, %v19074_v40  ;;  %v13007_v29 = vadd.f32 %v13006_v9, %v13005_v41  ;;  %v8163_v40 = vor.u32 %v8162_v48, %v8159_v20  ;;  %v9114_v20 = vsel %vm3649_vm3, %v9103_v34, %v9113_v37 }
 0x456   : > { %13902 = vmatmul.mubr.bf16.gmra.mrb[48].mxu0 %v8119_v57  ;;  %9517 = vmatmul.mubr.bf16.gmra.mrb[20].mxu1 %v9104_v6  ;;  %v15417_v57 = vld [vmem:[%s15510_s8 + $0x1dc] sm:$0xf] }
 0x457   : > { %v19328_v55 = vadd.f32 %v18641_v44, %v7457_v60  ;;  %v7460_v17 = vadd.f32 %v13007_v29, %v19081_v8  ;;  %13905 = vmatprep.mubr.msk.bf16.mxu0 %vm15447_vm1, %v20516_v18  ;;  %9524 = vmatprep.mubr.bf16.mxu1 %v9116_v54  ;;  %v8207_v44 = vrot.slane %v8205_v47, 3  ;;  %v19340_v51 = vcombine.low %v15417_v57, %v7669_v1 }
 0x458   : > { %v8164_v6 = vsel %vm7764_vm6, %v8118_v0, %v8163_v40  ;;  %v9123_v54 = vrot.slane %v19072_v52, 3 }
 0x459   : > { %v19337_v28 = vadd.f32 %v18648_v56, %v7460_v17  ;;  %v13008_v22 = vpop.f32.mrb[172].mxu1  ;;  %v8208_v9 = vor.u32 %v8207_v44, %v8204_v36  ;;  %v8247_v0 = vshrl.u32 %v19340_v51, 16  ;;  %v15418_v36 = vld [vmem:[%s15510_s8 + $0x58] sm:$0xff] }
 0x45a   : > { %v13009_v49 = vpop.f32.mrb[173].mxu1  ;;  %v11729_v44 = vcombine.high %v8932_v23, %v15418_v36 }
 0x45b   : > { %v13010_v8 = vadd.f32 %v13009_v49, %v13008_v22  ;;  %v13011_v41 = vpop.f32.mrb[174].mxu1  ;;  %v8249_v1 = vrot.slane %v8247_v0, 2 }
 0x45c   : > { %v13012_v4 = vpop.f32.mrb[175].mxu1 }
 0x45d   : > { %v7465_v56 = vadd.f32 %v13010_v8, %v19090_v2  ;;  %v13013_v48 = vadd.f32 %v13012_v4, %v13011_v41  ;;  %v8250_v2 = vshll.u32 %v19340_v51, 16  ;;  %v9037_v41 = vrot.slane %v11729_v44, 3 }
 0x45e   : > { %13906 = vmatmul.mubr.bf16.gmra.mrb[52].mxu0 %v8164_v6  ;;  %9525 = vmatmul.mubr.bf16.gmra.mrb[24].mxu1 %v9114_v20  ;;  %v15419_v6 = vld [vmem:[%s15510_s8 + $0x70] ss:$20 sps:$4 sm:$0xff]  }
 0x45f   : > { %v19348_v60 = vadd.f32 %v18665_v58, %v7465_v56  ;;  %v7468_v29 = vadd.f32 %v13013_v48, %v19096_v31  ;;  %13909 = vmatprep.mubr.msk.bf16.mxu0 %vm15447_vm1, %v20516_v18  ;;  %9532 = vmatprep.mubr.bf16.mxu1 %v9126_v32  ;;  %v8209_v58 = vsel %vm7764_vm6, %v8163_v40, %v8208_v9  ;;  %v8252_v22 = vrot.slane %v8250_v2, 3 }
 0x460   : > { %v9124_v31 = vsel %vm3649_vm3, %v9113_v37, %v9123_v54  ;;  %v9038_v20 = vrot.slane %v15419_v6, 3 }
 0x461   : > { %v19356_v34 = vadd.f32 %v18677_v38, %v7468_v29  ;;  %v13014_v3 = vpop.f32.mrb[176].mxu1  ;;  %v8253_v37 = vor.u32 %v8252_v22, %v8249_v1 }
 0x462   : > { %v13015_v52 = vpop.f32.mrb[177].mxu1 }
 0x463   : > { %v13016_v47 = vadd.f32 %v13015_v52, %v13014_v3  ;;  %v13017_v17 = vpop.f32.mrb[178].mxu1 }
 0x464   : > { %v13018_v49 = vpop.f32.mrb[179].mxu1 }
 0x465   : > { %v7473_v57 = vadd.f32 %v13016_v47, %v19102_v39  ;;  %v13019_v8 = vadd.f32 %v13018_v49, %v13017_v17  ;;  %v20658_v17 = vld [vmem:[#allocation16_spill] sm:$0xff]  ;;  %v15422_v49 = vld [vmem:[%s15510_s8 + $0x60] sm:$0xf] }
 0x466   : > { %13910 = vmatmul.mubr.bf16.gmra.mrb[56].mxu0 %v8209_v58  ;;  %9533 = vmatmul.mubr.bf16.gmra.mrb[28].mxu1 %v9124_v31  ;;  %v15421_v58 = vld [vmem:[%s15510_s8 + $0x98] ss:$20 sps:$4 sm:$0xff]  }
 0x467   : > { %v19364_v38 = vadd.f32 %v18703_v24, %v7473_v57  ;;  %v7476_v40 = vadd.f32 %v13019_v8, %v19107_v61  ;;  %13913 = vmatprep.mubr.msk.bf16.mxu0 %vm15447_vm1, %v20516_v18  ;;  %9540 = vmatprep.mubr.bf16.mxu1 %v9125_v33  ;;  %v8254_v24 = vsel %vm7764_vm6, %v8208_v9, %v8253_v37  ;;  %v9049_v47 = vrot.slane %v15421_v58, 3 }
 0x468   : > { %v11728_v61 = vcombine.low %v8932_v23, %v15418_v36  ;;  %v9039_v33 = vsel %vm3649_vm3, %v9037_v41, %v9038_v20  ;;  %v15420_v23 = vld [vmem:[%s15510_s8 + $0x6c] ss:$20 sps:$4 sm:$0xff]   ;;  %v15423_v41 = vld [vmem:[%s15510_s8 + $0x94] ss:$20 sps:$4 sm:$0xff]  }
 0x469   : > { %v19371_v4 = vadd.f32 %v18715_v59, %v7476_v40  ;;  %v13020_v39 = vpop.f32.mrb[180].mxu1  ;;  %v9035_v52 = vrot.slane %v15420_v23, 3  ;;  %v9050_v57 = vsel %vm3649_vm3, %v9038_v20, %v9049_v47  ;;  %v9047_v6 = vrot.slane %v15423_v41, 3  ;;  %v15424_v20 = vld [vmem:[%s15510_s8 + $0xc0] ss:$20 sps:$4 sm:$0xff]  }
 0x46a   : > { %v13021_v32 = vpop.f32.mrb[181].mxu1  ;;  %v9034_v9 = vrot.slane %v11728_v61, 3  ;;  %v9059_v61 = vrot.slane %v15424_v20, 3 }
 0x46b   : > { %v13022_v56 = vadd.f32 %v13021_v32, %v13020_v39  ;;  %v13023_v48 = vpop.f32.mrb[182].mxu1  ;;  %v20659_v39 = vld [vmem:[#allocation17_spill] sm:$0xff] }
 0x46c   : > { %v13024_v29 = vpop.f32.mrb[183].mxu1  ;;  %v9060_v23 = vsel %vm3649_vm3, %v9049_v47, %v9059_v61 }
 0x46d   : > { %v7481_v0 = vadd.f32 %v13022_v56, %v19110_v35  ;;  %v13025_v2 = vadd.f32 %v13024_v29, %v13023_v48  ;;  %v8933_v35 = vld [vmem:[%s15510_s8 + $0x4c] sm:$0x8] }
 0x46e   : > { %13914 = vmatmul.mubr.bf16.gmra.mrb[60].mxu0 %v8254_v24  ;;  %9541 = vmatmul.mubr.bf16.gmra.mrb[32].mxu1 %v9123_v54  ;;  %v11730_v36 = vcombine.low %v8933_v35, %v15422_v49  ;;  %v9041_v24 = vrot.slane %v19120_v45, 3  ;;  %v20661_v35 = vld [vmem:[#allocation22_spill] sm:$0xff] }
 0x46f   : > { %v19377_v59 = vadd.f32 %v18751_v11, %v7481_v0  ;;  %v7484_v3 = vadd.f32 %v13025_v2, %v19114_v42  ;;  %13917 = vmatprep.mubr.msk.bf16.mxu0 %vm15447_vm1, %v20516_v18  ;;  %9580 = vmatprep.mubr.bf16.mxu1 %v9039_v33  ;;  %v9036_v42 = vsel %vm3649_vm3, %v9034_v9, %v9035_v52 }
 0x470   : > { %v9040_v48 = vrot.slane %v11730_v36, 3 }
 0x471   : > { %v19386_v31 = vadd.f32 %v20658_v17, %v7484_v3  ;;  %v13026_v54 = vpop.f32.mrb[184].mxu1 }
 0x472   : > { %v13027_v11 = vpop.f32.mrb[185].mxu1  ;;  %v9042_v3 = vsel %vm3649_vm3, %v9040_v48, %v9041_v24 }
 0x473   : > { %v13028_v1 = vadd.f32 %v13027_v11, %v13026_v54  ;;  %v13029_v22 = vpop.f32.mrb[186].mxu1 }
 0x474   : > { %v13030_v44 = vpop.f32.mrb[187].mxu1 }
 0x475   : > { %v7489_v8 = vadd.f32 %v13028_v1, %v19126_v62  ;;  %v13031_v40 = vadd.f32 %v13030_v44, %v13029_v22  ;;  %v20660_v62 = vld [vmem:[#allocation19_spill] sm:$0xff]  ;;  %v9051_v1 = vrot.slane %v19144_v46, 3 }
 0x476   : > { %13918 = vmatmul.mubr.bf16.gmra.mrb[64].mxu0 %v8253_v37  ;;  %9581 = vmatmul.mubr.bf16.vlgmr.msra.gmra.mrb[36].mxu1 %v9036_v42  ;;  %v15426_v22 = vld [vmem:[%s15510_s8 + $0xe8] ss:$20 sps:$4 sm:$0xff]  }
 0x477   : > { %v19394_v32 = vadd.f32 %v20659_v39, %v7489_v8  ;;  %v7492_v56 = vadd.f32 %v13031_v40, %v19134_v10  ;;  %9588 = vmatprep.mubr.bf16.mxu1 %v9050_v57  ;;  %13937 = vmatprep.mubr.msk.bf16.mxu0 %vm15447_vm1, %v20516_v18  ;;  %v9048_v10 = vsel %vm3649_vm3, %v9035_v52, %v9047_v6  ;;  %v15425_v52 = vld [vmem:[%s15510_s8 + $0xbc] ss:$20 sps:$4 sm:$0xff]   ;;  %v9069_v47 = vrot.slane %v15426_v22, 3 }
 0x478   : > { %v9057_v11 = vrot.slane %v15425_v52, 3  ;;  %v20662_v42 = vld [vmem:[#allocation21_spill] sm:$0xff]  ;;  %v9052_v8 = vsel %vm3649_vm3, %v9041_v24, %v9051_v1  ;;  %v9061_v24 = vrot.slane %v19166_v16, 3 }
 0x479   : > { %v19402_v29 = vadd.f32 %v20660_v62, %v7492_v56  ;;  %v13032_v37 = vpop.f32.mrb[188].mxu1  ;;  %v9070_v41 = vsel %vm3649_vm3, %v9059_v61, %v9069_v47  ;;  %v20663_v56 = vld [vmem:[#allocation37_spill] sm:$0xff] }
 0x47a   : > { %v13033_v33 = vpop.f32.mrb[189].mxu1 }
 0x47b   : > { %v13034_v0 = vadd.f32 %v13033_v33, %v13032_v37  ;;  %v13035_v2 = vpop.f32.mrb[190].mxu1  ;;  %v15428_v37 = vld [vmem:[%s15510_s8 + $0x110] ss:$20 sps:$4 sm:$0xff]   ;;  %v20664_v33 = vld [vmem:[#allocation23_spill] sm:$0xff] }
 0x47c   : > { %v13036_v9 = vpop.f32.mrb[191].mxu1  ;;  %v9079_v61 = vrot.slane %v15428_v37, 3 }
 0x47d   : > { %v7497_v45 = vadd.f32 %v13034_v0, %v19153_v5  ;;  %v13037_v58 = vadd.f32 %v13036_v9, %v13035_v2  ;;  %v9062_v9 = vsel %vm3649_vm3, %v9051_v1, %v9061_v24  ;;  %v9071_v1 = vrot.slane %v19208_v43, 3 }
 0x47e   : > { %9589 = vmatmul.mubr.bf16.gmra.mrb[40].mxu1 %v9048_v10  ;;  %13938 = vmatmul.mubr.bf16.vlgmr.msra.gmra.mrb[24].mxu0 %v9042_v3 }
 0x47f   : > { %v19409_v17 = vadd.f32 %v20661_v35, %v7497_v45  ;;  %v7500_v54 = vadd.f32 %v13037_v58, %v19159_v50  ;;  %9596 = vmatprep.mubr.bf16.mxu1 %v9060_v23  ;;  %13941 = vmatprep.mubr.msk.bf16.mxu0 %vm15447_vm1, %v20516_v18  ;;  %v9058_v50 = vsel %vm3649_vm3, %v9047_v6, %v9057_v11  ;;  %v15427_v6 = vld [vmem:[%s15510_s8 + $0xe4] ss:$20 sps:$4 sm:$0xff]  }
 0x480   : > { %v9067_v62 = vrot.slane %v15427_v6, 3  ;;  %v9080_v45 = vsel %vm3649_vm3, %v9069_v47, %v9079_v61  ;;  %v20665_v35 = vld [vmem:[#allocation25_spill] sm:$0xff]  ;;  %v9081_v6 = vrot.slane %v19238_v27, 3 }
 0x481   : > { %v19418_v5 = vadd.f32 %v20662_v42, %v7500_v54  ;;  %v13038_v49 = vpop.f32.mrb[192].mxu1  ;;  %v15430_v42 = vld [vmem:[%s15510_s8 + $0x138] ss:$20 sps:$4 sm:$0xff]   ;;  %v15433_v27 = vld [vmem:[%s15510_s8 + $0x15c] ss:$20 sps:$4 sm:$0xff]  }
 0x482   : > { %v13039_v36 = vpop.f32.mrb[193].mxu1  ;;  %v9089_v47 = vrot.slane %v15430_v42, 3 }
 0x483   : > { %v13040_v44 = vadd.f32 %v13039_v36, %v13038_v49  ;;  %v13041_v57 = vpop.f32.mrb[194].mxu1  ;;  %v20666_v49 = vld [vmem:[#allocation24_spill] sm:$0xff] }
 0x484   : > { %v13042_v40 = vpop.f32.mrb[195].mxu1 }
 0x485   : > { %v7505_v46 = vadd.f32 %v13040_v44, %v19184_v12  ;;  %v13043_v39 = vadd.f32 %v13042_v40, %v13041_v57 }
 0x486   : > { %9597 = vmatmul.mubr.bf16.gmra.mrb[44].mxu1 %v9058_v50  ;;  %13942 = vmatmul.mubr.bf16.gmra.mrb[28].mxu0 %v9052_v8  ;;  %v9072_v8 = vsel %vm3649_vm3, %v9061_v24, %v9071_v1 }
 0x487   : > { %v19425_v48 = vadd.f32 %v20663_v56, %v7505_v46  ;;  %v7508_v20 = vadd.f32 %v13043_v39, %v19196_v25  ;;  %9604 = vmatprep.mubr.bf16.mxu1 %v9070_v41  ;;  %13945 = vmatprep.mubr.msk.bf16.mxu0 %vm15447_vm1, %v20516_v18  ;;  %v9068_v25 = vsel %vm3649_vm3, %v9057_v11, %v9067_v62  ;;  %v15429_v11 = vld [vmem:[%s15510_s8 + $0x10c] ss:$20 sps:$4 sm:$0xff]   ;;  %v15431_v56 = vld [vmem:[%s15510_s8 + $0x134] ss:$20 sps:$4 sm:$0xff]  }
 0x488   : > { %v9077_v22 = vrot.slane %v15429_v11, 3  ;;  %v9090_v41 = vsel %vm3649_vm3, %v9079_v61, %v9089_v47  ;;  %v20667_v46 = vld [vmem:[#allocation39_spill] sm:$0xff] }
 0x489   : > { %v19434_v12 = vadd.f32 %v20664_v33, %v7508_v20  ;;  %v13044_v0 = vpop.f32.mrb[196].mxu1  ;;  %v9087_v20 = vrot.slane %v15431_v56, 3 }
 0x48a   : > { %v13045_v2 = vpop.f32.mrb[197].mxu1 }
 0x48b   : > { %v13046_v10 = vadd.f32 %v13045_v2, %v13044_v0  ;;  %v13047_v3 = vpop.f32.mrb[198].mxu1  ;;  %v9088_v0 = vsel %vm3649_vm3, %v9077_v22, %v9087_v20  ;;  %v9082_v2 = vsel %vm3649_vm3, %v9071_v1, %v9081_v6 }
 0x48c   : > { %v13048_v23 = vpop.f32.mrb[199].mxu1 }
 0x48d   : > { %v7513_v16 = vadd.f32 %v13046_v10, %v19221_v26  ;;  %v13049_v58 = vadd.f32 %v13048_v23, %v13047_v3  ;;  %v20668_v23 = vld [vmem:[#allocation27_spill] sm:$0xff] }
 0x48e   : > { %9605 = vmatmul.mubr.bf16.gmra.mrb[48].mxu1 %v9068_v25  ;;  %13946 = vmatmul.mubr.bf16.gmra.mrb[32].mxu0 %v9062_v9  ;;  %v9097_v9 = vrot.slane %v15433_v27, 3 }
 0x48f   : > { %v19441_v54 = vadd.f32 %v20665_v35, %v7513_v16  ;;  %v7516_v52 = vadd.f32 %v13049_v58, %v19231_v15  ;;  %9612 = vmatprep.mubr.bf16.mxu1 %v9080_v45  ;;  %13949 = vmatprep.mubr.msk.bf16.mxu0 %vm15447_vm1, %v20516_v18  ;;  %v9078_v15 = vsel %vm3649_vm3, %v9067_v62, %v9077_v22  ;;  %v15432_v62 = vld [vmem:[%s15510_s8 + $0x160] ss:$20 sps:$4 sm:$0xff]   ;;  %v9091_v45 = vrot.slane %v20668_v23, 3  ;;  %v15434_v16 = vld [vmem:[%s15510_s8 + $0x188] ss:$20 sps:$4 sm:$0xff]  }
 0x490   : > { %v9099_v24 = vrot.slane %v15432_v62, 3  ;;  %v9109_v58 = vrot.slane %v15434_v16, 3  ;;  %v15436_v62 = vld [vmem:[%s15510_s8 + $0x1b0] ss:$20 sps:$4 sm:$0xff]  }
 0x491   : > { %v19450_v26 = vadd.f32 %v20666_v49, %v7516_v52  ;;  %v13050_v36 = vpop.f32.mrb[200].mxu1 }
 0x492   : > { %v13051_v44 = vpop.f32.mrb[201].mxu1  ;;  %v9100_v3 = vsel %vm3649_vm3, %v9089_v47, %v9099_v24 }
 0x493   : > { %v13052_v57 = vadd.f32 %v13051_v44, %v13050_v36  ;;  %v13053_v50 = vpop.f32.mrb[202].mxu1  ;;  %v9098_v36 = vsel %vm3649_vm3, %v9087_v20, %v9097_v9  ;;  %v9092_v44 = vsel %vm3649_vm3, %v9081_v6, %v9091_v45  ;;  %v9101_v20 = vrot.slane %v19283_v19, 3 }
 0x494   : > { %v13054_v40 = vpop.f32.mrb[203].mxu1 }
 0x495   : > { %v7521_v43 = vadd.f32 %v13052_v57, %v19256_v30  ;;  %v9102_v19 = vsel %vm3649_vm3, %v9091_v45, %v9101_v20 }
 0x496   : > { %9613 = vmatmul.mubr.bf16.gmra.mrb[52].mxu1 %v9078_v15  ;;  %13950 = vmatmul.mubr.bf16.gmra.mrb[36].mxu0 %v9072_v8  ;;  %v9110_v15 = vsel %vm3649_vm3, %v9099_v24, %v9109_v58 }
 0x497   : > { %v19457_v39 = vadd.f32 %v20667_v46, %v7521_v43  ;;  %9620 = vmatprep.mubr.bf16.mxu1 %v9090_v41  ;;  %13953 = vmatprep.mubr.msk.bf16.mxu0 %vm15447_vm1, %v20516_v18  ;;  %v15435_v46 = vld [vmem:[%s15510_s8 + $0x184] ss:$20 sps:$4 sm:$0xff]  }
 0x498   : > { %v9107_v56 = vrot.slane %v15435_v46, 3 }
 0x499   : > { %v13091_v37 = vpop.f32.mrb[204].mxu1 }
 0x49a   : > { %v13092_v61 = vpop.f32.mrb[205].mxu1  ;;  %v9108_v27 = vsel %vm3649_vm3, %v9097_v9, %v9107_v56  ;;  %v9111_v9 = vrot.slane %v19310_v7, 3 }
 0x49b   : > { %v13093_v30 = vadd.f32 %v13092_v61, %v13091_v37  ;;  %v13094_v33 = vpop.f32.mrb[206].mxu1  ;;  %v9119_v37 = vrot.slane %v15436_v62, 3 }
 0x49c   : > { %v13095_v10 = vpop.f32.mrb[207].mxu1  ;;  %v9112_v7 = vsel %vm3649_vm3, %v9101_v20, %v9111_v9 }
 0x49d   : > { %v13096_v25 = vadd.f32 %v13095_v10, %v13094_v33  ;;  %v9120_v16 = vsel %vm3649_vm3, %v9109_v58, %v9119_v37 }
 0x49e   : > { %9621 = vmatmul.mubr.bf16.gmra.mrb[56].mxu1 %v9088_v0  ;;  %13954 = vmatmul.mubr.bf16.gmra.mrb[40].mxu0 %v9082_v2 }
 0x49f   : > { %9628 = vmatprep.mubr.bf16.mxu1 %v9100_v3  ;;  %13957 = vmatprep.mubr.msk.bf16.mxu0 %vm15447_vm1, %v20516_v18 }
 0x4a1   : > { %v13097_v35 = vpop.f32.mrb[208].mxu1  ;;  %v13173_v52 = vpop.f32.mrb[200].mxu0 }
 0x4a2   : > { %v13098_v11 = vpop.f32.mrb[209].mxu1  ;;  %v13174_v22 = vpop.f32.mrb[201].mxu0 }
 0x4a3   : > { %v13099_v1 = vadd.f32 %v13098_v11, %v13097_v35  ;;  %v13175_v42 = vadd.f32 %v13174_v22, %v13173_v52  ;;  %v13100_v47 = vpop.f32.mrb[210].mxu1  ;;  %v13176_v49 = vpop.f32.mrb[202].mxu0  ;;  %v15437_v22 = vld [vmem:[%s15510_s8 + $0x1ac] ss:$20 sps:$4 sm:$0xff]   ;;  %s14560_s8 = smul.u32 168, %s20787_s13 }
 0x4a4   : > { %v13101_v57 = vpop.f32.mrb[211].mxu1  ;;  %v13177_v50 = vpop.f32.mrb[203].mxu0 }
 0x4a5   : > { %v8705_v8 = vadd.f32 %v13175_v42, %v13093_v30  ;;  %v13102_v40 = vadd.f32 %v13101_v57, %v13100_v47  ;;  %v13178_v41 = vadd.f32 %v13177_v50, %v13176_v49  ;;  %v9117_v42 = vrot.slane %v15437_v22, 3  ;;  %v20669_v47 = vld [vmem:[#allocation26_spill] sm:$0xff]  ;;  %s19996_s19 = scalar_lea.vmem %s20444_s2, %s14560_s8 }
 0x4a6   : > { %9629 = vmatmul.mubr.bf16.gmra.mrb[60].mxu1 %v9098_v36  ;;  %13958 = vmatmul.mubr.bf16.gmra.mrb[44].mxu0 %v9092_v44  ;;  %v9129_v49 = vrot.slane %v20669_v47, 3 }
 0x4a7   : > { %v8708_v43 = vadd.f32 %v13178_v41, %v13096_v25  ;;  %9636 = vmatprep.mubr.bf16.mxu1 %v9110_v15  ;;  %13961 = vmatprep.mubr.msk.bf16.mxu0 %vm15447_vm1, %v20516_v18  ;;  %v19480_v6 = vadd.f32 %v19288_v53, %v8705_v8  ;;  %v9118_v41 = vsel %vm3649_vm3, %v9107_v56, %v9117_v42  ;;  %v9121_v56 = vrot.slane %v19323_v63, 3 }
 0x4a8   : > { %v9130_v46 = vsel %vm3649_vm3, %v9119_v37, %v9129_v49 }
 0x4a9   : > { %v13103_v24 = vpop.f32.mrb[212].mxu1  ;;  %v13179_v61 = vpop.f32.mrb[204].mxu0  ;;  %v19484_v30 = vadd.f32 %v19296_v21, %v8708_v43 }
 0x4aa   : > { %v13104_v33 = vpop.f32.mrb[213].mxu1  ;;  %v13180_v0 = vpop.f32.mrb[205].mxu0 }
 0x4ab   : > { %v13105_v2 = vadd.f32 %v13104_v33, %v13103_v24  ;;  %v13181_v10 = vadd.f32 %v13180_v0, %v13179_v61  ;;  %v13106_v3 = vpop.f32.mrb[214].mxu1  ;;  %v13182_v25 = vpop.f32.mrb[206].mxu0  ;;  %v20670_v33 = vld [vmem:[#allocation28_spill] sm:$0xff] }
 0x4ac   : > { %v13107_v53 = vpop.f32.mrb[215].mxu1  ;;  %v13183_v23 = vpop.f32.mrb[207].mxu0  ;;  %v9127_v0 = vrot.slane %v20670_v33, 3 }
 0x4ad   : > { %v8713_v35 = vadd.f32 %v13181_v10, %v13099_v1  ;;  %v13108_v52 = vadd.f32 %v13107_v53, %v13106_v3  ;;  %v13184_v11 = vadd.f32 %v13183_v23, %v13182_v25 }
 0x4ae   : > { %9637 = vmatmul.mubr.bf16.gmra.mrb[64].mxu1 %v9108_v27  ;;  %13962 = vmatmul.mubr.bf16.gmra.mrb[48].mxu0 %v9102_v19 }
 0x4af   : > { %v8716_v21 = vadd.f32 %v13184_v11, %v13102_v40  ;;  %9644 = vmatprep.mubr.bf16.mxu1 %v9120_v16  ;;  %13965 = vmatprep.mubr.msk.bf16.mxu0 %vm15447_vm1, %v20516_v18  ;;  %v19494_v45 = vadd.f32 %v19304_v14, %v8713_v35  ;;  %v9128_v16 = vsel %vm3649_vm3, %v9117_v42, %v9127_v0 }
 0x4b0   : > { %v9122_v35 = vsel %vm3649_vm3, %v9111_v9, %v9121_v56 }
 0x4b1   : > { %v13109_v58 = vpop.f32.mrb[216].mxu1  ;;  %v13185_v1 = vpop.f32.mrb[208].mxu0  ;;  %v19498_v36 = vadd.f32 %v19316_v13, %v8716_v21 }
 0x4b2   : > { %v13110_v44 = vpop.f32.mrb[217].mxu1  ;;  %v13186_v57 = vpop.f32.mrb[209].mxu0 }
 0x4b3   : > { %v13111_v50 = vadd.f32 %v13110_v44, %v13109_v58  ;;  %v13187_v15 = vadd.f32 %v13186_v57, %v13185_v1  ;;  %v13112_v8 = vpop.f32.mrb[218].mxu1  ;;  %v13188_v40 = vpop.f32.mrb[210].mxu0 }
 0x4b4   : > { %v13113_v43 = vpop.f32.mrb[219].mxu1  ;;  %v13189_v14 = vpop.f32.mrb[211].mxu0 }
 0x4b5   : > { %v8721_v62 = vadd.f32 %v13187_v15, %v13105_v2  ;;  %v13114_v24 = vadd.f32 %v13113_v43, %v13112_v8  ;;  %v13190_v61 = vadd.f32 %v13189_v14, %v13188_v40 }
 0x4b6   : > { %9645 = vmatmul.mubr.bf16.gmra.mrb[68].mxu1 %v9118_v41  ;;  %13966 = vmatmul.mubr.bf16.gmra.mrb[52].mxu0 %v9112_v7 }
 0x4b7   : > { %v8724_v13 = vadd.f32 %v13190_v61, %v13108_v52  ;;  %9652 = vmatprep.mubr.bf16.mxu1 %v9130_v46  ;;  %13969 = vmatprep.mubr.msk.bf16.mxu0 %vm15447_vm1, %v20516_v18  ;;  %v19508_v20 = vadd.f32 %v19328_v55, %v8721_v62 }
 0x4b9   : > { %v13115_v10 = vpop.f32.mrb[220].mxu1  ;;  %v13191_v3 = vpop.f32.mrb[212].mxu0  ;;  %v19511_v37 = vadd.f32 %v19337_v28, %v8724_v13  ;;  %v9131_v28 = vrot.slane %v19340_v51, 3 }
 0x4ba   : > { %v13116_v2 = vpop.f32.mrb[221].mxu1  ;;  %v13192_v25 = vpop.f32.mrb[213].mxu0 }
 0x4bb   : > { %v13117_v27 = vadd.f32 %v13116_v2, %v13115_v10  ;;  %v13193_v19 = vadd.f32 %v13192_v25, %v13191_v3  ;;  %v13118_v53 = vpop.f32.mrb[222].mxu1  ;;  %v13194_v23 = vpop.f32.mrb[214].mxu0 }
 0x4bc   : > { %v13119_v52 = vpop.f32.mrb[223].mxu1  ;;  %v13195_v63 = vpop.f32.mrb[215].mxu0 }
 0x4bd   : > { %v8729_v11 = vadd.f32 %v13193_v19, %v13111_v50  ;;  %v13120_v55 = vadd.f32 %v13119_v52, %v13118_v53  ;;  %v13196_v21 = vadd.f32 %v13195_v63, %v13194_v23 }
 0x4be   : > { %9653 = vmatmul.mubr.bf16.gmra.mrb[72].mxu1 %v9128_v16  ;;  %13970 = vmatmul.mubr.bf16.gmra.mrb[56].mxu0 %v9122_v35 }
 0x4bf   : > { %v8732_v22 = vadd.f32 %v13196_v21, %v13114_v24  ;;  %9660 = vmatprep.mubr.bf16.mxu1 %v9129_v49  ;;  %13973 = vmatprep.mubr.msk.bf16.mxu0 %vm15447_vm1, %v20516_v18  ;;  %v19519_v47 = vadd.f32 %v19348_v60, %v8729_v11  ;;  %v9132_v49 = vsel %vm3649_vm3, %v9121_v56, %v9131_v28 }
 0x4c1   : > { %v13121_v42 = vpop.f32.mrb[224].mxu1  ;;  %v13197_v58 = vpop.f32.mrb[216].mxu0  ;;  %v19522_v9 = vadd.f32 %v19356_v34, %v8732_v22 }
 0x4c2   : > { %v13122_v1 = vpop.f32.mrb[225].mxu1  ;;  %v13198_v44 = vpop.f32.mrb[217].mxu0 }
 0x4c3   : > { %v13123_v57 = vadd.f32 %v13122_v1, %v13121_v42  ;;  %v13199_v50 = vadd.f32 %v13198_v44, %v13197_v58  ;;  %v13124_v15 = vpop.f32.mrb[226].mxu1  ;;  %v13200_v8 = vpop.f32.mrb[218].mxu0 }
 0x4c4   : > { %v13125_v40 = vpop.f32.mrb[227].mxu1  ;;  %v13201_v41 = vpop.f32.mrb[219].mxu0 }
 0x4c5   : > { %v8737_v7 = vadd.f32 %v13199_v50, %v13117_v27  ;;  %v13126_v51 = vadd.f32 %v13125_v40, %v13124_v15  ;;  %v13202_v43 = vadd.f32 %v13201_v41, %v13200_v8 }
 0x4c6   : > { %9661 = vmatmul.mubr.bf16.gmra.mrb[76].mxu1 %v9127_v0  ;;  %13974 = vmatmul.mubr.bf16.gmra.mrb[60].mxu0 %v9132_v49 }
 0x4c7   : > { %v8740_v60 = vadd.f32 %v13202_v43, %v13120_v55  ;;  %13977 = vmatprep.mubr.msk.bf16.mxu0 %vm15447_vm1, %v20516_v18  ;;  %v19528_v34 = vadd.f32 %v19364_v38, %v8737_v7 }
 0x4c9   : > { %v13127_v14 = vpop.f32.mrb[228].mxu1  ;;  %v13203_v46 = vpop.f32.mrb[220].mxu0  ;;  %v19531_v62 = vadd.f32 %v19371_v4, %v8740_v60 }
 0x4ca   : > { %v13128_v24 = vpop.f32.mrb[229].mxu1  ;;  %v13204_v61 = vpop.f32.mrb[221].mxu0 }
 0x4cb   : > { %v13129_v13 = vadd.f32 %v13128_v24, %v13127_v14  ;;  %v13205_v33 = vadd.f32 %v13204_v61, %v13203_v46  ;;  %v13130_v56 = vpop.f32.mrb[230].mxu1  ;;  %v13206_v10 = vpop.f32.mrb[222].mxu0 }
 0x4cc   : > { %v13131_v0 = vpop.f32.mrb[231].mxu1  ;;  %v13207_v3 = vpop.f32.mrb[223].mxu0 }
 0x4cd   : > { %v8745_v2 = vadd.f32 %v13205_v33, %v13123_v57  ;;  %v13132_v25 = vadd.f32 %v13131_v0, %v13130_v56  ;;  %v13208_v27 = vadd.f32 %v13207_v3, %v13206_v10 }
 0x4ce   : > { %13978 = vmatmul.mubr.bf16.gmra.mrb[64].mxu0 %v9131_v28 }
 0x4cf   : > { %v8748_v19 = vadd.f32 %v13208_v27, %v13126_v51  ;;  %v19534_v23 = vadd.f32 %v19377_v59, %v8745_v2 }
 0x4d1   : > { %v13133_v38 = vpop.f32.mrb[232].mxu1  ;;  %v13209_v53 = vpop.f32.mrb[224].mxu0  ;;  %20671 = vst [vmem:[#allocation40_spill] sm:$0xff] %v19534_v23  ;;  %v19537_v4 = vadd.f32 %v19386_v31, %v8748_v19 }
 0x4d2   : > { %v13134_v16 = vpop.f32.mrb[233].mxu1  ;;  %v13210_v35 = vpop.f32.mrb[225].mxu0 }
 0x4d3   : > { %20672 = vst [vmem:[#allocation29_spill] sm:$0xff] %v19537_v4  ;;  %v13135_v52 = vadd.f32 %v13134_v16, %v13133_v38  ;;  %v13211_v63 = vadd.f32 %v13210_v35, %v13209_v53  ;;  %v13136_v11 = vpop.f32.mrb[234].mxu1  ;;  %v13212_v55 = vpop.f32.mrb[226].mxu0 }
 0x4d4   : > { %v13137_v21 = vpop.f32.mrb[235].mxu1  ;;  %v13213_v22 = vpop.f32.mrb[227].mxu0 }
 0x4d5   : > { %v8753_v42 = vadd.f32 %v13211_v63, %v13129_v13  ;;  %v13138_v58 = vadd.f32 %v13137_v21, %v13136_v11  ;;  %v13214_v28 = vadd.f32 %v13213_v22, %v13212_v55 }
 0x4d7   : > { %v8756_v1 = vadd.f32 %v13214_v28, %v13132_v25  ;;  %v19540_v44 = vadd.f32 %v19394_v32, %v8753_v42 }
 0x4d9   : > { %20673 = vst [vmem:[#allocation31_spill] sm:$0xff] %v19540_v44  ;;  %v13139_v59 = vpop.f32.mrb[236].mxu1  ;;  %v13215_v57 = vpop.f32.mrb[228].mxu0  ;;  %v19543_v31 = vadd.f32 %v19402_v29, %v8756_v1 }
 0x4da   : > { %v13140_v50 = vpop.f32.mrb[237].mxu1  ;;  %v13216_v15 = vpop.f32.mrb[229].mxu0 }
 0x4db   : > { %20674 = vst [vmem:[#allocation30_spill] sm:$0xff] %v19543_v31  ;;  %v13141_v8 = vadd.f32 %v13140_v50, %v13139_v59  ;;  %v13217_v49 = vadd.f32 %v13216_v15, %v13215_v57  ;;  %v13142_v40 = vpop.f32.mrb[238].mxu1  ;;  %v13218_v41 = vpop.f32.mrb[230].mxu0 }
 0x4dc   : > { %v13143_v7 = vpop.f32.mrb[239].mxu1  ;;  %v13219_v51 = vpop.f32.mrb[231].mxu0 }
 0x4dd   : > { %v8761_v43 = vadd.f32 %v13217_v49, %v13135_v52  ;;  %v13144_v60 = vadd.f32 %v13143_v7, %v13142_v40  ;;  %v13220_v14 = vadd.f32 %v13219_v51, %v13218_v41 }
 0x4df   : > { %v8764_v46 = vadd.f32 %v13220_v14, %v13138_v58  ;;  %v19546_v32 = vadd.f32 %v19409_v17, %v8761_v43 }
 0x4e1   : > { %20675 = vst [vmem:[#allocation32_spill] sm:$0xff] %v19546_v32  ;;  %v13145_v24 = vpop.f32.mrb[240].mxu1  ;;  %v13221_v61 = vpop.f32.mrb[232].mxu0  ;;  %v19549_v33 = vadd.f32 %v19418_v5, %v8764_v46 }
 0x4e2   : > { %v13146_v13 = vpop.f32.mrb[241].mxu1  ;;  %v13222_v29 = vpop.f32.mrb[233].mxu0 }
 0x4e3   : > { %20676 = vst [vmem:[#allocation34_spill] sm:$0xff] %v19549_v33  ;;  %v13147_v56 = vadd.f32 %v13146_v13, %v13145_v24  ;;  %v13223_v10 = vadd.f32 %v13222_v29, %v13221_v61  ;;  %v13148_v0 = vpop.f32.mrb[242].mxu1  ;;  %v13224_v3 = vpop.f32.mrb[234].mxu0 }
 0x4e4   : > { %v13149_v2 = vpop.f32.mrb[243].mxu1  ;;  %v13225_v25 = vpop.f32.mrb[235].mxu0 }
 0x4e5   : > { %v8769_v27 = vadd.f32 %v13223_v10, %v13141_v8  ;;  %v13150_v19 = vadd.f32 %v13149_v2, %v13148_v0  ;;  %v13226_v38 = vadd.f32 %v13225_v25, %v13224_v3 }
 0x4e7   : > { %v8772_v53 = vadd.f32 %v13226_v38, %v13144_v60  ;;  %v19552_v17 = vadd.f32 %v19425_v48, %v8769_v27 }
 0x4e9   : > { %20677 = vst [vmem:[#allocation33_spill] sm:$0xff] %v19552_v17  ;;  %v13151_v16 = vpop.f32.mrb[244].mxu1  ;;  %v13227_v35 = vpop.f32.mrb[236].mxu0  ;;  %v19555_v52 = vadd.f32 %v19434_v12, %v8772_v53  ;;  %v9830_v53 = vlaneseq }
 0x4ea   : > { %v13152_v5 = vpop.f32.mrb[245].mxu1  ;;  %v13228_v63 = vpop.f32.mrb[237].mxu0 }
 0x4eb   : > { %20678 = vst [vmem:[#allocation6_spill] sm:$0xff] %v19555_v52  ;;  %v13153_v11 = vadd.f32 %v13152_v5, %v13151_v16  ;;  %v13229_v55 = vadd.f32 %v13228_v63, %v13227_v35  ;;  %v13154_v21 = vpop.f32.mrb[246].mxu1  ;;  %v13230_v22 = vpop.f32.mrb[238].mxu0  ;;  %v19582_v63 = vshrl.u32 %v9830_v53, 7 }
 0x4ec   : > { %v13155_v42 = vpop.f32.mrb[247].mxu1  ;;  %v13231_v58 = vpop.f32.mrb[239].mxu0 }
 0x4ed   : > { %v8777_v28 = vadd.f32 %v13229_v55, %v13147_v56  ;;  %v13232_v1 = vadd.f32 %v13231_v58, %v13230_v22  ;;  %v19585_v21 = vmul.u32.u64.low 2454267026, %v19582_v63  ;;  %v19586_v22 = vmul.u32.u64.high 2454267026, %v19582_v63, %v19585_v21 }
 0x4ee   : > { %v19591_v58 = vadd.s32 8, %v19582_v63  ;;  %v19628_v53 = vadd.s32 40, %v19582_v63  ;;  %v19673_v17 = vadd.s32 72, %v19582_v63 }
 0x4ef   : > { %v8780_v59 = vadd.f32 %v13232_v1, %v13150_v19  ;;  %v19558_v48 = vadd.f32 %v19441_v54, %v8777_v28  ;;  %vm9858_vm7 = vc.u32 %v19585_v21, 2454267026 }
 0x4f1   : > { %v13233_v57 = vpop.f32.mrb[240].mxu0  ;;  %v13274_v50 = vpop.f32.mrb[248].mxu1  ;;  %20679 = vst [vmem:[#allocation35_spill] sm:$0xff] %v19558_v48  ;;  %v19569_v29 = vadd.f32 %v19450_v26, %v8780_v59 }
 0x4f2   : > { %v13234_v15 = vpop.f32.mrb[241].mxu0  ;;  %v13275_v8 = vpop.f32.mrb[249].mxu1 }
 0x4f3   : > { %v13235_v12 = vadd.f32 %v13234_v15, %v13233_v57  ;;  %v19560_v49 = vadd.f32 %v13275_v8, %v13274_v50  ;;  %v13236_v40 = vpop.f32.mrb[242].mxu0  ;;  %v13277_v41 = vpop.f32.mrb[250].mxu1  ;;  %20680 = vst [vmem:[#allocation36_spill] sm:$0xff] %v19569_v29  ;;  %v19596_v59 = vmul.u32.u64.low 2454267026, %v19591_v58  ;;  %v19597_v57 = vmul.u32.u64.high 2454267026, %v19591_v58, %v19596_v59 }
 0x4f4   : > { %v13237_v7 = vpop.f32.mrb[243].mxu0  ;;  %v13278_v51 = vpop.f32.mrb[251].mxu1  ;;  %v19600_v50 = vadd.s32 16, %v19582_v63  ;;  %v19603_v8 = vadd.s32 24, %v19582_v63  ;;  %v20496_v40 = vmov 0  }
 0x4f5   : > { %v8785_v43 = vadd.f32 %v13235_v12, %v13153_v11  ;;  %v19562_v60 = vadd.f32 %v13278_v51, %v13277_v41  ;;  %v9859_v41 = vsel %vm9858_vm7, 1, %v20496_v40  ;;  %vm9872_vm8 = vc.u32 %v19596_v59, 2454267026 }
 0x4f7   : > { %v19574_v25 = vadd.f32 %v19457_v39, %v8785_v43 }
 0x4f9   : > { %v13280_v14 = vpop.f32.mrb[252].mxu1  ;;  %20681 = vst [vmem:[#allocation7_spill] sm:$0xff] %v19574_v25 }
 0x4fa   : > { %v13281_v46 = vpop.f32.mrb[253].mxu1 }
 0x4fb   : > { %v19564_v24 = vadd.f32 %v13281_v46, %v13280_v14  ;;  %v13283_v61 = vpop.f32.mrb[254].mxu1  ;;  %v19609_v43 = vmul.u32.u64.low 2454267026, %v19600_v50  ;;  %v19610_v14 = vmul.u32.u64.high 2454267026, %v19600_v50, %v19609_v43 }
 0x4fc   : > { %v13284_v13 = vpop.f32.mrb[255].mxu1 }
 0x4fd   : > { %v19566_v54 = vadd.f32 %v13284_v13, %v13283_v61  ;;  %v19613_v61 = vadd.s32 32, %v19582_v63  ;;  %vm9886_vm9 = vc.u32 %v19609_v43, 2454267026 }
 0x4fe   : > { %v9887_v21 = vsel %vm9886_vm9, 1, %v20496_v40 }
 0x4ff   : > { %v9888_v43 = vadd.s32 %v19610_v14, %v9887_v21 }
 0x501   : > { %v13286_v56 = vpop.f32.mrb[0].mxu1 }
 0x502   : > { %v13287_v10 = vpop.f32.mrb[1].mxu1 }
 0x503   : > { %v19571_v0 = vadd.f32 %v13287_v10, %v13286_v56  ;;  %v13289_v3 = vpop.f32.mrb[2].mxu1  ;;  %v19618_v56 = vmul.u32.u64.low 2454267026, %v19603_v8  ;;  %v19619_v10 = vmul.u32.u64.high 2454267026, %v19603_v8, %v19618_v56 }
 0x504   : > { %v13290_v2 = vpop.f32.mrb[3].mxu1 }
 0x505   : > { %v19576_v27 = vadd.f32 %v13290_v2, %v13289_v3  ;;  %v9860_v3 = vadd.s32 %v19586_v22, %v9859_v41  ;;  %v9873_v2 = vsel %vm9872_vm8, 1, %v20496_v40  ;;  %vm9900_vm10 = vc.u32 %v19618_v56, 2454267026 }
 0x509   : > { %v13292_v19 = vpop.f32.mrb[4].mxu1 }
 0x50a   : > { %v13293_v38 = vpop.f32.mrb[5].mxu1 }
 0x50b   : > { %v19578_v16 = vadd.f32 %v13293_v38, %v13292_v19  ;;  %v13295_v35 = vpop.f32.mrb[6].mxu1  ;;  %v19624_v19 = vmul.u32.u64.low 2454267026, %v19613_v61  ;;  %v19625_v38 = vmul.u32.u64.high 2454267026, %v19613_v61, %v19624_v19 }
 0x50c   : > { %v13296_v5 = vpop.f32.mrb[7].mxu1 }
 0x50d   : > { %v19580_v26 = vadd.f32 %v13296_v5, %v13295_v35  ;;  %v9874_v5 = vadd.s32 %v19597_v57, %v9873_v2  ;;  %vm9914_vm11 = vc.u32 %v19624_v19, 2454267026 }
 0x50e   : > { %v9915_v19 = vsel %vm9914_vm11, 1, %v20496_v40 }
 0x511   : > { %v13298_v11 = vpop.f32.mrb[8].mxu1 }
 0x512   : > { %v13299_v55 = vpop.f32.mrb[9].mxu1 }
 0x513   : > { %v19588_v39 = vadd.f32 %v13299_v55, %v13298_v11  ;;  %v13301_v42 = vpop.f32.mrb[10].mxu1  ;;  %v9861_v55 = vshrl.u32 %v9860_v3, 3  ;;  %v19649_v3 = vadd.s32 64, %v19582_v63 }
 0x514   : > { %v13302_v28 = vpop.f32.mrb[11].mxu1 }
 0x515   : > { %v19593_v1 = vadd.f32 %v13302_v28, %v13301_v42  ;;  %v19635_v28 = vadd.s32 48, %v19582_v63  ;;  %v9862_v56 = vmul.u32 14, %v9861_v55 }
 0x517   : > { %v19662_v25 = vsub.s32 %v19582_v63, %v9862_v56 }
 0x519   : > { %v13304_v15 = vpop.f32.mrb[12].mxu1  ;;  %vm10146_vm0 = vcmp.ne.s32.totalorder %v19662_v25, 0  ;;  %vm10167_vm1 = vcmp.lt.s32.totalorder %v19662_v25, 0 }
 0x51a   : > { %v13305_v12 = vpop.f32.mrb[13].mxu1  ;;  %vm19724_vm6 = vmand %vm10167_vm1, %vm10146_vm0 }
 0x51b   : > { %v19606_v7 = vadd.f32 %v13305_v12, %v13304_v15  ;;  %v13307_v51 = vpop.f32.mrb[14].mxu1  ;;  %v9901_v15 = vsel %vm9900_vm10, 1, %v20496_v40  ;;  %v19639_v12 = vmul.u32.u64.low 2454267026, %v19628_v53  ;;  %v19640_v41 = vmul.u32.u64.high 2454267026, %v19628_v53, %v19639_v12 }
 0x51c   : > { %v13308_v46 = vpop.f32.mrb[15].mxu1  ;;  %v9902_v2 = vadd.s32 %v19619_v10, %v9901_v15  ;;  %v9916_v10 = vadd.s32 %v19625_v38, %v9915_v19  ;;  %v19666_v15 = vmul.u32.u64.low 2454267026, %v19649_v3  ;;  %v19667_v40 = vmul.u32.u64.high 2454267026, %v19649_v3, %v19666_v15 }
 0x51d   : > { %v19615_v13 = vadd.f32 %v13308_v46, %v13307_v51  ;;  %v9875_v51 = vshrl.u32 %v9874_v5, 3  ;;  %v19646_v46 = vadd.s32 56, %v19582_v63  ;;  %vm9928_vm12 = vc.u32 %v19639_v12, 2454267026 }
 0x51e   : > { %v9903_v48 = vshrl.u32 %v9902_v2, 3  ;;  %v9917_v19 = vshrl.u32 %v9916_v10, 3  ;;  %vm9970_vm15 = vc.u32 %v19666_v15, 2454267026 }
 0x51f   : > { %v9876_v5 = vmul.u32 14, %v9875_v51  ;;  %v19658_v14 = vmul.u32.u64.low 2454267026, %v19646_v46  ;;  %v19659_v21 = vmul.u32.u64.high 2454267026, %v19646_v46, %v19658_v14  ;;  %v20685_v51 = vmov 0  }
 0x520   : > { %v9904_v2 = vmul.u32 14, %v9903_v48  ;;  %v9971_v48 = vsel %vm9970_vm15, 1, %v20685_v51  ;;  %v9918_v15 = vmul.u32 14, %v9917_v19 }
 0x521   : > { %v13310_v35 = vpop.f32.mrb[16].mxu1  ;;  %v19678_v56 = vsub.s32 %v19591_v58, %v9876_v5  ;;  %vm9956_vm14 = vc.u32 %v19658_v14, 2454267026  ;;  %v19690_v58 = vadd.s32 80, %v19582_v63 }
 0x522   : > { %v13311_v11 = vpop.f32.mrb[17].mxu1 }
 0x523   : > { %v19632_v42 = vadd.f32 %v13311_v11, %v13310_v35  ;;  %v13313_v22 = vpop.f32.mrb[18].mxu1  ;;  %v19654_v35 = vmul.u32.u64.low 2454267026, %v19635_v28  ;;  %v19655_v11 = vmul.u32.u64.high 2454267026, %v19635_v28, %v19654_v35  ;;  %vm10147_vm2 = vcmp.ne.s32.totalorder %v19678_v56, 0 }
 0x524   : > { %v13314_v59 = vpop.f32.mrb[19].mxu1  ;;  %vm10168_vm3 = vcmp.lt.s32.totalorder %v19678_v56, 0  ;;  %v19713_v31 = vmul.u32.u64.low 2454267026, %v19690_v58  ;;  %v19714_v44 = vmul.u32.u64.high 2454267026, %v19690_v58, %v19713_v31 }
 0x525   : > { %20682 = vst [vmem:[#allocation38_spill] sm:$0xff] %v19632_v42  ;;  %v19642_v57 = vadd.f32 %v13314_v59, %v13313_v22  ;;  %v9889_v59 = vshrl.u32 %v9888_v43, 3  ;;  %v9929_v43 = vsel %vm9928_vm12, 1, %v20685_v51  ;;  %vm9942_vm13 = vc.u32 %v19654_v35, 2454267026  ;;  %vm19740_vm10 = vmand %vm10168_vm3, %vm10147_vm2 }
 0x526   : > { %v9957_v35 = vsel %vm9956_vm14, 1, %v20685_v51  ;;  %vm9998_vm11 = vc.u32 %v19713_v31, 2454267026  ;;  %v19776_v42 = vadd.s32 96, %v19582_v63 }
 0x527   : > { %20683 = vst [vmem:[#allocation8_spill] sm:$0xff] %v19642_v57  ;;  %v9890_v38 = vmul.u32 14, %v9889_v59 }
 0x529   : > { %v13316_v22 = vpop.f32.mrb[20].mxu1  ;;  %v19696_v59 = vsub.s32 %v19600_v50, %v9890_v38  ;;  %v9958_v50 = vadd.s32 %v19659_v21, %v9957_v35  ;;  %v19709_v38 = vadd.s32 88, %v19582_v63 }
 0x52a   : > { %v13317_v55 = vpop.f32.mrb[21].mxu1 }
 0x52b   : > { %v19669_v29 = vadd.f32 %v13317_v55, %v13316_v22  ;;  %v13319_v12 = vpop.f32.mrb[22].mxu1  ;;  %v9930_v22 = vadd.s32 %v19640_v41, %v9929_v43  ;;  %v9943_v55 = vsel %vm9942_vm13, 1, %v20685_v51  ;;  %v19693_v41 = vadd.s32 14, %v19662_v25 }
 0x52c   : > { %v13320_v52 = vpop.f32.mrb[23].mxu1  ;;  %v9944_v14 = vadd.s32 %v19655_v11, %v9943_v55  ;;  %v9972_v55 = vadd.s32 %v19667_v40, %v9971_v48  ;;  %vm10148_vm5 = vcmp.ne.s32.totalorder %v19696_v59, 0  ;;  %vm10169_vm7 = vcmp.lt.s32.totalorder %v19696_v59, 0 }
 0x52d   : > { %20684 = vst [vmem:[#allocation9_spill] sm:$0xff] %v19669_v29  ;;  %v19675_v33 = vadd.f32 %v13320_v52, %v13319_v12  ;;  %v19686_v52 = vmul.u32.u64.low 2454267026, %v19673_v17  ;;  %v19687_v12 = vmul.u32.u64.high 2454267026, %v19673_v17, %v19686_v52  ;;  %v9931_v43 = vshrl.u32 %v9930_v22, 3  ;;  %vm19756_vm12 = vmand %vm10169_vm7, %vm10148_vm5 }
 0x52e   : > { %v19705_v29 = vsub.s32 %v19603_v8, %v9904_v2  ;;  %v10210_v22 = vadd.s32 14, %v19678_v56  ;;  %v9945_v8 = vshrl.u32 %v9944_v14, 3  ;;  %v10211_v40 = vadd.s32 14, %v19696_v59 }
 0x52f   : > { %20686 = vst [vmem:[#allocation3_spill] sm:$0xff] %v19675_v33  ;;  %vm9984_vm4 = vc.u32 %v19686_v52, 2454267026  ;;  %v9932_v2 = vmul.u32 14, %v9931_v43  ;;  %v9959_v35 = vshrl.u32 %v9958_v50, 3  ;;  %v9973_v14 = vshrl.u32 %v9972_v55, 3 }
 0x530   : > { %vm10149_vm8 = vcmp.ne.s32.totalorder %v19705_v29, 0  ;;  %vm10170_vm9 = vcmp.lt.s32.totalorder %v19705_v29, 0  ;;  %v9985_v52 = vsel %vm9984_vm4, 1, %v20685_v51  ;;  %v10212_v50 = vadd.s32 14, %v19705_v29 }
 0x531   : > { %v13322_v5 = vpop.f32.mrb[24].mxu1  ;;  %vm19761_vm13 = vmand %vm10170_vm9, %vm10149_vm8  ;;  %v9960_v57 = vmul.u32 14, %v9959_v35  ;;  %v10231_v23 = vsel %vm19740_vm10, %v10210_v22, %v19678_v56  ;;  %v19906_v22 = vadd.s32 112, %v19582_v63 }
 0x532   : > { %v13323_v10 = vpop.f32.mrb[25].mxu1  ;;  %v10233_v31 = vsel %vm19761_vm13, %v10212_v50, %v19705_v29  ;;  %vm19816_vm5 = vcmp.lt.s32.totalorder %v10231_v23, 12 }
 0x533   : > { %v19702_v32 = vadd.f32 %v13323_v10, %v13322_v5  ;;  %v13325_v33 = vpop.f32.mrb[26].mxu1  ;;  %v19805_v29 = vsub.s32 %v19646_v46, %v9960_v57  ;;  %vm19827_vm7 = vcmp.lt.s32.totalorder %v10233_v31, 12  ;;  %v19871_v31 = vadd.s32 104, %v19582_v63 }
 0x534   : > { %v13326_v11 = vpop.f32.mrb[27].mxu1 }
 0x535   : > { %20687 = vst [vmem:[#allocation20_spill] sm:$0xff] %v19702_v32  ;;  %v19716_v19 = vadd.f32 %v13326_v11, %v13325_v33  ;;  %v19731_v33 = vsub.s32 %v19613_v61, %v9918_v15  ;;  %v19745_v61 = vmul.u32.u64.low 2454267026, %v19709_v38  ;;  %v19746_v48 = vmul.u32.u64.high 2454267026, %v19709_v38, %v19745_v61 }
 0x536   : > { %v10230_v15 = vsel %vm19724_vm6, %v19693_v41, %v19662_v25  ;;  %v9946_v11 = vmul.u32 14, %v9945_v8  ;;  %v19768_v25 = vsub.s32 %v19628_v53, %v9932_v2  ;;  %v9986_v41 = vadd.s32 %v19687_v12, %v9985_v52 }
 0x537   : > { %20688 = vst [vmem:[#allocation4_spill] sm:$0xff] %v19716_v19  ;;  %vm10150_vm14 = vcmp.ne.s32.totalorder %v19731_v33, 0  ;;  %vm10171_vm15 = vcmp.lt.s32.totalorder %v19731_v33, 0  ;;  %v9999_v8 = vsel %vm9998_vm11, 1, %v20685_v51  ;;  %v10232_v53 = vsel %vm19756_vm12, %v10211_v40, %v19696_v59 }
 0x538   : > { %v9974_v12 = vmul.u32 14, %v9973_v14  ;;  %vm10012_vm0 = vc.u32 %v19745_v61, 2454267026  ;;  %v10213_v35 = vadd.s32 14, %v19731_v33  ;;  %v19791_v52 = vsub.s32 %v19635_v28, %v9946_v11  ;;  %vm19797_vm1 = vmand %vm10171_vm15, %vm10150_vm14 }
 0x539   : > { %v13328_v10 = vpop.f32.mrb[28].mxu1  ;;  %vm10151_vm2 = vcmp.ne.s32.totalorder %v19768_v25, 0  ;;  %vm10172_vm3 = vcmp.lt.s32.totalorder %v19768_v25, 0  ;;  %v10013_v28 = vsel %vm10012_vm0, 1, %v20685_v51  ;;  %vm19812_vm4 = vcmp.lt.s32.totalorder %v10230_v15, 12 }
 0x53a   : > { %v13329_v55 = vpop.f32.mrb[29].mxu1  ;;  %v19809_v59 = vmul.u32.u64.low 2454267026, %v19776_v42  ;;  %v19810_v19 = vmul.u32.u64.high 2454267026, %v19776_v42, %v19809_v59  ;;  %vm19820_vm6 = vcmp.lt.s32.totalorder %v10232_v53, 12  ;;  %v10234_v14 = vsel %vm19797_vm1, %v10213_v35, %v19731_v33  ;;  %vm19840_vm9 = vmand %vm10172_vm3, %vm10151_vm2 }
 0x53b   : > { %v19771_v21 = vadd.f32 %v13329_v55, %v13328_v10  ;;  %v13331_v32 = vpop.f32.mrb[30].mxu1  ;;  %v10214_v23 = vadd.s32 14, %v19768_v25  ;;  %vm10152_vm8 = vcmp.ne.s32.totalorder %v19791_v52, 0  ;;  %vm10173_vm10 = vcmp.lt.s32.totalorder %v19791_v52, 0 }
 0x53c   : > { %v13332_v4 = vpop.f32.mrb[31].mxu1  ;;  %v10014_v43 = vadd.s32 %v19746_v48, %v10013_v28  ;;  %vm10153_vm11 = vcmp.ne.s32.totalorder %v19805_v29, 0  ;;  %vm10174_vm12 = vcmp.lt.s32.totalorder %v19805_v29, 0  ;;  %vm10026_vm13 = vc.u32 %v19809_v59, 2454267026  ;;  %vm19864_vm1 = vmand %vm10173_vm10, %vm10152_vm8 }
 0x53d   : > { %v19784_v2 = vadd.f32 %v13332_v4, %v13331_v32  ;;  %v9987_v4 = vshrl.u32 %v9986_v41, 3  ;;  %v10000_v32 = vadd.s32 %v19714_v44, %v9999_v8  ;;  %v19825_v44 = vsub.s32 %v19649_v3, %v9974_v12  ;;  %vm19873_vm2 = vmand %vm10174_vm12, %vm10153_vm11 }
 0x53e   : > { %vm19850_vm14 = vcmp.lt.s32.totalorder %v10234_v14, 12  ;;  %v10215_v41 = vadd.s32 14, %v19791_v52  ;;  %v10235_v48 = vsel %vm19840_vm9, %v10214_v23, %v19768_v25  ;;  %v10216_v53 = vadd.s32 14, %v19805_v29 }
 0x53f   : > { %v9988_v10 = vmul.u32 14, %v9987_v4  ;;  %v10001_v15 = vshrl.u32 %v10000_v32, 3  ;;  %vm10154_vm15 = vcmp.ne.s32.totalorder %v19825_v44, 0  ;;  %vm10175_vm0 = vcmp.lt.s32.totalorder %v19825_v44, 0 }
 0x540   : > { %v10217_v12 = vadd.s32 14, %v19825_v44  ;;  %v10015_v4 = vshrl.u32 %v10014_v43, 3  ;;  %v10027_v32 = vsel %vm10026_vm13, 1, %v20685_v51  ;;  %v19885_v28 = vsel %vm19812_vm4, 1.0, %v20516_v18  ;;  %vm19901_vm3 = vmand %vm10175_vm0, %vm10154_vm15 }
 0x541   : > { %v13334_v57 = vpop.f32.mrb[32].mxu1  ;;  %v19878_v25 = vsub.s32 %v19673_v17, %v9988_v10  ;;  %v10002_v56 = vmul.u32 14, %v10001_v15  ;;  %v19895_v17 = vsel %vm19820_vm6, 1.0, %v20516_v18  ;;  %v19911_v40 = vsel %vm19827_vm7, 1.0, %v20516_v18 }
 0x542   : > { %v13335_v61 = vpop.f32.mrb[33].mxu1  ;;  %v19916_v5 = vsel %vm19850_vm14, 1.0, %v20516_v18  ;;  %vm19918_vm4 = vcmp.lt.s32.totalorder %v10235_v48, 12  ;;  %v10236_v23 = vsel %vm19864_vm1, %v10215_v41, %v19791_v52  ;;  %v10237_v46 = vsel %vm19873_vm2, %v10216_v53, %v19805_v29 }
 0x543   : > { %v19846_v33 = vadd.f32 %v13335_v61, %v13334_v57  ;;  %v13337_v50 = vpop.f32.mrb[34].mxu1  ;;  %v19890_v57 = vsel %vm19816_vm5, 1.0, %v20516_v18  ;;  %v10028_v3 = vadd.s32 %v19810_v19, %v10027_v32  ;;  %vm10155_vm5 = vcmp.ne.s32.totalorder %v19878_v25, 0 }
 0x544   : > { %v13338_v11 = vpop.f32.mrb[35].mxu1  ;;  %v19930_v10 = vmul.u32.u64.low 2454267026, %v19871_v31  ;;  %v19931_v15 = vmul.u32.u64.high 2454267026, %v19871_v31, %v19930_v10  ;;  %v10238_v50 = vsel %vm19901_vm3, %v10217_v12, %v19825_v44  ;;  %v19938_v52 = vsub.s32 %v19690_v58, %v10002_v56 }
 0x545   : > { %v10016_v11 = vmul.u32 14, %v10015_v4  ;;  %vm10176_vm6 = vcmp.lt.s32.totalorder %v19878_v25, 0  ;;  %v19942_v19 = vmul.u32.u64.low 2454267026, %v19906_v22  ;;  %v19943_v41 = vmul.u32.u64.high 2454267026, %v19906_v22, %v19942_v19 }
 0x546   : > { %v19948_v8 = vsel %vm19918_vm4, 1.0, %v20516_v18  ;;  %vm19950_vm7 = vcmp.lt.s32.totalorder %v10236_v23, 12  ;;  %vm19954_vm8 = vcmp.lt.s32.totalorder %v10237_v46, 12  ;;  %v10218_v53 = vadd.s32 14, %v19878_v25  ;;  %vm19967_vm11 = vmand %vm10176_vm6, %vm10155_vm5 }
 0x547   : > { %v10029_v56 = vshrl.u32 %v10028_v3, 3  ;;  %vm10040_vm9 = vc.u32 %v19930_v10, 2454267026  ;;  %vm19961_vm10 = vcmp.lt.s32.totalorder %v10238_v50, 12  ;;  %vm10156_vm12 = vcmp.ne.s32.totalorder %v19938_v52, 0 }
 0x548   : > { %vm10177_vm13 = vcmp.lt.s32.totalorder %v19938_v52, 0  ;;  %vm10054_vm14 = vc.u32 %v19942_v19, 2454267026  ;;  %v19979_v23 = vadd.s32 120, %v19582_v63  ;;  %v19989_v46 = vsel %vm19954_vm8, 1.0, %v20516_v18 }
 0x549   : > { %v13356_v61 = vpop.f32.mrb[36].mxu1  ;;  %v10239_v50 = vsel %vm19967_vm11, %v10218_v53, %v19878_v25  ;;  %vm20011_vm15 = vmand %vm10177_vm13, %vm10156_vm12  ;;  %v10055_v44 = vsel %vm10054_vm14, 1, %v20685_v51 }
 0x54a   : > { %v13357_v43 = vpop.f32.mrb[37].mxu1  ;;  %vm20032_vm2 = vcmp.lt.s32.totalorder %v10239_v50, 12  ;;  %v20052_v50 = vadd.s32 128, %v19582_v63 }
 0x54b   : > { %v13358_v55 = vadd.f32 %v13357_v43, %v13356_v61  ;;  %v13359_v29 = vpop.f32.mrb[38].mxu1  ;;  %v19984_v61 = vsel %vm19950_vm7, 1.0, %v20516_v18  ;;  %v20002_v43 = vsel %vm19961_vm10, 1.0, %v20516_v18 }
 0x54c   : > { %v13360_v48 = vpop.f32.mrb[39].mxu1 }
 0x54d   : > { %v9583_v12 = vadd.f32 %v13358_v55, %v19560_v49  ;;  %v13361_v35 = vadd.f32 %v13360_v48, %v13359_v29  ;;  %v19974_v49 = vsub.s32 %v19709_v38, %v10016_v11  ;;  %v10219_v38 = vadd.s32 14, %v19938_v52 }
 0x54e   : > { %v10030_v55 = vmul.u32 14, %v10029_v56 }
 0x54f   : > { %v9586_v59 = vadd.f32 %v13361_v35, %v19562_v60  ;;  %v14005_v14 = vadd.f32 %v19480_v6, %v9583_v12  ;;  %v10041_v60 = vsel %vm10040_vm9, 1, %v20685_v51  ;;  %vm10157_vm0 = vcmp.ne.s32.totalorder %v19974_v49, 0 }
 0x550   : > { %vm10178_vm1 = vcmp.lt.s32.totalorder %v19974_v49, 0  ;;  %v10042_v12 = vadd.s32 %v19931_v15, %v10041_v60  ;;  %v20021_v35 = vmul.u32.u64.low 2454267026, %v19979_v23  ;;  %v20022_v4 = vmul.u32.u64.high 2454267026, %v19979_v23, %v20021_v35 }
 0x551   : > { %v13362_v3 = vpop.f32.mrb[40].mxu1  ;;  %v9702_v6 = vpop.f32.mrb[24].mxu0  ;;  %v14015_v10 = vadd.f32 %v19484_v30, %v9586_v59  ;;  %v10240_v19 = vsel %vm20011_vm15, %v10219_v38, %v19938_v52  ;;  %v20037_v60 = vsub.s32 %v19776_v42, %v10030_v55  ;;  %vm20047_vm3 = vmand %vm10178_vm1, %vm10157_vm0 }
 0x552   : > { %v14006_v30 = vadd.f32 %v14005_v14, %v9702_v6  ;;  %v13363_v29 = vpop.f32.mrb[41].mxu1  ;;  %v13939_v48 = vpop.f32.mrb[25].mxu0  ;;  %v10043_v11 = vshrl.u32 %v10042_v12, 3  ;;  %vm10068_vm4 = vc.u32 %v20021_v35, 2454267026  ;;  %vm20058_vm5 = vcmp.lt.s32.totalorder %v10240_v19, 12 }
 0x553   : > { %v13364_v25 = vadd.f32 %v13363_v29, %v13362_v3  ;;  %v13365_v58 = vpop.f32.mrb[42].mxu1  ;;  %v9705_v53 = vpop.f32.mrb[26].mxu0  ;;  %v20029_v3 = vadd.s32 14, %v19974_v49  ;;  %vm10158_vm6 = vcmp.ne.s32.totalorder %v20037_v60, 0  ;;  %vm10179_vm7 = vcmp.lt.s32.totalorder %v20037_v60, 0 }
 0x554   : > { %9809 = vst [vmem:[%s19996_s19] sm:$0xff] %v14006_v30  ;;  %v10361_v56 = vmul.f32 %v14006_v30, %v14006_v30  ;;  %v14016_v32 = vadd.f32 %v14015_v10, %v9705_v53  ;;  %v13366_v59 = vpop.f32.mrb[43].mxu1  ;;  %v13940_v14 = vpop.f32.mrb[27].mxu0  ;;  %v10056_v10 = vadd.s32 %v19943_v41, %v10055_v44  ;;  %v10314_v48 = vmul.f32 %v14006_v30, %v19885_v28  ;;  %vm20091_vm8 = vmand %vm10179_vm7, %vm10158_vm6 }
 0x555   : > { %v9591_v6 = vadd.f32 %v13364_v25, %v19564_v24  ;;  %v13367_v29 = vadd.f32 %v13366_v59, %v13365_v58  ;;  %v10069_v59 = vsel %vm10068_vm4, 1, %v20685_v51  ;;  %v20078_v24 = vadd.s32 14, %v20037_v60 }
 0x556   : > { %9810 = vst [vmem:[%s19996_s19 + $0x8] sm:$0xff] %v14016_v32  ;;  %v10315_v52 = vmul.f32 %v14016_v32, %v19890_v57  ;;  %v10362_v38 = vmul.f32 %v14016_v32, %v14016_v32  ;;  %v10382_v55 = vmul.f32 %v19885_v28, %v10361_v56  ;;  %v20123_v25 = vadd.s32 136, %v19582_v63 }
 0x557   : > { %v9594_v42 = vadd.f32 %v13367_v29, %v19566_v54  ;;  %v14025_v41 = vadd.f32 %v19494_v45, %v9591_v6  ;;  %v10241_v45 = vsel %vm20047_vm3, %v20029_v3, %v19974_v49  ;;  %v10057_v54 = vshrl.u32 %v10056_v10, 3 }
 0x558   : > { %v10335_v30 = vadd.f32 %v10315_v52, %v10314_v48  ;;  %v10383_v44 = vmul.f32 %v19890_v57, %v10362_v38  ;;  %v10044_v6 = vmul.u32 14, %v10043_v11  ;;  %v20082_v11 = vadd.s32 %v20022_v4, %v10069_v59 }
 0x559   : > { %v13368_v58 = vpop.f32.mrb[44].mxu1  ;;  %v9710_v53 = vpop.f32.mrb[28].mxu0  ;;  %v14035_v32 = vadd.f32 %v19498_v36, %v9594_v42  ;;  %v20072_v29 = vmul.u32.u64.low 2454267026, %v20052_v50  ;;  %v20073_v49 = vmul.u32.u64.high 2454267026, %v20052_v50, %v20072_v29  ;;  %vm20112_vm10 = vcmp.lt.s32.totalorder %v10241_v45, 12 }
 0x55a   : > { %v10403_v28 = vadd.f32 %v10383_v44, %v10382_v55  ;;  %v14026_v12 = vadd.f32 %v14025_v41, %v9710_v53  ;;  %v13369_v57 = vpop.f32.mrb[45].mxu1  ;;  %v13943_v56 = vpop.f32.mrb[29].mxu0  ;;  %v10058_v41 = vmul.u32 14, %v10057_v54 }
 0x55b   : > { %v13370_v14 = vadd.f32 %v13369_v57, %v13368_v58  ;;  %v13371_v19 = vpop.f32.mrb[46].mxu1  ;;  %v9713_v36 = vpop.f32.mrb[30].mxu0  ;;  %vm10082_vm9 = vc.u32 %v20072_v29, 2454267026  ;;  %v20104_v57 = vsel %vm20032_vm2, 1.0, %v20516_v18 }
 0x55c   : > { %9811 = vst [vmem:[%s19996_s19 + $0x10] sm:$0xff] %v14026_v12  ;;  %v10316_v3 = vmul.f32 %v14026_v12, %v19895_v17  ;;  %v10363_v10 = vmul.f32 %v14026_v12, %v14026_v12  ;;  %v14036_v48 = vadd.f32 %v14035_v32, %v9713_v36  ;;  %v13372_v52 = vpop.f32.mrb[47].mxu1  ;;  %v13944_v38 = vpop.f32.mrb[31].mxu0 }
 0x55d   : > { %v9599_v35 = vadd.f32 %v13370_v14, %v19571_v0  ;;  %v13373_v42 = vadd.f32 %v13372_v52, %v13371_v19 }
 0x55e   : > { %v10336_v55 = vadd.f32 %v10335_v30, %v10316_v3  ;;  %v10384_v44 = vmul.f32 %v19895_v17, %v10363_v10  ;;  %9812 = vst [vmem:[%s19996_s19 + $0x18] sm:$0xff] %v14036_v48  ;;  %v10317_v58 = vmul.f32 %v14036_v48, %v19911_v40  ;;  %v10364_v53 = vmul.f32 %v14036_v48, %v14036_v48 }
 0x55f   : > { %v9602_v0 = vadd.f32 %v13373_v42, %v19576_v27  ;;  %v14045_v4 = vadd.f32 %v19508_v20, %v9599_v35  ;;  %v20098_v30 = vsub.s32 %v19871_v31, %v10044_v6  ;;  %v20110_v20 = vsel %vm20058_vm5, 1.0, %v20516_v18 }
 0x560   : > { %v10404_v17 = vadd.f32 %v10403_v28, %v10384_v44  ;;  %v10337_v54 = vadd.f32 %v10336_v55, %v10317_v58  ;;  %v10385_v12 = vmul.f32 %v19911_v40, %v10364_v53  ;;  %v10242_v31 = vsel %vm20091_vm8, %v20078_v24, %v20037_v60 }
 0x561   : > { %v13374_v56 = vpop.f32.mrb[48].mxu1  ;;  %v9718_v59 = vpop.f32.mrb[32].mxu0  ;;  %v14055_v14 = vadd.f32 %v19511_v37, %v9602_v0  ;;  %v10083_v37 = vsel %vm10082_vm9, 1, %v20685_v51  ;;  %vm10159_vm11 = vcmp.ne.s32.totalorder %v20098_v30, 0  ;;  %v20127_v3 = vsub.s32 %v19906_v22, %v10058_v41 }
 0x562   : > { %v10405_v40 = vadd.f32 %v10404_v17, %v10385_v12  ;;  %v14046_v15 = vadd.f32 %v14045_v4, %v9718_v59  ;;  %v13375_v28 = vpop.f32.mrb[49].mxu1  ;;  %v13947_v19 = vpop.f32.mrb[33].mxu0  ;;  %v10071_v60 = vshrl.u32 %v20082_v11, 3  ;;  %vm10180_vm12 = vcmp.lt.s32.totalorder %v20098_v30, 0 }
 0x563   : > { %v13376_v36 = vadd.f32 %v13375_v28, %v13374_v56  ;;  %v13377_v45 = vpop.f32.mrb[50].mxu1  ;;  %v9721_v6 = vpop.f32.mrb[34].mxu0  ;;  %v10222_v42 = vadd.s32 14, %v20098_v30  ;;  %v20136_v55 = vadd.s32 %v20073_v49, %v10083_v37  ;;  %vm20157_vm13 = vmand %vm10180_vm12, %vm10159_vm11  ;;  %vm20162_vm14 = vcmp.lt.s32.totalorder %v10242_v31, 12 }
 0x564   : > { %9813 = vst [vmem:[%s19996_s19 + $0x20] sm:$0xff] %v14046_v15  ;;  %v10318_v10 = vmul.f32 %v14046_v15, %v19916_v5  ;;  %v10365_v48 = vmul.f32 %v14046_v15, %v14046_v15  ;;  %v14056_v29 = vadd.f32 %v14055_v14, %v9721_v6  ;;  %v13378_v52 = vpop.f32.mrb[51].mxu1  ;;  %v13948_v38 = vpop.f32.mrb[35].mxu0  ;;  %vm10160_vm15 = vcmp.ne.s32.totalorder %v20127_v3, 0 }
 0x565   : > { %v9607_v24 = vadd.f32 %v13376_v36, %v19578_v16  ;;  %v13379_v35 = vadd.f32 %v13378_v52, %v13377_v45  ;;  %v20144_v32 = vmul.u32.u64.low 2454267026, %v20123_v25  ;;  %v20145_v16 = vmul.u32.u64.high 2454267026, %v20123_v25, %v20144_v32 }
 0x566   : > { %v10338_v22 = vadd.f32 %v10337_v54, %v10318_v10  ;;  %v10386_v41 = vmul.f32 %v19916_v5, %v10365_v48  ;;  %9814 = vst [vmem:[%s19996_s19 + $0x28] sm:$0xff] %v14056_v29  ;;  %v10319_v11 = vmul.f32 %v14056_v29, %v19948_v8  ;;  %v10366_v44 = vmul.f32 %v14056_v29, %v14056_v29 }
 0x567   : > { %v9610_v58 = vadd.f32 %v13379_v35, %v19580_v26  ;;  %v14065_v53 = vadd.f32 %v19519_v47, %v9607_v24  ;;  %v20151_v5 = vsel %vm20112_vm10, 1.0, %v20516_v18  ;;  %v20168_v12 = vadd.s32 144, %v19582_v63 }
 0x568   : > { %v10406_v0 = vadd.f32 %v10405_v40, %v10386_v41  ;;  %v10339_v4 = vadd.f32 %v10338_v22, %v10319_v11  ;;  %v10387_v49 = vmul.f32 %v19948_v8, %v10366_v44  ;;  %vm10181_vm0 = vcmp.lt.s32.totalorder %v20127_v3, 0 }
 0x569   : > { %v13380_v47 = vpop.f32.mrb[52].mxu1  ;;  %v9726_v17 = vpop.f32.mrb[36].mxu0  ;;  %v14075_v54 = vadd.f32 %v19522_v9, %v9610_v58  ;;  %v20172_v40 = vadd.s32 14, %v20127_v3  ;;  %v10243_v28 = vsel %vm20157_vm13, %v10222_v42, %v20098_v30  ;;  %v10072_v19 = vmul.u32 14, %v10071_v60  ;;  %vm20192_vm2 = vmand %vm10181_vm0, %vm10160_vm15 }
 0x56a   : > { %v10407_v56 = vadd.f32 %v10406_v0, %v10387_v49  ;;  %v14066_v59 = vadd.f32 %v14065_v53, %v9726_v17  ;;  %v13381_v14 = vpop.f32.mrb[53].mxu1  ;;  %v13951_v27 = vpop.f32.mrb[37].mxu0  ;;  %v10085_v37 = vshrl.u32 %v20136_v55, 3  ;;  %vm10096_vm1 = vc.u32 %v20144_v32, 2454267026 }
 0x56b   : > { %v13382_v9 = vadd.f32 %v13381_v14, %v13380_v47  ;;  %v13383_v15 = vpop.f32.mrb[54].mxu1  ;;  %v9729_v31 = vpop.f32.mrb[38].mxu0  ;;  %v20182_v38 = vmul.u32.u64.low 2454267026, %v20168_v12  ;;  %v20183_v24 = vmul.u32.u64.high 2454267026, %v20168_v12, %v20182_v38  ;;  %v20199_v41 = vsub.s32 %v19979_v23, %v10072_v19 }
 0x56c   : > { %9815 = vst [vmem:[%s19996_s19 + $0x30] sm:$0xff] %v14066_v59  ;;  %v10320_v36 = vmul.f32 %v14066_v59, %v19984_v61  ;;  %v10367_v45 = vmul.f32 %v14066_v59, %v14066_v59  ;;  %v14076_v6 = vadd.f32 %v14075_v54, %v9729_v31  ;;  %v13384_v10 = vpop.f32.mrb[55].mxu1  ;;  %v13952_v48 = vpop.f32.mrb[39].mxu0  ;;  %v10097_v53 = vsel %vm10096_vm1, 1, %v20685_v51 }
 0x56d   : > { %v9615_v29 = vadd.f32 %v13382_v9, %v19588_v39  ;;  %v13385_v52 = vadd.f32 %v13384_v10, %v13383_v15  ;;  %vm20213_vm3 = vcmp.lt.s32.totalorder %v10243_v28, 12  ;;  %v10086_v17 = vmul.u32 14, %v10085_v37 }
 0x56e   : > { %v10340_v35 = vadd.f32 %v10339_v4, %v10320_v36  ;;  %v10388_v30 = vmul.f32 %v19984_v61, %v10367_v45  ;;  %9816 = vst [vmem:[%s19996_s19 + $0x38] sm:$0xff] %v14076_v6  ;;  %v10321_v60 = vmul.f32 %v14076_v6, %v19989_v46  ;;  %v10368_v42 = vmul.f32 %v14076_v6, %v14076_v6 }
 0x56f   : > { %v9618_v39 = vadd.f32 %v13385_v52, %v19593_v1  ;;  %v14085_v22 = vadd.f32 %v19528_v34, %v9615_v29  ;;  %v20202_v61 = vadd.s32 152, %v19582_v63  ;;  %v20211_v34 = vsel %vm20162_vm14, 1.0, %v20516_v18  ;;  %v20747_v52 = vld [vmem:[#allocation40_spill] sm:$0xff] }
 0x570   : > { %v10408_v11 = vadd.f32 %v10407_v56, %v10388_v30  ;;  %v10341_v44 = vadd.f32 %v10340_v35, %v10321_v60  ;;  %v10389_v58 = vmul.f32 %v19989_v46, %v10368_v42  ;;  %v10244_v46 = vsel %vm20192_vm2, %v20172_v40, %v20127_v3 }
 0x571   : > { %v13386_v0 = vpop.f32.mrb[56].mxu1  ;;  %v9734_v4 = vpop.f32.mrb[40].mxu0  ;;  %v14095_v1 = vadd.f32 %v19531_v62, %v9618_v39  ;;  %vm10110_vm4 = vc.u32 %v20182_v38, 2454267026  ;;  %v10098_v56 = vadd.s32 %v20145_v16, %v10097_v53  ;;  %vm10161_vm5 = vcmp.ne.s32.totalorder %v20199_v41, 0 }
 0x572   : > { %v10409_v32 = vadd.f32 %v10408_v11, %v10389_v58  ;;  %v14086_v49 = vadd.f32 %v14085_v22, %v9734_v4  ;;  %v13387_v26 = vpop.f32.mrb[57].mxu1  ;;  %v13955_v47 = vpop.f32.mrb[41].mxu0  ;;  %v20223_v59 = vmul.u32.u64.low 2454267026, %v20202_v61  ;;  %v20224_v14 = vmul.u32.u64.high 2454267026, %v20202_v61, %v20223_v59  ;;  %v20748_v22 = vld [vmem:[#allocation29_spill] sm:$0xff] }
 0x573   : > { %v13388_v62 = vadd.f32 %v13387_v26, %v13386_v0  ;;  %v13389_v54 = vpop.f32.mrb[58].mxu1  ;;  %v9737_v8 = vpop.f32.mrb[42].mxu0  ;;  %v10111_v36 = vsel %vm10110_vm4, 1, %v20685_v51  ;;  %v20233_v16 = vadd.s32 160, %v19582_v63  ;;  %v10099_v30 = vshrl.u32 %v10098_v56, 3 }
 0x574   : > { %9817 = vst [vmem:[%s19996_s19 + $0x40] sm:$0xff] %v14086_v49  ;;  %v10322_v27 = vmul.f32 %v14086_v49, %v20002_v43  ;;  %v10369_v9 = vmul.f32 %v14086_v49, %v14086_v49  ;;  %v14096_v15 = vadd.f32 %v14095_v1, %v9737_v8  ;;  %v13390_v31 = vpop.f32.mrb[59].mxu1  ;;  %v13956_v28 = vpop.f32.mrb[43].mxu0  ;;  %vm10124_vm6 = vc.u32 %v20223_v59, 2454267026 }
 0x575   : > { %v9623_v19 = vadd.f32 %v13388_v62, %v19606_v7  ;;  %v13391_v37 = vadd.f32 %v13390_v31, %v13389_v54  ;;  %v10112_v63 = vadd.s32 %v20183_v24, %v10111_v36  ;;  %vm10182_vm7 = vcmp.lt.s32.totalorder %v20199_v41, 0 }
 0x576   : > { %v10342_v45 = vadd.f32 %v10341_v44, %v10322_v27  ;;  %v10390_v6 = vmul.f32 %v20002_v43, %v10369_v9  ;;  %9818 = vst [vmem:[%s19996_s19 + $0x48] sm:$0xff] %v14096_v15  ;;  %v10323_v10 = vmul.f32 %v14096_v15, %v20104_v57  ;;  %v10370_v48 = vmul.f32 %v14096_v15, %v14096_v15  ;;  %vm20267_vm8 = vmand %vm10182_vm7, %vm10161_vm5 }
 0x577   : > { %v9626_v29 = vadd.f32 %v13391_v37, %v19615_v13  ;;  %v14105_v35 = vadd.f32 %v20747_v52, %v9623_v19  ;;  %v20245_v11 = vmul.u32.u64.low 2454267026, %v20233_v16  ;;  %v20246_v13 = vmul.u32.u64.high 2454267026, %v20233_v16, %v20245_v11 }
 0x578   : > { %v10410_v7 = vadd.f32 %v10409_v32, %v10390_v6  ;;  %v10343_v60 = vadd.f32 %v10342_v45, %v10323_v10  ;;  %v10391_v38 = vmul.f32 %v20104_v57, %v10370_v48  ;;  %v20251_v57 = vsel %vm20213_vm3, 1.0, %v20516_v18  ;;  %v20754_v45 = vld [vmem:[#allocation8_spill] sm:$0xff] }
 0x579   : > { %v13392_v42 = vpop.f32.mrb[60].mxu1  ;;  %v9742_v39 = vpop.f32.mrb[44].mxu0  ;;  %v14115_v43 = vadd.f32 %v20748_v22, %v9626_v29  ;;  %v10125_v24 = vsel %vm10124_vm6, 1, %v20685_v51  ;;  %v20256_v49 = vadd.s32 14, %v20199_v41  ;;  %v20259_v26 = vsub.s32 %v20052_v50, %v10086_v17  ;;  %v20751_v50 = vld [vmem:[#allocation38_spill] sm:$0xff] }
 0x57a   : > { %v10411_v44 = vadd.f32 %v10410_v7, %v10391_v38  ;;  %v14106_v58 = vadd.f32 %v14105_v35, %v9742_v39  ;;  %v13393_v53 = vpop.f32.mrb[61].mxu1  ;;  %v13959_v0 = vpop.f32.mrb[45].mxu0  ;;  %v10100_v47 = vmul.u32 14, %v10099_v30  ;;  %v10113_v27 = vshrl.u32 %v10112_v63, 3  ;;  %v20756_v35 = vld [vmem:[#allocation30_spill] sm:$0xff] }
 0x57b   : > { %v13394_v4 = vadd.f32 %v13393_v53, %v13392_v42  ;;  %v13395_v1 = vpop.f32.mrb[62].mxu1  ;;  %v9745_v32 = vpop.f32.mrb[46].mxu0  ;;  %v10126_v15 = vadd.s32 %v20224_v14, %v10125_v24  ;;  %vm10138_vm9 = vc.u32 %v20245_v11, 2454267026  ;;  %vm20281_vm10 = vcmp.lt.s32.totalorder %v10244_v46, 12  ;;  %v20755_v14 = vld [vmem:[#allocation31_spill] sm:$0xff] }
 0x57c   : > { %9819 = vst [vmem:[%s19996_s19 + $0x50] sm:$0xff] %v14106_v58  ;;  %v10324_v62 = vmul.f32 %v14106_v58, %v20110_v20  ;;  %v10371_v23 = vmul.f32 %v14106_v58, %v14106_v58  ;;  %v14116_v54 = vadd.f32 %v14115_v43, %v9745_v32  ;;  %v13396_v8 = vpop.f32.mrb[63].mxu1  ;;  %v13960_v56 = vpop.f32.mrb[47].mxu0  ;;  %v20292_v48 = vsub.s32 %v20123_v25, %v10100_v47  ;;  %v20757_v24 = vld [vmem:[#allocation9_spill] sm:$0xff] }
 0x57d   : > { %v9631_v17 = vadd.f32 %v13394_v4, %v20751_v50  ;;  %v13397_v9 = vadd.f32 %v13396_v8, %v13395_v1  ;;  %v10139_v40 = vsel %vm10138_vm9, 1, %v20685_v51  ;;  %vm10162_vm11 = vcmp.ne.s32.totalorder %v20259_v26, 0  ;;  %v20762_v56 = vld [vmem:[#allocation3_spill] sm:$0xff] }
 0x57e   : > { %v10344_v31 = vadd.f32 %v10343_v60, %v10324_v62  ;;  %v10392_v28 = vmul.f32 %v20110_v20, %v10371_v23  ;;  %9820 = vst [vmem:[%s19996_s19 + $0x58] sm:$0xff] %v14116_v54  ;;  %v10325_v19 = vmul.f32 %v14116_v54, %v20151_v5  ;;  %v10372_v37 = vmul.f32 %v14116_v54, %v14116_v54 }
 0x57f   : > { %v9634_v6 = vadd.f32 %v13397_v9, %v20754_v45  ;;  %v14125_v10 = vadd.f32 %v20755_v14, %v9631_v17  ;;  %v10245_v20 = vsel %vm20267_vm8, %v20256_v49, %v20199_v41  ;;  %v10114_v7 = vmul.u32 14, %v10113_v27  ;;  %v20766_v45 = vld [vmem:[#allocation34_spill] sm:$0xff] }
 0x580   : > { %v10412_v55 = vadd.f32 %v10411_v44, %v10392_v28  ;;  %v10345_v29 = vadd.f32 %v10344_v31, %v10325_v19  ;;  %v10393_v3 = vmul.f32 %v20151_v5, %v10372_v37  ;;  %v10127_v60 = vshrl.u32 %v10126_v15, 3 }
 0x581   : > { %v13398_v46 = vpop.f32.mrb[64].mxu1  ;;  %v9750_v52 = vpop.f32.mrb[48].mxu0  ;;  %v14135_v30 = vadd.f32 %v20756_v35, %v9634_v6  ;;  %vm10183_vm12 = vcmp.lt.s32.totalorder %v20259_v26, 0  ;;  %v10225_v42 = vadd.s32 14, %v20259_v26  ;;  %vm10163_vm13 = vcmp.ne.s32.totalorder %v20292_v48, 0 }
 0x582   : > { %v10413_v38 = vadd.f32 %v10412_v55, %v10393_v3  ;;  %v14126_v41 = vadd.f32 %v14125_v10, %v9750_v52  ;;  %v13399_v63 = vpop.f32.mrb[65].mxu1  ;;  %v13963_v25 = vpop.f32.mrb[49].mxu0  ;;  %vm10184_vm14 = vcmp.lt.s32.totalorder %v20292_v48, 0  ;;  %v10140_v22 = vadd.s32 %v20246_v13, %v10139_v40  ;;  %vm20311_vm15 = vmand %vm10183_vm12, %vm10162_vm11 }
 0x583   : > { %v13400_v5 = vadd.f32 %v13399_v63, %v13398_v46  ;;  %v13401_v39 = vpop.f32.mrb[66].mxu1  ;;  %v9753_v51 = vpop.f32.mrb[50].mxu0  ;;  %v10226_v0 = vadd.s32 14, %v20292_v48  ;;  %v20316_v13 = vsub.s32 %v20168_v12, %v10114_v7  ;;  %v10128_v49 = vmul.u32 14, %v10127_v60  ;;  %vm20325_vm0 = vmand %vm10184_vm14, %vm10163_vm13  ;;  %v20763_v12 = vld [vmem:[#allocation32_spill] sm:$0xff] }
 0x584   : > { %9821 = vst [vmem:[%s19996_s19 + $0x60] sm:$0xff] %v14126_v41  ;;  %v10326_v43 = vmul.f32 %v14126_v41, %v20211_v34  ;;  %v10373_v11 = vmul.f32 %v14126_v41, %v14126_v41  ;;  %v14136_v44 = vadd.f32 %v14135_v30, %v9753_v51  ;;  %v13402_v58 = vpop.f32.mrb[67].mxu1  ;;  %v13964_v53 = vpop.f32.mrb[51].mxu0  ;;  %vm20331_vm1 = vcmp.lt.s32.totalorder %v10245_v20, 12 }
 0x585   : > { %v9639_v4 = vadd.f32 %v13400_v5, %v20757_v24  ;;  %v13403_v1 = vadd.f32 %v13402_v58, %v13401_v39  ;;  %v10246_v31 = vsel %vm20311_vm15, %v10225_v42, %v20259_v26  ;;  %v11785_v37 = vsel %vm20281_vm10, 1.0, %v20516_v18 }
 0x586   : > { %v10346_v47 = vadd.f32 %v10345_v29, %v10326_v43  ;;  %v10394_v62 = vmul.f32 %v20211_v34, %v10373_v11  ;;  %9822 = vst [vmem:[%s19996_s19 + $0x68] sm:$0xff] %v14136_v44  ;;  %v10327_v23 = vmul.f32 %v14136_v44, %v20251_v57  ;;  %v10374_v54 = vmul.f32 %v14136_v44, %v14136_v44  ;;  %v20774_v43 = vld [vmem:[#allocation4_spill] sm:$0xff]  ;;  %v20775_v44 = vld [vmem:[#allocation33_spill] sm:$0xff] }
 0x587   : > { %v9642_v59 = vadd.f32 %v13403_v1, %v20762_v56  ;;  %v14145_v27 = vadd.f32 %v20763_v12, %v9639_v4  ;;  %v10141_v34 = vshrl.u32 %v10140_v22, 3  ;;  %v10247_v14 = vsel %vm20325_vm0, %v10226_v0, %v20292_v48 }
 0x588   : > { %v10414_v17 = vadd.f32 %v10413_v38, %v10394_v62  ;;  %v10347_v9 = vadd.f32 %v10346_v47, %v10327_v23  ;;  %v10395_v15 = vmul.f32 %v20251_v57, %v10374_v54  ;;  %v20347_v10 = vsub.s32 %v20202_v61, %v10128_v49  ;;  %v20769_v38 = vld [vmem:[#allocation20_spill] sm:$0xff]  ;;  %v20776_v62 = vld [vmem:[#allocation6_spill] sm:$0xff] }
 0x589   : > { %v13404_v28 = vpop.f32.mrb[68].mxu1  ;;  %v9758_v19 = vpop.f32.mrb[52].mxu0  ;;  %v14155_v6 = vadd.f32 %v20766_v45, %v9642_v59  ;;  %vm10164_vm2 = vcmp.ne.s32.totalorder %v20316_v13, 0  ;;  %vm10185_vm3 = vcmp.lt.s32.totalorder %v20316_v13, 0  ;;  %v11786_v40 = vsel %vm20331_vm1, 1.0, %v20516_v18 }
 0x58a   : > { %v10415_v57 = vadd.f32 %v10414_v17, %v10395_v15  ;;  %v14146_v20 = vadd.f32 %v14145_v27, %v9758_v19  ;;  %v13405_v55 = vpop.f32.mrb[69].mxu1  ;;  %v13967_v26 = vpop.f32.mrb[53].mxu0  ;;  %vm20354_vm4 = vcmp.lt.s32.totalorder %v10246_v31, 12  ;;  %v10142_v61 = vmul.u32 14, %v10141_v34  ;;  %vm20369_vm6 = vmand %vm10185_vm3, %vm10164_vm2 }
 0x58b   : > { %v13406_v36 = vadd.f32 %v13405_v55, %v13404_v28  ;;  %v13407_v29 = vpop.f32.mrb[70].mxu1  ;;  %v9761_v3 = vpop.f32.mrb[54].mxu0  ;;  %v10227_v60 = vadd.s32 14, %v20316_v13  ;;  %vm20361_vm5 = vcmp.lt.s32.totalorder %v10247_v14, 12  ;;  %vm10165_vm7 = vcmp.ne.s32.totalorder %v20347_v10, 0 }
 0x58c   : > { %9823 = vst [vmem:[%s19996_s19 + $0x70] sm:$0xff] %v14146_v20  ;;  %v10328_v46 = vmul.f32 %v14146_v20, %v11785_v37  ;;  %v10375_v52 = vmul.f32 %v14146_v20, %v14146_v20  ;;  %v14156_v35 = vadd.f32 %v14155_v6, %v9761_v3  ;;  %v13408_v30 = vpop.f32.mrb[71].mxu1  ;;  %v13968_v7 = vpop.f32.mrb[55].mxu0  ;;  %vm10186_vm8 = vcmp.lt.s32.totalorder %v20347_v10, 0 }
 0x58d   : > { %v9647_v41 = vadd.f32 %v13406_v36, %v20769_v38  ;;  %v13409_v63 = vadd.f32 %v13408_v30, %v13407_v29  ;;  %v20379_v53 = vsub.s32 %v20233_v16, %v10142_v61  ;;  %v10248_v1 = vsel %vm20369_vm6, %v10227_v60, %v20316_v13  ;;  %vm20393_vm9 = vmand %vm10186_vm8, %vm10165_vm7  ;;  %v20781_v29 = vld [vmem:[#allocation35_spill] sm:$0xff] }
 0x58e   : > { %v10348_v5 = vadd.f32 %v10347_v9, %v10328_v46  ;;  %v10396_v39 = vmul.f32 %v11785_v37, %v10375_v52  ;;  %9824 = vst [vmem:[%s19996_s19 + $0x78] sm:$0xff] %v14156_v35  ;;  %v10329_v51 = vmul.f32 %v14156_v35, %v11786_v40  ;;  %v10376_v22 = vmul.f32 %v14156_v35, %v14156_v35 }
 0x58f   : > { %v9650_v11 = vadd.f32 %v13409_v63, %v20774_v43  ;;  %v14165_v58 = vadd.f32 %v20775_v44, %v9647_v41  ;;  %v11787_v47 = vsel %vm20354_vm4, 1.0, %v20516_v18  ;;  %v10228_v54 = vadd.s32 14, %v20347_v10 }
 0x590   : > { %v10416_v0 = vadd.f32 %v10415_v57, %v10396_v39  ;;  %v10349_v24 = vadd.f32 %v10348_v5, %v10329_v51  ;;  %v10397_v4 = vmul.f32 %v11786_v40, %v10376_v22  ;;  %v11788_v34 = vsel %vm20361_vm5, 1.0, %v20516_v18 }
 0x591   : > { %v13410_v32 = vpop.f32.mrb[72].mxu1  ;;  %v9766_v49 = vpop.f32.mrb[56].mxu0  ;;  %v14175_v23 = vadd.f32 %v20776_v62, %v9650_v11  ;;  %vm20400_vm10 = vcmp.lt.s32.totalorder %v10248_v1, 12  ;;  %vm10166_vm11 = vcmp.ne.s32.totalorder %v20379_v53, 0  ;;  %vm10187_vm12 = vcmp.lt.s32.totalorder %v20379_v53, 0 }
 0x592   : > { %v10417_v16 = vadd.f32 %v10416_v0, %v10397_v4  ;;  %v14166_v8 = vadd.f32 %v14165_v58, %v9766_v49  ;;  %v13411_v56 = vpop.f32.mrb[73].mxu1  ;;  %v13971_v59 = vpop.f32.mrb[57].mxu0  ;;  %v10249_v6 = vsel %vm20393_vm9, %v10228_v54, %v20347_v10  ;;  %v10229_v14 = vadd.s32 14, %v20379_v53  ;;  %vm20417_vm13 = vmand %vm10187_vm12, %vm10166_vm11  ;;  %v20785_v4 = vld [vmem:[#allocation7_spill] sm:$0xff] }
 0x593   : > { %v13412_v12 = vadd.f32 %v13411_v56, %v13410_v32  ;;  %v13413_v27 = vpop.f32.mrb[74].mxu1  ;;  %v9769_v50 = vpop.f32.mrb[58].mxu0  ;;  %vm10270_vm14 = vcmp.lt.s32.totalorder %v10249_v6, 12  ;;  %v11789_v52 = vsel %vm20400_vm10, 1.0, %v20516_v18  ;;  %vm10429_vm0 = vcmask 1040384  }
 0x594   : > { %9825 = vst [vmem:[%s19996_s19 + $0x80] sm:$0xff] %v14166_v8  ;;  %v10330_v9 = vmul.f32 %v14166_v8, %v11787_v47  ;;  %v10377_v15 = vmul.f32 %v14166_v8, %v14166_v8  ;;  %v14176_v31 = vadd.f32 %v14175_v23, %v9769_v50  ;;  %v13414_v28 = vpop.f32.mrb[75].mxu1  ;;  %v13972_v19 = vpop.f32.mrb[59].mxu0  ;;  %v10250_v41 = vsel %vm20417_vm13, %v10229_v14, %v20379_v53 }
 0x595   : > { %v9655_v37 = vadd.f32 %v13412_v12, %v19771_v21  ;;  %v13415_v45 = vadd.f32 %v13414_v28, %v13413_v27  ;;  %v11790_v5 = vsel %vm10270_vm14, 1.0, %v20516_v18  ;;  %vm10271_vm15 = vcmp.lt.s32.totalorder %v10250_v41, 12 }
 0x596   : > { %v10350_v57 = vadd.f32 %v10349_v24, %v10330_v9  ;;  %v10398_v20 = vmul.f32 %v11787_v47, %v10377_v15  ;;  %9826 = vst [vmem:[%s19996_s19 + $0x88] sm:$0xff] %v14176_v31  ;;  %v10331_v55 = vmul.f32 %v14176_v31, %v11788_v34  ;;  %v10378_v26 = vmul.f32 %v14176_v31, %v14176_v31 }
 0x597   : > { %v9658_v36 = vadd.f32 %v13415_v45, %v19784_v2  ;;  %v14185_v3 = vadd.f32 %v20781_v29, %v9655_v37  ;;  %v20784_v2 = vld [vmem:[#allocation36_spill] sm:$0xff]  ;;  %v11791_v23 = vsel %vm10271_vm15, 1.0, %v20516_v18 }
 0x598   : > { %v10418_v40 = vadd.f32 %v10417_v16, %v10398_v20  ;;  %v10351_v48 = vadd.f32 %v10350_v57, %v10331_v55  ;;  %v10399_v10 = vmul.f32 %v11788_v34, %v10378_v26 }
 0x599   : > { %v13416_v61 = vpop.f32.mrb[76].mxu1  ;;  %v9774_v46 = vpop.f32.mrb[60].mxu0  ;;  %v14195_v35 = vadd.f32 %v20784_v2, %v9658_v36 }
 0x59a   : > { %v10419_v30 = vadd.f32 %v10418_v40, %v10399_v10  ;;  %v14186_v7 = vadd.f32 %v14185_v3, %v9774_v46  ;;  %v13417_v60 = vpop.f32.mrb[77].mxu1  ;;  %v13975_v38 = vpop.f32.mrb[61].mxu0 }
 0x59b   : > { %v13418_v63 = vadd.f32 %v13417_v60, %v13416_v61  ;;  %v13419_v25 = vpop.f32.mrb[78].mxu1  ;;  %v9777_v42 = vpop.f32.mrb[62].mxu0 }
 0x59c   : > { %9827 = vst [vmem:[%s19996_s19 + $0x90] sm:$0xff] %v14186_v7  ;;  %v10332_v39 = vmul.f32 %v14186_v7, %v11789_v52  ;;  %v10379_v51 = vmul.f32 %v14186_v7, %v14186_v7  ;;  %v14196_v22 = vadd.f32 %v14195_v35, %v9777_v42  ;;  %v13420_v43 = vpop.f32.mrb[79].mxu1  ;;  %v13976_v11 = vpop.f32.mrb[63].mxu0 }
 0x59d   : > { %v9663_v44 = vadd.f32 %v13418_v63, %v19846_v33 }
 0x59e   : > { %v10352_v58 = vadd.f32 %v10351_v48, %v10332_v39  ;;  %v10400_v0 = vmul.f32 %v11789_v52, %v10379_v51  ;;  %9828 = vst [vmem:[%s19996_s19 + $0x98] sm:$0xff] %v14196_v22  ;;  %v10333_v24 = vmul.f32 %v14196_v22, %v11790_v5  ;;  %v10380_v53 = vmul.f32 %v14196_v22, %v14196_v22 }
 0x59f   : > { %v14205_v1 = vadd.f32 %v20785_v4, %v9663_v44 }
 0x5a0   : > { %v10420_v32 = vadd.f32 %v10419_v30, %v10400_v0  ;;  %v10353_v49 = vadd.f32 %v10352_v58, %v10333_v24  ;;  %v10401_v47 = vmul.f32 %v11790_v5, %v10380_v53 }
 0x5a1   : > { %v9782_v62 = vpop.f32.mrb[64].mxu0 }
 0x5a2   : > { %v10421_v54 = vadd.f32 %v10420_v32, %v10401_v47  ;;  %v14206_v16 = vadd.f32 %v14205_v1, %v9782_v62  ;;  %v13979_v8 = vpop.f32.mrb[65].mxu0 }
 0x5a3   : > { %v9785_v56 = vpop.f32.mrb[66].mxu0 }
 0x5a4   : > { %9829 = vst [vmem:[%s19996_s19 + $0xa0] sm:$0xff] %v14206_v16  ;;  %v10334_v33 = vmul.f32 %v14206_v16, %v11791_v23  ;;  %v10381_v59 = vmul.f32 %v14206_v16, %v14206_v16  ;;  %v13980_v13 = vpop.f32.mrb[67].mxu0 }
 0x5a6   : > { %v10354_v12 = vadd.f32 %v10353_v49, %v10334_v33  ;;  %v10402_v27 = vmul.f32 %v11791_v23, %v10381_v59 }
 0x5a8   : > { %v10355_v50 = vrot.slane %v10354_v12, 4  ;;  %v10422_v34 = vadd.f32 %v10421_v54, %v10402_v27 }
 0x5aa   : > { %v10356_v17 = vadd.f32 %v10355_v50, %v10354_v12  ;;  %v10423_v9 = vrot.slane %v10422_v34, 4 }
 0x5ac   : > { %v10357_v15 = vrot.slane %v10356_v17, 2  ;;  %v10424_v31 = vadd.f32 %v10423_v9, %v10422_v34 }
 0x5ae   : > { %v10358_v28 = vadd.f32 %v10357_v15, %v10356_v17  ;;  %v10425_v19 = vrot.slane %v10424_v31, 2 }
 0x5b0   : > { %v10359_v18 = vrot.slane %v10358_v28, 1  ;;  %v10426_v37 = vadd.f32 %v10425_v19, %v10424_v31 }
 0x5b2   : > { %v10427_v45 = vrot.slane %v10426_v37, 1  ;;  %v10360_v6 = vadd.f32 %v10359_v18, %v10358_v28 }
 0x5b4   : > { %v10428_v14 = vadd.f32 %v10427_v45, %v10426_v37 }
 0x5b6   : > { %v10430_v57 = vsel %vm10429_vm0, %v10360_v6, %v10428_v14 }
 0x5b7   : > { %10431 = vst [vmem:[%s181_s23] sm:$0x3] %v10430_v57 }
 0x5b8 PF: > { %s14_s12 = sadd.s32 1, %s15444_s12  }
 0x5b9   : > { %p11_p4 = scmp.ge.s32.totalorder %s14_s12, 4  }
 0x5bb   :  { %13 = sbr.rel (!%p11_p4) target bundleno = 1 (0x1), region = 78 }

</bundles_post_ra>
